<compile_context>
chip_gen: v7x
topology: tpu7x:2x2x1
jax: 0.10.0
libtpu: 0.0.40
codegen_flags: <defaults>
</compile_context>

<pallas_src>
import functools

import jax
import jax.numpy as jnp
from jax import lax
from jax.experimental import pallas as pl
from jax.experimental.pallas import tpu as pltpu


# ------------------------------- helpers ------------------------------------

def _tile_m(M, target=512):
    """Largest multiple-of-8 divisor of M that is <= target (else full M)."""
    if M <= target:
        return M
    for tm in range(target, 7, -8):
        if M % tm == 0:
            return tm
    return M


def _tile_lane(N, target=2048):
    """Largest multiple-of-128 divisor of N that is <= target (else full N)."""
    if N <= target:
        return N
    for tn in range(target, 127, -128):
        if N % tn == 0:
            return tn
    return N


# ----------------------------- Pallas kernels -------------------------------

def _patch_embed_kernel(x_ref, w_ref, b_ref, pos_ref, o_ref):
    # patch projection + positional embedding add, one batch element per step
    y = jnp.dot(x_ref[0], w_ref[...], preferred_element_type=jnp.float32)
    y = y + b_ref[...] + pos_ref[...]
    o_ref[0] = y.astype(o_ref.dtype)


def patch_embed(x, w, b, pos):
    B, P, pd = x.shape
    D = w.shape[1]
    return pl.pallas_call(
        _patch_embed_kernel,
        out_shape=jax.ShapeDtypeStruct((B, P, D), jnp.bfloat16),
        grid=(B,),
        in_specs=[pl.BlockSpec((1, P, pd), lambda i: (i, 0, 0)),
                  pl.BlockSpec((pd, D), lambda i: (0, 0)),
                  pl.BlockSpec((1, D), lambda i: (0, 0)),
                  pl.BlockSpec((P, D), lambda i: (0, 0))],
        out_specs=pl.BlockSpec((1, P, D), lambda i: (i, 0, 0)),
        compiler_params=pltpu.CompilerParams(dimension_semantics=("parallel",)),
    )(x, w, b.reshape(1, D), pos)


def _layernorm_kernel(x_ref, g_ref, b_ref, o_ref):
    x = x_ref[...].astype(jnp.float32)
    mu = jnp.mean(x, axis=-1, keepdims=True)
    var = jnp.mean((x - mu) ** 2, axis=-1, keepdims=True)
    y = (x - mu) * lax.rsqrt(var + 1e-5) * g_ref[...] + b_ref[...]
    o_ref[...] = y.astype(o_ref.dtype)


def layernorm(x, g, b):
    M, D = x.shape
    tm = _tile_m(M)
    return pl.pallas_call(
        _layernorm_kernel,
        out_shape=jax.ShapeDtypeStruct((M, D), jnp.bfloat16),
        grid=(M // tm,),
        in_specs=[pl.BlockSpec((tm, D), lambda i: (i, 0)),
                  pl.BlockSpec((1, D), lambda i: (0, 0)),
                  pl.BlockSpec((1, D), lambda i: (0, 0))],
        out_specs=pl.BlockSpec((tm, D), lambda i: (i, 0)),
        compiler_params=pltpu.CompilerParams(dimension_semantics=("parallel",)),
    )(x, g.reshape(1, D), b.reshape(1, D))


def _mha_core(qkv_like, q, k_all, v_all, n_head, scale, bias):
    """Per-head attention with a single concatenated (S, D) result."""
    D = q.shape[-1]
    hd = D // n_head
    heads = []
    for h in range(n_head):               # static unroll, n_head small
        sl = slice(h * hd, (h + 1) * hd)
        qh = q[:, sl].astype(jnp.bfloat16)
        kh = k_all[:, sl].astype(jnp.bfloat16)
        vh = v_all[:, sl].astype(jnp.bfloat16)
        # q @ k^T without an explicit transpose: contract dim 1 against dim 1.
        s = lax.dot_general(qh, kh, (((1,), (1,)), ((), ())),
                            preferred_element_type=jnp.float32) * scale
        if bias is not None:
            s = s + bias
        m = jnp.max(s, axis=-1, keepdims=True)
        p = jnp.exp(s - m)
        p = p / jnp.sum(p, axis=-1, keepdims=True)          # exact division
        heads.append(jnp.dot(p.astype(jnp.bfloat16), vh,
                             preferred_element_type=jnp.float32))
    return jnp.concatenate(heads, axis=-1)                   # (Sq, D) f32


def _self_attn_ln_kernel(*refs, n_head, scale, causal):
    # Fused: QKV projection + MHA + out-projection + residual + layernorm.
    if causal:
        (x_ref, mask_ref, wqkv_ref, bqkv_ref,
         wo_ref, bo_ref, g_ref, b_ref, o_ref) = refs
    else:
        (x_ref, wqkv_ref, bqkv_ref,
         wo_ref, bo_ref, g_ref, b_ref, o_ref) = refs
        mask_ref = None

    x = x_ref[0]                                              # (S, D) bf16
    qkv = jnp.dot(x, wqkv_ref[...],
                  preferred_element_type=jnp.float32) + bqkv_ref[...]   # (S, 3D)
    S = qkv.shape[0]
    D = qkv.shape[1] // 3

    bias = None
    if causal:
        # causal + key-padding bias generated in-kernel (no (B,L,L) HBM tensor)
        row = lax.broadcasted_iota(jnp.int32, (S, S), 0)
        col = lax.broadcasted_iota(jnp.int32, (S, S), 1)
        keep = (col <= row) & (mask_ref[0] > 0.0)             # (S,S) & (1,S)
        bias = jnp.where(keep, 0.0, -1e9).astype(jnp.float32)

    attn = _mha_core(qkv, qkv[:, :D], qkv[:, D:2 * D], qkv[:, 2 * D:],
                     n_head, scale, bias)
    # single K=128 output projection on the MXU
    y = jnp.dot(attn.astype(jnp.bfloat16), wo_ref[...],
                preferred_element_type=jnp.float32) + bo_ref[...]
    y = y + x.astype(jnp.float32)
    mu = jnp.mean(y, axis=-1, keepdims=True)
    var = jnp.mean((y - mu) ** 2, axis=-1, keepdims=True)
    o_ref[0] = ((y - mu) * lax.rsqrt(var + 1e-5) * g_ref[...]
                + b_ref[...]).astype(o_ref.dtype)


def self_attn_block(x, p, n_head, ln_g, ln_b, mask=None):
    """LayerNorm(x + MHA(x) @ wo + bo) with fused QKV; optional causal+pad mask."""
    B, S, D = x.shape
    hd = D // n_head
    scale = 1.0 / (hd ** 0.5)
    causal = mask is not None
    kernel = functools.partial(_self_attn_ln_kernel, n_head=n_head,
                               scale=scale, causal=causal)

    in_specs = [pl.BlockSpec((1, S, D), lambda i: (i, 0, 0))]
    args = [x]
    if causal:
        in_specs.append(pl.BlockSpec((1, 1, S), lambda i: (i, 0, 0)))
        args.append(mask.reshape(B, 1, S).astype(jnp.float32))
    in_specs += [pl.BlockSpec((D, 3 * D), lambda i: (0, 0)),
                 pl.BlockSpec((1, 3 * D), lambda i: (0, 0)),
                 pl.BlockSpec((D, D), lambda i: (0, 0)),
                 pl.BlockSpec((1, D), lambda i: (0, 0)),
                 pl.BlockSpec((1, D), lambda i: (0, 0)),
                 pl.BlockSpec((1, D), lambda i: (0, 0))]
    args += [p["w_qkv"], p["b_qkv"].reshape(1, 3 * D), p["wo"],
             p["bo"].reshape(1, D), ln_g.reshape(1, D), ln_b.reshape(1, D)]

    return pl.pallas_call(
        kernel,
        out_shape=jax.ShapeDtypeStruct((B, S, D), jnp.bfloat16),
        grid=(B,),
        in_specs=in_specs,
        out_specs=pl.BlockSpec((1, S, D), lambda i: (i, 0, 0)),
        compiler_params=pltpu.CompilerParams(dimension_semantics=("parallel",)),
    )(*args)


def _cross_attn_ln_kernel(xq_ref, mem_ref, wq_ref, bq_ref, wkv_ref, bkv_ref,
                          wo_ref, bo_ref, g_ref, b_ref, o_ref, *, n_head, scale):
    xq = xq_ref[0]                                            # (Sq, D) bf16
    mem = mem_ref[0]                                          # (Sk, D) bf16
    q = jnp.dot(xq, wq_ref[...],
                preferred_element_type=jnp.float32) + bq_ref[...]       # (Sq, D)
    kv = jnp.dot(mem, wkv_ref[...],
                 preferred_element_type=jnp.float32) + bkv_ref[...]     # (Sk, 2D)
    D = q.shape[-1]
    attn = _mha_core(kv, q, kv[:, :D], kv[:, D:], n_head, scale, None)
    y = jnp.dot(attn.astype(jnp.bfloat16), wo_ref[...],
                preferred_element_type=jnp.float32) + bo_ref[...]
    y = y + xq.astype(jnp.float32)
    mu = jnp.mean(y, axis=-1, keepdims=True)
    var = jnp.mean((y - mu) ** 2, axis=-1, keepdims=True)
    o_ref[0] = ((y - mu) * lax.rsqrt(var + 1e-5) * g_ref[...]
                + b_ref[...]).astype(o_ref.dtype)


def cross_attn_block(x_q, mem, p, n_head, ln_g, ln_b):
    B, Sq, D = x_q.shape
    Sk = mem.shape[1]
    hd = D // n_head
    scale = 1.0 / (hd ** 0.5)
    kernel = functools.partial(_cross_attn_ln_kernel, n_head=n_head, scale=scale)
    return pl.pallas_call(
        kernel,
        out_shape=jax.ShapeDtypeStruct((B, Sq, D), jnp.bfloat16),
        grid=(B,),
        in_specs=[pl.BlockSpec((1, Sq, D), lambda i: (i, 0, 0)),
                  pl.BlockSpec((1, Sk, D), lambda i: (i, 0, 0)),
                  pl.BlockSpec((D, D), lambda i: (0, 0)),
                  pl.BlockSpec((1, D), lambda i: (0, 0)),
                  pl.BlockSpec((D, 2 * D), lambda i: (0, 0)),
                  pl.BlockSpec((1, 2 * D), lambda i: (0, 0)),
                  pl.BlockSpec((D, D), lambda i: (0, 0)),
                  pl.BlockSpec((1, D), lambda i: (0, 0)),
                  pl.BlockSpec((1, D), lambda i: (0, 0)),
                  pl.BlockSpec((1, D), lambda i: (0, 0))],
        out_specs=pl.BlockSpec((1, Sq, D), lambda i: (i, 0, 0)),
        compiler_params=pltpu.CompilerParams(dimension_semantics=("parallel",)),
    )(x_q, mem, p["wq"], p["bq"].reshape(1, D), p["w_kv"],
      p["b_kv"].reshape(1, 2 * D), p["wo"], p["bo"].reshape(1, D),
      ln_g.reshape(1, D), ln_b.reshape(1, D))


def _ffn_ln_kernel(x_ref, w1_ref, b1_ref, w2_ref, b2_ref, g_ref, b_ref, o_ref):
    x = x_ref[...]                                            # (tm, D) bf16
    h = jnp.dot(x, w1_ref[...], preferred_element_type=jnp.float32) + b1_ref[...]
    # TODO(synk): PyTorch nn.GELU default is exact erf; tanh approximation used
    # here (EUP friendly), small numerical divergence only.
    h = jax.nn.gelu(h, approximate=True)
    y = jnp.dot(h.astype(jnp.bfloat16), w2_ref[...],
                preferred_element_type=jnp.float32) + b2_ref[...]
    y = y + x.astype(jnp.float32)
    mu = jnp.mean(y, axis=-1, keepdims=True)
    var = jnp.mean((y - mu) ** 2, axis=-1, keepdims=True)
    o_ref[...] = ((y - mu) * lax.rsqrt(var + 1e-5) * g_ref[...]
                  + b_ref[...]).astype(o_ref.dtype)


def ffn_ln(x, p, g, b):
    """LayerNorm(x + GELU(x@w1+b1)@w2+b2), fused in one kernel, M-tiled."""
    B, S, D = x.shape
    M = B * S
    F = p["w1"].shape[1]
    tm = _tile_m(M)
    out = pl.pallas_call(
        _ffn_ln_kernel,
        out_shape=jax.ShapeDtypeStruct((M, D), jnp.bfloat16),
        grid=(M // tm,),
        in_specs=[pl.BlockSpec((tm, D), lambda i: (i, 0)),
                  pl.BlockSpec((D, F), lambda i: (0, 0)),
                  pl.BlockSpec((1, F), lambda i: (0, 0)),
                  pl.BlockSpec((F, D), lambda i: (0, 0)),
                  pl.BlockSpec((1, D), lambda i: (0, 0)),
                  pl.BlockSpec((1, D), lambda i: (0, 0)),
                  pl.BlockSpec((1, D), lambda i: (0, 0))],
        out_specs=pl.BlockSpec((tm, D), lambda i: (i, 0)),
        compiler_params=pltpu.CompilerParams(dimension_semantics=("parallel",)),
    )(x.reshape(M, D), p["w1"], p["b1"].reshape(1, F), p["w2"],
      p["b2"].reshape(1, D), g.reshape(1, D), b.reshape(1, D))
    return out.reshape(B, S, D)


def _tag_head_kernel(x_ref, w_ref, b_ref, o_ref, *, thresh):
    # per-tag classifier: logits[b, t] = <x[b, t, :], w[t, :]> + bias[t]
    x = x_ref[...].astype(jnp.float32)                        # (B, T, D)
    w = w_ref[...]                                            # (T, D) f32
    lg = jnp.sum(x * w[None], axis=-1) + b_ref[...]           # (B, T)
    o_ref[0] = lg                                             # raw logits
    o_ref[1] = jax.nn.sigmoid(lg)                             # torch.sigmoid(tag_logits)
    # Mirrors the reference exactly: torch.where(tag_logits >= threshs) thresholds
    # the RAW logits (not the sigmoid probabilities).
    o_ref[2] = (lg >= thresh).astype(jnp.float32)


def tag_head(x, w, b, thresh):
    B, T, D = x.shape
    out = pl.pallas_call(
        functools.partial(_tag_head_kernel, thresh=float(thresh)),
        out_shape=jax.ShapeDtypeStruct((3, B, T), jnp.float32),
        grid=(1,),
        in_specs=[pl.BlockSpec((B, T, D), lambda i: (0, 0, 0)),
                  pl.BlockSpec((T, D), lambda i: (0, 0)),
                  pl.BlockSpec((1, T), lambda i: (0, 0))],
        out_specs=pl.BlockSpec((3, B, T), lambda i: (0, 0, 0)),
    )(x, w, b.reshape(1, T))
    return out[0], out[1], out[2]


def _lmhead_xent_kernel(x_ref, g_ref, b_ref, wte_ref, tgt_ref, w_ref, loss_ref,
                        y_scr, m_scr, l_scr, t_scr, num_scr, den_scr, *, tv):
    # Fused final-LN + tied-embedding LM head + weighted cross-entropy.
    # grid = (M tiles, V tiles); the (tm, tv) logits tile never leaves VMEM.
    i = pl.program_id(0)
    k = pl.program_id(1)
    ni = pl.num_programs(0)
    nk = pl.num_programs(1)

    @pl.when(jnp.logical_and(i == 0, k == 0))
    def _():
        num_scr[...] = jnp.zeros_like(num_scr)
        den_scr[...] = jnp.zeros_like(den_scr)

    @pl.when(k == 0)
    def _():
        x = x_ref[...].astype(jnp.float32)
        mu = jnp.mean(x, axis=-1, keepdims=True)
        var = jnp.mean((x - mu) ** 2, axis=-1, keepdims=True)
        y_scr[...] = ((x - mu) * lax.rsqrt(var + 1e-5) * g_ref[...]
                      + b_ref[...]).astype(jnp.bfloat16)
        m_scr[...] = jnp.full_like(m_scr[...], -jnp.inf)
        l_scr[...] = jnp.zeros_like(l_scr[...])
        t_scr[...] = jnp.zeros_like(t_scr[...])

    # logits for this vocab tile; wte is (tv, D) and contracted on dim 1, so no
    # transposed (D, V) copy is ever materialized in HBM.
    logits = lax.dot_general(y_scr[...], wte_ref[...],
                             (((1,), (1,)), ((), ())),
                             preferred_element_type=jnp.float32)   # (tm, tv)

    m_prev = m_scr[...]
    m_new = jnp.maximum(m_prev, jnp.max(logits, axis=-1, keepdims=True))
    l_scr[...] = (l_scr[...] * jnp.exp(m_prev - m_new)
                  + jnp.sum(jnp.exp(logits - m_new), axis=-1, keepdims=True))
    m_scr[...] = m_new

    ids = lax.broadcasted_iota(jnp.int32, logits.shape, 1) + k * tv
    t_scr[...] += jnp.sum(jnp.where(ids == tgt_ref[...], logits, 0.0),
                          axis=-1, keepdims=True)

    @pl.when(k == nk - 1)
    def _():
        nll = m_scr[...] + jnp.log(l_scr[...]) - t_scr[...]        # (tm, 1)
        w = w_ref[...]
        num_scr[...] += jnp.sum(nll * w, axis=(0, 1), keepdims=True)
        den_scr[...] += jnp.sum(w, axis=(0, 1), keepdims=True)

    @pl.when(jnp.logical_and(i == ni - 1, k == nk - 1))
    def _():
        loss_ref[...] = num_scr[...] / jnp.maximum(den_scr[...], 1.0)


def lm_head_xent_loss(x, g, b, wte, targets, weights):
    """Weighted token-mean CE of LN(x) @ wte.T against integer targets."""
    M, D = x.shape
    V = wte.shape[0]
    tm = _tile_m(M, target=256)
    tv = _tile_lane(V, target=2048)
    loss = pl.pallas_call(
        functools.partial(_lmhead_xent_kernel, tv=tv),
        out_shape=jax.ShapeDtypeStruct((1, 1), jnp.float32),
        grid=(M // tm, V // tv),
        in_specs=[pl.BlockSpec((tm, D), lambda i, k: (i, 0)),
                  pl.BlockSpec((1, D), lambda i, k: (0, 0)),
                  pl.BlockSpec((1, D), lambda i, k: (0, 0)),
                  pl.BlockSpec((tv, D), lambda i, k: (k, 0)),
                  pl.BlockSpec((tm, 1), lambda i, k: (i, 0)),
                  pl.BlockSpec((tm, 1), lambda i, k: (i, 0))],
        out_specs=pl.BlockSpec((1, 1), lambda i, k: (0, 0)),
        scratch_shapes=[pltpu.VMEM((tm, D), jnp.bfloat16),
                        pltpu.VMEM((tm, 1), jnp.float32),
                        pltpu.VMEM((tm, 1), jnp.float32),
                        pltpu.VMEM((tm, 1), jnp.float32),
                        pltpu.VMEM((1, 1), jnp.float32),
                        pltpu.VMEM((1, 1), jnp.float32)],
        compiler_params=pltpu.CompilerParams(
            dimension_semantics=("arbitrary", "arbitrary")),
    )(x, g.reshape(1, D), b.reshape(1, D), wte,
      targets.reshape(M, 1).astype(jnp.int32),
      weights.reshape(M, 1).astype(jnp.float32))
    return loss[0, 0]


# ------------------------------ Model blocks --------------------------------

def encoder_layer(x, p, n_head, mask=None):
    x = self_attn_block(x, p["attn"], n_head, p["ln1_g"], p["ln1_b"], mask=mask)
    x = ffn_ln(x, p["ffn"], p["ln2_g"], p["ln2_b"])
    return x


def tag_decoder_layer(q, mem, p, n_head):
    q = self_attn_block(q, p["self_attn"], n_head, p["ln1_g"], p["ln1_b"])
    q = cross_attn_block(q, mem, p["cross_attn"], n_head, p["ln2_g"], p["ln2_b"])
    q = ffn_ln(q, p["ffn"], p["ln3_g"], p["ln3_b"])
    return q


def vision_encoder(pixel_values, p, n_head, patch=4):
    B, C, H, W = pixel_values.shape
    ph, pw = H // patch, W // patch
    x = pixel_values.reshape(B, C, ph, patch, pw, patch)
    x = jnp.transpose(x, (0, 2, 4, 1, 3, 5)).reshape(B, ph * pw, C * patch * patch)
    x = patch_embed(x.astype(jnp.bfloat16), p["w_patch"], p["b_patch"], p["pos"])
    for lp in p["layers"]:
        x = encoder_layer(x, lp, n_head)
    B_, P, D = x.shape
    x = layernorm(x.reshape(B_ * P, D), p["ln_f_g"], p["ln_f_b"]).reshape(B_, P, D)
    return x


def tag_decoder(vision_embedding, p, n_head, thresh):
    B = vision_embedding.shape[0]
    T, D = p["tag_embedding"].shape
    q = jnp.broadcast_to(p["tag_embedding"][None], (B, T, D)).astype(jnp.bfloat16)
    for lp in p["layers"]:
        q = tag_decoder_layer(q, vision_embedding, lp, n_head)
    return tag_head(q, p["w_cls"], p["b_cls"], thresh)


def caption_decoder(vision_embedding, input_ids, attention_mask, labels, p, n_head):
    # TODO(synk): the real CaptionDecoder wraps a pretrained GPT-2 + HF tokenizer
    # and additionally conditions on *string* tag names; here we condition on the
    # vision tokens only, with a tied-embedding LM head and the standard causal
    # shift.  HF GPT-2 is causal over the whole inputs_embeds sequence, so the
    # [vision | text] causal+padding mask below matches that behavior.
    B, P, D = vision_embedding.shape
    S = input_ids.shape[1]
    # TODO(synk): embedding gather left to XLA (a DMA-gather kernel is overkill here).
    text_emb = p["wte"][input_ids] + p["wpe"][:S][None]                # bf16
    x = jnp.concatenate([vision_embedding, text_emb], axis=1)          # (B, L, D)
    ext_mask = jnp.concatenate(
        [jnp.ones((B, P), jnp.float32), attention_mask.astype(jnp.float32)], axis=1)
    for lp in p["layers"]:
        x = encoder_layer(x, lp, n_head, mask=ext_mask)
    # Only the shifted text positions are needed for the loss.
    x_pred = x[:, P:P + S - 1, :].reshape(B * (S - 1), D)
    tgt = labels[:, 1:].reshape(B * (S - 1))
    # TODO(synk): reference likely masks on shifted label padding (ignore_index=-100);
    # the attention mask of the shifted positions is used here as the proxy.
    w = attention_mask[:, 1:].astype(jnp.float32).reshape(B * (S - 1))
    return lm_head_xent_loss(x_pred, p["ln_f_g"], p["ln_f_b"], p["wte"], tgt, w)


@functools.partial(jax.jit, static_argnames=("threshs", "n_head"))
def vision_language_model_forward(params, input_ids, attention_mask, pixel_values,
                                  labels, threshs=0.6, n_head=4):
    vision_embedding = vision_encoder(pixel_values, params["vision"], n_head)
    # TODO(synk): ids_to_tags (int -> string tag name) and passing tag strings to
    # the caption decoder have no array equivalent; we return the thresholded mask.
    tag_logits, tag_probs, tag_mask = tag_decoder(
        vision_embedding, params["tag"], n_head, threshs)
    caption_loss = caption_decoder(vision_embedding, input_ids, attention_mask,
                                   labels, params["caption"], n_head)
    return tag_logits, caption_loss, tag_probs, tag_mask


# ------------------------------ Param init -----------------------------------

def init_params(key, *, D=128, FFN=256, patch_dim=48, P=16, T=8, V=128, S=8,
                n_vis_layers=1, n_tag_layers=1, n_cap_layers=1):
    keys = iter(jax.random.split(key, 256))

    def nrm(shape, dtype=jnp.bfloat16, scale=0.02):
        return (jax.random.normal(next(keys), shape, jnp.float32) * scale).astype(dtype)

    def lin(fan_in, fan_out):
        # bf16 weights in HBM (f32 accumulation in the kernels), f32 biases
        return nrm((fan_in, fan_out)), jnp.zeros((fan_out,), jnp.float32)

    def attn_self_p():
        w_qkv, b_qkv = lin(D, 3 * D)          # fused Q|K|V projection
        wo, bo = lin(D, D)
        return dict(w_qkv=w_qkv, b_qkv=b_qkv, wo=wo, bo=bo)

    def attn_cross_p():
        wq, bq = lin(D, D)
        w_kv, b_kv = lin(D, 2 * D)            # fused K|V projection
        wo, bo = lin(D, D)
        return dict(wq=wq, bq=bq, w_kv=w_kv, b_kv=b_kv, wo=wo, bo=bo)

    def ffn_p():
        w1, b1 = lin(D, FFN)
        w2, b2 = lin(FFN, D)
        return dict(w1=w1, b1=b1, w2=w2, b2=b2)

    def enc_layer():
        return dict(attn=attn_self_p(), ffn=ffn_p(),
                    ln1_g=jnp.ones((D,), jnp.float32), ln1_b=jnp.zeros((D,), jnp.float32),
                    ln2_g=jnp.ones((D,), jnp.float32), ln2_b=jnp.zeros((D,), jnp.float32))

    def dec_layer():
        return dict(self_attn=attn_self_p(), cross_attn=attn_cross_p(), ffn=ffn_p(),
                    ln1_g=jnp.ones((D,), jnp.float32), ln1_b=jnp.zeros((D,), jnp.float32),
                    ln2_g=jnp.ones((D,), jnp.float32), ln2_b=jnp.zeros((D,), jnp.float32),
                    ln3_g=jnp.ones((D,), jnp.float32), ln3_b=jnp.zeros((D,), jnp.float32))

    w_patch, b_patch = lin(patch_dim, D)
    vision = dict(w_patch=w_patch, b_patch=b_patch,
                  pos=nrm((P, D), dtype=jnp.float32),
                  layers=[enc_layer() for _ in range(n_vis_layers)],
                  ln_f_g=jnp.ones((D,), jnp.float32), ln_f_b=jnp.zeros((D,), jnp.float32))
    tag = dict(tag_embedding=nrm((T, D), dtype=jnp.float32),
               layers=[dec_layer() for _ in range(n_tag_layers)],
               w_cls=nrm((T, D), dtype=jnp.float32),
               b_cls=jnp.zeros((T,), jnp.float32))
    caption = dict(wte=nrm((V, D)), wpe=nrm((S, D)),
                   layers=[enc_layer() for _ in range(n_cap_layers)],
                   ln_f_g=jnp.ones((D,), jnp.float32), ln_f_b=jnp.zeros((D,), jnp.float32))
    return dict(vision=vision, tag=tag, caption=caption)


# --------------------------------- Main ---------------------------------------

if __name__ == "__main__":
    key = jax.random.PRNGKey(0)
    k_p, k_img, k_ids = jax.random.split(key, 3)

    B, S, V = 2, 8, 128
    pixel_values = jax.random.normal(k_img, (B, 3, 16, 16), jnp.float32)   # NCHW
    input_ids = jax.random.randint(k_ids, (B, S), 0, V, dtype=jnp.int32)
    attention_mask = jnp.ones((B, S), jnp.int32).at[1, 6:].set(0)
    labels = input_ids

    params = init_params(k_p)
    tag_logits, caption_loss, tag_probs, tag_mask = vision_language_model_forward(
        params, input_ids, attention_mask, pixel_values, labels, threshs=0.6)

    jax.block_until_ready((tag_logits, caption_loss, tag_probs, tag_mask))
    assert tag_logits.shape == (B, 8)
    assert tag_probs.shape == (B, 8)
    assert tag_mask.shape == (B, 8)
    assert caption_loss.shape == ()
    assert bool(jnp.isfinite(caption_loss))
    print("KERNEL_OK")
</pallas_src>

<mosaic_0001>
module attributes {stable_mosaic.version = 11 : i64} {
  func.func @_patch_embed_kernel(%arg0: i32, %arg1: memref<1x16x48xbf16, #tpu.memory_space<vmem>>, %arg2: memref<48x128xbf16, #tpu.memory_space<vmem>>, %arg3: memref<1x128xf32, #tpu.memory_space<vmem>>, %arg4: memref<16x128xf32, #tpu.memory_space<vmem>>, %arg5: memref<1x16x128xbf16, #tpu.memory_space<vmem>>) attributes {dimension_semantics = [#tpu.dimension_semantics<parallel>], iteration_bounds = array<i64: 2>, scalar_prefetch = 0 : i64, scratch_operands = 0 : i64, tpu.core_type = #tpu.core_type<tc>, window_params = [{transform_indices = @transform_0, window_bounds = array<i64: 1, 16, 48>}, {pipeline_mode = #tpu.pipeline_mode<synchronous>, transform_indices = @transform_1, window_bounds = array<i64: 48, 128>}, {pipeline_mode = #tpu.pipeline_mode<synchronous>, transform_indices = @transform_2, window_bounds = array<i64: 1, 128>}, {pipeline_mode = #tpu.pipeline_mode<synchronous>, transform_indices = @transform_3, window_bounds = array<i64: 16, 128>}, {transform_indices = @transform_4, window_bounds = array<i64: 1, 16, 128>}]} {
    %c0 = arith.constant 0 : index
    %c0_0 = arith.constant 0 : index
    %c0_1 = arith.constant 0 : index
    %0 = vector.load %arg1[%c0, %c0_0, %c0_1] : memref<1x16x48xbf16, #tpu.memory_space<vmem>>, vector<1x16x48xbf16>
    %1 = vector.shape_cast %0 : vector<1x16x48xbf16> to vector<16x48xbf16>
    %c0_2 = arith.constant 0 : index
    %c0_3 = arith.constant 0 : index
    %2 = vector.load %arg2[%c0_2, %c0_3] : memref<48x128xbf16, #tpu.memory_space<vmem>>, vector<48x128xbf16>
    %cst = arith.constant dense<0.000000e+00> : vector<16x128xf32>
    %3 = tpu.matmul %1, %2, %cst {dimension_numbers = #tpu.dot_dimension_numbers<[1], [0], [0], [1], [0, 0, 1, 1], [], []>} : vector<16x48xbf16>, vector<48x128xbf16>, vector<16x128xf32> -> vector<16x128xf32>
    %c0_4 = arith.constant 0 : index
    %c0_5 = arith.constant 0 : index
    %4 = vector.load %arg3[%c0_4, %c0_5] : memref<1x128xf32, #tpu.memory_space<vmem>>, vector<1x128xf32>
    %5 = vector.broadcast %4 : vector<1x128xf32> to vector<16x128xf32>
    %6 = arith.addf %3, %5 : vector<16x128xf32>
    %c0_6 = arith.constant 0 : index
    %c0_7 = arith.constant 0 : index
    %7 = vector.load %arg4[%c0_6, %c0_7] : memref<16x128xf32, #tpu.memory_space<vmem>>, vector<16x128xf32>
    %8 = arith.addf %6, %7 : vector<16x128xf32>
    %9 = arith.truncf %8 : vector<16x128xf32> to vector<16x128xbf16>
    %c0_8 = arith.constant 0 : index
    %c0_9 = arith.constant 0 : index
    %c0_10 = arith.constant 0 : index
    %10 = vector.load %arg5[%c0_8, %c0_9, %c0_10] : memref<1x16x128xbf16, #tpu.memory_space<vmem>>, vector<1x16x128xbf16>
    %11 = vector.shape_cast %10 : vector<1x16x128xbf16> to vector<16x128xbf16>
    %12 = vector.shape_cast %9 : vector<16x128xbf16> to vector<1x16x128xbf16>
    tpu.vector_store %arg5[%c0_8, %c0_9, %c0_10], %12 {strides = array<i32>} : memref<1x16x128xbf16, #tpu.memory_space<vmem>>, vector<1x16x128xbf16>,
    return
  }
  func.func @transform_0(%arg0: i32) -> (i32, i32, i32) {
    %c0_i32 = arith.constant 0 : i32
    %c0_i32_0 = arith.constant 0 : i32
    %c0_i32_1 = arith.constant 0 : i32
    return %arg0, %c0_i32, %c0_i32_0 : i32, i32, i32
  }
  func.func @transform_1(%arg0: i32) -> (i32, i32) {
    %c0_i32 = arith.constant 0 : i32
    %c0_i32_0 = arith.constant 0 : i32
    %c0_i32_1 = arith.constant 0 : i32
    return %c0_i32, %c0_i32_0 : i32, i32
  }
  func.func @transform_2(%arg0: i32) -> (i32, i32) {
    %c0_i32 = arith.constant 0 : i32
    %c0_i32_0 = arith.constant 0 : i32
    %c0_i32_1 = arith.constant 0 : i32
    return %c0_i32, %c0_i32_0 : i32, i32
  }
  func.func @transform_3(%arg0: i32) -> (i32, i32) {
    %c0_i32 = arith.constant 0 : i32
    %c0_i32_0 = arith.constant 0 : i32
    %c0_i32_1 = arith.constant 0 : i32
    return %c0_i32, %c0_i32_0 : i32, i32
  }
  func.func @transform_4(%arg0: i32) -> (i32, i32, i32) {
    %c0_i32 = arith.constant 0 : i32
    %c0_i32_0 = arith.constant 0 : i32
    %c0_i32_1 = arith.constant 0 : i32
    return %arg0, %c0_i32, %c0_i32_0 : i32, i32, i32
  }
}

module attributes {stable_mosaic.version = 11 : i64} {
  func.func @_layernorm_kernel(%arg0: i32, %arg1: memref<32x128xbf16, #tpu.memory_space<vmem>>, %arg2: memref<1x128xf32, #tpu.memory_space<vmem>>, %arg3: memref<1x128xf32, #tpu.memory_space<vmem>>, %arg4: memref<32x128xbf16, #tpu.memory_space<vmem>>) attributes {dimension_semantics = [#tpu.dimension_semantics<parallel>], iteration_bounds = array<i64: 1>, scalar_prefetch = 0 : i64, scratch_operands = 0 : i64, tpu.core_type = #tpu.core_type<tc>, window_params = [{transform_indices = @transform_0, window_bounds = array<i64: 32, 128>}, {pipeline_mode = #tpu.pipeline_mode<synchronous>, transform_indices = @transform_1, window_bounds = array<i64: 1, 128>}, {pipeline_mode = #tpu.pipeline_mode<synchronous>, transform_indices = @transform_2, window_bounds = array<i64: 1, 128>}, {transform_indices = @transform_3, window_bounds = array<i64: 32, 128>}]} {
    %c0 = arith.constant 0 : index
    %c0_0 = arith.constant 0 : index
    %0 = vector.load %arg1[%c0, %c0_0] : memref<32x128xbf16, #tpu.memory_space<vmem>>, vector<32x128xbf16>
    %1 = arith.extf %0 : vector<32x128xbf16> to vector<32x128xf32>
    %cst = arith.constant dense<0.000000e+00> : vector<32xf32>
    %2 = vector.multi_reduction <add>, %1, %cst [1] : vector<32x128xf32> to vector<32xf32>
    %3 = vector.shape_cast %2 : vector<32xf32> to vector<32x1xf32>
    %cst_1 = arith.constant 1.280000e+02 : f32
    %4 = vector.broadcast %cst_1 : f32 to vector<32x1xf32>
    %5 = arith.divf %3, %4 : vector<32x1xf32>
    %6 = vector.broadcast %5 : vector<32x1xf32> to vector<32x128xf32>
    %7 = arith.subf %1, %6 : vector<32x128xf32>
    %8 = arith.mulf %7, %7 : vector<32x128xf32>
    %cst_2 = arith.constant dense<0.000000e+00> : vector<32xf32>
    %9 = vector.multi_reduction <add>, %8, %cst_2 [1] : vector<32x128xf32> to vector<32xf32>
    %10 = vector.shape_cast %9 : vector<32xf32> to vector<32x1xf32>
    %cst_3 = arith.constant 1.280000e+02 : f32
    %11 = vector.broadcast %cst_3 : f32 to vector<32x1xf32>
    %12 = arith.divf %10, %11 : vector<32x1xf32>
    %13 = vector.broadcast %5 : vector<32x1xf32> to vector<32x128xf32>
    %14 = arith.subf %1, %13 : vector<32x128xf32>
    %cst_4 = arith.constant 9.99999974E-6 : f32
    %15 = vector.broadcast %cst_4 : f32 to vector<32x1xf32>
    %16 = arith.addf %12, %15 : vector<32x1xf32>
    %17 = math.rsqrt %16 : vector<32x1xf32>
    %18 = vector.broadcast %17 : vector<32x1xf32> to vector<32x128xf32>
    %19 = arith.mulf %14, %18 : vector<32x128xf32>
    %c0_5 = arith.constant 0 : index
    %c0_6 = arith.constant 0 : index
    %20 = vector.load %arg2[%c0_5, %c0_6] : memref<1x128xf32, #tpu.memory_space<vmem>>, vector<1x128xf32>
    %21 = vector.broadcast %20 : vector<1x128xf32> to vector<32x128xf32>
    %22 = arith.mulf %19, %21 : vector<32x128xf32>
    %c0_7 = arith.constant 0 : index
    %c0_8 = arith.constant 0 : index
    %23 = vector.load %arg3[%c0_7, %c0_8] : memref<1x128xf32, #tpu.memory_space<vmem>>, vector<1x128xf32>
    %24 = vector.broadcast %23 : vector<1x128xf32> to vector<32x128xf32>
    %25 = arith.addf %22, %24 : vector<32x128xf32>
    %26 = arith.truncf %25 : vector<32x128xf32> to vector<32x128xbf16>
    %c0_9 = arith.constant 0 : index
    %c0_10 = arith.constant 0 : index
    %27 = vector.load %arg4[%c0_9, %c0_10] : memref<32x128xbf16, #tpu.memory_space<vmem>>, vector<32x128xbf16>
    tpu.vector_store %arg4[%c0_9, %c0_10], %26 {strides = array<i32>} : memref<32x128xbf16, #tpu.memory_space<vmem>>, vector<32x128xbf16>,
    return
  }
  func.func @transform_0(%arg0: i32) -> (i32, i32) {
    %c0_i32 = arith.constant 0 : i32
    %c0_i32_0 = arith.constant 0 : i32
    return %arg0, %c0_i32 : i32, i32
  }
  func.func @transform_1(%arg0: i32) -> (i32, i32) {
    %c0_i32 = arith.constant 0 : i32
    %c0_i32_0 = arith.constant 0 : i32
    %c0_i32_1 = arith.constant 0 : i32
    return %c0_i32, %c0_i32_0 : i32, i32
  }
  func.func @transform_2(%arg0: i32) -> (i32, i32) {
    %c0_i32 = arith.constant 0 : i32
    %c0_i32_0 = arith.constant 0 : i32
    %c0_i32_1 = arith.constant 0 : i32
    return %c0_i32, %c0_i32_0 : i32, i32
  }
  func.func @transform_3(%arg0: i32) -> (i32, i32) {
    %c0_i32 = arith.constant 0 : i32
    %c0_i32_0 = arith.constant 0 : i32
    return %arg0, %c0_i32 : i32, i32
  }
}

module attributes {stable_mosaic.version = 11 : i64} {
  func.func @_ffn_ln_kernel(%arg0: i32, %arg1: memref<32x128xbf16, #tpu.memory_space<vmem>>, %arg2: memref<128x256xbf16, #tpu.memory_space<vmem>>, %arg3: memref<1x256xf32, #tpu.memory_space<vmem>>, %arg4: memref<256x128xbf16, #tpu.memory_space<vmem>>, %arg5: memref<1x128xf32, #tpu.memory_space<vmem>>, %arg6: memref<1x128xf32, #tpu.memory_space<vmem>>, %arg7: memref<1x128xf32, #tpu.memory_space<vmem>>, %arg8: memref<32x128xbf16, #tpu.memory_space<vmem>>) attributes {dimension_semantics = [#tpu.dimension_semantics<parallel>], iteration_bounds = array<i64: 1>, scalar_prefetch = 0 : i64, scratch_operands = 0 : i64, tpu.core_type = #tpu.core_type<tc>, window_params = [{transform_indices = @transform_0, window_bounds = array<i64: 32, 128>}, {pipeline_mode = #tpu.pipeline_mode<synchronous>, transform_indices = @transform_1, window_bounds = array<i64: 128, 256>}, {pipeline_mode = #tpu.pipeline_mode<synchronous>, transform_indices = @transform_2, window_bounds = array<i64: 1, 256>}, {pipeline_mode = #tpu.pipeline_mode<synchronous>, transform_indices = @transform_3, window_bounds = array<i64: 256, 128>}, {pipeline_mode = #tpu.pipeline_mode<synchronous>, transform_indices = @transform_4, window_bounds = array<i64: 1, 128>}, {pipeline_mode = #tpu.pipeline_mode<synchronous>, transform_indices = @transform_5, window_bounds = array<i64: 1, 128>}, {pipeline_mode = #tpu.pipeline_mode<synchronous>, transform_indices = @transform_6, window_bounds = array<i64: 1, 128>}, {transform_indices = @transform_7, window_bounds = array<i64: 32, 128>}]} {
    %c0 = arith.constant 0 : index
    %c0_0 = arith.constant 0 : index
    %0 = vector.load %arg1[%c0, %c0_0] : memref<32x128xbf16, #tpu.memory_space<vmem>>, vector<32x128xbf16>
    %c0_1 = arith.constant 0 : index
    %c0_2 = arith.constant 0 : index
    %1 = vector.load %arg2[%c0_1, %c0_2] : memref<128x256xbf16, #tpu.memory_space<vmem>>, vector<128x256xbf16>
    %cst = arith.constant dense<0.000000e+00> : vector<32x256xf32>
    %2 = tpu.matmul %0, %1, %cst {dimension_numbers = #tpu.dot_dimension_numbers<[1], [0], [0], [1], [0, 0, 1, 1], [], []>} : vector<32x128xbf16>, vector<128x256xbf16>, vector<32x256xf32> -> vector<32x256xf32>
    %c0_3 = arith.constant 0 : index
    %c0_4 = arith.constant 0 : index
    %3 = vector.load %arg3[%c0_3, %c0_4] : memref<1x256xf32, #tpu.memory_space<vmem>>, vector<1x256xf32>
    %4 = vector.broadcast %3 : vector<1x256xf32> to vector<32x256xf32>
    %5 = arith.addf %2, %4 : vector<32x256xf32>
    %6 = arith.mulf %5, %5 : vector<32x256xf32>
    %7 = arith.mulf %5, %6 : vector<32x256xf32>
    %cst_5 = arith.constant 4.471500e-02 : f32
    %8 = vector.broadcast %cst_5 : f32 to vector<32x256xf32>
    %9 = arith.mulf %8, %7 : vector<32x256xf32>
    %10 = arith.addf %5, %9 : vector<32x256xf32>
    %cst_6 = arith.constant 0.797884583 : f32
    %11 = vector.broadcast %cst_6 : f32 to vector<32x256xf32>
    %12 = arith.mulf %11, %10 : vector<32x256xf32>
    %13 = math.tanh %12 : vector<32x256xf32>
    %cst_7 = arith.constant 1.000000e+00 : f32
    %14 = vector.broadcast %cst_7 : f32 to vector<32x256xf32>
    %15 = arith.addf %14, %13 : vector<32x256xf32>
    %cst_8 = arith.constant 5.000000e-01 : f32
    %16 = vector.broadcast %cst_8 : f32 to vector<32x256xf32>
    %17 = arith.mulf %16, %15 : vector<32x256xf32>
    %18 = arith.mulf %5, %17 : vector<32x256xf32>
    %19 = arith.truncf %18 : vector<32x256xf32> to vector<32x256xbf16>
    %c0_9 = arith.constant 0 : index
    %c0_10 = arith.constant 0 : index
    %20 = vector.load %arg4[%c0_9, %c0_10] : memref<256x128xbf16, #tpu.memory_space<vmem>>, vector<256x128xbf16>
    %cst_11 = arith.constant dense<0.000000e+00> : vector<32x128xf32>
    %21 = tpu.matmul %19, %20, %cst_11 {dimension_numbers = #tpu.dot_dimension_numbers<[1], [0], [0], [1], [0, 0, 1, 1], [], []>} : vector<32x256xbf16>, vector<256x128xbf16>, vector<32x128xf32> -> vector<32x128xf32>
    %c0_12 = arith.constant 0 : index
    %c0_13 = arith.constant 0 : index
    %22 = vector.load %arg5[%c0_12, %c0_13] : memref<1x128xf32, #tpu.memory_space<vmem>>, vector<1x128xf32>
    %23 = vector.broadcast %22 : vector<1x128xf32> to vector<32x128xf32>
    %24 = arith.addf %21, %23 : vector<32x128xf32>
    %25 = arith.extf %0 : vector<32x128xbf16> to vector<32x128xf32>
    %26 = arith.addf %24, %25 : vector<32x128xf32>
    %cst_14 = arith.constant dense<0.000000e+00> : vector<32xf32>
    %27 = vector.multi_reduction <add>, %26, %cst_14 [1] : vector<32x128xf32> to vector<32xf32>
    %28 = vector.shape_cast %27 : vector<32xf32> to vector<32x1xf32>
    %cst_15 = arith.constant 1.280000e+02 : f32
    %29 = vector.broadcast %cst_15 : f32 to vector<32x1xf32>
    %30 = arith.divf %28, %29 : vector<32x1xf32>
    %31 = vector.broadcast %30 : vector<32x1xf32> to vector<32x128xf32>
    %32 = arith.subf %26, %31 : vector<32x128xf32>
    %33 = arith.mulf %32, %32 : vector<32x128xf32>
    %cst_16 = arith.constant dense<0.000000e+00> : vector<32xf32>
    %34 = vector.multi_reduction <add>, %33, %cst_16 [1] : vector<32x128xf32> to vector<32xf32>
    %35 = vector.shape_cast %34 : vector<32xf32> to vector<32x1xf32>
    %cst_17 = arith.constant 1.280000e+02 : f32
    %36 = vector.broadcast %cst_17 : f32 to vector<32x1xf32>
    %37 = arith.divf %35, %36 : vector<32x1xf32>
    %38 = vector.broadcast %30 : vector<32x1xf32> to vector<32x128xf32>
    %39 = arith.subf %26, %38 : vector<32x128xf32>
    %cst_18 = arith.constant 9.99999974E-6 : f32
    %40 = vector.broadcast %cst_18 : f32 to vector<32x1xf32>
    %41 = arith.addf %37, %40 : vector<32x1xf32>
    %42 = math.rsqrt %41 : vector<32x1xf32>
    %43 = vector.broadcast %42 : vector<32x1xf32> to vector<32x128xf32>
    %44 = arith.mulf %39, %43 : vector<32x128xf32>
    %c0_19 = arith.constant 0 : index
    %c0_20 = arith.constant 0 : index
    %45 = vector.load %arg6[%c0_19, %c0_20] : memref<1x128xf32, #tpu.memory_space<vmem>>, vector<1x128xf32>
    %46 = vector.broadcast %45 : vector<1x128xf32> to vector<32x128xf32>
    %47 = arith.mulf %44, %46 : vector<32x128xf32>
    %c0_21 = arith.constant 0 : index
    %c0_22 = arith.constant 0 : index
    %48 = vector.load %arg7[%c0_21, %c0_22] : memref<1x128xf32, #tpu.memory_space<vmem>>, vector<1x128xf32>
    %49 = vector.broadcast %48 : vector<1x128xf32> to vector<32x128xf32>
    %50 = arith.addf %47, %49 : vector<32x128xf32>
    %51 = arith.truncf %50 : vector<32x128xf32> to vector<32x128xbf16>
    %c0_23 = arith.constant 0 : index
    %c0_24 = arith.constant 0 : index
    %52 = vector.load %arg8[%c0_23, %c0_24] : memref<32x128xbf16, #tpu.memory_space<vmem>>, vector<32x128xbf16>
    tpu.vector_store %arg8[%c0_23, %c0_24], %51 {strides = array<i32>} : memref<32x128xbf16, #tpu.memory_space<vmem>>, vector<32x128xbf16>,
    return
  }
  func.func @transform_0(%arg0: i32) -> (i32, i32) {
    %c0_i32 = arith.constant 0 : i32
    %c0_i32_0 = arith.constant 0 : i32
    return %arg0, %c0_i32 : i32, i32
  }
  func.func @transform_1(%arg0: i32) -> (i32, i32) {
    %c0_i32 = arith.constant 0 : i32
    %c0_i32_0 = arith.constant 0 : i32
    %c0_i32_1 = arith.constant 0 : i32
    return %c0_i32, %c0_i32_0 : i32, i32
  }
  func.func @transform_2(%arg0: i32) -> (i32, i32) {
    %c0_i32 = arith.constant 0 : i32
    %c0_i32_0 = arith.constant 0 : i32
    %c0_i32_1 = arith.constant 0 : i32
    return %c0_i32, %c0_i32_0 : i32, i32
  }
  func.func @transform_3(%arg0: i32) -> (i32, i32) {
    %c0_i32 = arith.constant 0 : i32
    %c0_i32_0 = arith.constant 0 : i32
    %c0_i32_1 = arith.constant 0 : i32
    return %c0_i32, %c0_i32_0 : i32, i32
  }
  func.func @transform_4(%arg0: i32) -> (i32, i32) {
    %c0_i32 = arith.constant 0 : i32
    %c0_i32_0 = arith.constant 0 : i32
    %c0_i32_1 = arith.constant 0 : i32
    return %c0_i32, %c0_i32_0 : i32, i32
  }
  func.func @transform_5(%arg0: i32) -> (i32, i32) {
    %c0_i32 = arith.constant 0 : i32
    %c0_i32_0 = arith.constant 0 : i32
    %c0_i32_1 = arith.constant 0 : i32
    return %c0_i32, %c0_i32_0 : i32, i32
  }
  func.func @transform_6(%arg0: i32) -> (i32, i32) {
    %c0_i32 = arith.constant 0 : i32
    %c0_i32_0 = arith.constant 0 : i32
    %c0_i32_1 = arith.constant 0 : i32
    return %c0_i32, %c0_i32_0 : i32, i32
  }
  func.func @transform_7(%arg0: i32) -> (i32, i32) {
    %c0_i32 = arith.constant 0 : i32
    %c0_i32_0 = arith.constant 0 : i32
    return %arg0, %c0_i32 : i32, i32
  }
}

module attributes {stable_mosaic.version = 11 : i64} {
  func.func @_self_attn_ln_kernel(%arg0: i32, %arg1: memref<1x16x128xbf16, #tpu.memory_space<vmem>>, %arg2: memref<128x384xbf16, #tpu.memory_space<vmem>>, %arg3: memref<1x384xf32, #tpu.memory_space<vmem>>, %arg4: memref<128x128xbf16, #tpu.memory_space<vmem>>, %arg5: memref<1x128xf32, #tpu.memory_space<vmem>>, %arg6: memref<1x128xf32, #tpu.memory_space<vmem>>, %arg7: memref<1x128xf32, #tpu.memory_space<vmem>>, %arg8: memref<1x16x128xbf16, #tpu.memory_space<vmem>>) attributes {dimension_semantics = [#tpu.dimension_semantics<parallel>], iteration_bounds = array<i64: 2>, scalar_prefetch = 0 : i64, scratch_operands = 0 : i64, tpu.core_type = #tpu.core_type<tc>, window_params = [{transform_indices = @transform_0, window_bounds = array<i64: 1, 16, 128>}, {pipeline_mode = #tpu.pipeline_mode<synchronous>, transform_indices = @transform_1, window_bounds = array<i64: 128, 384>}, {pipeline_mode = #tpu.pipeline_mode<synchronous>, transform_indices = @transform_2, window_bounds = array<i64: 1, 384>}, {pipeline_mode = #tpu.pipeline_mode<synchronous>, transform_indices = @transform_3, window_bounds = array<i64: 128, 128>}, {pipeline_mode = #tpu.pipeline_mode<synchronous>, transform_indices = @transform_4, window_bounds = array<i64: 1, 128>}, {pipeline_mode = #tpu.pipeline_mode<synchronous>, transform_indices = @transform_5, window_bounds = array<i64: 1, 128>}, {pipeline_mode = #tpu.pipeline_mode<synchronous>, transform_indices = @transform_6, window_bounds = array<i64: 1, 128>}, {transform_indices = @transform_7, window_bounds = array<i64: 1, 16, 128>}]} {
    %c0 = arith.constant 0 : index
    %c0_0 = arith.constant 0 : index
    %c0_1 = arith.constant 0 : index
    %0 = vector.load %arg1[%c0, %c0_0, %c0_1] : memref<1x16x128xbf16, #tpu.memory_space<vmem>>, vector<1x16x128xbf16>
    %1 = vector.shape_cast %0 : vector<1x16x128xbf16> to vector<16x128xbf16>
    %c0_2 = arith.constant 0 : index
    %c0_3 = arith.constant 0 : index
    %2 = vector.load %arg2[%c0_2, %c0_3] : memref<128x384xbf16, #tpu.memory_space<vmem>>, vector<128x384xbf16>
    %cst = arith.constant dense<0.000000e+00> : vector<16x384xf32>
    %3 = tpu.matmul %1, %2, %cst {dimension_numbers = #tpu.dot_dimension_numbers<[1], [0], [0], [1], [0, 0, 1, 1], [], []>} : vector<16x128xbf16>, vector<128x384xbf16>, vector<16x384xf32> -> vector<16x384xf32>
    %c0_4 = arith.constant 0 : index
    %c0_5 = arith.constant 0 : index
    %4 = vector.load %arg3[%c0_4, %c0_5] : memref<1x384xf32, #tpu.memory_space<vmem>>, vector<1x384xf32>
    %5 = vector.broadcast %4 : vector<1x384xf32> to vector<16x384xf32>
    %6 = arith.addf %3, %5 : vector<16x384xf32>
    %7 = vector.extract_strided_slice %6 {offsets = [0, 0], sizes = [16, 128], strides = [1, 1]} : vector<16x384xf32> to vector<16x128xf32>
    %8 = vector.extract_strided_slice %6 {offsets = [0, 128], sizes = [16, 128], strides = [1, 1]} : vector<16x384xf32> to vector<16x128xf32>
    %9 = vector.extract_strided_slice %6 {offsets = [0, 256], sizes = [16, 128], strides = [1, 1]} : vector<16x384xf32> to vector<16x128xf32>
    %10 = vector.extract_strided_slice %7 {offsets = [0, 0], sizes = [16, 32], strides = [1, 1]} : vector<16x128xf32> to vector<16x32xf32>
    %11 = arith.truncf %10 : vector<16x32xf32> to vector<16x32xbf16>
    %12 = vector.extract_strided_slice %8 {offsets = [0, 0], sizes = [16, 32], strides = [1, 1]} : vector<16x128xf32> to vector<16x32xf32>
    %13 = arith.truncf %12 : vector<16x32xf32> to vector<16x32xbf16>
    %14 = vector.extract_strided_slice %9 {offsets = [0, 0], sizes = [16, 32], strides = [1, 1]} : vector<16x128xf32> to vector<16x32xf32>
    %15 = arith.truncf %14 : vector<16x32xf32> to vector<16x32xbf16>
    %cst_6 = arith.constant dense<0.000000e+00> : vector<16x16xf32>
    %16 = tpu.matmul %11, %13, %cst_6 {dimension_numbers = #tpu.dot_dimension_numbers<[1], [1], [0], [0], [0, 0, 1, 0], [], []>} : vector<16x32xbf16>, vector<16x32xbf16>, vector<16x16xf32> -> vector<16x16xf32>
    %cst_7 = arith.constant 0.176776692 : f32
    %17 = vector.broadcast %cst_7 : f32 to vector<16x16xf32>
    %18 = arith.mulf %16, %17 : vector<16x16xf32>
    %cst_8 = arith.constant dense<0xFF800000> : vector<16xf32>
    %19 = vector.multi_reduction <maximumf>, %18, %cst_8 [1] : vector<16x16xf32> to vector<16xf32>
    %20 = vector.shape_cast %19 : vector<16xf32> to vector<16x1xf32>
    %21 = vector.broadcast %20 : vector<16x1xf32> to vector<16x16xf32>
    %22 = arith.subf %18, %21 : vector<16x16xf32>
    %23 = math.exp %22 : vector<16x16xf32>
    %cst_9 = arith.constant dense<0.000000e+00> : vector<16xf32>
    %24 = vector.multi_reduction <add>, %23, %cst_9 [1] : vector<16x16xf32> to vector<16xf32>
    %25 = vector.shape_cast %24 : vector<16xf32> to vector<16x1xf32>
    %26 = vector.broadcast %25 : vector<16x1xf32> to vector<16x16xf32>
    %27 = arith.divf %23, %26 : vector<16x16xf32>
    %28 = arith.truncf %27 : vector<16x16xf32> to vector<16x16xbf16>
    %cst_10 = arith.constant dense<0.000000e+00> : vector<16x32xf32>
    %29 = tpu.matmul %28, %15, %cst_10 {dimension_numbers = #tpu.dot_dimension_numbers<[1], [0], [0], [1], [0, 0, 1, 1], [], []>} : vector<16x16xbf16>, vector<16x32xbf16>, vector<16x32xf32> -> vector<16x32xf32>
    %30 = vector.extract_strided_slice %7 {offsets = [0, 32], sizes = [16, 32], strides = [1, 1]} : vector<16x128xf32> to vector<16x32xf32>
    %31 = arith.truncf %30 : vector<16x32xf32> to vector<16x32xbf16>
    %32 = vector.extract_strided_slice %8 {offsets = [0, 32], sizes = [16, 32], strides = [1, 1]} : vector<16x128xf32> to vector<16x32xf32>
    %33 = arith.truncf %32 : vector<16x32xf32> to vector<16x32xbf16>
    %34 = vector.extract_strided_slice %9 {offsets = [0, 32], sizes = [16, 32], strides = [1, 1]} : vector<16x128xf32> to vector<16x32xf32>
    %35 = arith.truncf %34 : vector<16x32xf32> to vector<16x32xbf16>
    %cst_11 = arith.constant dense<0.000000e+00> : vector<16x16xf32>
    %36 = tpu.matmul %31, %33, %cst_11 {dimension_numbers = #tpu.dot_dimension_numbers<[1], [1], [0], [0], [0, 0, 1, 0], [], []>} : vector<16x32xbf16>, vector<16x32xbf16>, vector<16x16xf32> -> vector<16x16xf32>
    %cst_12 = arith.constant 0.176776692 : f32
    %37 = vector.broadcast %cst_12 : f32 to vector<16x16xf32>
    %38 = arith.mulf %36, %37 : vector<16x16xf32>
    %cst_13 = arith.constant dense<0xFF800000> : vector<16xf32>
    %39 = vector.multi_reduction <maximumf>, %38, %cst_13 [1] : vector<16x16xf32> to vector<16xf32>
    %40 = vector.shape_cast %39 : vector<16xf32> to vector<16x1xf32>
    %41 = vector.broadcast %40 : vector<16x1xf32> to vector<16x16xf32>
    %42 = arith.subf %38, %41 : vector<16x16xf32>
    %43 = math.exp %42 : vector<16x16xf32>
    %cst_14 = arith.constant dense<0.000000e+00> : vector<16xf32>
    %44 = vector.multi_reduction <add>, %43, %cst_14 [1] : vector<16x16xf32> to vector<16xf32>
    %45 = vector.shape_cast %44 : vector<16xf32> to vector<16x1xf32>
    %46 = vector.broadcast %45 : vector<16x1xf32> to vector<16x16xf32>
    %47 = arith.divf %43, %46 : vector<16x16xf32>
    %48 = arith.truncf %47 : vector<16x16xf32> to vector<16x16xbf16>
    %cst_15 = arith.constant dense<0.000000e+00> : vector<16x32xf32>
    %49 = tpu.matmul %48, %35, %cst_15 {dimension_numbers = #tpu.dot_dimension_numbers<[1], [0], [0], [1], [0, 0, 1, 1], [], []>} : vector<16x16xbf16>, vector<16x32xbf16>, vector<16x32xf32> -> vector<16x32xf32>
    %50 = vector.extract_strided_slice %7 {offsets = [0, 64], sizes = [16, 32], strides = [1, 1]} : vector<16x128xf32> to vector<16x32xf32>
    %51 = arith.truncf %50 : vector<16x32xf32> to vector<16x32xbf16>
    %52 = vector.extract_strided_slice %8 {offsets = [0, 64], sizes = [16, 32], strides = [1, 1]} : vector<16x128xf32> to vector<16x32xf32>
    %53 = arith.truncf %52 : vector<16x32xf32> to vector<16x32xbf16>
    %54 = vector.extract_strided_slice %9 {offsets = [0, 64], sizes = [16, 32], strides = [1, 1]} : vector<16x128xf32> to vector<16x32xf32>
    %55 = arith.truncf %54 : vector<16x32xf32> to vector<16x32xbf16>
    %cst_16 = arith.constant dense<0.000000e+00> : vector<16x16xf32>
    %56 = tpu.matmul %51, %53, %cst_16 {dimension_numbers = #tpu.dot_dimension_numbers<[1], [1], [0], [0], [0, 0, 1, 0], [], []>} : vector<16x32xbf16>, vector<16x32xbf16>, vector<16x16xf32> -> vector<16x16xf32>
    %cst_17 = arith.constant 0.176776692 : f32
    %57 = vector.broadcast %cst_17 : f32 to vector<16x16xf32>
    %58 = arith.mulf %56, %57 : vector<16x16xf32>
    %cst_18 = arith.constant dense<0xFF800000> : vector<16xf32>
    %59 = vector.multi_reduction <maximumf>, %58, %cst_18 [1] : vector<16x16xf32> to vector<16xf32>
    %60 = vector.shape_cast %59 : vector<16xf32> to vector<16x1xf32>
    %61 = vector.broadcast %60 : vector<16x1xf32> to vector<16x16xf32>
    %62 = arith.subf %58, %61 : vector<16x16xf32>
    %63 = math.exp %62 : vector<16x16xf32>
    %cst_19 = arith.constant dense<0.000000e+00> : vector<16xf32>
    %64 = vector.multi_reduction <add>, %63, %cst_19 [1] : vector<16x16xf32> to vector<16xf32>
    %65 = vector.shape_cast %64 : vector<16xf32> to vector<16x1xf32>
    %66 = vector.broadcast %65 : vector<16x1xf32> to vector<16x16xf32>
    %67 = arith.divf %63, %66 : vector<16x16xf32>
    %68 = arith.truncf %67 : vector<16x16xf32> to vector<16x16xbf16>
    %cst_20 = arith.constant dense<0.000000e+00> : vector<16x32xf32>
    %69 = tpu.matmul %68, %55, %cst_20 {dimension_numbers = #tpu.dot_dimension_numbers<[1], [0], [0], [1], [0, 0, 1, 1], [], []>} : vector<16x16xbf16>, vector<16x32xbf16>, vector<16x32xf32> -> vector<16x32xf32>
    %70 = vector.extract_strided_slice %7 {offsets = [0, 96], sizes = [16, 32], strides = [1, 1]} : vector<16x128xf32> to vector<16x32xf32>
    %71 = arith.truncf %70 : vector<16x32xf32> to vector<16x32xbf16>
    %72 = vector.extract_strided_slice %8 {offsets = [0, 96], sizes = [16, 32], strides = [1, 1]} : vector<16x128xf32> to vector<16x32xf32>
    %73 = arith.truncf %72 : vector<16x32xf32> to vector<16x32xbf16>
    %74 = vector.extract_strided_slice %9 {offsets = [0, 96], sizes = [16, 32], strides = [1, 1]} : vector<16x128xf32> to vector<16x32xf32>
    %75 = arith.truncf %74 : vector<16x32xf32> to vector<16x32xbf16>
    %cst_21 = arith.constant dense<0.000000e+00> : vector<16x16xf32>
    %76 = tpu.matmul %71, %73, %cst_21 {dimension_numbers = #tpu.dot_dimension_numbers<[1], [1], [0], [0], [0, 0, 1, 0], [], []>} : vector<16x32xbf16>, vector<16x32xbf16>, vector<16x16xf32> -> vector<16x16xf32>
    %cst_22 = arith.constant 0.176776692 : f32
    %77 = vector.broadcast %cst_22 : f32 to vector<16x16xf32>
    %78 = arith.mulf %76, %77 : vector<16x16xf32>
    %cst_23 = arith.constant dense<0xFF800000> : vector<16xf32>
    %79 = vector.multi_reduction <maximumf>, %78, %cst_23 [1] : vector<16x16xf32> to vector<16xf32>
    %80 = vector.shape_cast %79 : vector<16xf32> to vector<16x1xf32>
    %81 = vector.broadcast %80 : vector<16x1xf32> to vector<16x16xf32>
    %82 = arith.subf %78, %81 : vector<16x16xf32>
    %83 = math.exp %82 : vector<16x16xf32>
    %cst_24 = arith.constant dense<0.000000e+00> : vector<16xf32>
    %84 = vector.multi_reduction <add>, %83, %cst_24 [1] : vector<16x16xf32> to vector<16xf32>
    %85 = vector.shape_cast %84 : vector<16xf32> to vector<16x1xf32>
    %86 = vector.broadcast %85 : vector<16x1xf32> to vector<16x16xf32>
    %87 = arith.divf %83, %86 : vector<16x16xf32>
    %88 = arith.truncf %87 : vector<16x16xf32> to vector<16x16xbf16>
    %cst_25 = arith.constant dense<0.000000e+00> : vector<16x32xf32>
    %89 = tpu.matmul %88, %75, %cst_25 {dimension_numbers = #tpu.dot_dimension_numbers<[1], [0], [0], [1], [0, 0, 1, 1], [], []>} : vector<16x16xbf16>, vector<16x32xbf16>, vector<16x32xf32> -> vector<16x32xf32>
    %90 = tpu.concatenate %29, %49, %69, %89 in 1 : vector<16x32xf32>, vector<16x32xf32>, vector<16x32xf32>, vector<16x32xf32> -> vector<16x128xf32>
    %91 = arith.truncf %90 : vector<16x128xf32> to vector<16x128xbf16>
    %c0_26 = arith.constant 0 : index
    %c0_27 = arith.constant 0 : index
    %92 = vector.load %arg4[%c0_26, %c0_27] : memref<128x128xbf16, #tpu.memory_space<vmem>>, vector<128x128xbf16>
    %cst_28 = arith.constant dense<0.000000e+00> : vector<16x128xf32>
    %93 = tpu.matmul %91, %92, %cst_28 {dimension_numbers = #tpu.dot_dimension_numbers<[1], [0], [0], [1], [0, 0, 1, 1], [], []>} : vector<16x128xbf16>, vector<128x128xbf16>, vector<16x128xf32> -> vector<16x128xf32>
    %c0_29 = arith.constant 0 : index
    %c0_30 = arith.constant 0 : index
    %94 = vector.load %arg5[%c0_29, %c0_30] : memref<1x128xf32, #tpu.memory_space<vmem>>, vector<1x128xf32>
    %95 = vector.broadcast %94 : vector<1x128xf32> to vector<16x128xf32>
    %96 = arith.addf %93, %95 : vector<16x128xf32>
    %97 = arith.extf %1 : vector<16x128xbf16> to vector<16x128xf32>
    %98 = arith.addf %96, %97 : vector<16x128xf32>
    %cst_31 = arith.constant dense<0.000000e+00> : vector<16xf32>
    %99 = vector.multi_reduction <add>, %98, %cst_31 [1] : vector<16x128xf32> to vector<16xf32>
    %100 = vector.shape_cast %99 : vector<16xf32> to vector<16x1xf32>
    %cst_32 = arith.constant 1.280000e+02 : f32
    %101 = vector.broadcast %cst_32 : f32 to vector<16x1xf32>
    %102 = arith.divf %100, %101 : vector<16x1xf32>
    %103 = vector.broadcast %102 : vector<16x1xf32> to vector<16x128xf32>
    %104 = arith.subf %98, %103 : vector<16x128xf32>
    %105 = arith.mulf %104, %104 : vector<16x128xf32>
    %cst_33 = arith.constant dense<0.000000e+00> : vector<16xf32>
    %106 = vector.multi_reduction <add>, %105, %cst_33 [1] : vector<16x128xf32> to vector<16xf32>
    %107 = vector.shape_cast %106 : vector<16xf32> to vector<16x1xf32>
    %cst_34 = arith.constant 1.280000e+02 : f32
    %108 = vector.broadcast %cst_34 : f32 to vector<16x1xf32>
    %109 = arith.divf %107, %108 : vector<16x1xf32>
    %110 = vector.broadcast %102 : vector<16x1xf32> to vector<16x128xf32>
    %111 = arith.subf %98, %110 : vector<16x128xf32>
    %cst_35 = arith.constant 9.99999974E-6 : f32
    %112 = vector.broadcast %cst_35 : f32 to vector<16x1xf32>
    %113 = arith.addf %109, %112 : vector<16x1xf32>
    %114 = math.rsqrt %113 : vector<16x1xf32>
    %115 = vector.broadcast %114 : vector<16x1xf32> to vector<16x128xf32>
    %116 = arith.mulf %111, %115 : vector<16x128xf32>
    %c0_36 = arith.constant 0 : index
    %c0_37 = arith.constant 0 : index
    %117 = vector.load %arg6[%c0_36, %c0_37] : memref<1x128xf32, #tpu.memory_space<vmem>>, vector<1x128xf32>
    %118 = vector.broadcast %117 : vector<1x128xf32> to vector<16x128xf32>
    %119 = arith.mulf %116, %118 : vector<16x128xf32>
    %c0_38 = arith.constant 0 : index
    %c0_39 = arith.constant 0 : index
    %120 = vector.load %arg7[%c0_38, %c0_39] : memref<1x128xf32, #tpu.memory_space<vmem>>, vector<1x128xf32>
    %121 = vector.broadcast %120 : vector<1x128xf32> to vector<16x128xf32>
    %122 = arith.addf %119, %121 : vector<16x128xf32>
    %123 = arith.truncf %122 : vector<16x128xf32> to vector<16x128xbf16>
    %c0_40 = arith.constant 0 : index
    %c0_41 = arith.constant 0 : index
    %c0_42 = arith.constant 0 : index
    %124 = vector.load %arg8[%c0_40, %c0_41, %c0_42] : memref<1x16x128xbf16, #tpu.memory_space<vmem>>, vector<1x16x128xbf16>
    %125 = vector.shape_cast %124 : vector<1x16x128xbf16> to vector<16x128xbf16>
    %126 = vector.shape_cast %123 : vector<16x128xbf16> to vector<1x16x128xbf16>
    tpu.vector_store %arg8[%c0_40, %c0_41, %c0_42], %126 {strides = array<i32>} : memref<1x16x128xbf16, #tpu.memory_space<vmem>>, vector<1x16x128xbf16>,
    return
  }
  func.func @transform_0(%arg0: i32) -> (i32, i32, i32) {
    %c0_i32 = arith.constant 0 : i32
    %c0_i32_0 = arith.constant 0 : i32
    %c0_i32_1 = arith.constant 0 : i32
    return %arg0, %c0_i32, %c0_i32_0 : i32, i32, i32
  }
  func.func @transform_1(%arg0: i32) -> (i32, i32) {
    %c0_i32 = arith.constant 0 : i32
    %c0_i32_0 = arith.constant 0 : i32
    %c0_i32_1 = arith.constant 0 : i32
    return %c0_i32, %c0_i32_0 : i32, i32
  }
  func.func @transform_2(%arg0: i32) -> (i32, i32) {
    %c0_i32 = arith.constant 0 : i32
    %c0_i32_0 = arith.constant 0 : i32
    %c0_i32_1 = arith.constant 0 : i32
    return %c0_i32, %c0_i32_0 : i32, i32
  }
  func.func @transform_3(%arg0: i32) -> (i32, i32) {
    %c0_i32 = arith.constant 0 : i32
    %c0_i32_0 = arith.constant 0 : i32
    %c0_i32_1 = arith.constant 0 : i32
    return %c0_i32, %c0_i32_0 : i32, i32
  }
  func.func @transform_4(%arg0: i32) -> (i32, i32) {
    %c0_i32 = arith.constant 0 : i32
    %c0_i32_0 = arith.constant 0 : i32
    %c0_i32_1 = arith.constant 0 : i32
    return %c0_i32, %c0_i32_0 : i32, i32
  }
  func.func @transform_5(%arg0: i32) -> (i32, i32) {
    %c0_i32 = arith.constant 0 : i32
    %c0_i32_0 = arith.constant 0 : i32
    %c0_i32_1 = arith.constant 0 : i32
    return %c0_i32, %c0_i32_0 : i32, i32
  }
  func.func @transform_6(%arg0: i32) -> (i32, i32) {
    %c0_i32 = arith.constant 0 : i32
    %c0_i32_0 = arith.constant 0 : i32
    %c0_i32_1 = arith.constant 0 : i32
    return %c0_i32, %c0_i32_0 : i32, i32
  }
  func.func @transform_7(%arg0: i32) -> (i32, i32, i32) {
    %c0_i32 = arith.constant 0 : i32
    %c0_i32_0 = arith.constant 0 : i32
    %c0_i32_1 = arith.constant 0 : i32
    return %arg0, %c0_i32, %c0_i32_0 : i32, i32, i32
  }
}

module attributes {stable_mosaic.version = 11 : i64} {
  func.func @_self_attn_ln_kernel(%arg0: i32, %arg1: memref<1x8x128xbf16, #tpu.memory_space<vmem>>, %arg2: memref<128x384xbf16, #tpu.memory_space<vmem>>, %arg3: memref<1x384xf32, #tpu.memory_space<vmem>>, %arg4: memref<128x128xbf16, #tpu.memory_space<vmem>>, %arg5: memref<1x128xf32, #tpu.memory_space<vmem>>, %arg6: memref<1x128xf32, #tpu.memory_space<vmem>>, %arg7: memref<1x128xf32, #tpu.memory_space<vmem>>, %arg8: memref<1x8x128xbf16, #tpu.memory_space<vmem>>) attributes {dimension_semantics = [#tpu.dimension_semantics<parallel>], iteration_bounds = array<i64: 2>, scalar_prefetch = 0 : i64, scratch_operands = 0 : i64, tpu.core_type = #tpu.core_type<tc>, window_params = [{transform_indices = @transform_0, window_bounds = array<i64: 1, 8, 128>}, {pipeline_mode = #tpu.pipeline_mode<synchronous>, transform_indices = @transform_1, window_bounds = array<i64: 128, 384>}, {pipeline_mode = #tpu.pipeline_mode<synchronous>, transform_indices = @transform_2, window_bounds = array<i64: 1, 384>}, {pipeline_mode = #tpu.pipeline_mode<synchronous>, transform_indices = @transform_3, window_bounds = array<i64: 128, 128>}, {pipeline_mode = #tpu.pipeline_mode<synchronous>, transform_indices = @transform_4, window_bounds = array<i64: 1, 128>}, {pipeline_mode = #tpu.pipeline_mode<synchronous>, transform_indices = @transform_5, window_bounds = array<i64: 1, 128>}, {pipeline_mode = #tpu.pipeline_mode<synchronous>, transform_indices = @transform_6, window_bounds = array<i64: 1, 128>}, {transform_indices = @transform_7, window_bounds = array<i64: 1, 8, 128>}]} {
    %c0 = arith.constant 0 : index
    %c0_0 = arith.constant 0 : index
    %c0_1 = arith.constant 0 : index
    %0 = vector.load %arg1[%c0, %c0_0, %c0_1] : memref<1x8x128xbf16, #tpu.memory_space<vmem>>, vector<1x8x128xbf16>
    %1 = vector.shape_cast %0 : vector<1x8x128xbf16> to vector<8x128xbf16>
    %c0_2 = arith.constant 0 : index
    %c0_3 = arith.constant 0 : index
    %2 = vector.load %arg2[%c0_2, %c0_3] : memref<128x384xbf16, #tpu.memory_space<vmem>>, vector<128x384xbf16>
    %cst = arith.constant dense<0.000000e+00> : vector<8x384xf32>
    %3 = tpu.matmul %1, %2, %cst {dimension_numbers = #tpu.dot_dimension_numbers<[1], [0], [0], [1], [0, 0, 1, 1], [], []>} : vector<8x128xbf16>, vector<128x384xbf16>, vector<8x384xf32> -> vector<8x384xf32>
    %c0_4 = arith.constant 0 : index
    %c0_5 = arith.constant 0 : index
    %4 = vector.load %arg3[%c0_4, %c0_5] : memref<1x384xf32, #tpu.memory_space<vmem>>, vector<1x384xf32>
    %5 = vector.broadcast %4 : vector<1x384xf32> to vector<8x384xf32>
    %6 = arith.addf %3, %5 : vector<8x384xf32>
    %7 = vector.extract_strided_slice %6 {offsets = [0, 0], sizes = [8, 128], strides = [1, 1]} : vector<8x384xf32> to vector<8x128xf32>
    %8 = vector.extract_strided_slice %6 {offsets = [0, 128], sizes = [8, 128], strides = [1, 1]} : vector<8x384xf32> to vector<8x128xf32>
    %9 = vector.extract_strided_slice %6 {offsets = [0, 256], sizes = [8, 128], strides = [1, 1]} : vector<8x384xf32> to vector<8x128xf32>
    %10 = vector.extract_strided_slice %7 {offsets = [0, 0], sizes = [8, 32], strides = [1, 1]} : vector<8x128xf32> to vector<8x32xf32>
    %11 = arith.truncf %10 : vector<8x32xf32> to vector<8x32xbf16>
    %12 = vector.extract_strided_slice %8 {offsets = [0, 0], sizes = [8, 32], strides = [1, 1]} : vector<8x128xf32> to vector<8x32xf32>
    %13 = arith.truncf %12 : vector<8x32xf32> to vector<8x32xbf16>
    %14 = vector.extract_strided_slice %9 {offsets = [0, 0], sizes = [8, 32], strides = [1, 1]} : vector<8x128xf32> to vector<8x32xf32>
    %15 = arith.truncf %14 : vector<8x32xf32> to vector<8x32xbf16>
    %cst_6 = arith.constant dense<0.000000e+00> : vector<8x8xf32>
    %16 = tpu.matmul %11, %13, %cst_6 {dimension_numbers = #tpu.dot_dimension_numbers<[1], [1], [0], [0], [0, 0, 1, 0], [], []>} : vector<8x32xbf16>, vector<8x32xbf16>, vector<8x8xf32> -> vector<8x8xf32>
    %cst_7 = arith.constant 0.176776692 : f32
    %17 = vector.broadcast %cst_7 : f32 to vector<8x8xf32>
    %18 = arith.mulf %16, %17 : vector<8x8xf32>
    %cst_8 = arith.constant dense<0xFF800000> : vector<8xf32>
    %19 = vector.multi_reduction <maximumf>, %18, %cst_8 [1] : vector<8x8xf32> to vector<8xf32>
    %20 = vector.shape_cast %19 : vector<8xf32> to vector<8x1xf32>
    %21 = vector.broadcast %20 : vector<8x1xf32> to vector<8x8xf32>
    %22 = arith.subf %18, %21 : vector<8x8xf32>
    %23 = math.exp %22 : vector<8x8xf32>
    %cst_9 = arith.constant dense<0.000000e+00> : vector<8xf32>
    %24 = vector.multi_reduction <add>, %23, %cst_9 [1] : vector<8x8xf32> to vector<8xf32>
    %25 = vector.shape_cast %24 : vector<8xf32> to vector<8x1xf32>
    %26 = vector.broadcast %25 : vector<8x1xf32> to vector<8x8xf32>
    %27 = arith.divf %23, %26 : vector<8x8xf32>
    %28 = arith.truncf %27 : vector<8x8xf32> to vector<8x8xbf16>
    %cst_10 = arith.constant dense<0.000000e+00> : vector<8x32xf32>
    %29 = tpu.matmul %28, %15, %cst_10 {dimension_numbers = #tpu.dot_dimension_numbers<[1], [0], [0], [1], [0, 0, 1, 1], [], []>} : vector<8x8xbf16>, vector<8x32xbf16>, vector<8x32xf32> -> vector<8x32xf32>
    %30 = vector.extract_strided_slice %7 {offsets = [0, 32], sizes = [8, 32], strides = [1, 1]} : vector<8x128xf32> to vector<8x32xf32>
    %31 = arith.truncf %30 : vector<8x32xf32> to vector<8x32xbf16>
    %32 = vector.extract_strided_slice %8 {offsets = [0, 32], sizes = [8, 32], strides = [1, 1]} : vector<8x128xf32> to vector<8x32xf32>
    %33 = arith.truncf %32 : vector<8x32xf32> to vector<8x32xbf16>
    %34 = vector.extract_strided_slice %9 {offsets = [0, 32], sizes = [8, 32], strides = [1, 1]} : vector<8x128xf32> to vector<8x32xf32>
    %35 = arith.truncf %34 : vector<8x32xf32> to vector<8x32xbf16>
    %cst_11 = arith.constant dense<0.000000e+00> : vector<8x8xf32>
    %36 = tpu.matmul %31, %33, %cst_11 {dimension_numbers = #tpu.dot_dimension_numbers<[1], [1], [0], [0], [0, 0, 1, 0], [], []>} : vector<8x32xbf16>, vector<8x32xbf16>, vector<8x8xf32> -> vector<8x8xf32>
    %cst_12 = arith.constant 0.176776692 : f32
    %37 = vector.broadcast %cst_12 : f32 to vector<8x8xf32>
    %38 = arith.mulf %36, %37 : vector<8x8xf32>
    %cst_13 = arith.constant dense<0xFF800000> : vector<8xf32>
    %39 = vector.multi_reduction <maximumf>, %38, %cst_13 [1] : vector<8x8xf32> to vector<8xf32>
    %40 = vector.shape_cast %39 : vector<8xf32> to vector<8x1xf32>
    %41 = vector.broadcast %40 : vector<8x1xf32> to vector<8x8xf32>
    %42 = arith.subf %38, %41 : vector<8x8xf32>
    %43 = math.exp %42 : vector<8x8xf32>
    %cst_14 = arith.constant dense<0.000000e+00> : vector<8xf32>
    %44 = vector.multi_reduction <add>, %43, %cst_14 [1] : vector<8x8xf32> to vector<8xf32>
    %45 = vector.shape_cast %44 : vector<8xf32> to vector<8x1xf32>
    %46 = vector.broadcast %45 : vector<8x1xf32> to vector<8x8xf32>
    %47 = arith.divf %43, %46 : vector<8x8xf32>
    %48 = arith.truncf %47 : vector<8x8xf32> to vector<8x8xbf16>
    %cst_15 = arith.constant dense<0.000000e+00> : vector<8x32xf32>
    %49 = tpu.matmul %48, %35, %cst_15 {dimension_numbers = #tpu.dot_dimension_numbers<[1], [0], [0], [1], [0, 0, 1, 1], [], []>} : vector<8x8xbf16>, vector<8x32xbf16>, vector<8x32xf32> -> vector<8x32xf32>
    %50 = vector.extract_strided_slice %7 {offsets = [0, 64], sizes = [8, 32], strides = [1, 1]} : vector<8x128xf32> to vector<8x32xf32>
    %51 = arith.truncf %50 : vector<8x32xf32> to vector<8x32xbf16>
    %52 = vector.extract_strided_slice %8 {offsets = [0, 64], sizes = [8, 32], strides = [1, 1]} : vector<8x128xf32> to vector<8x32xf32>
    %53 = arith.truncf %52 : vector<8x32xf32> to vector<8x32xbf16>
    %54 = vector.extract_strided_slice %9 {offsets = [0, 64], sizes = [8, 32], strides = [1, 1]} : vector<8x128xf32> to vector<8x32xf32>
    %55 = arith.truncf %54 : vector<8x32xf32> to vector<8x32xbf16>
    %cst_16 = arith.constant dense<0.000000e+00> : vector<8x8xf32>
    %56 = tpu.matmul %51, %53, %cst_16 {dimension_numbers = #tpu.dot_dimension_numbers<[1], [1], [0], [0], [0, 0, 1, 0], [], []>} : vector<8x32xbf16>, vector<8x32xbf16>, vector<8x8xf32> -> vector<8x8xf32>
    %cst_17 = arith.constant 0.176776692 : f32
    %57 = vector.broadcast %cst_17 : f32 to vector<8x8xf32>
    %58 = arith.mulf %56, %57 : vector<8x8xf32>
    %cst_18 = arith.constant dense<0xFF800000> : vector<8xf32>
    %59 = vector.multi_reduction <maximumf>, %58, %cst_18 [1] : vector<8x8xf32> to vector<8xf32>
    %60 = vector.shape_cast %59 : vector<8xf32> to vector<8x1xf32>
    %61 = vector.broadcast %60 : vector<8x1xf32> to vector<8x8xf32>
    %62 = arith.subf %58, %61 : vector<8x8xf32>
    %63 = math.exp %62 : vector<8x8xf32>
    %cst_19 = arith.constant dense<0.000000e+00> : vector<8xf32>
    %64 = vector.multi_reduction <add>, %63, %cst_19 [1] : vector<8x8xf32> to vector<8xf32>
    %65 = vector.shape_cast %64 : vector<8xf32> to vector<8x1xf32>
    %66 = vector.broadcast %65 : vector<8x1xf32> to vector<8x8xf32>
    %67 = arith.divf %63, %66 : vector<8x8xf32>
    %68 = arith.truncf %67 : vector<8x8xf32> to vector<8x8xbf16>
    %cst_20 = arith.constant dense<0.000000e+00> : vector<8x32xf32>
    %69 = tpu.matmul %68, %55, %cst_20 {dimension_numbers = #tpu.dot_dimension_numbers<[1], [0], [0], [1], [0, 0, 1, 1], [], []>} : vector<8x8xbf16>, vector<8x32xbf16>, vector<8x32xf32> -> vector<8x32xf32>
    %70 = vector.extract_strided_slice %7 {offsets = [0, 96], sizes = [8, 32], strides = [1, 1]} : vector<8x128xf32> to vector<8x32xf32>
    %71 = arith.truncf %70 : vector<8x32xf32> to vector<8x32xbf16>
    %72 = vector.extract_strided_slice %8 {offsets = [0, 96], sizes = [8, 32], strides = [1, 1]} : vector<8x128xf32> to vector<8x32xf32>
    %73 = arith.truncf %72 : vector<8x32xf32> to vector<8x32xbf16>
    %74 = vector.extract_strided_slice %9 {offsets = [0, 96], sizes = [8, 32], strides = [1, 1]} : vector<8x128xf32> to vector<8x32xf32>
    %75 = arith.truncf %74 : vector<8x32xf32> to vector<8x32xbf16>
    %cst_21 = arith.constant dense<0.000000e+00> : vector<8x8xf32>
    %76 = tpu.matmul %71, %73, %cst_21 {dimension_numbers = #tpu.dot_dimension_numbers<[1], [1], [0], [0], [0, 0, 1, 0], [], []>} : vector<8x32xbf16>, vector<8x32xbf16>, vector<8x8xf32> -> vector<8x8xf32>
    %cst_22 = arith.constant 0.176776692 : f32
    %77 = vector.broadcast %cst_22 : f32 to vector<8x8xf32>
    %78 = arith.mulf %76, %77 : vector<8x8xf32>
    %cst_23 = arith.constant dense<0xFF800000> : vector<8xf32>
    %79 = vector.multi_reduction <maximumf>, %78, %cst_23 [1] : vector<8x8xf32> to vector<8xf32>
    %80 = vector.shape_cast %79 : vector<8xf32> to vector<8x1xf32>
    %81 = vector.broadcast %80 : vector<8x1xf32> to vector<8x8xf32>
    %82 = arith.subf %78, %81 : vector<8x8xf32>
    %83 = math.exp %82 : vector<8x8xf32>
    %cst_24 = arith.constant dense<0.000000e+00> : vector<8xf32>
    %84 = vector.multi_reduction <add>, %83, %cst_24 [1] : vector<8x8xf32> to vector<8xf32>
    %85 = vector.shape_cast %84 : vector<8xf32> to vector<8x1xf32>
    %86 = vector.broadcast %85 : vector<8x1xf32> to vector<8x8xf32>
    %87 = arith.divf %83, %86 : vector<8x8xf32>
    %88 = arith.truncf %87 : vector<8x8xf32> to vector<8x8xbf16>
    %cst_25 = arith.constant dense<0.000000e+00> : vector<8x32xf32>
    %89 = tpu.matmul %88, %75, %cst_25 {dimension_numbers = #tpu.dot_dimension_numbers<[1], [0], [0], [1], [0, 0, 1, 1], [], []>} : vector<8x8xbf16>, vector<8x32xbf16>, vector<8x32xf32> -> vector<8x32xf32>
    %90 = tpu.concatenate %29, %49, %69, %89 in 1 : vector<8x32xf32>, vector<8x32xf32>, vector<8x32xf32>, vector<8x32xf32> -> vector<8x128xf32>
    %91 = arith.truncf %90 : vector<8x128xf32> to vector<8x128xbf16>
    %c0_26 = arith.constant 0 : index
    %c0_27 = arith.constant 0 : index
    %92 = vector.load %arg4[%c0_26, %c0_27] : memref<128x128xbf16, #tpu.memory_space<vmem>>, vector<128x128xbf16>
    %cst_28 = arith.constant dense<0.000000e+00> : vector<8x128xf32>
    %93 = tpu.matmul %91, %92, %cst_28 {dimension_numbers = #tpu.dot_dimension_numbers<[1], [0], [0], [1], [0, 0, 1, 1], [], []>} : vector<8x128xbf16>, vector<128x128xbf16>, vector<8x128xf32> -> vector<8x128xf32>
    %c0_29 = arith.constant 0 : index
    %c0_30 = arith.constant 0 : index
    %94 = vector.load %arg5[%c0_29, %c0_30] : memref<1x128xf32, #tpu.memory_space<vmem>>, vector<1x128xf32>
    %95 = vector.broadcast %94 : vector<1x128xf32> to vector<8x128xf32>
    %96 = arith.addf %93, %95 : vector<8x128xf32>
    %97 = arith.extf %1 : vector<8x128xbf16> to vector<8x128xf32>
    %98 = arith.addf %96, %97 : vector<8x128xf32>
    %cst_31 = arith.constant dense<0.000000e+00> : vector<8xf32>
    %99 = vector.multi_reduction <add>, %98, %cst_31 [1] : vector<8x128xf32> to vector<8xf32>
    %100 = vector.shape_cast %99 : vector<8xf32> to vector<8x1xf32>
    %cst_32 = arith.constant 1.280000e+02 : f32
    %101 = vector.broadcast %cst_32 : f32 to vector<8x1xf32>
    %102 = arith.divf %100, %101 : vector<8x1xf32>
    %103 = vector.broadcast %102 : vector<8x1xf32> to vector<8x128xf32>
    %104 = arith.subf %98, %103 : vector<8x128xf32>
    %105 = arith.mulf %104, %104 : vector<8x128xf32>
    %cst_33 = arith.constant dense<0.000000e+00> : vector<8xf32>
    %106 = vector.multi_reduction <add>, %105, %cst_33 [1] : vector<8x128xf32> to vector<8xf32>
    %107 = vector.shape_cast %106 : vector<8xf32> to vector<8x1xf32>
    %cst_34 = arith.constant 1.280000e+02 : f32
    %108 = vector.broadcast %cst_34 : f32 to vector<8x1xf32>
    %109 = arith.divf %107, %108 : vector<8x1xf32>
    %110 = vector.broadcast %102 : vector<8x1xf32> to vector<8x128xf32>
    %111 = arith.subf %98, %110 : vector<8x128xf32>
    %cst_35 = arith.constant 9.99999974E-6 : f32
    %112 = vector.broadcast %cst_35 : f32 to vector<8x1xf32>
    %113 = arith.addf %109, %112 : vector<8x1xf32>
    %114 = math.rsqrt %113 : vector<8x1xf32>
    %115 = vector.broadcast %114 : vector<8x1xf32> to vector<8x128xf32>
    %116 = arith.mulf %111, %115 : vector<8x128xf32>
    %c0_36 = arith.constant 0 : index
    %c0_37 = arith.constant 0 : index
    %117 = vector.load %arg6[%c0_36, %c0_37] : memref<1x128xf32, #tpu.memory_space<vmem>>, vector<1x128xf32>
    %118 = vector.broadcast %117 : vector<1x128xf32> to vector<8x128xf32>
    %119 = arith.mulf %116, %118 : vector<8x128xf32>
    %c0_38 = arith.constant 0 : index
    %c0_39 = arith.constant 0 : index
    %120 = vector.load %arg7[%c0_38, %c0_39] : memref<1x128xf32, #tpu.memory_space<vmem>>, vector<1x128xf32>
    %121 = vector.broadcast %120 : vector<1x128xf32> to vector<8x128xf32>
    %122 = arith.addf %119, %121 : vector<8x128xf32>
    %123 = arith.truncf %122 : vector<8x128xf32> to vector<8x128xbf16>
    %c0_40 = arith.constant 0 : index
    %c0_41 = arith.constant 0 : index
    %c0_42 = arith.constant 0 : index
    %124 = vector.load %arg8[%c0_40, %c0_41, %c0_42] : memref<1x8x128xbf16, #tpu.memory_space<vmem>>, vector<1x8x128xbf16>
    %125 = vector.shape_cast %124 : vector<1x8x128xbf16> to vector<8x128xbf16>
    %126 = vector.shape_cast %123 : vector<8x128xbf16> to vector<1x8x128xbf16>
    tpu.vector_store %arg8[%c0_40, %c0_41, %c0_42], %126 {strides = array<i32>} : memref<1x8x128xbf16, #tpu.memory_space<vmem>>, vector<1x8x128xbf16>,
    return
  }
  func.func @transform_0(%arg0: i32) -> (i32, i32, i32) {
    %c0_i32 = arith.constant 0 : i32
    %c0_i32_0 = arith.constant 0 : i32
    %c0_i32_1 = arith.constant 0 : i32
    return %arg0, %c0_i32, %c0_i32_0 : i32, i32, i32
  }
  func.func @transform_1(%arg0: i32) -> (i32, i32) {
    %c0_i32 = arith.constant 0 : i32
    %c0_i32_0 = arith.constant 0 : i32
    %c0_i32_1 = arith.constant 0 : i32
    return %c0_i32, %c0_i32_0 : i32, i32
  }
  func.func @transform_2(%arg0: i32) -> (i32, i32) {
    %c0_i32 = arith.constant 0 : i32
    %c0_i32_0 = arith.constant 0 : i32
    %c0_i32_1 = arith.constant 0 : i32
    return %c0_i32, %c0_i32_0 : i32, i32
  }
  func.func @transform_3(%arg0: i32) -> (i32, i32) {
    %c0_i32 = arith.constant 0 : i32
    %c0_i32_0 = arith.constant 0 : i32
    %c0_i32_1 = arith.constant 0 : i32
    return %c0_i32, %c0_i32_0 : i32, i32
  }
  func.func @transform_4(%arg0: i32) -> (i32, i32) {
    %c0_i32 = arith.constant 0 : i32
    %c0_i32_0 = arith.constant 0 : i32
    %c0_i32_1 = arith.constant 0 : i32
    return %c0_i32, %c0_i32_0 : i32, i32
  }
  func.func @transform_5(%arg0: i32) -> (i32, i32) {
    %c0_i32 = arith.constant 0 : i32
    %c0_i32_0 = arith.constant 0 : i32
    %c0_i32_1 = arith.constant 0 : i32
    return %c0_i32, %c0_i32_0 : i32, i32
  }
  func.func @transform_6(%arg0: i32) -> (i32, i32) {
    %c0_i32 = arith.constant 0 : i32
    %c0_i32_0 = arith.constant 0 : i32
    %c0_i32_1 = arith.constant 0 : i32
    return %c0_i32, %c0_i32_0 : i32, i32
  }
  func.func @transform_7(%arg0: i32) -> (i32, i32, i32) {
    %c0_i32 = arith.constant 0 : i32
    %c0_i32_0 = arith.constant 0 : i32
    %c0_i32_1 = arith.constant 0 : i32
    return %arg0, %c0_i32, %c0_i32_0 : i32, i32, i32
  }
}

module attributes {stable_mosaic.version = 11 : i64} {
  func.func @_ffn_ln_kernel(%arg0: i32, %arg1: memref<16x128xbf16, #tpu.memory_space<vmem>>, %arg2: memref<128x256xbf16, #tpu.memory_space<vmem>>, %arg3: memref<1x256xf32, #tpu.memory_space<vmem>>, %arg4: memref<256x128xbf16, #tpu.memory_space<vmem>>, %arg5: memref<1x128xf32, #tpu.memory_space<vmem>>, %arg6: memref<1x128xf32, #tpu.memory_space<vmem>>, %arg7: memref<1x128xf32, #tpu.memory_space<vmem>>, %arg8: memref<16x128xbf16, #tpu.memory_space<vmem>>) attributes {dimension_semantics = [#tpu.dimension_semantics<parallel>], iteration_bounds = array<i64: 1>, scalar_prefetch = 0 : i64, scratch_operands = 0 : i64, tpu.core_type = #tpu.core_type<tc>, window_params = [{transform_indices = @transform_0, window_bounds = array<i64: 16, 128>}, {pipeline_mode = #tpu.pipeline_mode<synchronous>, transform_indices = @transform_1, window_bounds = array<i64: 128, 256>}, {pipeline_mode = #tpu.pipeline_mode<synchronous>, transform_indices = @transform_2, window_bounds = array<i64: 1, 256>}, {pipeline_mode = #tpu.pipeline_mode<synchronous>, transform_indices = @transform_3, window_bounds = array<i64: 256, 128>}, {pipeline_mode = #tpu.pipeline_mode<synchronous>, transform_indices = @transform_4, window_bounds = array<i64: 1, 128>}, {pipeline_mode = #tpu.pipeline_mode<synchronous>, transform_indices = @transform_5, window_bounds = array<i64: 1, 128>}, {pipeline_mode = #tpu.pipeline_mode<synchronous>, transform_indices = @transform_6, window_bounds = array<i64: 1, 128>}, {transform_indices = @transform_7, window_bounds = array<i64: 16, 128>}]} {
    %c0 = arith.constant 0 : index
    %c0_0 = arith.constant 0 : index
    %0 = vector.load %arg1[%c0, %c0_0] : memref<16x128xbf16, #tpu.memory_space<vmem>>, vector<16x128xbf16>
    %c0_1 = arith.constant 0 : index
    %c0_2 = arith.constant 0 : index
    %1 = vector.load %arg2[%c0_1, %c0_2] : memref<128x256xbf16, #tpu.memory_space<vmem>>, vector<128x256xbf16>
    %cst = arith.constant dense<0.000000e+00> : vector<16x256xf32>
    %2 = tpu.matmul %0, %1, %cst {dimension_numbers = #tpu.dot_dimension_numbers<[1], [0], [0], [1], [0, 0, 1, 1], [], []>} : vector<16x128xbf16>, vector<128x256xbf16>, vector<16x256xf32> -> vector<16x256xf32>
    %c0_3 = arith.constant 0 : index
    %c0_4 = arith.constant 0 : index
    %3 = vector.load %arg3[%c0_3, %c0_4] : memref<1x256xf32, #tpu.memory_space<vmem>>, vector<1x256xf32>
    %4 = vector.broadcast %3 : vector<1x256xf32> to vector<16x256xf32>
    %5 = arith.addf %2, %4 : vector<16x256xf32>
    %6 = arith.mulf %5, %5 : vector<16x256xf32>
    %7 = arith.mulf %5, %6 : vector<16x256xf32>
    %cst_5 = arith.constant 4.471500e-02 : f32
    %8 = vector.broadcast %cst_5 : f32 to vector<16x256xf32>
    %9 = arith.mulf %8, %7 : vector<16x256xf32>
    %10 = arith.addf %5, %9 : vector<16x256xf32>
    %cst_6 = arith.constant 0.797884583 : f32
    %11 = vector.broadcast %cst_6 : f32 to vector<16x256xf32>
    %12 = arith.mulf %11, %10 : vector<16x256xf32>
    %13 = math.tanh %12 : vector<16x256xf32>
    %cst_7 = arith.constant 1.000000e+00 : f32
    %14 = vector.broadcast %cst_7 : f32 to vector<16x256xf32>
    %15 = arith.addf %14, %13 : vector<16x256xf32>
    %cst_8 = arith.constant 5.000000e-01 : f32
    %16 = vector.broadcast %cst_8 : f32 to vector<16x256xf32>
    %17 = arith.mulf %16, %15 : vector<16x256xf32>
    %18 = arith.mulf %5, %17 : vector<16x256xf32>
    %19 = arith.truncf %18 : vector<16x256xf32> to vector<16x256xbf16>
    %c0_9 = arith.constant 0 : index
    %c0_10 = arith.constant 0 : index
    %20 = vector.load %arg4[%c0_9, %c0_10] : memref<256x128xbf16, #tpu.memory_space<vmem>>, vector<256x128xbf16>
    %cst_11 = arith.constant dense<0.000000e+00> : vector<16x128xf32>
    %21 = tpu.matmul %19, %20, %cst_11 {dimension_numbers = #tpu.dot_dimension_numbers<[1], [0], [0], [1], [0, 0, 1, 1], [], []>} : vector<16x256xbf16>, vector<256x128xbf16>, vector<16x128xf32> -> vector<16x128xf32>
    %c0_12 = arith.constant 0 : index
    %c0_13 = arith.constant 0 : index
    %22 = vector.load %arg5[%c0_12, %c0_13] : memref<1x128xf32, #tpu.memory_space<vmem>>, vector<1x128xf32>
    %23 = vector.broadcast %22 : vector<1x128xf32> to vector<16x128xf32>
    %24 = arith.addf %21, %23 : vector<16x128xf32>
    %25 = arith.extf %0 : vector<16x128xbf16> to vector<16x128xf32>
    %26 = arith.addf %24, %25 : vector<16x128xf32>
    %cst_14 = arith.constant dense<0.000000e+00> : vector<16xf32>
    %27 = vector.multi_reduction <add>, %26, %cst_14 [1] : vector<16x128xf32> to vector<16xf32>
    %28 = vector.shape_cast %27 : vector<16xf32> to vector<16x1xf32>
    %cst_15 = arith.constant 1.280000e+02 : f32
    %29 = vector.broadcast %cst_15 : f32 to vector<16x1xf32>
    %30 = arith.divf %28, %29 : vector<16x1xf32>
    %31 = vector.broadcast %30 : vector<16x1xf32> to vector<16x128xf32>
    %32 = arith.subf %26, %31 : vector<16x128xf32>
    %33 = arith.mulf %32, %32 : vector<16x128xf32>
    %cst_16 = arith.constant dense<0.000000e+00> : vector<16xf32>
    %34 = vector.multi_reduction <add>, %33, %cst_16 [1] : vector<16x128xf32> to vector<16xf32>
    %35 = vector.shape_cast %34 : vector<16xf32> to vector<16x1xf32>
    %cst_17 = arith.constant 1.280000e+02 : f32
    %36 = vector.broadcast %cst_17 : f32 to vector<16x1xf32>
    %37 = arith.divf %35, %36 : vector<16x1xf32>
    %38 = vector.broadcast %30 : vector<16x1xf32> to vector<16x128xf32>
    %39 = arith.subf %26, %38 : vector<16x128xf32>
    %cst_18 = arith.constant 9.99999974E-6 : f32
    %40 = vector.broadcast %cst_18 : f32 to vector<16x1xf32>
    %41 = arith.addf %37, %40 : vector<16x1xf32>
    %42 = math.rsqrt %41 : vector<16x1xf32>
    %43 = vector.broadcast %42 : vector<16x1xf32> to vector<16x128xf32>
    %44 = arith.mulf %39, %43 : vector<16x128xf32>
    %c0_19 = arith.constant 0 : index
    %c0_20 = arith.constant 0 : index
    %45 = vector.load %arg6[%c0_19, %c0_20] : memref<1x128xf32, #tpu.memory_space<vmem>>, vector<1x128xf32>
    %46 = vector.broadcast %45 : vector<1x128xf32> to vector<16x128xf32>
    %47 = arith.mulf %44, %46 : vector<16x128xf32>
    %c0_21 = arith.constant 0 : index
    %c0_22 = arith.constant 0 : index
    %48 = vector.load %arg7[%c0_21, %c0_22] : memref<1x128xf32, #tpu.memory_space<vmem>>, vector<1x128xf32>
    %49 = vector.broadcast %48 : vector<1x128xf32> to vector<16x128xf32>
    %50 = arith.addf %47, %49 : vector<16x128xf32>
    %51 = arith.truncf %50 : vector<16x128xf32> to vector<16x128xbf16>
    %c0_23 = arith.constant 0 : index
    %c0_24 = arith.constant 0 : index
    %52 = vector.load %arg8[%c0_23, %c0_24] : memref<16x128xbf16, #tpu.memory_space<vmem>>, vector<16x128xbf16>
    tpu.vector_store %arg8[%c0_23, %c0_24], %51 {strides = array<i32>} : memref<16x128xbf16, #tpu.memory_space<vmem>>, vector<16x128xbf16>,
    return
  }
  func.func @transform_0(%arg0: i32) -> (i32, i32) {
    %c0_i32 = arith.constant 0 : i32
    %c0_i32_0 = arith.constant 0 : i32
    return %arg0, %c0_i32 : i32, i32
  }
  func.func @transform_1(%arg0: i32) -> (i32, i32) {
    %c0_i32 = arith.constant 0 : i32
    %c0_i32_0 = arith.constant 0 : i32
    %c0_i32_1 = arith.constant 0 : i32
    return %c0_i32, %c0_i32_0 : i32, i32
  }
  func.func @transform_2(%arg0: i32) -> (i32, i32) {
    %c0_i32 = arith.constant 0 : i32
    %c0_i32_0 = arith.constant 0 : i32
    %c0_i32_1 = arith.constant 0 : i32
    return %c0_i32, %c0_i32_0 : i32, i32
  }
  func.func @transform_3(%arg0: i32) -> (i32, i32) {
    %c0_i32 = arith.constant 0 : i32
    %c0_i32_0 = arith.constant 0 : i32
    %c0_i32_1 = arith.constant 0 : i32
    return %c0_i32, %c0_i32_0 : i32, i32
  }
  func.func @transform_4(%arg0: i32) -> (i32, i32) {
    %c0_i32 = arith.constant 0 : i32
    %c0_i32_0 = arith.constant 0 : i32
    %c0_i32_1 = arith.constant 0 : i32
    return %c0_i32, %c0_i32_0 : i32, i32
  }
  func.func @transform_5(%arg0: i32) -> (i32, i32) {
    %c0_i32 = arith.constant 0 : i32
    %c0_i32_0 = arith.constant 0 : i32
    %c0_i32_1 = arith.constant 0 : i32
    return %c0_i32, %c0_i32_0 : i32, i32
  }
  func.func @transform_6(%arg0: i32) -> (i32, i32) {
    %c0_i32 = arith.constant 0 : i32
    %c0_i32_0 = arith.constant 0 : i32
    %c0_i32_1 = arith.constant 0 : i32
    return %c0_i32, %c0_i32_0 : i32, i32
  }
  func.func @transform_7(%arg0: i32) -> (i32, i32) {
    %c0_i32 = arith.constant 0 : i32
    %c0_i32_0 = arith.constant 0 : i32
    return %arg0, %c0_i32 : i32, i32
  }
}

module attributes {stable_mosaic.version = 11 : i64} {
  func.func @_cross_attn_ln_kernel(%arg0: i32, %arg1: memref<1x8x128xbf16, #tpu.memory_space<vmem>>, %arg2: memref<1x16x128xbf16, #tpu.memory_space<vmem>>, %arg3: memref<128x128xbf16, #tpu.memory_space<vmem>>, %arg4: memref<1x128xf32, #tpu.memory_space<vmem>>, %arg5: memref<128x256xbf16, #tpu.memory_space<vmem>>, %arg6: memref<1x256xf32, #tpu.memory_space<vmem>>, %arg7: memref<128x128xbf16, #tpu.memory_space<vmem>>, %arg8: memref<1x128xf32, #tpu.memory_space<vmem>>, %arg9: memref<1x128xf32, #tpu.memory_space<vmem>>, %arg10: memref<1x128xf32, #tpu.memory_space<vmem>>, %arg11: memref<1x8x128xbf16, #tpu.memory_space<vmem>>) attributes {dimension_semantics = [#tpu.dimension_semantics<parallel>], iteration_bounds = array<i64: 2>, scalar_prefetch = 0 : i64, scratch_operands = 0 : i64, tpu.core_type = #tpu.core_type<tc>, window_params = [{transform_indices = @transform_0, window_bounds = array<i64: 1, 8, 128>}, {transform_indices = @transform_1, window_bounds = array<i64: 1, 16, 128>}, {pipeline_mode = #tpu.pipeline_mode<synchronous>, transform_indices = @transform_2, window_bounds = array<i64: 128, 128>}, {pipeline_mode = #tpu.pipeline_mode<synchronous>, transform_indices = @transform_3, window_bounds = array<i64: 1, 128>}, {pipeline_mode = #tpu.pipeline_mode<synchronous>, transform_indices = @transform_4, window_bounds = array<i64: 128, 256>}, {pipeline_mode = #tpu.pipeline_mode<synchronous>, transform_indices = @transform_5, window_bounds = array<i64: 1, 256>}, {pipeline_mode = #tpu.pipeline_mode<synchronous>, transform_indices = @transform_6, window_bounds = array<i64: 128, 128>}, {pipeline_mode = #tpu.pipeline_mode<synchronous>, transform_indices = @transform_7, window_bounds = array<i64: 1, 128>}, {pipeline_mode = #tpu.pipeline_mode<synchronous>, transform_indices = @transform_8, window_bounds = array<i64: 1, 128>}, {pipeline_mode = #tpu.pipeline_mode<synchronous>, transform_indices = @transform_9, window_bounds = array<i64: 1, 128>}, {transform_indices = @transform_10, window_bounds = array<i64: 1, 8, 128>}]} {
    %c0 = arith.constant 0 : index
    %c0_0 = arith.constant 0 : index
    %c0_1 = arith.constant 0 : index
    %0 = vector.load %arg1[%c0, %c0_0, %c0_1] : memref<1x8x128xbf16, #tpu.memory_space<vmem>>, vector<1x8x128xbf16>
    %1 = vector.shape_cast %0 : vector<1x8x128xbf16> to vector<8x128xbf16>
    %c0_2 = arith.constant 0 : index
    %c0_3 = arith.constant 0 : index
    %c0_4 = arith.constant 0 : index
    %2 = vector.load %arg2[%c0_2, %c0_3, %c0_4] : memref<1x16x128xbf16, #tpu.memory_space<vmem>>, vector<1x16x128xbf16>
    %3 = vector.shape_cast %2 : vector<1x16x128xbf16> to vector<16x128xbf16>
    %c0_5 = arith.constant 0 : index
    %c0_6 = arith.constant 0 : index
    %4 = vector.load %arg3[%c0_5, %c0_6] : memref<128x128xbf16, #tpu.memory_space<vmem>>, vector<128x128xbf16>
    %cst = arith.constant dense<0.000000e+00> : vector<8x128xf32>
    %5 = tpu.matmul %1, %4, %cst {dimension_numbers = #tpu.dot_dimension_numbers<[1], [0], [0], [1], [0, 0, 1, 1], [], []>} : vector<8x128xbf16>, vector<128x128xbf16>, vector<8x128xf32> -> vector<8x128xf32>
    %c0_7 = arith.constant 0 : index
    %c0_8 = arith.constant 0 : index
    %6 = vector.load %arg4[%c0_7, %c0_8] : memref<1x128xf32, #tpu.memory_space<vmem>>, vector<1x128xf32>
    %7 = vector.broadcast %6 : vector<1x128xf32> to vector<8x128xf32>
    %8 = arith.addf %5, %7 : vector<8x128xf32>
    %c0_9 = arith.constant 0 : index
    %c0_10 = arith.constant 0 : index
    %9 = vector.load %arg5[%c0_9, %c0_10] : memref<128x256xbf16, #tpu.memory_space<vmem>>, vector<128x256xbf16>
    %cst_11 = arith.constant dense<0.000000e+00> : vector<16x256xf32>
    %10 = tpu.matmul %3, %9, %cst_11 {dimension_numbers = #tpu.dot_dimension_numbers<[1], [0], [0], [1], [0, 0, 1, 1], [], []>} : vector<16x128xbf16>, vector<128x256xbf16>, vector<16x256xf32> -> vector<16x256xf32>
    %c0_12 = arith.constant 0 : index
    %c0_13 = arith.constant 0 : index
    %11 = vector.load %arg6[%c0_12, %c0_13] : memref<1x256xf32, #tpu.memory_space<vmem>>, vector<1x256xf32>
    %12 = vector.broadcast %11 : vector<1x256xf32> to vector<16x256xf32>
    %13 = arith.addf %10, %12 : vector<16x256xf32>
    %14 = vector.extract_strided_slice %13 {offsets = [0, 0], sizes = [16, 128], strides = [1, 1]} : vector<16x256xf32> to vector<16x128xf32>
    %15 = vector.extract_strided_slice %13 {offsets = [0, 128], sizes = [16, 128], strides = [1, 1]} : vector<16x256xf32> to vector<16x128xf32>
    %16 = vector.extract_strided_slice %8 {offsets = [0, 0], sizes = [8, 32], strides = [1, 1]} : vector<8x128xf32> to vector<8x32xf32>
    %17 = arith.truncf %16 : vector<8x32xf32> to vector<8x32xbf16>
    %18 = vector.extract_strided_slice %14 {offsets = [0, 0], sizes = [16, 32], strides = [1, 1]} : vector<16x128xf32> to vector<16x32xf32>
    %19 = arith.truncf %18 : vector<16x32xf32> to vector<16x32xbf16>
    %20 = vector.extract_strided_slice %15 {offsets = [0, 0], sizes = [16, 32], strides = [1, 1]} : vector<16x128xf32> to vector<16x32xf32>
    %21 = arith.truncf %20 : vector<16x32xf32> to vector<16x32xbf16>
    %cst_14 = arith.constant dense<0.000000e+00> : vector<8x16xf32>
    %22 = tpu.matmul %17, %19, %cst_14 {dimension_numbers = #tpu.dot_dimension_numbers<[1], [1], [0], [0], [0, 0, 1, 0], [], []>} : vector<8x32xbf16>, vector<16x32xbf16>, vector<8x16xf32> -> vector<8x16xf32>
    %cst_15 = arith.constant 0.176776692 : f32
    %23 = vector.broadcast %cst_15 : f32 to vector<8x16xf32>
    %24 = arith.mulf %22, %23 : vector<8x16xf32>
    %cst_16 = arith.constant dense<0xFF800000> : vector<8xf32>
    %25 = vector.multi_reduction <maximumf>, %24, %cst_16 [1] : vector<8x16xf32> to vector<8xf32>
    %26 = vector.shape_cast %25 : vector<8xf32> to vector<8x1xf32>
    %27 = vector.broadcast %26 : vector<8x1xf32> to vector<8x16xf32>
    %28 = arith.subf %24, %27 : vector<8x16xf32>
    %29 = math.exp %28 : vector<8x16xf32>
    %cst_17 = arith.constant dense<0.000000e+00> : vector<8xf32>
    %30 = vector.multi_reduction <add>, %29, %cst_17 [1] : vector<8x16xf32> to vector<8xf32>
    %31 = vector.shape_cast %30 : vector<8xf32> to vector<8x1xf32>
    %32 = vector.broadcast %31 : vector<8x1xf32> to vector<8x16xf32>
    %33 = arith.divf %29, %32 : vector<8x16xf32>
    %34 = arith.truncf %33 : vector<8x16xf32> to vector<8x16xbf16>
    %cst_18 = arith.constant dense<0.000000e+00> : vector<8x32xf32>
    %35 = tpu.matmul %34, %21, %cst_18 {dimension_numbers = #tpu.dot_dimension_numbers<[1], [0], [0], [1], [0, 0, 1, 1], [], []>} : vector<8x16xbf16>, vector<16x32xbf16>, vector<8x32xf32> -> vector<8x32xf32>
    %36 = vector.extract_strided_slice %8 {offsets = [0, 32], sizes = [8, 32], strides = [1, 1]} : vector<8x128xf32> to vector<8x32xf32>
    %37 = arith.truncf %36 : vector<8x32xf32> to vector<8x32xbf16>
    %38 = vector.extract_strided_slice %14 {offsets = [0, 32], sizes = [16, 32], strides = [1, 1]} : vector<16x128xf32> to vector<16x32xf32>
    %39 = arith.truncf %38 : vector<16x32xf32> to vector<16x32xbf16>
    %40 = vector.extract_strided_slice %15 {offsets = [0, 32], sizes = [16, 32], strides = [1, 1]} : vector<16x128xf32> to vector<16x32xf32>
    %41 = arith.truncf %40 : vector<16x32xf32> to vector<16x32xbf16>
    %cst_19 = arith.constant dense<0.000000e+00> : vector<8x16xf32>
    %42 = tpu.matmul %37, %39, %cst_19 {dimension_numbers = #tpu.dot_dimension_numbers<[1], [1], [0], [0], [0, 0, 1, 0], [], []>} : vector<8x32xbf16>, vector<16x32xbf16>, vector<8x16xf32> -> vector<8x16xf32>
    %cst_20 = arith.constant 0.176776692 : f32
    %43 = vector.broadcast %cst_20 : f32 to vector<8x16xf32>
    %44 = arith.mulf %42, %43 : vector<8x16xf32>
    %cst_21 = arith.constant dense<0xFF800000> : vector<8xf32>
    %45 = vector.multi_reduction <maximumf>, %44, %cst_21 [1] : vector<8x16xf32> to vector<8xf32>
    %46 = vector.shape_cast %45 : vector<8xf32> to vector<8x1xf32>
    %47 = vector.broadcast %46 : vector<8x1xf32> to vector<8x16xf32>
    %48 = arith.subf %44, %47 : vector<8x16xf32>
    %49 = math.exp %48 : vector<8x16xf32>
    %cst_22 = arith.constant dense<0.000000e+00> : vector<8xf32>
    %50 = vector.multi_reduction <add>, %49, %cst_22 [1] : vector<8x16xf32> to vector<8xf32>
    %51 = vector.shape_cast %50 : vector<8xf32> to vector<8x1xf32>
    %52 = vector.broadcast %51 : vector<8x1xf32> to vector<8x16xf32>
    %53 = arith.divf %49, %52 : vector<8x16xf32>
    %54 = arith.truncf %53 : vector<8x16xf32> to vector<8x16xbf16>
    %cst_23 = arith.constant dense<0.000000e+00> : vector<8x32xf32>
    %55 = tpu.matmul %54, %41, %cst_23 {dimension_numbers = #tpu.dot_dimension_numbers<[1], [0], [0], [1], [0, 0, 1, 1], [], []>} : vector<8x16xbf16>, vector<16x32xbf16>, vector<8x32xf32> -> vector<8x32xf32>
    %56 = vector.extract_strided_slice %8 {offsets = [0, 64], sizes = [8, 32], strides = [1, 1]} : vector<8x128xf32> to vector<8x32xf32>
    %57 = arith.truncf %56 : vector<8x32xf32> to vector<8x32xbf16>
    %58 = vector.extract_strided_slice %14 {offsets = [0, 64], sizes = [16, 32], strides = [1, 1]} : vector<16x128xf32> to vector<16x32xf32>
    %59 = arith.truncf %58 : vector<16x32xf32> to vector<16x32xbf16>
    %60 = vector.extract_strided_slice %15 {offsets = [0, 64], sizes = [16, 32], strides = [1, 1]} : vector<16x128xf32> to vector<16x32xf32>
    %61 = arith.truncf %60 : vector<16x32xf32> to vector<16x32xbf16>
    %cst_24 = arith.constant dense<0.000000e+00> : vector<8x16xf32>
    %62 = tpu.matmul %57, %59, %cst_24 {dimension_numbers = #tpu.dot_dimension_numbers<[1], [1], [0], [0], [0, 0, 1, 0], [], []>} : vector<8x32xbf16>, vector<16x32xbf16>, vector<8x16xf32> -> vector<8x16xf32>
    %cst_25 = arith.constant 0.176776692 : f32
    %63 = vector.broadcast %cst_25 : f32 to vector<8x16xf32>
    %64 = arith.mulf %62, %63 : vector<8x16xf32>
    %cst_26 = arith.constant dense<0xFF800000> : vector<8xf32>
    %65 = vector.multi_reduction <maximumf>, %64, %cst_26 [1] : vector<8x16xf32> to vector<8xf32>
    %66 = vector.shape_cast %65 : vector<8xf32> to vector<8x1xf32>
    %67 = vector.broadcast %66 : vector<8x1xf32> to vector<8x16xf32>
    %68 = arith.subf %64, %67 : vector<8x16xf32>
    %69 = math.exp %68 : vector<8x16xf32>
    %cst_27 = arith.constant dense<0.000000e+00> : vector<8xf32>
    %70 = vector.multi_reduction <add>, %69, %cst_27 [1] : vector<8x16xf32> to vector<8xf32>
    %71 = vector.shape_cast %70 : vector<8xf32> to vector<8x1xf32>
    %72 = vector.broadcast %71 : vector<8x1xf32> to vector<8x16xf32>
    %73 = arith.divf %69, %72 : vector<8x16xf32>
    %74 = arith.truncf %73 : vector<8x16xf32> to vector<8x16xbf16>
    %cst_28 = arith.constant dense<0.000000e+00> : vector<8x32xf32>
    %75 = tpu.matmul %74, %61, %cst_28 {dimension_numbers = #tpu.dot_dimension_numbers<[1], [0], [0], [1], [0, 0, 1, 1], [], []>} : vector<8x16xbf16>, vector<16x32xbf16>, vector<8x32xf32> -> vector<8x32xf32>
    %76 = vector.extract_strided_slice %8 {offsets = [0, 96], sizes = [8, 32], strides = [1, 1]} : vector<8x128xf32> to vector<8x32xf32>
    %77 = arith.truncf %76 : vector<8x32xf32> to vector<8x32xbf16>
    %78 = vector.extract_strided_slice %14 {offsets = [0, 96], sizes = [16, 32], strides = [1, 1]} : vector<16x128xf32> to vector<16x32xf32>
    %79 = arith.truncf %78 : vector<16x32xf32> to vector<16x32xbf16>
    %80 = vector.extract_strided_slice %15 {offsets = [0, 96], sizes = [16, 32], strides = [1, 1]} : vector<16x128xf32> to vector<16x32xf32>
    %81 = arith.truncf %80 : vector<16x32xf32> to vector<16x32xbf16>
    %cst_29 = arith.constant dense<0.000000e+00> : vector<8x16xf32>
    %82 = tpu.matmul %77, %79, %cst_29 {dimension_numbers = #tpu.dot_dimension_numbers<[1], [1], [0], [0], [0, 0, 1, 0], [], []>} : vector<8x32xbf16>, vector<16x32xbf16>, vector<8x16xf32> -> vector<8x16xf32>
    %cst_30 = arith.constant 0.176776692 : f32
    %83 = vector.broadcast %cst_30 : f32 to vector<8x16xf32>
    %84 = arith.mulf %82, %83 : vector<8x16xf32>
    %cst_31 = arith.constant dense<0xFF800000> : vector<8xf32>
    %85 = vector.multi_reduction <maximumf>, %84, %cst_31 [1] : vector<8x16xf32> to vector<8xf32>
    %86 = vector.shape_cast %85 : vector<8xf32> to vector<8x1xf32>
    %87 = vector.broadcast %86 : vector<8x1xf32> to vector<8x16xf32>
    %88 = arith.subf %84, %87 : vector<8x16xf32>
    %89 = math.exp %88 : vector<8x16xf32>
    %cst_32 = arith.constant dense<0.000000e+00> : vector<8xf32>
    %90 = vector.multi_reduction <add>, %89, %cst_32 [1] : vector<8x16xf32> to vector<8xf32>
    %91 = vector.shape_cast %90 : vector<8xf32> to vector<8x1xf32>
    %92 = vector.broadcast %91 : vector<8x1xf32> to vector<8x16xf32>
    %93 = arith.divf %89, %92 : vector<8x16xf32>
    %94 = arith.truncf %93 : vector<8x16xf32> to vector<8x16xbf16>
    %cst_33 = arith.constant dense<0.000000e+00> : vector<8x32xf32>
    %95 = tpu.matmul %94, %81, %cst_33 {dimension_numbers = #tpu.dot_dimension_numbers<[1], [0], [0], [1], [0, 0, 1, 1], [], []>} : vector<8x16xbf16>, vector<16x32xbf16>, vector<8x32xf32> -> vector<8x32xf32>
    %96 = tpu.concatenate %35, %55, %75, %95 in 1 : vector<8x32xf32>, vector<8x32xf32>, vector<8x32xf32>, vector<8x32xf32> -> vector<8x128xf32>
    %97 = arith.truncf %96 : vector<8x128xf32> to vector<8x128xbf16>
    %c0_34 = arith.constant 0 : index
    %c0_35 = arith.constant 0 : index
    %98 = vector.load %arg7[%c0_34, %c0_35] : memref<128x128xbf16, #tpu.memory_space<vmem>>, vector<128x128xbf16>
    %cst_36 = arith.constant dense<0.000000e+00> : vector<8x128xf32>
    %99 = tpu.matmul %97, %98, %cst_36 {dimension_numbers = #tpu.dot_dimension_numbers<[1], [0], [0], [1], [0, 0, 1, 1], [], []>} : vector<8x128xbf16>, vector<128x128xbf16>, vector<8x128xf32> -> vector<8x128xf32>
    %c0_37 = arith.constant 0 : index
    %c0_38 = arith.constant 0 : index
    %100 = vector.load %arg8[%c0_37, %c0_38] : memref<1x128xf32, #tpu.memory_space<vmem>>, vector<1x128xf32>
    %101 = vector.broadcast %100 : vector<1x128xf32> to vector<8x128xf32>
    %102 = arith.addf %99, %101 : vector<8x128xf32>
    %103 = arith.extf %1 : vector<8x128xbf16> to vector<8x128xf32>
    %104 = arith.addf %102, %103 : vector<8x128xf32>
    %cst_39 = arith.constant dense<0.000000e+00> : vector<8xf32>
    %105 = vector.multi_reduction <add>, %104, %cst_39 [1] : vector<8x128xf32> to vector<8xf32>
    %106 = vector.shape_cast %105 : vector<8xf32> to vector<8x1xf32>
    %cst_40 = arith.constant 1.280000e+02 : f32
    %107 = vector.broadcast %cst_40 : f32 to vector<8x1xf32>
    %108 = arith.divf %106, %107 : vector<8x1xf32>
    %109 = vector.broadcast %108 : vector<8x1xf32> to vector<8x128xf32>
    %110 = arith.subf %104, %109 : vector<8x128xf32>
    %111 = arith.mulf %110, %110 : vector<8x128xf32>
    %cst_41 = arith.constant dense<0.000000e+00> : vector<8xf32>
    %112 = vector.multi_reduction <add>, %111, %cst_41 [1] : vector<8x128xf32> to vector<8xf32>
    %113 = vector.shape_cast %112 : vector<8xf32> to vector<8x1xf32>
    %cst_42 = arith.constant 1.280000e+02 : f32
    %114 = vector.broadcast %cst_42 : f32 to vector<8x1xf32>
    %115 = arith.divf %113, %114 : vector<8x1xf32>
    %116 = vector.broadcast %108 : vector<8x1xf32> to vector<8x128xf32>
    %117 = arith.subf %104, %116 : vector<8x128xf32>
    %cst_43 = arith.constant 9.99999974E-6 : f32
    %118 = vector.broadcast %cst_43 : f32 to vector<8x1xf32>
    %119 = arith.addf %115, %118 : vector<8x1xf32>
    %120 = math.rsqrt %119 : vector<8x1xf32>
    %121 = vector.broadcast %120 : vector<8x1xf32> to vector<8x128xf32>
    %122 = arith.mulf %117, %121 : vector<8x128xf32>
    %c0_44 = arith.constant 0 : index
    %c0_45 = arith.constant 0 : index
    %123 = vector.load %arg9[%c0_44, %c0_45] : memref<1x128xf32, #tpu.memory_space<vmem>>, vector<1x128xf32>
    %124 = vector.broadcast %123 : vector<1x128xf32> to vector<8x128xf32>
    %125 = arith.mulf %122, %124 : vector<8x128xf32>
    %c0_46 = arith.constant 0 : index
    %c0_47 = arith.constant 0 : index
    %126 = vector.load %arg10[%c0_46, %c0_47] : memref<1x128xf32, #tpu.memory_space<vmem>>, vector<1x128xf32>
    %127 = vector.broadcast %126 : vector<1x128xf32> to vector<8x128xf32>
    %128 = arith.addf %125, %127 : vector<8x128xf32>
    %129 = arith.truncf %128 : vector<8x128xf32> to vector<8x128xbf16>
    %c0_48 = arith.constant 0 : index
    %c0_49 = arith.constant 0 : index
    %c0_50 = arith.constant 0 : index
    %130 = vector.load %arg11[%c0_48, %c0_49, %c0_50] : memref<1x8x128xbf16, #tpu.memory_space<vmem>>, vector<1x8x128xbf16>
    %131 = vector.shape_cast %130 : vector<1x8x128xbf16> to vector<8x128xbf16>
    %132 = vector.shape_cast %129 : vector<8x128xbf16> to vector<1x8x128xbf16>
    tpu.vector_store %arg11[%c0_48, %c0_49, %c0_50], %132 {strides = array<i32>} : memref<1x8x128xbf16, #tpu.memory_space<vmem>>, vector<1x8x128xbf16>,
    return
  }
  func.func @transform_0(%arg0: i32) -> (i32, i32, i32) {
    %c0_i32 = arith.constant 0 : i32
    %c0_i32_0 = arith.constant 0 : i32
    %c0_i32_1 = arith.constant 0 : i32
    return %arg0, %c0_i32, %c0_i32_0 : i32, i32, i32
  }
  func.func @transform_1(%arg0: i32) -> (i32, i32, i32) {
    %c0_i32 = arith.constant 0 : i32
    %c0_i32_0 = arith.constant 0 : i32
    %c0_i32_1 = arith.constant 0 : i32
    return %arg0, %c0_i32, %c0_i32_0 : i32, i32, i32
  }
  func.func @transform_2(%arg0: i32) -> (i32, i32) {
    %c0_i32 = arith.constant 0 : i32
    %c0_i32_0 = arith.constant 0 : i32
    %c0_i32_1 = arith.constant 0 : i32
    return %c0_i32, %c0_i32_0 : i32, i32
  }
  func.func @transform_3(%arg0: i32) -> (i32, i32) {
    %c0_i32 = arith.constant 0 : i32
    %c0_i32_0 = arith.constant 0 : i32
    %c0_i32_1 = arith.constant 0 : i32
    return %c0_i32, %c0_i32_0 : i32, i32
  }
  func.func @transform_4(%arg0: i32) -> (i32, i32) {
    %c0_i32 = arith.constant 0 : i32
    %c0_i32_0 = arith.constant 0 : i32
    %c0_i32_1 = arith.constant 0 : i32
    return %c0_i32, %c0_i32_0 : i32, i32
  }
  func.func @transform_5(%arg0: i32) -> (i32, i32) {
    %c0_i32 = arith.constant 0 : i32
    %c0_i32_0 = arith.constant 0 : i32
    %c0_i32_1 = arith.constant 0 : i32
    return %c0_i32, %c0_i32_0 : i32, i32
  }
  func.func @transform_6(%arg0: i32) -> (i32, i32) {
    %c0_i32 = arith.constant 0 : i32
    %c0_i32_0 = arith.constant 0 : i32
    %c0_i32_1 = arith.constant 0 : i32
    return %c0_i32, %c0_i32_0 : i32, i32
  }
  func.func @transform_7(%arg0: i32) -> (i32, i32) {
    %c0_i32 = arith.constant 0 : i32
    %c0_i32_0 = arith.constant 0 : i32
    %c0_i32_1 = arith.constant 0 : i32
    return %c0_i32, %c0_i32_0 : i32, i32
  }
  func.func @transform_8(%arg0: i32) -> (i32, i32) {
    %c0_i32 = arith.constant 0 : i32
    %c0_i32_0 = arith.constant 0 : i32
    %c0_i32_1 = arith.constant 0 : i32
    return %c0_i32, %c0_i32_0 : i32, i32
  }
  func.func @transform_9(%arg0: i32) -> (i32, i32) {
    %c0_i32 = arith.constant 0 : i32
    %c0_i32_0 = arith.constant 0 : i32
    %c0_i32_1 = arith.constant 0 : i32
    return %c0_i32, %c0_i32_0 : i32, i32
  }
  func.func @transform_10(%arg0: i32) -> (i32, i32, i32) {
    %c0_i32 = arith.constant 0 : i32
    %c0_i32_0 = arith.constant 0 : i32
    %c0_i32_1 = arith.constant 0 : i32
    return %arg0, %c0_i32, %c0_i32_0 : i32, i32, i32
  }
}

module attributes {stable_mosaic.version = 11 : i64} {
  func.func @_tag_head_kernel(%arg0: i32, %arg1: memref<2x8x128xbf16, #tpu.memory_space<vmem>>, %arg2: memref<8x128xf32, #tpu.memory_space<vmem>>, %arg3: memref<1x8xf32, #tpu.memory_space<vmem>>, %arg4: memref<3x2x8xf32, #tpu.memory_space<vmem>>) attributes {dimension_semantics = [#tpu.dimension_semantics<arbitrary>], iteration_bounds = array<i64: 1>, scalar_prefetch = 0 : i64, scratch_operands = 0 : i64, tpu.core_type = #tpu.core_type<tc>, window_params = [{pipeline_mode = #tpu.pipeline_mode<synchronous>, transform_indices = @transform_0, window_bounds = array<i64: 2, 8, 128>}, {pipeline_mode = #tpu.pipeline_mode<synchronous>, transform_indices = @transform_1, window_bounds = array<i64: 8, 128>}, {pipeline_mode = #tpu.pipeline_mode<synchronous>, transform_indices = @transform_2, window_bounds = array<i64: 1, 8>}, {pipeline_mode = #tpu.pipeline_mode<synchronous>, transform_indices = @transform_3, window_bounds = array<i64: 3, 2, 8>}]} {
    %c0 = arith.constant 0 : index
    %c0_0 = arith.constant 0 : index
    %c0_1 = arith.constant 0 : index
    %0 = vector.load %arg1[%c0, %c0_0, %c0_1] : memref<2x8x128xbf16, #tpu.memory_space<vmem>>, vector<2x8x128xbf16>
    %1 = arith.extf %0 : vector<2x8x128xbf16> to vector<2x8x128xf32>
    %c0_2 = arith.constant 0 : index
    %c0_3 = arith.constant 0 : index
    %2 = vector.load %arg2[%c0_2, %c0_3] : memref<8x128xf32, #tpu.memory_space<vmem>>, vector<8x128xf32>
    %3 = vector.shape_cast %2 : vector<8x128xf32> to vector<1x8x128xf32>
    %4 = vector.broadcast %3 : vector<1x8x128xf32> to vector<2x8x128xf32>
    %5 = arith.mulf %1, %4 : vector<2x8x128xf32>
    %cst = arith.constant dense<0.000000e+00> : vector<2x8xf32>
    %6 = vector.multi_reduction <add>, %5, %cst [2] : vector<2x8x128xf32> to vector<2x8xf32>
    %c0_4 = arith.constant 0 : index
    %c0_5 = arith.constant 0 : index
    %7 = vector.load %arg3[%c0_4, %c0_5] : memref<1x8xf32, #tpu.memory_space<vmem>>, vector<1x8xf32>
    %8 = vector.broadcast %7 : vector<1x8xf32> to vector<2x8xf32>
    %9 = arith.addf %6, %8 : vector<2x8xf32>
    %c0_6 = arith.constant 0 : index
    %c0_7 = arith.constant 0 : index
    %c0_8 = arith.constant 0 : index
    %10 = vector.load %arg4[%c0_6, %c0_7, %c0_8] : memref<3x2x8xf32, #tpu.memory_space<vmem>>, vector<1x2x8xf32>
    %11 = vector.shape_cast %10 : vector<1x2x8xf32> to vector<2x8xf32>
    %12 = vector.shape_cast %9 : vector<2x8xf32> to vector<1x2x8xf32>
    tpu.vector_store %arg4[%c0_6, %c0_7, %c0_8], %12 {strides = array<i32>} : memref<3x2x8xf32, #tpu.memory_space<vmem>>, vector<1x2x8xf32>,
    %13 = arith.negf %9 : vector<2x8xf32>
    %14 = math.exp %13 : vector<2x8xf32>
    %cst_9 = arith.constant 1.000000e+00 : f32
    %15 = vector.broadcast %cst_9 : f32 to vector<2x8xf32>
    %16 = arith.addf %15, %14 : vector<2x8xf32>
    %17 = arith.divf %15, %16 : vector<2x8xf32>
    %c1 = arith.constant 1 : index
    %c0_10 = arith.constant 0 : index
    %c0_11 = arith.constant 0 : index
    %18 = vector.load %arg4[%c1, %c0_10, %c0_11] : memref<3x2x8xf32, #tpu.memory_space<vmem>>, vector<1x2x8xf32>
    %19 = vector.shape_cast %18 : vector<1x2x8xf32> to vector<2x8xf32>
    %20 = vector.shape_cast %17 : vector<2x8xf32> to vector<1x2x8xf32>
    tpu.vector_store %arg4[%c1, %c0_10, %c0_11], %20 {strides = array<i32>} : memref<3x2x8xf32, #tpu.memory_space<vmem>>, vector<1x2x8xf32>,
    %cst_12 = arith.constant 6.000000e-01 : f32
    %21 = vector.broadcast %cst_12 : f32 to vector<2x8xf32>
    %22 = arith.cmpf oge, %9, %21 : vector<2x8xf32>
    %23 = arith.extui %22 : vector<2x8xi1> to vector<2x8xi32>
    %24 = arith.sitofp %23 : vector<2x8xi32> to vector<2x8xf32>
    %c2 = arith.constant 2 : index
    %c0_13 = arith.constant 0 : index
    %c0_14 = arith.constant 0 : index
    %25 = vector.load %arg4[%c2, %c0_13, %c0_14] : memref<3x2x8xf32, #tpu.memory_space<vmem>>, vector<1x2x8xf32>
    %26 = vector.shape_cast %25 : vector<1x2x8xf32> to vector<2x8xf32>
    %27 = vector.shape_cast %24 : vector<2x8xf32> to vector<1x2x8xf32>
    tpu.vector_store %arg4[%c2, %c0_13, %c0_14], %27 {strides = array<i32>} : memref<3x2x8xf32, #tpu.memory_space<vmem>>, vector<1x2x8xf32>,
    return
  }
  func.func @transform_0(%arg0: i32) -> (i32, i32, i32) {
    %c0_i32 = arith.constant 0 : i32
    %c0_i32_0 = arith.constant 0 : i32
    %c0_i32_1 = arith.constant 0 : i32
    %c0_i32_2 = arith.constant 0 : i32
    return %c0_i32, %c0_i32_0, %c0_i32_1 : i32, i32, i32
  }
  func.func @transform_1(%arg0: i32) -> (i32, i32) {
    %c0_i32 = arith.constant 0 : i32
    %c0_i32_0 = arith.constant 0 : i32
    %c0_i32_1 = arith.constant 0 : i32
    return %c0_i32, %c0_i32_0 : i32, i32
  }
  func.func @transform_2(%arg0: i32) -> (i32, i32) {
    %c0_i32 = arith.constant 0 : i32
    %c0_i32_0 = arith.constant 0 : i32
    %c0_i32_1 = arith.constant 0 : i32
    return %c0_i32, %c0_i32_0 : i32, i32
  }
  func.func @transform_3(%arg0: i32) -> (i32, i32, i32) {
    %c0_i32 = arith.constant 0 : i32
    %c0_i32_0 = arith.constant 0 : i32
    %c0_i32_1 = arith.constant 0 : i32
    %c0_i32_2 = arith.constant 0 : i32
    return %c0_i32, %c0_i32_0, %c0_i32_1 : i32, i32, i32
  }
}

module attributes {stable_mosaic.version = 11 : i64} {
  func.func @_self_attn_ln_kernel(%arg0: i32, %arg1: memref<1x24x128xbf16, #tpu.memory_space<vmem>>, %arg2: memref<1x1x24xf32, #tpu.memory_space<vmem>>, %arg3: memref<128x384xbf16, #tpu.memory_space<vmem>>, %arg4: memref<1x384xf32, #tpu.memory_space<vmem>>, %arg5: memref<128x128xbf16, #tpu.memory_space<vmem>>, %arg6: memref<1x128xf32, #tpu.memory_space<vmem>>, %arg7: memref<1x128xf32, #tpu.memory_space<vmem>>, %arg8: memref<1x128xf32, #tpu.memory_space<vmem>>, %arg9: memref<1x24x128xbf16, #tpu.memory_space<vmem>>) attributes {dimension_semantics = [#tpu.dimension_semantics<parallel>], iteration_bounds = array<i64: 2>, scalar_prefetch = 0 : i64, scratch_operands = 0 : i64, tpu.core_type = #tpu.core_type<tc>, window_params = [{transform_indices = @transform_0, window_bounds = array<i64: 1, 24, 128>}, {transform_indices = @transform_1, window_bounds = array<i64: 1, 1, 24>}, {pipeline_mode = #tpu.pipeline_mode<synchronous>, transform_indices = @transform_2, window_bounds = array<i64: 128, 384>}, {pipeline_mode = #tpu.pipeline_mode<synchronous>, transform_indices = @transform_3, window_bounds = array<i64: 1, 384>}, {pipeline_mode = #tpu.pipeline_mode<synchronous>, transform_indices = @transform_4, window_bounds = array<i64: 128, 128>}, {pipeline_mode = #tpu.pipeline_mode<synchronous>, transform_indices = @transform_5, window_bounds = array<i64: 1, 128>}, {pipeline_mode = #tpu.pipeline_mode<synchronous>, transform_indices = @transform_6, window_bounds = array<i64: 1, 128>}, {pipeline_mode = #tpu.pipeline_mode<synchronous>, transform_indices = @transform_7, window_bounds = array<i64: 1, 128>}, {transform_indices = @transform_8, window_bounds = array<i64: 1, 24, 128>}]} {
    %c0 = arith.constant 0 : index
    %c0_0 = arith.constant 0 : index
    %c0_1 = arith.constant 0 : index
    %0 = vector.load %arg1[%c0, %c0_0, %c0_1] : memref<1x24x128xbf16, #tpu.memory_space<vmem>>, vector<1x24x128xbf16>
    %1 = vector.shape_cast %0 : vector<1x24x128xbf16> to vector<24x128xbf16>
    %c0_2 = arith.constant 0 : index
    %c0_3 = arith.constant 0 : index
    %2 = vector.load %arg3[%c0_2, %c0_3] : memref<128x384xbf16, #tpu.memory_space<vmem>>, vector<128x384xbf16>
    %cst = arith.constant dense<0.000000e+00> : vector<24x384xf32>
    %3 = tpu.matmul %1, %2, %cst {dimension_numbers = #tpu.dot_dimension_numbers<[1], [0], [0], [1], [0, 0, 1, 1], [], []>} : vector<24x128xbf16>, vector<128x384xbf16>, vector<24x384xf32> -> vector<24x384xf32>
    %c0_4 = arith.constant 0 : index
    %c0_5 = arith.constant 0 : index
    %4 = vector.load %arg4[%c0_4, %c0_5] : memref<1x384xf32, #tpu.memory_space<vmem>>, vector<1x384xf32>
    %5 = vector.broadcast %4 : vector<1x384xf32> to vector<24x384xf32>
    %6 = arith.addf %3, %5 : vector<24x384xf32>
    %7 = tpu.iota {dimensions = array<i32: 0>} : vector<24x24xi32>
    %8 = tpu.iota {dimensions = array<i32: 1>} : vector<24x24xi32>
    %9 = arith.cmpi sle, %8, %7 : vector<24x24xi32>
    %c0_6 = arith.constant 0 : index
    %c0_7 = arith.constant 0 : index
    %c0_8 = arith.constant 0 : index
    %10 = vector.load %arg2[%c0_6, %c0_7, %c0_8] : memref<1x1x24xf32, #tpu.memory_space<vmem>>, vector<1x1x24xf32>
    %11 = vector.shape_cast %10 : vector<1x1x24xf32> to vector<1x24xf32>
    %cst_9 = arith.constant 0.000000e+00 : f32
    %12 = vector.broadcast %cst_9 : f32 to vector<1x24xf32>
    %13 = arith.cmpf ogt, %11, %12 : vector<1x24xf32>
    %14 = vector.broadcast %13 : vector<1x24xi1> to vector<24x24xi1>
    %15 = arith.andi %9, %14 : vector<24x24xi1>
    %cst_10 = arith.constant 0.000000e+00 : f32
    %cst_11 = arith.constant -1.000000e+09 : f32
    %16 = vector.broadcast %cst_10 : f32 to vector<24x24xf32>
    %17 = vector.broadcast %cst_11 : f32 to vector<24x24xf32>
    %18 = arith.select %15, %16, %17 : vector<24x24xi1>, vector<24x24xf32>
    %19 = vector.extract_strided_slice %6 {offsets = [0, 0], sizes = [24, 128], strides = [1, 1]} : vector<24x384xf32> to vector<24x128xf32>
    %20 = vector.extract_strided_slice %6 {offsets = [0, 128], sizes = [24, 128], strides = [1, 1]} : vector<24x384xf32> to vector<24x128xf32>
    %21 = vector.extract_strided_slice %6 {offsets = [0, 256], sizes = [24, 128], strides = [1, 1]} : vector<24x384xf32> to vector<24x128xf32>
    %22 = vector.extract_strided_slice %19 {offsets = [0, 0], sizes = [24, 32], strides = [1, 1]} : vector<24x128xf32> to vector<24x32xf32>
    %23 = arith.truncf %22 : vector<24x32xf32> to vector<24x32xbf16>
    %24 = vector.extract_strided_slice %20 {offsets = [0, 0], sizes = [24, 32], strides = [1, 1]} : vector<24x128xf32> to vector<24x32xf32>
    %25 = arith.truncf %24 : vector<24x32xf32> to vector<24x32xbf16>
    %26 = vector.extract_strided_slice %21 {offsets = [0, 0], sizes = [24, 32], strides = [1, 1]} : vector<24x128xf32> to vector<24x32xf32>
    %27 = arith.truncf %26 : vector<24x32xf32> to vector<24x32xbf16>
    %cst_12 = arith.constant dense<0.000000e+00> : vector<24x24xf32>
    %28 = tpu.matmul %23, %25, %cst_12 {dimension_numbers = #tpu.dot_dimension_numbers<[1], [1], [0], [0], [0, 0, 1, 0], [], []>} : vector<24x32xbf16>, vector<24x32xbf16>, vector<24x24xf32> -> vector<24x24xf32>
    %cst_13 = arith.constant 0.176776692 : f32
    %29 = vector.broadcast %cst_13 : f32 to vector<24x24xf32>
    %30 = arith.mulf %28, %29 : vector<24x24xf32>
    %31 = arith.addf %30, %18 : vector<24x24xf32>
    %cst_14 = arith.constant dense<0xFF800000> : vector<24xf32>
    %32 = vector.multi_reduction <maximumf>, %31, %cst_14 [1] : vector<24x24xf32> to vector<24xf32>
    %33 = vector.shape_cast %32 : vector<24xf32> to vector<24x1xf32>
    %34 = vector.broadcast %33 : vector<24x1xf32> to vector<24x24xf32>
    %35 = arith.subf %31, %34 : vector<24x24xf32>
    %36 = math.exp %35 : vector<24x24xf32>
    %cst_15 = arith.constant dense<0.000000e+00> : vector<24xf32>
    %37 = vector.multi_reduction <add>, %36, %cst_15 [1] : vector<24x24xf32> to vector<24xf32>
    %38 = vector.shape_cast %37 : vector<24xf32> to vector<24x1xf32>
    %39 = vector.broadcast %38 : vector<24x1xf32> to vector<24x24xf32>
    %40 = arith.divf %36, %39 : vector<24x24xf32>
    %41 = arith.truncf %40 : vector<24x24xf32> to vector<24x24xbf16>
    %cst_16 = arith.constant dense<0.000000e+00> : vector<24x32xf32>
    %42 = tpu.matmul %41, %27, %cst_16 {dimension_numbers = #tpu.dot_dimension_numbers<[1], [0], [0], [1], [0, 0, 1, 1], [], []>} : vector<24x24xbf16>, vector<24x32xbf16>, vector<24x32xf32> -> vector<24x32xf32>
    %43 = vector.extract_strided_slice %19 {offsets = [0, 32], sizes = [24, 32], strides = [1, 1]} : vector<24x128xf32> to vector<24x32xf32>
    %44 = arith.truncf %43 : vector<24x32xf32> to vector<24x32xbf16>
    %45 = vector.extract_strided_slice %20 {offsets = [0, 32], sizes = [24, 32], strides = [1, 1]} : vector<24x128xf32> to vector<24x32xf32>
    %46 = arith.truncf %45 : vector<24x32xf32> to vector<24x32xbf16>
    %47 = vector.extract_strided_slice %21 {offsets = [0, 32], sizes = [24, 32], strides = [1, 1]} : vector<24x128xf32> to vector<24x32xf32>
    %48 = arith.truncf %47 : vector<24x32xf32> to vector<24x32xbf16>
    %cst_17 = arith.constant dense<0.000000e+00> : vector<24x24xf32>
    %49 = tpu.matmul %44, %46, %cst_17 {dimension_numbers = #tpu.dot_dimension_numbers<[1], [1], [0], [0], [0, 0, 1, 0], [], []>} : vector<24x32xbf16>, vector<24x32xbf16>, vector<24x24xf32> -> vector<24x24xf32>
    %cst_18 = arith.constant 0.176776692 : f32
    %50 = vector.broadcast %cst_18 : f32 to vector<24x24xf32>
    %51 = arith.mulf %49, %50 : vector<24x24xf32>
    %52 = arith.addf %51, %18 : vector<24x24xf32>
    %cst_19 = arith.constant dense<0xFF800000> : vector<24xf32>
    %53 = vector.multi_reduction <maximumf>, %52, %cst_19 [1] : vector<24x24xf32> to vector<24xf32>
    %54 = vector.shape_cast %53 : vector<24xf32> to vector<24x1xf32>
    %55 = vector.broadcast %54 : vector<24x1xf32> to vector<24x24xf32>
    %56 = arith.subf %52, %55 : vector<24x24xf32>
    %57 = math.exp %56 : vector<24x24xf32>
    %cst_20 = arith.constant dense<0.000000e+00> : vector<24xf32>
    %58 = vector.multi_reduction <add>, %57, %cst_20 [1] : vector<24x24xf32> to vector<24xf32>
    %59 = vector.shape_cast %58 : vector<24xf32> to vector<24x1xf32>
    %60 = vector.broadcast %59 : vector<24x1xf32> to vector<24x24xf32>
    %61 = arith.divf %57, %60 : vector<24x24xf32>
    %62 = arith.truncf %61 : vector<24x24xf32> to vector<24x24xbf16>
    %cst_21 = arith.constant dense<0.000000e+00> : vector<24x32xf32>
    %63 = tpu.matmul %62, %48, %cst_21 {dimension_numbers = #tpu.dot_dimension_numbers<[1], [0], [0], [1], [0, 0, 1, 1], [], []>} : vector<24x24xbf16>, vector<24x32xbf16>, vector<24x32xf32> -> vector<24x32xf32>
    %64 = vector.extract_strided_slice %19 {offsets = [0, 64], sizes = [24, 32], strides = [1, 1]} : vector<24x128xf32> to vector<24x32xf32>
    %65 = arith.truncf %64 : vector<24x32xf32> to vector<24x32xbf16>
    %66 = vector.extract_strided_slice %20 {offsets = [0, 64], sizes = [24, 32], strides = [1, 1]} : vector<24x128xf32> to vector<24x32xf32>
    %67 = arith.truncf %66 : vector<24x32xf32> to vector<24x32xbf16>
    %68 = vector.extract_strided_slice %21 {offsets = [0, 64], sizes = [24, 32], strides = [1, 1]} : vector<24x128xf32> to vector<24x32xf32>
    %69 = arith.truncf %68 : vector<24x32xf32> to vector<24x32xbf16>
    %cst_22 = arith.constant dense<0.000000e+00> : vector<24x24xf32>
    %70 = tpu.matmul %65, %67, %cst_22 {dimension_numbers = #tpu.dot_dimension_numbers<[1], [1], [0], [0], [0, 0, 1, 0], [], []>} : vector<24x32xbf16>, vector<24x32xbf16>, vector<24x24xf32> -> vector<24x24xf32>
    %cst_23 = arith.constant 0.176776692 : f32
    %71 = vector.broadcast %cst_23 : f32 to vector<24x24xf32>
    %72 = arith.mulf %70, %71 : vector<24x24xf32>
    %73 = arith.addf %72, %18 : vector<24x24xf32>
    %cst_24 = arith.constant dense<0xFF800000> : vector<24xf32>
    %74 = vector.multi_reduction <maximumf>, %73, %cst_24 [1] : vector<24x24xf32> to vector<24xf32>
    %75 = vector.shape_cast %74 : vector<24xf32> to vector<24x1xf32>
    %76 = vector.broadcast %75 : vector<24x1xf32> to vector<24x24xf32>
    %77 = arith.subf %73, %76 : vector<24x24xf32>
    %78 = math.exp %77 : vector<24x24xf32>
    %cst_25 = arith.constant dense<0.000000e+00> : vector<24xf32>
    %79 = vector.multi_reduction <add>, %78, %cst_25 [1] : vector<24x24xf32> to vector<24xf32>
    %80 = vector.shape_cast %79 : vector<24xf32> to vector<24x1xf32>
    %81 = vector.broadcast %80 : vector<24x1xf32> to vector<24x24xf32>
    %82 = arith.divf %78, %81 : vector<24x24xf32>
    %83 = arith.truncf %82 : vector<24x24xf32> to vector<24x24xbf16>
    %cst_26 = arith.constant dense<0.000000e+00> : vector<24x32xf32>
    %84 = tpu.matmul %83, %69, %cst_26 {dimension_numbers = #tpu.dot_dimension_numbers<[1], [0], [0], [1], [0, 0, 1, 1], [], []>} : vector<24x24xbf16>, vector<24x32xbf16>, vector<24x32xf32> -> vector<24x32xf32>
    %85 = vector.extract_strided_slice %19 {offsets = [0, 96], sizes = [24, 32], strides = [1, 1]} : vector<24x128xf32> to vector<24x32xf32>
    %86 = arith.truncf %85 : vector<24x32xf32> to vector<24x32xbf16>
    %87 = vector.extract_strided_slice %20 {offsets = [0, 96], sizes = [24, 32], strides = [1, 1]} : vector<24x128xf32> to vector<24x32xf32>
    %88 = arith.truncf %87 : vector<24x32xf32> to vector<24x32xbf16>
    %89 = vector.extract_strided_slice %21 {offsets = [0, 96], sizes = [24, 32], strides = [1, 1]} : vector<24x128xf32> to vector<24x32xf32>
    %90 = arith.truncf %89 : vector<24x32xf32> to vector<24x32xbf16>
    %cst_27 = arith.constant dense<0.000000e+00> : vector<24x24xf32>
    %91 = tpu.matmul %86, %88, %cst_27 {dimension_numbers = #tpu.dot_dimension_numbers<[1], [1], [0], [0], [0, 0, 1, 0], [], []>} : vector<24x32xbf16>, vector<24x32xbf16>, vector<24x24xf32> -> vector<24x24xf32>
    %cst_28 = arith.constant 0.176776692 : f32
    %92 = vector.broadcast %cst_28 : f32 to vector<24x24xf32>
    %93 = arith.mulf %91, %92 : vector<24x24xf32>
    %94 = arith.addf %93, %18 : vector<24x24xf32>
    %cst_29 = arith.constant dense<0xFF800000> : vector<24xf32>
    %95 = vector.multi_reduction <maximumf>, %94, %cst_29 [1] : vector<24x24xf32> to vector<24xf32>
    %96 = vector.shape_cast %95 : vector<24xf32> to vector<24x1xf32>
    %97 = vector.broadcast %96 : vector<24x1xf32> to vector<24x24xf32>
    %98 = arith.subf %94, %97 : vector<24x24xf32>
    %99 = math.exp %98 : vector<24x24xf32>
    %cst_30 = arith.constant dense<0.000000e+00> : vector<24xf32>
    %100 = vector.multi_reduction <add>, %99, %cst_30 [1] : vector<24x24xf32> to vector<24xf32>
    %101 = vector.shape_cast %100 : vector<24xf32> to vector<24x1xf32>
    %102 = vector.broadcast %101 : vector<24x1xf32> to vector<24x24xf32>
    %103 = arith.divf %99, %102 : vector<24x24xf32>
    %104 = arith.truncf %103 : vector<24x24xf32> to vector<24x24xbf16>
    %cst_31 = arith.constant dense<0.000000e+00> : vector<24x32xf32>
    %105 = tpu.matmul %104, %90, %cst_31 {dimension_numbers = #tpu.dot_dimension_numbers<[1], [0], [0], [1], [0, 0, 1, 1], [], []>} : vector<24x24xbf16>, vector<24x32xbf16>, vector<24x32xf32> -> vector<24x32xf32>
    %106 = tpu.concatenate %42, %63, %84, %105 in 1 : vector<24x32xf32>, vector<24x32xf32>, vector<24x32xf32>, vector<24x32xf32> -> vector<24x128xf32>
    %107 = arith.truncf %106 : vector<24x128xf32> to vector<24x128xbf16>
    %c0_32 = arith.constant 0 : index
    %c0_33 = arith.constant 0 : index
    %108 = vector.load %arg5[%c0_32, %c0_33] : memref<128x128xbf16, #tpu.memory_space<vmem>>, vector<128x128xbf16>
    %cst_34 = arith.constant dense<0.000000e+00> : vector<24x128xf32>
    %109 = tpu.matmul %107, %108, %cst_34 {dimension_numbers = #tpu.dot_dimension_numbers<[1], [0], [0], [1], [0, 0, 1, 1], [], []>} : vector<24x128xbf16>, vector<128x128xbf16>, vector<24x128xf32> -> vector<24x128xf32>
    %c0_35 = arith.constant 0 : index
    %c0_36 = arith.constant 0 : index
    %110 = vector.load %arg6[%c0_35, %c0_36] : memref<1x128xf32, #tpu.memory_space<vmem>>, vector<1x128xf32>
    %111 = vector.broadcast %110 : vector<1x128xf32> to vector<24x128xf32>
    %112 = arith.addf %109, %111 : vector<24x128xf32>
    %113 = arith.extf %1 : vector<24x128xbf16> to vector<24x128xf32>
    %114 = arith.addf %112, %113 : vector<24x128xf32>
    %cst_37 = arith.constant dense<0.000000e+00> : vector<24xf32>
    %115 = vector.multi_reduction <add>, %114, %cst_37 [1] : vector<24x128xf32> to vector<24xf32>
    %116 = vector.shape_cast %115 : vector<24xf32> to vector<24x1xf32>
    %cst_38 = arith.constant 1.280000e+02 : f32
    %117 = vector.broadcast %cst_38 : f32 to vector<24x1xf32>
    %118 = arith.divf %116, %117 : vector<24x1xf32>
    %119 = vector.broadcast %118 : vector<24x1xf32> to vector<24x128xf32>
    %120 = arith.subf %114, %119 : vector<24x128xf32>
    %121 = arith.mulf %120, %120 : vector<24x128xf32>
    %cst_39 = arith.constant dense<0.000000e+00> : vector<24xf32>
    %122 = vector.multi_reduction <add>, %121, %cst_39 [1] : vector<24x128xf32> to vector<24xf32>
    %123 = vector.shape_cast %122 : vector<24xf32> to vector<24x1xf32>
    %cst_40 = arith.constant 1.280000e+02 : f32
    %124 = vector.broadcast %cst_40 : f32 to vector<24x1xf32>
    %125 = arith.divf %123, %124 : vector<24x1xf32>
    %126 = vector.broadcast %118 : vector<24x1xf32> to vector<24x128xf32>
    %127 = arith.subf %114, %126 : vector<24x128xf32>
    %cst_41 = arith.constant 9.99999974E-6 : f32
    %128 = vector.broadcast %cst_41 : f32 to vector<24x1xf32>
    %129 = arith.addf %125, %128 : vector<24x1xf32>
    %130 = math.rsqrt %129 : vector<24x1xf32>
    %131 = vector.broadcast %130 : vector<24x1xf32> to vector<24x128xf32>
    %132 = arith.mulf %127, %131 : vector<24x128xf32>
    %c0_42 = arith.constant 0 : index
    %c0_43 = arith.constant 0 : index
    %133 = vector.load %arg7[%c0_42, %c0_43] : memref<1x128xf32, #tpu.memory_space<vmem>>, vector<1x128xf32>
    %134 = vector.broadcast %133 : vector<1x128xf32> to vector<24x128xf32>
    %135 = arith.mulf %132, %134 : vector<24x128xf32>
    %c0_44 = arith.constant 0 : index
    %c0_45 = arith.constant 0 : index
    %136 = vector.load %arg8[%c0_44, %c0_45] : memref<1x128xf32, #tpu.memory_space<vmem>>, vector<1x128xf32>
    %137 = vector.broadcast %136 : vector<1x128xf32> to vector<24x128xf32>
    %138 = arith.addf %135, %137 : vector<24x128xf32>
    %139 = arith.truncf %138 : vector<24x128xf32> to vector<24x128xbf16>
    %c0_46 = arith.constant 0 : index
    %c0_47 = arith.constant 0 : index
    %c0_48 = arith.constant 0 : index
    %140 = vector.load %arg9[%c0_46, %c0_47, %c0_48] : memref<1x24x128xbf16, #tpu.memory_space<vmem>>, vector<1x24x128xbf16>
    %141 = vector.shape_cast %140 : vector<1x24x128xbf16> to vector<24x128xbf16>
    %142 = vector.shape_cast %139 : vector<24x128xbf16> to vector<1x24x128xbf16>
    tpu.vector_store %arg9[%c0_46, %c0_47, %c0_48], %142 {strides = array<i32>} : memref<1x24x128xbf16, #tpu.memory_space<vmem>>, vector<1x24x128xbf16>,
    return
  }
  func.func @transform_0(%arg0: i32) -> (i32, i32, i32) {
    %c0_i32 = arith.constant 0 : i32
    %c0_i32_0 = arith.constant 0 : i32
    %c0_i32_1 = arith.constant 0 : i32
    return %arg0, %c0_i32, %c0_i32_0 : i32, i32, i32
  }
  func.func @transform_1(%arg0: i32) -> (i32, i32, i32) {
    %c0_i32 = arith.constant 0 : i32
    %c0_i32_0 = arith.constant 0 : i32
    %c0_i32_1 = arith.constant 0 : i32
    return %arg0, %c0_i32, %c0_i32_0 : i32, i32, i32
  }
  func.func @transform_2(%arg0: i32) -> (i32, i32) {
    %c0_i32 = arith.constant 0 : i32
    %c0_i32_0 = arith.constant 0 : i32
    %c0_i32_1 = arith.constant 0 : i32
    return %c0_i32, %c0_i32_0 : i32, i32
  }
  func.func @transform_3(%arg0: i32) -> (i32, i32) {
    %c0_i32 = arith.constant 0 : i32
    %c0_i32_0 = arith.constant 0 : i32
    %c0_i32_1 = arith.constant 0 : i32
    return %c0_i32, %c0_i32_0 : i32, i32
  }
  func.func @transform_4(%arg0: i32) -> (i32, i32) {
    %c0_i32 = arith.constant 0 : i32
    %c0_i32_0 = arith.constant 0 : i32
    %c0_i32_1 = arith.constant 0 : i32
    return %c0_i32, %c0_i32_0 : i32, i32
  }
  func.func @transform_5(%arg0: i32) -> (i32, i32) {
    %c0_i32 = arith.constant 0 : i32
    %c0_i32_0 = arith.constant 0 : i32
    %c0_i32_1 = arith.constant 0 : i32
    return %c0_i32, %c0_i32_0 : i32, i32
  }
  func.func @transform_6(%arg0: i32) -> (i32, i32) {
    %c0_i32 = arith.constant 0 : i32
    %c0_i32_0 = arith.constant 0 : i32
    %c0_i32_1 = arith.constant 0 : i32
    return %c0_i32, %c0_i32_0 : i32, i32
  }
  func.func @transform_7(%arg0: i32) -> (i32, i32) {
    %c0_i32 = arith.constant 0 : i32
    %c0_i32_0 = arith.constant 0 : i32
    %c0_i32_1 = arith.constant 0 : i32
    return %c0_i32, %c0_i32_0 : i32, i32
  }
  func.func @transform_8(%arg0: i32) -> (i32, i32, i32) {
    %c0_i32 = arith.constant 0 : i32
    %c0_i32_0 = arith.constant 0 : i32
    %c0_i32_1 = arith.constant 0 : i32
    return %arg0, %c0_i32, %c0_i32_0 : i32, i32, i32
  }
}

module attributes {stable_mosaic.version = 11 : i64} {
  func.func @_ffn_ln_kernel(%arg0: i32, %arg1: memref<48x128xbf16, #tpu.memory_space<vmem>>, %arg2: memref<128x256xbf16, #tpu.memory_space<vmem>>, %arg3: memref<1x256xf32, #tpu.memory_space<vmem>>, %arg4: memref<256x128xbf16, #tpu.memory_space<vmem>>, %arg5: memref<1x128xf32, #tpu.memory_space<vmem>>, %arg6: memref<1x128xf32, #tpu.memory_space<vmem>>, %arg7: memref<1x128xf32, #tpu.memory_space<vmem>>, %arg8: memref<48x128xbf16, #tpu.memory_space<vmem>>) attributes {dimension_semantics = [#tpu.dimension_semantics<parallel>], iteration_bounds = array<i64: 1>, scalar_prefetch = 0 : i64, scratch_operands = 0 : i64, tpu.core_type = #tpu.core_type<tc>, window_params = [{transform_indices = @transform_0, window_bounds = array<i64: 48, 128>}, {pipeline_mode = #tpu.pipeline_mode<synchronous>, transform_indices = @transform_1, window_bounds = array<i64: 128, 256>}, {pipeline_mode = #tpu.pipeline_mode<synchronous>, transform_indices = @transform_2, window_bounds = array<i64: 1, 256>}, {pipeline_mode = #tpu.pipeline_mode<synchronous>, transform_indices = @transform_3, window_bounds = array<i64: 256, 128>}, {pipeline_mode = #tpu.pipeline_mode<synchronous>, transform_indices = @transform_4, window_bounds = array<i64: 1, 128>}, {pipeline_mode = #tpu.pipeline_mode<synchronous>, transform_indices = @transform_5, window_bounds = array<i64: 1, 128>}, {pipeline_mode = #tpu.pipeline_mode<synchronous>, transform_indices = @transform_6, window_bounds = array<i64: 1, 128>}, {transform_indices = @transform_7, window_bounds = array<i64: 48, 128>}]} {
    %c0 = arith.constant 0 : index
    %c0_0 = arith.constant 0 : index
    %0 = vector.load %arg1[%c0, %c0_0] : memref<48x128xbf16, #tpu.memory_space<vmem>>, vector<48x128xbf16>
    %c0_1 = arith.constant 0 : index
    %c0_2 = arith.constant 0 : index
    %1 = vector.load %arg2[%c0_1, %c0_2] : memref<128x256xbf16, #tpu.memory_space<vmem>>, vector<128x256xbf16>
    %cst = arith.constant dense<0.000000e+00> : vector<48x256xf32>
    %2 = tpu.matmul %0, %1, %cst {dimension_numbers = #tpu.dot_dimension_numbers<[1], [0], [0], [1], [0, 0, 1, 1], [], []>} : vector<48x128xbf16>, vector<128x256xbf16>, vector<48x256xf32> -> vector<48x256xf32>
    %c0_3 = arith.constant 0 : index
    %c0_4 = arith.constant 0 : index
    %3 = vector.load %arg3[%c0_3, %c0_4] : memref<1x256xf32, #tpu.memory_space<vmem>>, vector<1x256xf32>
    %4 = vector.broadcast %3 : vector<1x256xf32> to vector<48x256xf32>
    %5 = arith.addf %2, %4 : vector<48x256xf32>
    %6 = arith.mulf %5, %5 : vector<48x256xf32>
    %7 = arith.mulf %5, %6 : vector<48x256xf32>
    %cst_5 = arith.constant 4.471500e-02 : f32
    %8 = vector.broadcast %cst_5 : f32 to vector<48x256xf32>
    %9 = arith.mulf %8, %7 : vector<48x256xf32>
    %10 = arith.addf %5, %9 : vector<48x256xf32>
    %cst_6 = arith.constant 0.797884583 : f32
    %11 = vector.broadcast %cst_6 : f32 to vector<48x256xf32>
    %12 = arith.mulf %11, %10 : vector<48x256xf32>
    %13 = math.tanh %12 : vector<48x256xf32>
    %cst_7 = arith.constant 1.000000e+00 : f32
    %14 = vector.broadcast %cst_7 : f32 to vector<48x256xf32>
    %15 = arith.addf %14, %13 : vector<48x256xf32>
    %cst_8 = arith.constant 5.000000e-01 : f32
    %16 = vector.broadcast %cst_8 : f32 to vector<48x256xf32>
    %17 = arith.mulf %16, %15 : vector<48x256xf32>
    %18 = arith.mulf %5, %17 : vector<48x256xf32>
    %19 = arith.truncf %18 : vector<48x256xf32> to vector<48x256xbf16>
    %c0_9 = arith.constant 0 : index
    %c0_10 = arith.constant 0 : index
    %20 = vector.load %arg4[%c0_9, %c0_10] : memref<256x128xbf16, #tpu.memory_space<vmem>>, vector<256x128xbf16>
    %cst_11 = arith.constant dense<0.000000e+00> : vector<48x128xf32>
    %21 = tpu.matmul %19, %20, %cst_11 {dimension_numbers = #tpu.dot_dimension_numbers<[1], [0], [0], [1], [0, 0, 1, 1], [], []>} : vector<48x256xbf16>, vector<256x128xbf16>, vector<48x128xf32> -> vector<48x128xf32>
    %c0_12 = arith.constant 0 : index
    %c0_13 = arith.constant 0 : index
    %22 = vector.load %arg5[%c0_12, %c0_13] : memref<1x128xf32, #tpu.memory_space<vmem>>, vector<1x128xf32>
    %23 = vector.broadcast %22 : vector<1x128xf32> to vector<48x128xf32>
    %24 = arith.addf %21, %23 : vector<48x128xf32>
    %25 = arith.extf %0 : vector<48x128xbf16> to vector<48x128xf32>
    %26 = arith.addf %24, %25 : vector<48x128xf32>
    %cst_14 = arith.constant dense<0.000000e+00> : vector<48xf32>
    %27 = vector.multi_reduction <add>, %26, %cst_14 [1] : vector<48x128xf32> to vector<48xf32>
    %28 = vector.shape_cast %27 : vector<48xf32> to vector<48x1xf32>
    %cst_15 = arith.constant 1.280000e+02 : f32
    %29 = vector.broadcast %cst_15 : f32 to vector<48x1xf32>
    %30 = arith.divf %28, %29 : vector<48x1xf32>
    %31 = vector.broadcast %30 : vector<48x1xf32> to vector<48x128xf32>
    %32 = arith.subf %26, %31 : vector<48x128xf32>
    %33 = arith.mulf %32, %32 : vector<48x128xf32>
    %cst_16 = arith.constant dense<0.000000e+00> : vector<48xf32>
    %34 = vector.multi_reduction <add>, %33, %cst_16 [1] : vector<48x128xf32> to vector<48xf32>
    %35 = vector.shape_cast %34 : vector<48xf32> to vector<48x1xf32>
    %cst_17 = arith.constant 1.280000e+02 : f32
    %36 = vector.broadcast %cst_17 : f32 to vector<48x1xf32>
    %37 = arith.divf %35, %36 : vector<48x1xf32>
    %38 = vector.broadcast %30 : vector<48x1xf32> to vector<48x128xf32>
    %39 = arith.subf %26, %38 : vector<48x128xf32>
    %cst_18 = arith.constant 9.99999974E-6 : f32
    %40 = vector.broadcast %cst_18 : f32 to vector<48x1xf32>
    %41 = arith.addf %37, %40 : vector<48x1xf32>
    %42 = math.rsqrt %41 : vector<48x1xf32>
    %43 = vector.broadcast %42 : vector<48x1xf32> to vector<48x128xf32>
    %44 = arith.mulf %39, %43 : vector<48x128xf32>
    %c0_19 = arith.constant 0 : index
    %c0_20 = arith.constant 0 : index
    %45 = vector.load %arg6[%c0_19, %c0_20] : memref<1x128xf32, #tpu.memory_space<vmem>>, vector<1x128xf32>
    %46 = vector.broadcast %45 : vector<1x128xf32> to vector<48x128xf32>
    %47 = arith.mulf %44, %46 : vector<48x128xf32>
    %c0_21 = arith.constant 0 : index
    %c0_22 = arith.constant 0 : index
    %48 = vector.load %arg7[%c0_21, %c0_22] : memref<1x128xf32, #tpu.memory_space<vmem>>, vector<1x128xf32>
    %49 = vector.broadcast %48 : vector<1x128xf32> to vector<48x128xf32>
    %50 = arith.addf %47, %49 : vector<48x128xf32>
    %51 = arith.truncf %50 : vector<48x128xf32> to vector<48x128xbf16>
    %c0_23 = arith.constant 0 : index
    %c0_24 = arith.constant 0 : index
    %52 = vector.load %arg8[%c0_23, %c0_24] : memref<48x128xbf16, #tpu.memory_space<vmem>>, vector<48x128xbf16>
    tpu.vector_store %arg8[%c0_23, %c0_24], %51 {strides = array<i32>} : memref<48x128xbf16, #tpu.memory_space<vmem>>, vector<48x128xbf16>,
    return
  }
  func.func @transform_0(%arg0: i32) -> (i32, i32) {
    %c0_i32 = arith.constant 0 : i32
    %c0_i32_0 = arith.constant 0 : i32
    return %arg0, %c0_i32 : i32, i32
  }
  func.func @transform_1(%arg0: i32) -> (i32, i32) {
    %c0_i32 = arith.constant 0 : i32
    %c0_i32_0 = arith.constant 0 : i32
    %c0_i32_1 = arith.constant 0 : i32
    return %c0_i32, %c0_i32_0 : i32, i32
  }
  func.func @transform_2(%arg0: i32) -> (i32, i32) {
    %c0_i32 = arith.constant 0 : i32
    %c0_i32_0 = arith.constant 0 : i32
    %c0_i32_1 = arith.constant 0 : i32
    return %c0_i32, %c0_i32_0 : i32, i32
  }
  func.func @transform_3(%arg0: i32) -> (i32, i32) {
    %c0_i32 = arith.constant 0 : i32
    %c0_i32_0 = arith.constant 0 : i32
    %c0_i32_1 = arith.constant 0 : i32
    return %c0_i32, %c0_i32_0 : i32, i32
  }
  func.func @transform_4(%arg0: i32) -> (i32, i32) {
    %c0_i32 = arith.constant 0 : i32
    %c0_i32_0 = arith.constant 0 : i32
    %c0_i32_1 = arith.constant 0 : i32
    return %c0_i32, %c0_i32_0 : i32, i32
  }
  func.func @transform_5(%arg0: i32) -> (i32, i32) {
    %c0_i32 = arith.constant 0 : i32
    %c0_i32_0 = arith.constant 0 : i32
    %c0_i32_1 = arith.constant 0 : i32
    return %c0_i32, %c0_i32_0 : i32, i32
  }
  func.func @transform_6(%arg0: i32) -> (i32, i32) {
    %c0_i32 = arith.constant 0 : i32
    %c0_i32_0 = arith.constant 0 : i32
    %c0_i32_1 = arith.constant 0 : i32
    return %c0_i32, %c0_i32_0 : i32, i32
  }
  func.func @transform_7(%arg0: i32) -> (i32, i32) {
    %c0_i32 = arith.constant 0 : i32
    %c0_i32_0 = arith.constant 0 : i32
    return %arg0, %c0_i32 : i32, i32
  }
}

module attributes {stable_mosaic.version = 11 : i64} {
  func.func @_lmhead_xent_kernel(%arg0: i32, %arg1: i32, %arg2: memref<14x128xbf16, #tpu.memory_space<vmem>>, %arg3: memref<1x128xf32, #tpu.memory_space<vmem>>, %arg4: memref<1x128xf32, #tpu.memory_space<vmem>>, %arg5: memref<128x128xbf16, #tpu.memory_space<vmem>>, %arg6: memref<14x1xi32, #tpu.memory_space<vmem>>, %arg7: memref<14x1xf32, #tpu.memory_space<vmem>>, %arg8: memref<1x1xf32, #tpu.memory_space<vmem>>, %arg9: memref<14x128xbf16, #tpu.memory_space<vmem>>, %arg10: memref<14x1xf32, #tpu.memory_space<vmem>>, %arg11: memref<14x1xf32, #tpu.memory_space<vmem>>, %arg12: memref<14x1xf32, #tpu.memory_space<vmem>>, %arg13: memref<1x1xf32, #tpu.memory_space<vmem>>, %arg14: memref<1x1xf32, #tpu.memory_space<vmem>>) attributes {dimension_semantics = [#tpu.dimension_semantics<arbitrary>, #tpu.dimension_semantics<arbitrary>], iteration_bounds = array<i64: 1, 1>, scalar_prefetch = 0 : i64, scratch_operands = 6 : i64, tpu.core_type = #tpu.core_type<tc>, window_params = [{transform_indices = @transform_0, window_bounds = array<i64: 14, 128>}, {pipeline_mode = #tpu.pipeline_mode<synchronous>, transform_indices = @transform_1, window_bounds = array<i64: 1, 128>}, {pipeline_mode = #tpu.pipeline_mode<synchronous>, transform_indices = @transform_2, window_bounds = array<i64: 1, 128>}, {transform_indices = @transform_3, window_bounds = array<i64: 128, 128>}, {transform_indices = @transform_4, window_bounds = array<i64: 14, 1>}, {transform_indices = @transform_5, window_bounds = array<i64: 14, 1>}, {pipeline_mode = #tpu.pipeline_mode<synchronous>, transform_indices = @transform_6, window_bounds = array<i64: 1, 1>}]} {
    %c0_i32 = arith.constant 0 : i32
    %0 = arith.cmpi eq, %arg0, %c0_i32 : i32
    %c0_i32_0 = arith.constant 0 : i32
    %1 = arith.cmpi eq, %arg1, %c0_i32_0 : i32
    %2 = arith.andi %0, %1 : i1
    %3 = arith.extui %2 : i1 to i32
    %c0_i32_1 = arith.constant 0 : i32
    %4 = arith.cmpi ne, %3, %c0_i32_1 : i32
    scf.if %4 {
      %cst_30 = arith.constant 0.000000e+00 : f32
      %49 = vector.broadcast %cst_30 : f32 to vector<1x1xf32>
      %c0_31 = arith.constant 0 : index
      %c0_32 = arith.constant 0 : index
      %50 = vector.load %arg13[%c0_31, %c0_32] : memref<1x1xf32, #tpu.memory_space<vmem>>, vector<1x1xf32>
      tpu.vector_store %arg13[%c0_31, %c0_32], %49 {strides = array<i32>} : memref<1x1xf32, #tpu.memory_space<vmem>>, vector<1x1xf32>,
      %cst_33 = arith.constant 0.000000e+00 : f32
      %51 = vector.broadcast %cst_33 : f32 to vector<1x1xf32>
      %c0_34 = arith.constant 0 : index
      %c0_35 = arith.constant 0 : index
      %52 = vector.load %arg14[%c0_34, %c0_35] : memref<1x1xf32, #tpu.memory_space<vmem>>, vector<1x1xf32>
      tpu.vector_store %arg14[%c0_34, %c0_35], %51 {strides = array<i32>} : memref<1x1xf32, #tpu.memory_space<vmem>>, vector<1x1xf32>,
    } else {
    }
    %c0_i32_2 = arith.constant 0 : i32
    %5 = arith.cmpi eq, %arg1, %c0_i32_2 : i32
    %6 = arith.extui %5 : i1 to i32
    %c0_i32_3 = arith.constant 0 : i32
    %7 = arith.cmpi ne, %6, %c0_i32_3 : i32
    scf.if %7 {
      %c0_30 = arith.constant 0 : index
      %c0_31 = arith.constant 0 : index
      %49 = vector.load %arg2[%c0_30, %c0_31] : memref<14x128xbf16, #tpu.memory_space<vmem>>, vector<14x128xbf16>
      %50 = arith.extf %49 : vector<14x128xbf16> to vector<14x128xf32>
      %cst_32 = arith.constant dense<0.000000e+00> : vector<14xf32>
      %51 = vector.multi_reduction <add>, %50, %cst_32 [1] : vector<14x128xf32> to vector<14xf32>
      %52 = vector.shape_cast %51 : vector<14xf32> to vector<14x1xf32>
      %cst_33 = arith.constant 1.280000e+02 : f32
      %53 = vector.broadcast %cst_33 : f32 to vector<14x1xf32>
      %54 = arith.divf %52, %53 : vector<14x1xf32>
      %55 = vector.broadcast %54 : vector<14x1xf32> to vector<14x128xf32>
      %56 = arith.subf %50, %55 : vector<14x128xf32>
      %57 = arith.mulf %56, %56 : vector<14x128xf32>
      %cst_34 = arith.constant dense<0.000000e+00> : vector<14xf32>
      %58 = vector.multi_reduction <add>, %57, %cst_34 [1] : vector<14x128xf32> to vector<14xf32>
      %59 = vector.shape_cast %58 : vector<14xf32> to vector<14x1xf32>
      %cst_35 = arith.constant 1.280000e+02 : f32
      %60 = vector.broadcast %cst_35 : f32 to vector<14x1xf32>
      %61 = arith.divf %59, %60 : vector<14x1xf32>
      %62 = vector.broadcast %54 : vector<14x1xf32> to vector<14x128xf32>
      %63 = arith.subf %50, %62 : vector<14x128xf32>
      %cst_36 = arith.constant 9.99999974E-6 : f32
      %64 = vector.broadcast %cst_36 : f32 to vector<14x1xf32>
      %65 = arith.addf %61, %64 : vector<14x1xf32>
      %66 = math.rsqrt %65 : vector<14x1xf32>
      %67 = vector.broadcast %66 : vector<14x1xf32> to vector<14x128xf32>
      %68 = arith.mulf %63, %67 : vector<14x128xf32>
      %c0_37 = arith.constant 0 : index
      %c0_38 = arith.constant 0 : index
      %69 = vector.load %arg3[%c0_37, %c0_38] : memref<1x128xf32, #tpu.memory_space<vmem>>, vector<1x128xf32>
      %70 = vector.broadcast %69 : vector<1x128xf32> to vector<14x128xf32>
      %71 = arith.mulf %68, %70 : vector<14x128xf32>
      %c0_39 = arith.constant 0 : index
      %c0_40 = arith.constant 0 : index
      %72 = vector.load %arg4[%c0_39, %c0_40] : memref<1x128xf32, #tpu.memory_space<vmem>>, vector<1x128xf32>
      %73 = vector.broadcast %72 : vector<1x128xf32> to vector<14x128xf32>
      %74 = arith.addf %71, %73 : vector<14x128xf32>
      %75 = arith.truncf %74 : vector<14x128xf32> to vector<14x128xbf16>
      %c0_41 = arith.constant 0 : index
      %c0_42 = arith.constant 0 : index
      %76 = vector.load %arg9[%c0_41, %c0_42] : memref<14x128xbf16, #tpu.memory_space<vmem>>, vector<14x128xbf16>
      tpu.vector_store %arg9[%c0_41, %c0_42], %75 {strides = array<i32>} : memref<14x128xbf16, #tpu.memory_space<vmem>>, vector<14x128xbf16>,
      %cst_43 = arith.constant 0xFF800000 : f32
      %77 = vector.broadcast %cst_43 : f32 to vector<14x1xf32>
      %c0_44 = arith.constant 0 : index
      %c0_45 = arith.constant 0 : index
      %78 = vector.load %arg10[%c0_44, %c0_45] : memref<14x1xf32, #tpu.memory_space<vmem>>, vector<14x1xf32>
      tpu.vector_store %arg10[%c0_44, %c0_45], %77 {strides = array<i32>} : memref<14x1xf32, #tpu.memory_space<vmem>>, vector<14x1xf32>,
      %cst_46 = arith.constant 0.000000e+00 : f32
      %79 = vector.broadcast %cst_46 : f32 to vector<14x1xf32>
      %c0_47 = arith.constant 0 : index
      %c0_48 = arith.constant 0 : index
      %80 = vector.load %arg11[%c0_47, %c0_48] : memref<14x1xf32, #tpu.memory_space<vmem>>, vector<14x1xf32>
      tpu.vector_store %arg11[%c0_47, %c0_48], %79 {strides = array<i32>} : memref<14x1xf32, #tpu.memory_space<vmem>>, vector<14x1xf32>,
      %cst_49 = arith.constant 0.000000e+00 : f32
      %81 = vector.broadcast %cst_49 : f32 to vector<14x1xf32>
      %c0_50 = arith.constant 0 : index
      %c0_51 = arith.constant 0 : index
      %82 = vector.load %arg12[%c0_50, %c0_51] : memref<14x1xf32, #tpu.memory_space<vmem>>, vector<14x1xf32>
      tpu.vector_store %arg12[%c0_50, %c0_51], %81 {strides = array<i32>} : memref<14x1xf32, #tpu.memory_space<vmem>>, vector<14x1xf32>,
    } else {
    }
    %c0 = arith.constant 0 : index
    %c0_4 = arith.constant 0 : index
    %8 = vector.load %arg9[%c0, %c0_4] : memref<14x128xbf16, #tpu.memory_space<vmem>>, vector<14x128xbf16>
    %c0_5 = arith.constant 0 : index
    %c0_6 = arith.constant 0 : index
    %9 = vector.load %arg5[%c0_5, %c0_6] : memref<128x128xbf16, #tpu.memory_space<vmem>>, vector<128x128xbf16>
    %cst = arith.constant dense<0.000000e+00> : vector<14x128xf32>
    %10 = tpu.matmul %8, %9, %cst {dimension_numbers = #tpu.dot_dimension_numbers<[1], [1], [0], [0], [0, 0, 1, 0], [], []>} : vector<14x128xbf16>, vector<128x128xbf16>, vector<14x128xf32> -> vector<14x128xf32>
    %c0_7 = arith.constant 0 : index
    %c0_8 = arith.constant 0 : index
    %11 = vector.load %arg10[%c0_7, %c0_8] : memref<14x1xf32, #tpu.memory_space<vmem>>, vector<14x1xf32>
    %cst_9 = arith.constant dense<0xFF800000> : vector<14xf32>
    %12 = vector.multi_reduction <maximumf>, %10, %cst_9 [1] : vector<14x128xf32> to vector<14xf32>
    %13 = vector.shape_cast %12 : vector<14xf32> to vector<14x1xf32>
    %14 = arith.maximumf %11, %13 : vector<14x1xf32>
    %c0_10 = arith.constant 0 : index
    %c0_11 = arith.constant 0 : index
    %15 = vector.load %arg11[%c0_10, %c0_11] : memref<14x1xf32, #tpu.memory_space<vmem>>, vector<14x1xf32>
    %16 = arith.subf %11, %14 : vector<14x1xf32>
    %17 = math.exp %16 : vector<14x1xf32>
    %18 = arith.mulf %15, %17 : vector<14x1xf32>
    %19 = vector.broadcast %14 : vector<14x1xf32> to vector<14x128xf32>
    %20 = arith.subf %10, %19 : vector<14x128xf32>
    %21 = math.exp %20 : vector<14x128xf32>
    %cst_12 = arith.constant dense<0.000000e+00> : vector<14xf32>
    %22 = vector.multi_reduction <add>, %21, %cst_12 [1] : vector<14x128xf32> to vector<14xf32>
    %23 = vector.shape_cast %22 : vector<14xf32> to vector<14x1xf32>
    %24 = arith.addf %18, %23 : vector<14x1xf32>
    %c0_13 = arith.constant 0 : index
    %c0_14 = arith.constant 0 : index
    %25 = vector.load %arg11[%c0_13, %c0_14] : memref<14x1xf32, #tpu.memory_space<vmem>>, vector<14x1xf32>
    tpu.vector_store %arg11[%c0_13, %c0_14], %24 {strides = array<i32>} : memref<14x1xf32, #tpu.memory_space<vmem>>, vector<14x1xf32>,
    %c0_15 = arith.constant 0 : index
    %c0_16 = arith.constant 0 : index
    %26 = vector.load %arg10[%c0_15, %c0_16] : memref<14x1xf32, #tpu.memory_space<vmem>>, vector<14x1xf32>
    tpu.vector_store %arg10[%c0_15, %c0_16], %14 {strides = array<i32>} : memref<14x1xf32, #tpu.memory_space<vmem>>, vector<14x1xf32>,
    %27 = tpu.iota {dimensions = array<i32: 1>} : vector<14x128xi32>
    %c128_i32 = arith.constant 128 : i32
    %28 = arith.muli %arg1, %c128_i32 : i32
    %29 = vector.broadcast %28 : i32 to vector<14x128xi32>
    %30 = arith.addi %27, %29 : vector<14x128xi32>
    %c0_17 = arith.constant 0 : index
    %c0_18 = arith.constant 0 : index
    %31 = vector.load %arg12[%c0_17, %c0_18] : memref<14x1xf32, #tpu.memory_space<vmem>>, vector<14x1xf32>
    %c0_19 = arith.constant 0 : index
    %c0_20 = arith.constant 0 : index
    %32 = vector.load %arg6[%c0_19, %c0_20] : memref<14x1xi32, #tpu.memory_space<vmem>>, vector<14x1xi32>
    %33 = vector.broadcast %32 : vector<14x1xi32> to vector<14x128xi32>
    %34 = arith.cmpi eq, %30, %33 : vector<14x128xi32>
    %cst_21 = arith.constant 0.000000e+00 : f32
    %35 = vector.broadcast %cst_21 : f32 to vector<14x128xf32>
    %36 = arith.select %34, %10, %35 : vector<14x128xi1>, vector<14x128xf32>
    %cst_22 = arith.constant dense<0.000000e+00> : vector<14xf32>
    %37 = vector.multi_reduction <add>, %36, %cst_22 [1] : vector<14x128xf32> to vector<14xf32>
    %38 = vector.shape_cast %37 : vector<14xf32> to vector<14x1xf32>
    %39 = arith.addf %31, %38 : vector<14x1xf32>
    %c0_23 = arith.constant 0 : index
    %c0_24 = arith.constant 0 : index
    %40 = vector.load %arg12[%c0_23, %c0_24] : memref<14x1xf32, #tpu.memory_space<vmem>>, vector<14x1xf32>
    tpu.vector_store %arg12[%c0_23, %c0_24], %39 {strides = array<i32>} : memref<14x1xf32, #tpu.memory_space<vmem>>, vector<14x1xf32>,
    %c0_i32_25 = arith.constant 0 : i32
    %41 = arith.cmpi eq, %arg1, %c0_i32_25 : i32
    %42 = arith.extui %41 : i1 to i32
    %c0_i32_26 = arith.constant 0 : i32
    %43 = arith.cmpi ne, %42, %c0_i32_26 : i32
    scf.if %43 {
      %c0_30 = arith.constant 0 : index
      %c0_31 = arith.constant 0 : index
      %49 = vector.load %arg10[%c0_30, %c0_31] : memref<14x1xf32, #tpu.memory_space<vmem>>, vector<14x1xf32>
      %c0_32 = arith.constant 0 : index
      %c0_33 = arith.constant 0 : index
      %50 = vector.load %arg11[%c0_32, %c0_33] : memref<14x1xf32, #tpu.memory_space<vmem>>, vector<14x1xf32>
      %51 = math.log %50 : vector<14x1xf32>
      %52 = arith.addf %49, %51 : vector<14x1xf32>
      %c0_34 = arith.constant 0 : index
      %c0_35 = arith.constant 0 : index
      %53 = vector.load %arg12[%c0_34, %c0_35] : memref<14x1xf32, #tpu.memory_space<vmem>>, vector<14x1xf32>
      %54 = arith.subf %52, %53 : vector<14x1xf32>
      %c0_36 = arith.constant 0 : index
      %c0_37 = arith.constant 0 : index
      %55 = vector.load %arg7[%c0_36, %c0_37] : memref<14x1xf32, #tpu.memory_space<vmem>>, vector<14x1xf32>
      %c0_38 = arith.constant 0 : index
      %c0_39 = arith.constant 0 : index
      %56 = vector.load %arg13[%c0_38, %c0_39] : memref<1x1xf32, #tpu.memory_space<vmem>>, vector<1x1xf32>
      %57 = arith.mulf %54, %55 : vector<14x1xf32>
      %58 = vector.shape_cast %57 : vector<14x1xf32> to vector<1x14x1xf32>
      %cst_40 = arith.constant dense<0.000000e+00> : vector<1xf32>
      %59 = vector.multi_reduction <add>, %58, %cst_40 [1, 2] : vector<1x14x1xf32> to vector<1xf32>
      %60 = vector.shape_cast %59 : vector<1xf32> to vector<1x1x1xf32>
      %61 = vector.extract %60[0, 0, 0] : f32 from vector<1x1x1xf32>
      %62 = vector.broadcast %61 : f32 to vector<1x1xf32>
      %63 = arith.addf %56, %62 : vector<1x1xf32>
      %c0_41 = arith.constant 0 : index
      %c0_42 = arith.constant 0 : index
      %64 = vector.load %arg13[%c0_41, %c0_42] : memref<1x1xf32, #tpu.memory_space<vmem>>, vector<1x1xf32>
      tpu.vector_store %arg13[%c0_41, %c0_42], %63 {strides = array<i32>} : memref<1x1xf32, #tpu.memory_space<vmem>>, vector<1x1xf32>,
      %c0_43 = arith.constant 0 : index
      %c0_44 = arith.constant 0 : index
      %65 = vector.load %arg14[%c0_43, %c0_44] : memref<1x1xf32, #tpu.memory_space<vmem>>, vector<1x1xf32>
      %66 = vector.shape_cast %55 : vector<14x1xf32> to vector<1x14x1xf32>
      %cst_45 = arith.constant dense<0.000000e+00> : vector<1xf32>
      %67 = vector.multi_reduction <add>, %66, %cst_45 [1, 2] : vector<1x14x1xf32> to vector<1xf32>
      %68 = vector.shape_cast %67 : vector<1xf32> to vector<1x1x1xf32>
      %69 = vector.extract %68[0, 0, 0] : f32 from vector<1x1x1xf32>
      %70 = vector.broadcast %69 : f32 to vector<1x1xf32>
      %71 = arith.addf %65, %70 : vector<1x1xf32>
      %c0_46 = arith.constant 0 : index
      %c0_47 = arith.constant 0 : index
      %72 = vector.load %arg14[%c0_46, %c0_47] : memref<1x1xf32, #tpu.memory_space<vmem>>, vector<1x1xf32>
      tpu.vector_store %arg14[%c0_46, %c0_47], %71 {strides = array<i32>} : memref<1x1xf32, #tpu.memory_space<vmem>>, vector<1x1xf32>,
    } else {
    }
    %c0_i32_27 = arith.constant 0 : i32
    %44 = arith.cmpi eq, %arg0, %c0_i32_27 : i32
    %c0_i32_28 = arith.constant 0 : i32
    %45 = arith.cmpi eq, %arg1, %c0_i32_28 : i32
    %46 = arith.andi %44, %45 : i1
    %47 = arith.extui %46 : i1 to i32
    %c0_i32_29 = arith.constant 0 : i32
    %48 = arith.cmpi ne, %47, %c0_i32_29 : i32
    scf.if %48 {
      %c0_30 = arith.constant 0 : index
      %c0_31 = arith.constant 0 : index
      %49 = vector.load %arg13[%c0_30, %c0_31] : memref<1x1xf32, #tpu.memory_space<vmem>>, vector<1x1xf32>
      %c0_32 = arith.constant 0 : index
      %c0_33 = arith.constant 0 : index
      %50 = vector.load %arg14[%c0_32, %c0_33] : memref<1x1xf32, #tpu.memory_space<vmem>>, vector<1x1xf32>
      %cst_34 = arith.constant 1.000000e+00 : f32
      %51 = vector.broadcast %cst_34 : f32 to vector<1x1xf32>
      %52 = arith.maximumf %50, %51 : vector<1x1xf32>
      %53 = arith.divf %49, %52 : vector<1x1xf32>
      %c0_35 = arith.constant 0 : index
      %c0_36 = arith.constant 0 : index
      %54 = vector.load %arg8[%c0_35, %c0_36] : memref<1x1xf32, #tpu.memory_space<vmem>>, vector<1x1xf32>
      tpu.vector_store %arg8[%c0_35, %c0_36], %53 {strides = array<i32>} : memref<1x1xf32, #tpu.memory_space<vmem>>, vector<1x1xf32>,
    } else {
    }
    return
  }
  func.func @transform_0(%arg0: i32, %arg1: i32) -> (i32, i32) {
    %c0_i32 = arith.constant 0 : i32
    %c0_i32_0 = arith.constant 0 : i32
    return %arg0, %c0_i32 : i32, i32
  }
  func.func @transform_1(%arg0: i32, %arg1: i32) -> (i32, i32) {
    %c0_i32 = arith.constant 0 : i32
    %c0_i32_0 = arith.constant 0 : i32
    %c0_i32_1 = arith.constant 0 : i32
    return %c0_i32, %c0_i32_0 : i32, i32
  }
  func.func @transform_2(%arg0: i32, %arg1: i32) -> (i32, i32) {
    %c0_i32 = arith.constant 0 : i32
    %c0_i32_0 = arith.constant 0 : i32
    %c0_i32_1 = arith.constant 0 : i32
    return %c0_i32, %c0_i32_0 : i32, i32
  }
  func.func @transform_3(%arg0: i32, %arg1: i32) -> (i32, i32) {
    %c0_i32 = arith.constant 0 : i32
    %c0_i32_0 = arith.constant 0 : i32
    return %arg1, %c0_i32 : i32, i32
  }
  func.func @transform_4(%arg0: i32, %arg1: i32) -> (i32, i32) {
    %c0_i32 = arith.constant 0 : i32
    %c0_i32_0 = arith.constant 0 : i32
    return %arg0, %c0_i32 : i32, i32
  }
  func.func @transform_5(%arg0: i32, %arg1: i32) -> (i32, i32) {
    %c0_i32 = arith.constant 0 : i32
    %c0_i32_0 = arith.constant 0 : i32
    return %arg0, %c0_i32 : i32, i32
  }
  func.func @transform_6(%arg0: i32, %arg1: i32) -> (i32, i32) {
    %c0_i32 = arith.constant 0 : i32
    %c0_i32_0 = arith.constant 0 : i32
    %c0_i32_1 = arith.constant 0 : i32
    return %c0_i32, %c0_i32_0 : i32, i32
  }
}

</mosaic_0001>

<bundles_post_ra>
// kernel: vision_language_model_forward.11
= control target key start
LH: loop header
LB: loop body
LE: loop exit
PB: predicated region body
PF: predicated region fallthrough
CT: control target
= control target key end

     0   :  { %s442_s15 = smov 0   ;;  %s477_s0 = inlined_call_operand.vmem [shape: bf16[2,16,48], index: 0, kind: input, shape index: {}]   ;;  %s478_s1 = inlined_call_operand.vmem [shape: bf16[48,128], index: 1, kind: input, shape index: {}]   ;;  %s479_s2 = inlined_call_operand.vmem [shape: f32[1,128], index: 2, kind: input, shape index: {}]   ;;  %s480_s3 = inlined_call_operand.vmem [shape: f32[16,128], index: 3, kind: input, shape index: {}]   ;;  %s481_s4 = inlined_call_operand.vmem [shape: bf16[2,16,128], index: 4, kind: output, shape index: {}]  }
   0x1 LB: > { %s351_s16 = sadd.s32 4294967295, %s413_s15   ;;  %p355_p0 = scmp.ge.s32.totalorder %s413_s15, 1  ;;  %s413_s15 = sphi %s442_s15, %s14_s15  }
   0x2   : > { %p162_p1 = scmp.lt.s32.totalorder %s413_s15, 3 }
   0x4   : > { %p163_p2 = pnand %p355_p0, %p162_p1 }
   0x5   : > { %v403_v0 = vld [vmem:[%s478_s1] sm:$0xff] (!%p163_p2)   ;;  %v415_v1 = vmov (!%p163_p2), 0.0   ;;  %v404_v2 = vld [vmem:[%s478_s1 + $0x8] sm:$0xff] (!%p163_p2)   ;;  %vm416_vm0 = vmmov (!%p163_p2), 0   ;;  %p188_p3 = scmp.lt.s32.totalorder (!%p163_p2), %s351_s16, 1  ;;  %v405_v3 = vld [vmem:[%s478_s1 + $0x10] sm:$0xff] (!%p163_p2)  }
   0x6   : > { %166 = sbr.rel (%p163_p2) target bundleno = 239 (0xef), region = 36  ;;  %383 = vmatprep.subr.bf16.mxu0 (!%p163_p2), %v415_v1  ;;  %389 = vmatprep.mubr.msk.bf16.mxu0 (!%p163_p2), %vm416_vm0, %v415_v1  ;;  %vm237_vm1 = vcmask (!%p163_p2), 392192   ;;  %v360_v5 = vld [vmem:[%s479_s2] ss:$0 sm:$0xff] (!%p163_p2)  ;;  %v283_v11 = vld [vmem:[%s480_s3 + $0x8] sm:$0xff] (!%p163_p2) }
   0x7   : > { %384 = vmatpush3.bf16.msra.mxu0 (!%p163_p2), %v403_v0  ;;  %v282_v9 = vld [vmem:[%s480_s3] sm:$0xff] (!%p163_p2) }
   0x8   : > { %385 = vmatprep.subr.bf16.mxu0 (!%p163_p2), %v415_v1 }
   0xb   : > { %386 = vmatpush3.bf16.msra.mxu0 (!%p163_p2), %v404_v2 }
   0xc   : > { %387 = vmatprep.subr.bf16.mxu0 (!%p163_p2), %v415_v1 }
   0xd   : > { %s483_s16 = smov (!%p188_p3, %s351_s16), 1 }
   0xe   : > { %s370_s23 = sshll.u32 %s483_s16, 3 }
   0xf   : > { %s192_s26 = scalar_lea.vmem %s477_s0, %s370_s23  ;;  %388 = vmatpush3.bf16.msra.mxu0 %v405_v3  ;;  %s197_s9 = scalar_lea.vmem %s481_s4, %s370_s23 }
  0x10   : > { %v406_v4 = vld [vmem:[%s192_s26] sm:$0xff]  }
  0x12   : > { %390 = vmatmul.mubr.msk.bf16.vlgmr.msra.gmra.mrb[0].mxu0 %vm237_vm1, %v406_v4 }
  0xe5   : > { %v275_v6 = vpop.f32.mrb[0].mxu0 }
  0xe6   : > { %v276_v7 = vadd.f32 %v360_v5, %v275_v6  ;;  %v391_v8 = vpop.f32.mrb[1].mxu0 }
  0xe7   : > { %v278_v10 = vpop.f32.mrb[2].mxu0 }
  0xe8   : > { %v279_v12 = vadd.f32 %v360_v5, %v278_v10  ;;  %v392_v13 = vpop.f32.mrb[3].mxu0  ;;  %v284_v14 = vadd.f32 %v282_v9, %v276_v7 }
  0xea   : > { %v285_v15 = vadd.f32 %v283_v11, %v279_v12 }
  0xec   : > { %v377_v16 = vpack.c.bf16 %v285_v15, %v284_v14 }
  0xee   : > { %378 = vst [vmem:[%s197_s9] sm:$0xff] %v377_v16  }
  0xef PF: > { %s14_s15 = sadd.s32 1, %s413_s15  }
  0xf0   : > { %p11_p4 = scmp.ge.s32.totalorder %s14_s15, 4  }
  0xf2   :  { %13 = sbr.rel (!%p11_p4) target bundleno = 1 (0x1), region = 66 }

// kernel: vision_language_model_forward.14
= control target key start
LH: loop header
LB: loop body
LE: loop exit
PB: predicated region body
PF: predicated region fallthrough
CT: control target
= control target key end

     0   :  { %s189_s0 = inlined_call_operand.vmem [shape: bf16[32,128], index: 0, kind: input, shape index: {}]   ;;  %s190_s1 = inlined_call_operand.vmem [shape: f32[1,128], index: 1, kind: input, shape index: {}]   ;;  %s191_s2 = inlined_call_operand.vmem [shape: f32[1,128], index: 2, kind: input, shape index: {}]   ;;  %s192_s3 = inlined_call_operand.vmem [shape: bf16[32,128], index: 3, kind: output, shape index: {}]  }
   0x1   :  { %v124_v0 = vld [vmem:[%s189_s0] sm:$0xff]   ;;  %v141_v1 = vld [vmem:[%s189_s0 + $0x8] sm:$0xff]  }
   0x2   :  { %v125_v2 = vunpack.c.l.bf16 %v124_v0  ;;  %v129_v3 = vunpack.c.l.bf16 %v141_v1  ;;  %v126_v4 = vunpack.c.h.bf16 %v124_v0  ;;  %v130_v5 = vunpack.c.h.bf16 %v141_v1  ;;  %v113_v36 = vld [vmem:[%s190_s1] ss:$0 sm:$0xff] }
   0x3   :  { %v114_v41 = vld [vmem:[%s191_s2] ss:$0 sm:$0xff] }
   0x4   :  { %22 = vadd.xlane.f32.xlu0 %v125_v2  ;;  %26 = vadd.xlane.f32.xlu1 %v129_v3 }
   0x8   :  { %24 = vadd.xlane.f32.xlu0 %v126_v4  ;;  %28 = vadd.xlane.f32.xlu1 %v130_v5 }
  0x91   :  { %v23_v6 = vpop.xlane.xlu0 %22  ;;  %v27_v7 = vpop.xlane.xlu1 %26 }
  0x92   :  { %v31_v8 = vmul.f32 0.0078125, %v23_v6  ;;  %v33_v9 = vmul.f32 0.0078125, %v27_v7 }
  0x94   :  { %v35_v10 = vsub.f32 %v125_v2, %v31_v8  ;;  %v37_v11 = vsub.f32 %v129_v3, %v33_v9 }
  0x95   :  { %v25_v12 = vpop.xlane.xlu0 %24  ;;  %v29_v13 = vpop.xlane.xlu1 %28 }
  0x96   :  { %v32_v14 = vmul.f32 0.0078125, %v25_v12  ;;  %v39_v15 = vmul.f32 %v35_v10, %v35_v10  ;;  %v34_v16 = vmul.f32 0.0078125, %v29_v13  ;;  %v41_v19 = vmul.f32 %v37_v11, %v37_v11 }
  0x98   :  { %v36_v17 = vsub.f32 %v126_v4, %v32_v14  ;;  %43 = vadd.xlane.f32.xlu0 %v39_v15  ;;  %v38_v18 = vsub.f32 %v130_v5, %v34_v16 }
  0x9a   :  { %v40_v20 = vmul.f32 %v36_v17, %v36_v17  ;;  %v42_v21 = vmul.f32 %v38_v18, %v38_v18 }
  0x9c   :  { %47 = vadd.xlane.f32.xlu0 %v41_v19  ;;  %45 = vadd.xlane.f32.xlu1 %v40_v20 }
  0xa0   :  { %49 = vadd.xlane.f32.xlu1 %v42_v21 }
 0x125   :  { %v44_v22 = vpop.xlane.xlu0 %43 }
 0x126   :  { %v51_v23 = vmul.f32 0.0078125, %v44_v22 }
 0x128   :  { %v55_v24 = vadd.f32 1e-05, %v51_v23 }
 0x129   :  { %v46_v25 = vpop.xlane.xlu1 %45  ;;  %v48_v26 = vpop.xlane.xlu0 %47 }
 0x12a   :  { %143 = vrsqrt.f32 %v55_v24  ;;  %v52_v27 = vmul.f32 0.0078125, %v46_v25  ;;  %v53_v28 = vmul.f32 0.0078125, %v48_v26 }
 0x12c   :  { %v56_v29 = vadd.f32 1e-05, %v52_v27  ;;  %v57_v30 = vadd.f32 1e-05, %v53_v28 }
 0x12d   :  { %v50_v31 = vpop.xlane.xlu1 %49 }
 0x12e   :  { %145 = vrsqrt.f32 %v56_v29  ;;  %v54_v32 = vmul.f32 0.0078125, %v50_v31 }
 0x12f   :  { %147 = vrsqrt.f32 %v57_v30 }
 0x130   :  { %v58_v33 = vadd.f32 1e-05, %v54_v32 }
 0x132   :  { %149 = vrsqrt.f32 %v58_v33 }
 0x134   :  { %v144_v34 = vpop.eup %143 }
 0x135   :  { %v63_v35 = vmul.f32 %v144_v34, %v35_v10 }
 0x137   :  { %v74_v39 = vmul.f32 %v113_v36, %v63_v35 }
 0x138   :  { %v146_v37 = vpop.eup %145 }
 0x139   :  { %v148_v38 = vpop.eup %147  ;;  %v64_v40 = vmul.f32 %v146_v37, %v36_v17  ;;  %v85_v45 = vadd.f32 %v114_v41, %v74_v39 }
 0x13a   :  { %v65_v42 = vmul.f32 %v148_v38, %v37_v11 }
 0x13b   :  { %v75_v43 = vmul.f32 %v113_v36, %v64_v40 }
 0x13c   :  { %v150_v44 = vpop.eup %149  ;;  %v76_v47 = vmul.f32 %v113_v36, %v65_v42 }
 0x13d   :  { %v86_v46 = vadd.f32 %v114_v41, %v75_v43  ;;  %v66_v48 = vmul.f32 %v150_v44, %v38_v18 }
 0x13e   :  { %v87_v51 = vadd.f32 %v114_v41, %v76_v47 }
 0x13f   :  { %v134_v49 = vpack.c.bf16 %v86_v46, %v85_v45  ;;  %v77_v50 = vmul.f32 %v113_v36, %v66_v48 }
 0x141   :  { %135 = vst [vmem:[%s192_s3] sm:$0xff] %v134_v49   ;;  %v88_v52 = vadd.f32 %v114_v41, %v77_v50 }
 0x143   :  { %v139_v53 = vpack.c.bf16 %v88_v52, %v87_v51 }
 0x145   :  { %142 = vst [vmem:[%s192_s3 + $0x8] sm:$0xff] %v139_v53  }

// kernel: vision_language_model_forward.13
= control target key start
LH: loop header
LB: loop body
LE: loop exit
PB: predicated region body
PF: predicated region fallthrough
CT: control target
= control target key end

     0   :  { %v716_v1 = vmov 0   ;;  %v49_v35 = vlaneseq  ;;  %s943_s1 = inlined_call_operand.vmem [shape: bf16[128,256], index: 1, kind: input, shape index: {}]   ;;  %s944_s0 = inlined_call_operand.vmem [shape: bf16[32,128], index: 0, kind: input, shape index: {}]   ;;  %s945_s3 = inlined_call_operand.vmem [shape: bf16[256,128], index: 3, kind: input, shape index: {}]   ;;  %s946_s2 = inlined_call_operand.vmem [shape: f32[1,256], index: 2, kind: input, shape index: {}]   ;;  %s947_s4 = inlined_call_operand.vmem [shape: f32[1,128], index: 4, kind: input, shape index: {}]   ;;  %s948_s5 = inlined_call_operand.vmem [shape: f32[1,128], index: 5, kind: input, shape index: {}]   ;;  %s949_s6 = inlined_call_operand.vmem [shape: f32[1,128], index: 6, kind: input, shape index: {}]   ;;  %s950_s7 = inlined_call_operand.vmem [shape: bf16[32,128], index: 7, kind: output, shape index: {}]  }
   0x1   :  { %v648_v0 = vld [vmem:[%s943_s1 + $0x4] ss:$8 sps:$4 sm:$0xff]   ;;  %183 = vmatprep.mubr.bf16.mxu0 %v716_v1  ;;  %v650_v2 = vld [vmem:[%s943_s1] ss:$8 sps:$4 sm:$0xff]   ;;  %v651_v3 = vld [vmem:[%s943_s1 + $0x14] ss:$8 sps:$4 sm:$0xff]  }
   0x2   :  { %151 = vmatprep.subr.bf16.mxu0 %v648_v0  ;;  %v653_v4 = vld [vmem:[%s943_s1 + $0x10] ss:$8 sps:$4 sm:$0xff]   ;;  %v654_v5 = vld [vmem:[%s943_s1 + $0x24] ss:$8 sps:$4 sm:$0xff]   ;;  %v656_v6 = vld [vmem:[%s943_s1 + $0x20] ss:$8 sps:$4 sm:$0xff]  }
   0x3   :  { %152 = vmatpush1.bf16.msra.mxu0 %v650_v2  ;;  %v657_v7 = vld [vmem:[%s943_s1 + $0x34] ss:$8 sps:$4 sm:$0xff]   ;;  %v659_v8 = vld [vmem:[%s943_s1 + $0x30] ss:$8 sps:$4 sm:$0xff]   ;;  %v660_v9 = vld [vmem:[%s943_s1 + $0x44] ss:$8 sps:$4 sm:$0xff]  }
   0x4   :  { %153 = vmatprep.subr.bf16.mxu0 %v651_v3  ;;  %v662_v10 = vld [vmem:[%s943_s1 + $0x40] ss:$8 sps:$4 sm:$0xff]   ;;  %v663_v11 = vld [vmem:[%s943_s1 + $0x54] ss:$8 sps:$4 sm:$0xff]   ;;  %v665_v12 = vld [vmem:[%s943_s1 + $0x50] ss:$8 sps:$4 sm:$0xff]  }
   0x5   :  { %v666_v13 = vld [vmem:[%s943_s1 + $0x64] ss:$8 sps:$4 sm:$0xff]   ;;  %v668_v14 = vld [vmem:[%s943_s1 + $0x60] ss:$8 sps:$4 sm:$0xff]   ;;  %v669_v15 = vld [vmem:[%s943_s1 + $0x74] ss:$8 sps:$4 sm:$0xff]  }
   0x6   :  { %v671_v16 = vld [vmem:[%s943_s1 + $0x70] ss:$8 sps:$4 sm:$0xff]   ;;  %v808_v17 = vld [vmem:[%s944_s0] sm:$0xff]   ;;  %v814_v18 = vld [vmem:[%s944_s0 + $0x8] sm:$0xff]   ;;  %v50_v36 = vshrl.u32 %v49_v35, 7 }
   0x7   :  { %154 = vmatpush1.bf16.msra.mxu0 %v653_v4  ;;  %v674_v19 = vld [vmem:[%s945_s3 + $0x40] sm:$0xff]   ;;  %v676_v21 = vld [vmem:[%s945_s3 + $0x48] sm:$0xff]   ;;  %v678_v23 = vld [vmem:[%s945_s3 + $0x50] sm:$0xff]  }
   0x8   :  { %155 = vmatprep.subr.bf16.mxu0 %v654_v5  ;;  %v675_v20 = vld [vmem:[%s945_s3] sm:$0xff]   ;;  %619 = vmatprep.subr.bf16.mxu1 %v674_v19  ;;  %v677_v22 = vld [vmem:[%s945_s3 + $0x8] sm:$0xff]   ;;  %v679_v24 = vld [vmem:[%s945_s3 + $0x10] sm:$0xff]   ;;  %v51_v37 = vsub.s32 0, %v50_v36  ;;  %v55_v39 = vsub.s32 1, %v50_v36 }
   0x9   :  { %620 = vmatpush3.bf16.msra.mxu1 %v675_v20  ;;  %v680_v25 = vld [vmem:[%s945_s3 + $0x58] sm:$0xff]   ;;  %v682_v27 = vld [vmem:[%s945_s3 + $0x60] sm:$0xff]   ;;  %v684_v29 = vld [vmem:[%s945_s3 + $0x68] sm:$0xff]  }
   0xa   :  { %621 = vmatprep.subr.bf16.mxu1 %v676_v21  ;;  %v681_v26 = vld [vmem:[%s945_s3 + $0x18] sm:$0xff]   ;;  %v683_v28 = vld [vmem:[%s945_s3 + $0x20] sm:$0xff]   ;;  %v685_v30 = vld [vmem:[%s945_s3 + $0x28] sm:$0xff]  }
   0xb   :  { %156 = vmatpush1.bf16.msra.mxu0 %v656_v6  ;;  %v686_v31 = vld [vmem:[%s945_s3 + $0x70] sm:$0xff]   ;;  %v688_v33 = vld [vmem:[%s945_s3 + $0x78] sm:$0xff]   ;;  %v47_v38 = vld [vmem:[%s946_s2] sm:$0x3] }
   0xc   :  { %157 = vmatprep.subr.bf16.mxu0 %v657_v7  ;;  %v687_v32 = vld [vmem:[%s945_s3 + $0x30] sm:$0xff]   ;;  %v689_v34 = vld [vmem:[%s945_s3 + $0x38] sm:$0xff]   ;;  %v52_v40 = vrot.slane %v47_v38, %v51_v37  ;;  %v56_v41 = vrot.slane %v47_v38, %v55_v39 }
   0xd   :  { %622 = vmatpush3.bf16.msra.mxu1 %v677_v22 }
   0xe   :  { %623 = vmatprep.subr.bf16.mxu1 %v678_v23 }
   0xf   :  { %158 = vmatpush1.bf16.msra.mxu0 %v659_v8 }
  0x10   :  { %159 = vmatprep.subr.bf16.mxu0 %v660_v9 }
  0x11   :  { %624 = vmatpush3.bf16.msra.mxu1 %v679_v24 }
  0x12   :  { %625 = vmatprep.subr.bf16.mxu1 %v680_v25 }
  0x13   :  { %160 = vmatpush1.bf16.msra.mxu0 %v662_v10 }
  0x14   :  { %161 = vmatprep.subr.bf16.mxu0 %v663_v11 }
  0x15   :  { %626 = vmatpush3.bf16.msra.mxu1 %v681_v26 }
  0x16   :  { %627 = vmatprep.subr.bf16.mxu1 %v682_v27 }
  0x17   :  { %162 = vmatpush1.bf16.msra.mxu0 %v665_v12 }
  0x18   :  { %163 = vmatprep.subr.bf16.mxu0 %v666_v13 }
  0x19   :  { %628 = vmatpush3.bf16.msra.mxu1 %v683_v28 }
  0x1a   :  { %629 = vmatprep.subr.bf16.mxu1 %v684_v29 }
  0x1b   :  { %164 = vmatpush1.bf16.msra.mxu0 %v668_v14 }
  0x1c   :  { %165 = vmatprep.subr.bf16.mxu0 %v669_v15 }
  0x1d   :  { %630 = vmatpush3.bf16.msra.mxu1 %v685_v30 }
  0x1e   :  { %631 = vmatprep.subr.bf16.mxu1 %v686_v31 }
  0x1f   :  { %166 = vmatpush1.bf16.msra.mxu0 %v671_v16 }
  0x21   :  { %632 = vmatpush3.bf16.msra.mxu1 %v687_v32 }
  0x22   :  { %184 = vmatmul.mubr.bf16.vlgmr.msra.gmra.mrb[0].mxu0 %v808_v17  ;;  %633 = vmatprep.subr.bf16.mxu1 %v688_v33 }
  0x23   :  { %193 = vmatprep.mubr.bf16.mxu0 %v716_v1 }
  0x25   :  { %634 = vmatpush3.bf16.msra.mxu1 %v689_v34 }
  0x2a   :  { %194 = vmatmul.mubr.bf16.gmra.mrb[4].mxu0 %v814_v18 }
  0xf5   :  { %v185_v42 = vpop.f32.mrb[0].mxu0 }
  0xf6   :  { %v868_v43 = vadd.f32 %v185_v42, %v52_v40  ;;  %v187_v44 = vpop.f32.mrb[1].mxu0 }
  0xf7   :  { %v870_v45 = vadd.f32 %v187_v44, %v56_v41  ;;  %v189_v46 = vpop.f32.mrb[2].mxu0 }
  0xf8   :  { %v204_v47 = vmul.f32 %v868_v43, %v868_v43  ;;  %v874_v48 = vadd.f32 %v189_v46, %v52_v40  ;;  %v191_v49 = vpop.f32.mrb[3].mxu0 }
  0xf9   :  { %v205_v50 = vmul.f32 %v870_v45, %v870_v45  ;;  %v878_v51 = vadd.f32 %v191_v49, %v56_v41 }
  0xfa   :  { %v212_v52 = vmul.f32 %v204_v47, %v868_v43  ;;  %v206_v53 = vmul.f32 %v874_v48, %v874_v48 }
  0xfb   :  { %v213_v54 = vmul.f32 %v205_v50, %v870_v45  ;;  %v207_v55 = vmul.f32 %v878_v51, %v878_v51 }
  0xfc   :  { %v220_v56 = vmul.f32 0.044715, %v212_v52  ;;  %v214_v57 = vmul.f32 %v206_v53, %v874_v48 }
  0xfd   :  { %v221_v58 = vmul.f32 0.044715, %v213_v54  ;;  %v215_v59 = vmul.f32 %v207_v55, %v878_v51  ;;  %v195_v60 = vpop.f32.mrb[4].mxu0 }
  0xfe   :  { %v228_v61 = vadd.f32 %v220_v56, %v868_v43  ;;  %v222_v62 = vmul.f32 0.044715, %v214_v57  ;;  %v889_v63 = vadd.f32 %v195_v60, %v52_v40  ;;  %v197_v0 = vpop.f32.mrb[5].mxu0 }
  0xff   :  { %v223_v1 = vmul.f32 0.044715, %v215_v59  ;;  %v891_v2 = vadd.f32 %v197_v0, %v56_v41  ;;  %v199_v3 = vpop.f32.mrb[6].mxu0  ;;  %v229_v4 = vadd.f32 %v221_v58, %v870_v45 }
 0x100   :  { %v236_v5 = vmul.f32 0.7978846, %v228_v61  ;;  %v230_v6 = vadd.f32 %v222_v62, %v874_v48  ;;  %v208_v7 = vmul.f32 %v889_v63, %v889_v63  ;;  %v897_v8 = vadd.f32 %v199_v3, %v52_v40  ;;  %v201_v9 = vpop.f32.mrb[7].mxu0 }
 0x101   :  { %v209_v10 = vmul.f32 %v891_v2, %v891_v2  ;;  %v901_v11 = vadd.f32 %v201_v9, %v56_v41  ;;  %v231_v12 = vadd.f32 %v223_v1, %v878_v51  ;;  %v237_v13 = vmul.f32 0.7978846, %v229_v4 }
 0x102   :  { %692 = vtanh.f32 %v236_v5  ;;  %v238_v14 = vmul.f32 0.7978846, %v230_v6  ;;  %v216_v15 = vmul.f32 %v208_v7, %v889_v63  ;;  %v210_v16 = vmul.f32 %v897_v8, %v897_v8 }
 0x103   :  { %v217_v19 = vmul.f32 %v209_v10, %v891_v2  ;;  %v211_v20 = vmul.f32 %v901_v11, %v901_v11  ;;  %v239_v21 = vmul.f32 0.7978846, %v231_v12  ;;  %694 = vtanh.f32 %v237_v13  ;;  %v581_v13 = vld [vmem:[%s947_s4] ss:$0 sm:$0xff] }
 0x104   :  { %696 = vtanh.f32 %v238_v14  ;;  %v224_v22 = vmul.f32 0.044715, %v216_v15  ;;  %v218_v23 = vmul.f32 %v210_v16, %v897_v8 }
 0x105   :  { %v225_v24 = vmul.f32 0.044715, %v217_v19  ;;  %v219_v25 = vmul.f32 %v211_v20, %v901_v11  ;;  %698 = vtanh.f32 %v239_v21 }
 0x106   :  { %v232_v26 = vadd.f32 %v224_v22, %v889_v63  ;;  %v226_v27 = vmul.f32 0.044715, %v218_v23 }
 0x107   :  { %v233_v28 = vadd.f32 %v225_v24, %v891_v2  ;;  %v227_v29 = vmul.f32 0.044715, %v219_v25 }
 0x108   :  { %v240_v30 = vmul.f32 0.7978846, %v232_v26  ;;  %v234_v31 = vadd.f32 %v226_v27, %v897_v8  ;;  %v466_v27 = vunpack.c.l.bf16 %v814_v18 }
 0x109   :  { %v241_v32 = vmul.f32 0.7978846, %v233_v28  ;;  %v235_v33 = vadd.f32 %v227_v29, %v901_v11 }
 0x10a   :  { %700 = vtanh.f32 %v240_v30  ;;  %v242_v34 = vmul.f32 0.7978846, %v234_v31 }
 0x10b   :  { %702 = vtanh.f32 %v241_v32  ;;  %v243_v35 = vmul.f32 0.7978846, %v235_v33  ;;  %v467_v33 = vunpack.c.h.bf16 %v814_v18 }
 0x10c   :  { %v693_v36 = vpop.eup %692  ;;  %704 = vtanh.f32 %v242_v34 }
 0x10d   :  { %v695_v37 = vpop.eup %694  ;;  %706 = vtanh.f32 %v243_v35  ;;  %v252_v38 = vadd.f32 1.0, %v693_v36 }
 0x10e   :  { %v697_v39 = vpop.eup %696  ;;  %v253_v40 = vadd.f32 1.0, %v695_v37 }
 0x10f   :  { %v699_v41 = vpop.eup %698  ;;  %v254_v42 = vadd.f32 1.0, %v697_v39  ;;  %v260_v44 = vmul.f32 0.5, %v252_v38 }
 0x110   :  { %v255_v46 = vadd.f32 1.0, %v699_v41  ;;  %v261_v47 = vmul.f32 0.5, %v253_v40 }
 0x111   :  { %v262_v49 = vmul.f32 0.5, %v254_v42  ;;  %v268_v52 = vmul.f32 %v260_v44, %v868_v43 }
 0x112   :  { %v263_v50 = vmul.f32 0.5, %v255_v46  ;;  %v269_v55 = vmul.f32 %v261_v47, %v870_v45 }
 0x113   :  { %v270_v53 = vmul.f32 %v262_v49, %v874_v48 }
 0x114   :  { %v701_v54 = vpop.eup %700  ;;  %v271_v56 = vmul.f32 %v263_v50, %v878_v51 }
 0x115   :  { %v703_v57 = vpop.eup %702  ;;  %v276_v58 = vpack.c.bf16 %v270_v53, %v268_v52  ;;  %v256_v59 = vadd.f32 1.0, %v701_v54 }
 0x116   :  { %v705_v60 = vpop.eup %704  ;;  %v277_v61 = vpack.c.bf16 %v271_v56, %v269_v55  ;;  %v257_v62 = vadd.f32 1.0, %v703_v57 }
 0x117   :  { %v707_v0 = vpop.eup %706  ;;  %v258_v1 = vadd.f32 1.0, %v705_v60  ;;  %v264_v3 = vmul.f32 0.5, %v256_v59 }
 0x118   :  { %447 = vmatprep.mubr.bf16.mxu1 %v277_v61  ;;  %v259_v4 = vadd.f32 1.0, %v707_v0  ;;  %v265_v5 = vmul.f32 0.5, %v257_v62 }
 0x119   :  { %448 = vmatmul.mubr.bf16.vlgmr.msra.gmra.mrb[0].mxu1 %v276_v58  ;;  %v266_v43 = vmul.f32 0.5, %v258_v1  ;;  %v272_v6 = vmul.f32 %v264_v3, %v889_v63  ;;  %v464_v63 = vunpack.c.l.bf16 %v808_v17 }
 0x11a   :  { %v267_v48 = vmul.f32 0.5, %v259_v4  ;;  %v273_v51 = vmul.f32 %v265_v5, %v891_v2  ;;  %v598_v5 = vld [vmem:[%s948_s5] ss:$0 sm:$0xff] }
 0x11b   :  { %v274_v45 = vmul.f32 %v266_v43, %v897_v8 }
 0x11c   :  { %v275_v7 = vmul.f32 %v267_v48, %v901_v11  ;;  %v465_v11 = vunpack.c.h.bf16 %v808_v17 }
 0x11d   :  { %v278_v9 = vpack.c.bf16 %v274_v45, %v272_v6  ;;  %v599_v45 = vld [vmem:[%s949_s6] ss:$0 sm:$0xff] }
 0x11e   :  { %v279_v10 = vpack.c.bf16 %v275_v7, %v273_v51 }
 0x120   :  { %455 = vmatprep.mubr.bf16.mxu1 %v279_v10 }
 0x121   :  { %456 = vmatmul.mubr.bf16.gmra.mrb[4].mxu1 %v278_v9 }
 0x1ec   :  { %v635_v12 = vpop.f32.mrb[0].mxu1 }
 0x1ed   :  { %v636_v14 = vpop.f32.mrb[1].mxu1 }
 0x1ee   :  { %v637_v15 = vadd.f32 %v636_v14, %v635_v12  ;;  %v638_v16 = vpop.f32.mrb[2].mxu1 }
 0x1ef   :  { %v639_v19 = vpop.f32.mrb[3].mxu1 }
 0x1f0   :  { %v450_v8 = vadd.f32 %v637_v15, %v581_v13  ;;  %v640_v20 = vadd.f32 %v639_v19, %v638_v16 }
 0x1f2   :  { %v453_v2 = vadd.f32 %v640_v20, %v581_v13  ;;  %v468_v21 = vadd.f32 %v464_v63, %v450_v8 }
 0x1f4   :  { %v641_v22 = vpop.f32.mrb[4].mxu1  ;;  %472 = vadd.xlane.f32.xlu0 %v468_v21  ;;  %v469_v26 = vadd.f32 %v465_v11, %v453_v2 }
 0x1f5   :  { %v642_v23 = vpop.f32.mrb[5].mxu1 }
 0x1f6   :  { %v643_v24 = vadd.f32 %v642_v23, %v641_v22  ;;  %v644_v25 = vpop.f32.mrb[6].mxu1 }
 0x1f7   :  { %v645_v28 = vpop.f32.mrb[7].mxu1 }
 0x1f8   :  { %v458_v29 = vadd.f32 %v643_v24, %v581_v13  ;;  %v646_v30 = vadd.f32 %v645_v28, %v644_v25  ;;  %474 = vadd.xlane.f32.xlu0 %v469_v26 }
 0x1fa   :  { %v461_v31 = vadd.f32 %v646_v30, %v581_v13  ;;  %v470_v32 = vadd.f32 %v466_v27, %v458_v29 }
 0x1fc   :  { %476 = vadd.xlane.f32.xlu1 %v470_v32  ;;  %v471_v34 = vadd.f32 %v467_v33, %v461_v31 }
 0x200   :  { %478 = vadd.xlane.f32.xlu1 %v471_v34 }
 0x281   :  { %v473_v17 = vpop.xlane.xlu0 %472 }
 0x282   :  { %v481_v35 = vmul.f32 0.0078125, %v473_v17 }
 0x284   :  { %v485_v36 = vsub.f32 %v468_v21, %v481_v35 }
 0x285   :  { %v475_v37 = vpop.xlane.xlu0 %474 }
 0x286   :  { %v482_v38 = vmul.f32 0.0078125, %v475_v37  ;;  %v489_v39 = vmul.f32 %v485_v36, %v485_v36 }
 0x288   :  { %v486_v40 = vsub.f32 %v469_v26, %v482_v38  ;;  %493 = vadd.xlane.f32.xlu0 %v489_v39 }
 0x289   :  { %v477_v41 = vpop.xlane.xlu1 %476 }
 0x28a   :  { %v483_v42 = vmul.f32 0.0078125, %v477_v41  ;;  %v490_v44 = vmul.f32 %v486_v40, %v486_v40 }
 0x28c   :  { %v487_v46 = vsub.f32 %v470_v32, %v483_v42  ;;  %495 = vadd.xlane.f32.xlu1 %v490_v44 }
 0x28d   :  { %v479_v47 = vpop.xlane.xlu1 %478 }
 0x28e   :  { %v484_v49 = vmul.f32 0.0078125, %v479_v47  ;;  %v491_v50 = vmul.f32 %v487_v46, %v487_v46 }
 0x290   :  { %v488_v18 = vsub.f32 %v471_v34, %v484_v49  ;;  %497 = vadd.xlane.f32.xlu0 %v491_v50 }
 0x292   :  { %v492_v52 = vmul.f32 %v488_v18, %v488_v18 }
 0x294   :  { %499 = vadd.xlane.f32.xlu1 %v492_v52 }
 0x315   :  { %v494_v53 = vpop.xlane.xlu0 %493 }
 0x316   :  { %v501_v54 = vmul.f32 0.0078125, %v494_v53 }
 0x318   :  { %v505_v55 = vadd.f32 1e-05, %v501_v54 }
 0x319   :  { %v496_v56 = vpop.xlane.xlu1 %495 }
 0x31a   :  { %708 = vrsqrt.f32 %v505_v55  ;;  %v502_v57 = vmul.f32 0.0078125, %v496_v56 }
 0x31c   :  { %v506_v58 = vadd.f32 1e-05, %v502_v57 }
 0x31d   :  { %v498_v59 = vpop.xlane.xlu0 %497 }
 0x31e   :  { %710 = vrsqrt.f32 %v506_v58  ;;  %v503_v60 = vmul.f32 0.0078125, %v498_v59 }
 0x320   :  { %v507_v61 = vadd.f32 1e-05, %v503_v60 }
 0x321   :  { %v500_v62 = vpop.xlane.xlu1 %499 }
 0x322   :  { %712 = vrsqrt.f32 %v507_v61  ;;  %v504_v0 = vmul.f32 0.0078125, %v500_v62 }
 0x324   :  { %v709_v1 = vpop.eup %708  ;;  %v508_v3 = vadd.f32 1e-05, %v504_v0 }
 0x325   :  { %v513_v4 = vmul.f32 %v709_v1, %v485_v36 }
 0x326   :  { %714 = vrsqrt.f32 %v508_v3 }
 0x327   :  { %v524_v48 = vmul.f32 %v598_v5, %v513_v4 }
 0x328   :  { %v711_v43 = vpop.eup %710 }
 0x329   :  { %v514_v6 = vmul.f32 %v711_v43, %v486_v40  ;;  %v535_v9 = vadd.f32 %v599_v45, %v524_v48 }
 0x32b   :  { %v525_v51 = vmul.f32 %v598_v5, %v514_v6 }
 0x32c   :  { %v713_v7 = vpop.eup %712 }
 0x32d   :  { %v536_v10 = vadd.f32 %v599_v45, %v525_v51  ;;  %v515_v12 = vmul.f32 %v713_v7, %v487_v46 }
 0x32f   :  { %v611_v13 = vpack.c.bf16 %v536_v10, %v535_v9  ;;  %v526_v15 = vmul.f32 %v598_v5, %v515_v12 }
 0x330   :  { %v715_v14 = vpop.eup %714 }
 0x331   :  { %612 = vst [vmem:[%s950_s7] sm:$0xff] %v611_v13   ;;  %v516_v16 = vmul.f32 %v715_v14, %v488_v18  ;;  %v537_v19 = vadd.f32 %v599_v45, %v526_v15 }
 0x333   :  { %v527_v63 = vmul.f32 %v598_v5, %v516_v16 }
 0x335   :  { %v538_v8 = vadd.f32 %v599_v45, %v527_v63 }
 0x337   :  { %v616_v20 = vpack.c.bf16 %v538_v8, %v537_v19 }
 0x339   :  { %618 = vst [vmem:[%s950_s7 + $0x8] sm:$0xff] %v616_v20  }

// kernel: vision_language_model_forward.12
= control target key start
LH: loop header
LB: loop body
LE: loop exit
PB: predicated region body
PF: predicated region fallthrough
CT: control target
= control target key end

     0   :  { %s1646_s24 = smov 0   ;;  %s1882_s0 = inlined_call_operand.vmem [shape: bf16[2,16,128], index: 0, kind: input, shape index: {}]   ;;  %s1883_s1 = inlined_call_operand.vmem [shape: bf16[128,384], index: 1, kind: input, shape index: {}]   ;;  %s1884_s2 = inlined_call_operand.vmem [shape: f32[1,384], index: 2, kind: input, shape index: {}]   ;;  %s1885_s3 = inlined_call_operand.vmem [shape: bf16[128,128], index: 3, kind: input, shape index: {}]   ;;  %s1886_s4 = inlined_call_operand.vmem [shape: f32[1,128], index: 4, kind: input, shape index: {}]   ;;  %s1887_s5 = inlined_call_operand.vmem [shape: f32[1,128], index: 5, kind: input, shape index: {}]   ;;  %s1888_s6 = inlined_call_operand.vmem [shape: f32[1,128], index: 6, kind: input, shape index: {}]   ;;  %s1889_s7 = inlined_call_operand.vmem [shape: bf16[2,16,128], index: 7, kind: output, shape index: {}]  }
   0x1 LB: > { %s1297_s25 = sadd.s32 4294967295, %s1598_s24   ;;  %p1301_p0 = scmp.ge.s32.totalorder %s1598_s24, 1  ;;  %s1598_s24 = sphi %s1646_s24, %s17_s24  }
   0x2   : > { %p237_p1 = scmp.lt.s32.totalorder %s1598_s24, 3 }
   0x4   : > { %p238_p2 = pnand %p1301_p0, %p237_p1 }
   0x5   : > { %v1514_v0 = vld [vmem:[%s1883_s1 + $0x4] ss:$12 sps:$4 sm:$0xff] (!%p238_p2)   ;;  %v1516_v1 = vld [vmem:[%s1883_s1] ss:$12 sps:$4 sm:$0xff] (!%p238_p2)   ;;  %v1600_v2 = vmov (!%p238_p2), 0   ;;  %v1601_v4 = vmov (!%p238_p2), 0.0   ;;  %v316_v27 = vlaneseq (!%p238_p2) }
   0x6   : > { %241 = sbr.rel (%p238_p2) target bundleno = 2240 (0x8c0), region = 48  ;;  %497 = vmatprep.mubr.bf16.mxu0 (!%p238_p2), %v1600_v2  ;;  %465 = vmatprep.subr.bf16.mxu0 (!%p238_p2), %v1514_v0  ;;  %v1517_v3 = vld [vmem:[%s1883_s1 + $0x1c] ss:$12 sps:$4 sm:$0xff] (!%p238_p2)   ;;  %v1519_v5 = vld [vmem:[%s1883_s1 + $0x18] ss:$12 sps:$4 sm:$0xff] (!%p238_p2)   ;;  %p269_p3 = scmp.lt.s32.totalorder (!%p238_p2), %s1297_s25, 1 }
   0x7   : > { %1397 = vmatprep.subr.bf16.mxu1 (!%p238_p2), %v1601_v4  ;;  %466 = vmatpush1.bf16.msra.mxu0 (!%p238_p2), %v1516_v1  ;;  %v1520_v6 = vld [vmem:[%s1883_s1 + $0x34] ss:$12 sps:$4 sm:$0xff] (!%p238_p2)   ;;  %v1522_v7 = vld [vmem:[%s1883_s1 + $0x30] ss:$12 sps:$4 sm:$0xff] (!%p238_p2)   ;;  %v1523_v8 = vld [vmem:[%s1883_s1 + $0x4c] ss:$12 sps:$4 sm:$0xff] (!%p238_p2)  }
   0x8   : > { %467 = vmatprep.subr.bf16.mxu0 (!%p238_p2), %v1517_v3  ;;  %v1525_v9 = vld [vmem:[%s1883_s1 + $0x48] ss:$12 sps:$4 sm:$0xff] (!%p238_p2)   ;;  %v1526_v11 = vld [vmem:[%s1883_s1 + $0x64] ss:$12 sps:$4 sm:$0xff] (!%p238_p2)   ;;  %v1540_v12 = vld [vmem:[%s1883_s1 + $0x20] ss:$12 sps:$4 sm:$0xff] (!%p238_p2)  }
   0x9   : > { %v1539_v10 = vld [vmem:[%s1883_s1 + $0x8] ss:$12 sps:$4 sm:$0xff] (!%p238_p2)   ;;  %v1528_v13 = vld [vmem:[%s1883_s1 + $0x60] ss:$12 sps:$4 sm:$0xff] (!%p238_p2)   ;;  %v1531_v15 = vld [vmem:[%s1883_s1 + $0x78] ss:$12 sps:$4 sm:$0xff] (!%p238_p2)  }
   0xa   : > { %1398 = vmatpush3.bf16.msra.mxu1 (!%p238_p2), %v1539_v10  ;;  %v1529_v14 = vld [vmem:[%s1883_s1 + $0x7c] ss:$12 sps:$4 sm:$0xff] (!%p238_p2)   ;;  %v1541_v16 = vld [vmem:[%s1883_s1 + $0x38] ss:$12 sps:$4 sm:$0xff] (!%p238_p2)   ;;  %v1532_v17 = vld [vmem:[%s1883_s1 + $0x94] ss:$12 sps:$4 sm:$0xff] (!%p238_p2)  }
   0xb   : > { %468 = vmatpush1.bf16.msra.mxu0 (!%p238_p2), %v1519_v5  ;;  %1399 = vmatprep.subr.bf16.mxu1 (!%p238_p2), %v1601_v4  ;;  %v1542_v18 = vld [vmem:[%s1883_s1 + $0x50] ss:$12 sps:$4 sm:$0xff] (!%p238_p2)   ;;  %v1535_v20 = vld [vmem:[%s1883_s1 + $0xac] ss:$12 sps:$4 sm:$0xff] (!%p238_p2)   ;;  %v1543_v21 = vld [vmem:[%s1883_s1 + $0x68] ss:$12 sps:$4 sm:$0xff] (!%p238_p2)  }
   0xc   : > { %469 = vmatprep.subr.bf16.mxu0 (!%p238_p2), %v1520_v6  ;;  %v1534_v19 = vld [vmem:[%s1883_s1 + $0x90] ss:$12 sps:$4 sm:$0xff] (!%p238_p2)   ;;  %v1537_v22 = vld [vmem:[%s1883_s1 + $0xa8] ss:$12 sps:$4 sm:$0xff] (!%p238_p2)   ;;  %v1544_v24 = vld [vmem:[%s1883_s1 + $0x80] ss:$12 sps:$4 sm:$0xff] (!%p238_p2)  }
   0xd   : > { %s1891_s25 = smov (!%p269_p3, %s1297_s25), 1  ;;  %v1545_v25 = vld [vmem:[%s1883_s1 + $0x98] ss:$12 sps:$4 sm:$0xff]   ;;  %v1546_v26 = vld [vmem:[%s1883_s1 + $0xb0] ss:$12 sps:$4 sm:$0xff]   ;;  %vm1602_vm0 = vmmov 0  }
   0xe   : > { %s1354_s27 = sshll.u32 %s1891_s25, 3  ;;  %1400 = vmatpush3.bf16.msra.mxu1 %v1540_v12  ;;  %1413 = vmatprep.mubr.msk.bf16.mxu1 %vm1602_vm0, %v1601_v4  ;;  %v317_v28 = vshrl.u32 %v316_v27, 7  ;;  %v314_v30 = vld [vmem:[%s1884_s2] sm:$0x7]  ;;  %vm552_vm1 = vcmask 261120   ;;  %vm602_vm2 = vcmask 130048  }
   0xf   : > { %470 = vmatpush1.bf16.msra.mxu0 %v1522_v7  ;;  %1401 = vmatprep.subr.bf16.mxu1 %v1601_v4  ;;  %s273_s23 = scalar_lea.vmem %s1882_s0, %s1354_s27  ;;  %s1603_s16 = smov 96   ;;  %vm1068_vm3 = vcmask 523264   ;;  %vm1071_vm4 = vcmask 785408  }
  0x10   : > { %471 = vmatprep.subr.bf16.mxu0 %v1523_v8  ;;  %v1730_v23 = vld [vmem:[%s273_s23] sm:$0xff]   ;;  %v318_v29 = vsub.s32 0, %v317_v28  ;;  %v322_v31 = vsub.s32 1, %v317_v28  ;;  %v326_v45 = vsub.s32 2, %v317_v28  ;;  %s1604_s17 = smov 32   ;;  %s1605_s18 = smov 64  }
  0x11   : > { %s278_s23 = scalar_lea.vmem %s1889_s7, %s1354_s27 }
  0x12   : > { %1402 = vmatpush3.bf16.msra.mxu1 %v1541_v16  ;;  %v319_v32 = vrot.slane %v314_v30, %v318_v29  ;;  %v323_v34 = vrot.slane %v314_v30, %v322_v31  ;;  %v327_v46 = vrot.slane %v314_v30, %v326_v45 }
  0x13   : > { %472 = vmatpush1.bf16.msra.mxu0 %v1525_v9  ;;  %1403 = vmatprep.subr.bf16.mxu1 %v1601_v4 }
  0x14   : > { %473 = vmatprep.subr.bf16.mxu0 %v1526_v11 }
  0x16   : > { %1404 = vmatpush3.bf16.msra.mxu1 %v1542_v18 }
  0x17   : > { %474 = vmatpush1.bf16.msra.mxu0 %v1528_v13  ;;  %1405 = vmatprep.subr.bf16.mxu1 %v1601_v4 }
  0x18   : > { %475 = vmatprep.subr.bf16.mxu0 %v1529_v14 }
  0x1a   : > { %1406 = vmatpush3.bf16.msra.mxu1 %v1543_v21 }
  0x1b   : > { %476 = vmatpush1.bf16.msra.mxu0 %v1531_v15  ;;  %1407 = vmatprep.subr.bf16.mxu1 %v1601_v4 }
  0x1c   : > { %477 = vmatprep.subr.bf16.mxu0 %v1532_v17 }
  0x1e   : > { %1408 = vmatpush3.bf16.msra.mxu1 %v1544_v24 }
  0x1f   : > { %478 = vmatpush1.bf16.msra.mxu0 %v1534_v19  ;;  %1409 = vmatprep.subr.bf16.mxu1 %v1601_v4 }
  0x20   : > { %479 = vmatprep.subr.bf16.mxu0 %v1535_v20 }
  0x22   : > { %1410 = vmatpush3.bf16.msra.mxu1 %v1545_v25 }
  0x23   : > { %480 = vmatpush1.bf16.msra.mxu0 %v1537_v22  ;;  %1411 = vmatprep.subr.bf16.mxu1 %v1601_v4 }
  0x24   : > { %1441 = vmatprep.subr.bf16.mxu0 %v1601_v4 }
  0x26   : > { %498 = vmatmul.mubr.bf16.vlgmr.msra.gmra.mrb[0].mxu0 %v1730_v23  ;;  %1412 = vmatpush3.bf16.msra.mxu1 %v1546_v26 }
  0x27   : > { %1417 = vmatprep.subr.bf16.mxu1 %v1601_v4  ;;  %1443 = vmatprep.mubr.msk.bf16.mxu0 %vm1602_vm0, %v1601_v4 }
  0x29   : > { %1414 = vmatmul.mubr.bf16.vlgmr.msra.gmra.mrb[0].mxu1 %v1730_v23 }
  0x2a   : > { %1419 = vmatprep.mubr.msk.bf16.mxu1 %vm1602_vm0, %v1601_v4 }
  0xf9   : > { %v499_v33 = vpop.f32.mrb[0].mxu0 }
  0xfa   : > { %v501_v35 = vpop.f32.mrb[1].mxu0  ;;  %v500_v37 = vadd.f32 %v499_v33, %v319_v32 }
  0xfb   : > { %v503_v36 = vpop.f32.mrb[2].mxu0  ;;  %v502_v40 = vadd.f32 %v501_v35, %v323_v34 }
  0xfc   : > { %v504_v38 = vadd.f32 %v503_v36, %v319_v32  ;;  %v505_v39 = vpop.f32.mrb[3].mxu0  ;;  %v542_v47 = vpop.f32.mrb[0].mxu1 }
  0xfd   : > { %v506_v41 = vadd.f32 %v505_v39, %v323_v34  ;;  %v543_v48 = vadd.f32 %v542_v47, %v327_v46  ;;  %v1415_v49 = vpop.f32.mrb[1].mxu1 }
  0xfe   : > { %v549_v42 = vpack.c.bf16 %v504_v38, %v500_v37  ;;  %v545_v50 = vpop.f32.mrb[2].mxu1 }
  0xff   : > { %v550_v43 = vpack.c.bf16 %v506_v41, %v502_v40  ;;  %v546_v51 = vadd.f32 %v545_v50, %v327_v46  ;;  %v1416_v52 = vpop.f32.mrb[3].mxu1 }
 0x101   : > { %v557_v44 = vsel %vm552_vm1, %v550_v43, 0  ;;  %v1762_v53 = vpack.c.bf16 %v546_v51, %v543_v48 }
 0x102   : > { %1418 = vmatpush3.bf16.xpose.msra.mxu1 %v557_v44 }
 0x103   : > { %1423 = vmatprep.subr.bf16.mxu1 %v1601_v4 }
 0x109   : > { %1420 = vmatmul.mubr.msk.bf16.vlgmr.msra.gmra.mrb[4].mxu1 %vm552_vm1, %v549_v42 }
 0x10a   : > { %1425 = vmatprep.mubr.msk.bf16.mxu1 %vm1602_vm0, %v1601_v4  ;;  %1424 = vmatpush3.bf16.msra.mxu1 %v1762_v53 }
 0x10b   : > { %1429 = vmatprep.subr.bf16.mxu1 %v1601_v4 }
 0x1dc   : > { %v593_v54 = vpop.f32.mrb[4].mxu1 }
 0x1dd   : > { %v600_v55 = vmul.f32 0.17677669, %v593_v54  ;;  %v1421_v56 = vpop.f32.mrb[5].mxu1 }
 0x1de   : > { %v596_v57 = vpop.f32.mrb[6].mxu1 }
 0x1df   : > { %v601_v58 = vmul.f32 0.17677669, %v596_v57  ;;  %v1422_v59 = vpop.f32.mrb[7].mxu1  ;;  %v603_v60 = vsel %vm602_vm2, %v600_v55, -inf }
 0x1e0   : > { %604 = vmax.xlane.f32.xlu0 %v603_v60 }
 0x1e1   : > { %v606_v61 = vsel %vm602_vm2, %v601_v58, -inf }
 0x1e4   : > { %607 = vmax.xlane.f32.xlu0 %v606_v61 }
 0x1fa   : > { %674 = vrot.lane.b32.xlu0 %v550_v43, %s1603_s16 }
 0x1fe   : > { %921 = vrot.lane.b32.xlu0 %v550_v43, %s1604_s17 }
 0x26d   : > { %v605_v62 = vpop.xlane.xlu0 %604 }
 0x26e   : > { %v609_v63 = vsub.f32 %v600_v55, %v605_v62 }
 0x270   : > { %v611_v0 = vmul.f32 1.442695, %v609_v63 }
 0x271   : > { %v608_v1 = vpop.xlane.xlu0 %607 }
 0x272   : > { %1556 = vpow2.f32 %v611_v0  ;;  %v610_v2 = vsub.f32 %v601_v58, %v608_v1 }
 0x274   : > { %v613_v3 = vmul.f32 1.442695, %v610_v2 }
 0x275   : > { %v675_v12 = vpop.permute.xlu0 %674 }
 0x276   : > { %1558 = vpow2.f32 %v613_v3  ;;  %v680_v21 = vsel %vm552_vm1, %v675_v12, 0 }
 0x279   : > { %v922_v19 = vpop.permute.xlu0 %921 }
 0x27a   : > { %v927_v24 = vsel %vm552_vm1, %v922_v19, 0 }
 0x27c   : > { %v1557_v5 = vpop.eup %1556 }
 0x27d   : > { %v615_v6 = vsel %vm602_vm2, %v1557_v5, 0.0 }
 0x27e   : > { %616 = vadd.xlane.f32.xlu1 %v615_v6 }
 0x280   : > { %v1559_v7 = vpop.eup %1558 }
 0x281   : > { %v618_v8 = vsel %vm602_vm2, %v1559_v7, 0.0 }
 0x282   : > { %619 = vadd.xlane.f32.xlu1 %v618_v8 }
 0x293   : > { %671 = vrot.lane.b32.xlu1 %v549_v42, %s1603_s16 }
 0x297   : > { %798 = vrot.lane.b32.xlu1 %v550_v43, %s1605_s18 }
 0x29b   : > { %796 = vrot.lane.b32.xlu1 %v549_v42, %s1605_s18 }
 0x29f   : > { %919 = vrot.lane.b32.xlu1 %v549_v42, %s1604_s17 }
 0x30b   : > { %v617_v9 = vpop.xlane.xlu1 %616 }
 0x30c   : > { %1560 = vrcp.f32 %v617_v9 }
 0x30f   : > { %v620_v10 = vpop.xlane.xlu1 %619 }
 0x310   : > { %1562 = vrcp.f32 %v620_v10 }
 0x313   : > { %v672_v11 = vpop.permute.xlu1 %671 }
 0x316   : > { %v1561_v14 = vpop.eup %1560 }
 0x317   : > { %v799_v13 = vpop.permute.xlu1 %798  ;;  %v622_v17 = vmul.f32 %v1561_v14, %v1557_v5 }
 0x318   : > { %v804_v15 = vsel %vm552_vm1, %v799_v13, 0 }
 0x319   : > { %1442 = vmatpush3.bf16.xpose.msra.mxu0 %v804_v15 }
 0x31a   : > { %v1563_v16 = vpop.eup %1562  ;;  %1453 = vmatprep.subr.bf16.mxu0 %v1601_v4 }
 0x31b   : > { %v624_v18 = vmul.f32 %v1563_v16, %v1559_v7  ;;  %v797_v22 = vpop.permute.xlu1 %796 }
 0x31d   : > { %v625_v20 = vpack.c.bf16 %v624_v18, %v622_v17 }
 0x31f   : > { %1426 = vmatmul.mubr.msk.bf16.vlgmr.msra.gmra.mrb[8].mxu1 %vm602_vm2, %v625_v20  ;;  %v920_v25 = vpop.permute.xlu1 %919 }
 0x320   : > { %1430 = vmatpush3.bf16.xpose.msra.mxu1 %v680_v21  ;;  %1444 = vmatmul.mubr.msk.bf16.vlgmr.msra.gmra.mrb[4].mxu0 %vm552_vm1, %v797_v22 }
 0x321   : > { %1454 = vmatpush3.bf16.xpose.msra.mxu0 %v927_v24  ;;  %1431 = vmatprep.mubr.msk.bf16.mxu1 %vm1602_vm0, %v1601_v4 }
 0x322   : > { %1455 = vmatprep.mubr.msk.bf16.mxu0 %vm1602_vm0, %v1601_v4  ;;  %1435 = vmatprep.subr.bf16.mxu1 %v1601_v4 }
 0x323   : > { %1465 = vmatprep.subr.bf16.mxu0 %v1601_v4 }
 0x327   : > { %1432 = vmatmul.mubr.msk.bf16.vlgmr.msra.gmra.mrb[12].mxu1 %vm552_vm1, %v672_v11 }
 0x328   : > { %1456 = vmatmul.mubr.msk.bf16.vlgmr.msra.gmra.mrb[8].mxu0 %vm552_vm1, %v920_v25  ;;  %1437 = vmatprep.mubr.msk.bf16.mxu1 %vm1602_vm0, %v1601_v4 }
 0x329   : > { %1481 = vmatprep.mubr.msk.bf16.mxu0 %vm1602_vm0, %v1601_v4 }
 0x3f2   : > { %v1794_v26 = vpop.f32.mrb[8].mxu1 }
 0x3f3   : > { %v1427_v27 = vpop.f32.mrb[9].mxu1  ;;  %v840_v28 = vpop.f32.mrb[4].mxu0 }
 0x3f4   : > { %v1796_v29 = vpop.f32.mrb[10].mxu1  ;;  %v1445_v30 = vpop.f32.mrb[5].mxu0  ;;  %v847_v38 = vmul.f32 0.17677669, %v840_v28 }
 0x3f5   : > { %v1428_v31 = vpop.f32.mrb[11].mxu1  ;;  %v843_v32 = vpop.f32.mrb[6].mxu0 }
 0x3f6   : > { %v1446_v33 = vpop.f32.mrb[7].mxu0  ;;  %v848_v48 = vmul.f32 0.17677669, %v843_v32  ;;  %v849_v49 = vsel %vm602_vm2, %v847_v38, -inf }
 0x3f8   : > { %v852_v52 = vsel %vm602_vm2, %v848_v48, -inf }
 0x3fa   : > { %v716_v34 = vpop.f32.mrb[12].mxu1 }
 0x3fb   : > { %v723_v35 = vmul.f32 0.17677669, %v716_v34  ;;  %v1433_v36 = vpop.f32.mrb[13].mxu1  ;;  %v963_v37 = vpop.f32.mrb[8].mxu0 }
 0x3fc   : > { %v719_v39 = vpop.f32.mrb[14].mxu1  ;;  %v1457_v40 = vpop.f32.mrb[9].mxu0  ;;  %v970_v51 = vmul.f32 0.17677669, %v963_v37 }
 0x3fd   : > { %v724_v41 = vmul.f32 0.17677669, %v719_v39  ;;  %v1434_v42 = vpop.f32.mrb[15].mxu1  ;;  %v966_v43 = vpop.f32.mrb[10].mxu0  ;;  %v725_v44 = vsel %vm602_vm2, %v723_v35, -inf }
 0x3fe   : > { %v1458_v45 = vpop.f32.mrb[11].mxu0  ;;  %726 = vmax.xlane.f32.xlu0 %v725_v44  ;;  %v971_v46 = vmul.f32 0.17677669, %v966_v43  ;;  %v972_v54 = vsel %vm602_vm2, %v970_v51, -inf }
 0x3ff   : > { %v728_v47 = vsel %vm602_vm2, %v724_v41, -inf }
 0x400   : > { %729 = vmax.xlane.f32.xlu1 %v728_v47  ;;  %v975_v50 = vsel %vm602_vm2, %v971_v46, -inf }
 0x402   : > { %850 = vmax.xlane.f32.xlu0 %v849_v49  ;;  %v1548_v49 = vld [vmem:[%s1885_s3 + $0x8] sm:$0xff]  }
 0x404   : > { %976 = vmax.xlane.f32.xlu1 %v975_v50  ;;  %v1549_v50 = vld [vmem:[%s1885_s3 + $0x10] sm:$0xff]  }
 0x406   : > { %853 = vmax.xlane.f32.xlu0 %v852_v52  ;;  %v1551_v52 = vld [vmem:[%s1885_s3 + $0x20] sm:$0xff]  }
 0x40a   : > { %973 = vmax.xlane.f32.xlu0 %v972_v54 }
 0x48b   : > { %v727_v55 = vpop.xlane.xlu0 %726 }
 0x48c   : > { %v731_v0 = vsub.f32 %v723_v35, %v727_v55 }
 0x48d   : > { %v730_v56 = vpop.xlane.xlu1 %729 }
 0x48e   : > { %v732_v1 = vsub.f32 %v724_v41, %v730_v56  ;;  %v733_v7 = vmul.f32 1.442695, %v731_v0  ;;  %v1552_v56 = vld [vmem:[%s1885_s3 + $0x28] sm:$0xff]  }
 0x48f   : > { %v851_v57 = vpop.xlane.xlu0 %850 }
 0x490   : > { %v855_v58 = vsub.f32 %v847_v38, %v851_v57  ;;  %v735_v8 = vmul.f32 1.442695, %v732_v1 }
 0x491   : > { %v977_v59 = vpop.xlane.xlu1 %976 }
 0x492   : > { %v857_v60 = vmul.f32 1.442695, %v855_v58  ;;  %v979_v61 = vsub.f32 %v971_v46, %v977_v59 }
 0x493   : > { %v854_v62 = vpop.xlane.xlu0 %853 }
 0x494   : > { %1564 = vpow2.f32 %v857_v60  ;;  %v856_v63 = vsub.f32 %v848_v48, %v854_v62  ;;  %v982_v2 = vmul.f32 1.442695, %v979_v61  ;;  %v1547_v48 = vld [vmem:[%s1885_s3] sm:$0xff]   ;;  %v1553_v60 = vld [vmem:[%s1885_s3 + $0x30] sm:$0xff]  }
 0x495   : > { %1466 = vmatpush3.bf16.msra.mxu0 %v1547_v48 }
 0x496   : > { %v859_v3 = vmul.f32 1.442695, %v856_v63  ;;  %1467 = vmatprep.subr.bf16.mxu0 %v1601_v4  ;;  %v1554_v63 = vld [vmem:[%s1885_s3 + $0x38] sm:$0xff]  }
 0x497   : > { %v974_v5 = vpop.xlane.xlu0 %973 }
 0x498   : > { %1566 = vpow2.f32 %v859_v3  ;;  %v978_v6 = vsub.f32 %v970_v51, %v974_v5  ;;  %v1550_v51 = vld [vmem:[%s1885_s3 + $0x18] sm:$0xff]  }
 0x499   : > { %1568 = vpow2.f32 %v982_v2  ;;  %1468 = vmatpush3.bf16.msra.mxu0 %v1548_v49 }
 0x49a   : > { %v980_v9 = vmul.f32 1.442695, %v978_v6  ;;  %1469 = vmatprep.subr.bf16.mxu0 %v1601_v4 }
 0x49c   : > { %1570 = vpow2.f32 %v980_v9 }
 0x49d   : > { %1572 = vpow2.f32 %v733_v7  ;;  %1470 = vmatpush3.bf16.msra.mxu0 %v1549_v50  ;;  %v1348_v50 = vld [vmem:[%s1887_s5] ss:$0 sm:$0xff] }
 0x49e   : > { %v1565_v10 = vpop.eup %1564  ;;  %1574 = vpow2.f32 %v735_v8  ;;  %1471 = vmatprep.subr.bf16.mxu0 %v1601_v4 }
 0x49f   : > { %v861_v11 = vsel %vm602_vm2, %v1565_v10, 0.0 }
 0x4a0   : > { %862 = vadd.xlane.f32.xlu0 %v861_v11 }
 0x4a1   : > { %1472 = vmatpush3.bf16.msra.mxu0 %v1550_v51 }
 0x4a2   : > { %v1567_v12 = vpop.eup %1566  ;;  %1473 = vmatprep.subr.bf16.mxu0 %v1601_v4 }
 0x4a3   : > { %v864_v13 = vsel %vm602_vm2, %v1567_v12, 0.0  ;;  %v1569_v14 = vpop.eup %1568 }
 0x4a4   : > { %865 = vadd.xlane.f32.xlu1 %v864_v13  ;;  %v987_v18 = vsel %vm602_vm2, %v1569_v14, 0.0 }
 0x4a5   : > { %1474 = vmatpush3.bf16.msra.mxu0 %v1551_v52 }
 0x4a6   : > { %v1571_v15 = vpop.eup %1570  ;;  %1475 = vmatprep.subr.bf16.mxu0 %v1601_v4 }
 0x4a7   : > { %v1573_v16 = vpop.eup %1572  ;;  %v984_v17 = vsel %vm602_vm2, %v1571_v15, 0.0 }
 0x4a8   : > { %v1575_v19 = vpop.eup %1574  ;;  %985 = vadd.xlane.f32.xlu0 %v984_v17  ;;  %988 = vadd.xlane.f32.xlu1 %v987_v18  ;;  %v737_v20 = vsel %vm602_vm2, %v1573_v16, 0.0 }
 0x4a9   : > { %v740_v21 = vsel %vm602_vm2, %v1575_v19, 0.0  ;;  %1476 = vmatpush3.bf16.msra.mxu0 %v1552_v56 }
 0x4aa   : > { %1477 = vmatprep.subr.bf16.mxu0 %v1601_v4 }
 0x4ac   : > { %738 = vadd.xlane.f32.xlu0 %v737_v20  ;;  %741 = vadd.xlane.f32.xlu1 %v740_v21 }
 0x4ad   : > { %1478 = vmatpush3.bf16.msra.mxu0 %v1553_v60 }
 0x4ae   : > { %1479 = vmatprep.subr.bf16.mxu0 %v1601_v4 }
 0x4b1   : > { %1480 = vmatpush3.bf16.msra.mxu0 %v1554_v63 }
 0x4bd   : > { %872 = vrot.lane.b32.xlu1 %v1762_v53, %s1605_s18 }
 0x4c1   : > { %995 = vrot.lane.b32.xlu1 %v1762_v53, %s1604_s17 }
 0x4c2   : > { %749 = vrot.lane.b32.xlu0 %v1762_v53, %s1603_s16 }
 0x52d   : > { %v863_v22 = vpop.xlane.xlu0 %862 }
 0x531   : > { %v866_v24 = vpop.xlane.xlu1 %865 }
 0x535   : > { %v986_v25 = vpop.xlane.xlu0 %985  ;;  %v989_v27 = vpop.xlane.xlu1 %988 }
 0x539   : > { %v739_v28 = vpop.xlane.xlu0 %738  ;;  %v742_v30 = vpop.xlane.xlu1 %741 }
 0x53a   : > { %1576 = vrcp.f32 %v739_v28 }
 0x53b   : > { %1578 = vrcp.f32 %v742_v30 }
 0x53c   : > { %1580 = vrcp.f32 %v866_v24 }
 0x53d   : > { %v750_v31 = vpop.permute.xlu0 %749  ;;  %1582 = vrcp.f32 %v863_v22  ;;  %v873_v37 = vpop.permute.xlu1 %872 }
 0x53e   : > { %1436 = vmatpush3.bf16.msra.mxu1 %v750_v31  ;;  %1584 = vrcp.f32 %v986_v25  ;;  %v1339_v25 = vld [vmem:[%s1886_s4] ss:$0 sm:$0xff]  ;;  %v1188_v31 = vunpack.c.h.bf16 %v1730_v23 }
 0x53f   : > { %1447 = vmatprep.subr.bf16.mxu1 %v1601_v4  ;;  %1586 = vrcp.f32 %v989_v27  ;;  %v1187_v27 = vunpack.c.l.bf16 %v1730_v23 }
 0x541   : > { %v996_v44 = vpop.permute.xlu1 %995 }
 0x544   : > { %v1577_v32 = vpop.eup %1576 }
 0x545   : > { %v1579_v33 = vpop.eup %1578  ;;  %v744_v34 = vmul.f32 %v1577_v32, %v1573_v16 }
 0x546   : > { %v746_v35 = vmul.f32 %v1579_v33, %v1575_v19  ;;  %v1581_v36 = vpop.eup %1580 }
 0x547   : > { %v1583_v38 = vpop.eup %1582  ;;  %v870_v39 = vmul.f32 %v1581_v36, %v1567_v12 }
 0x548   : > { %v747_v53 = vpack.c.bf16 %v746_v35, %v744_v34  ;;  %v868_v40 = vmul.f32 %v1583_v38, %v1565_v10  ;;  %v1585_v41 = vpop.eup %1584 }
 0x549   : > { %v1587_v43 = vpop.eup %1586  ;;  %v991_v45 = vmul.f32 %v1585_v41, %v1571_v15 }
 0x54a   : > { %1438 = vmatmul.mubr.msk.bf16.vlgmr.msra.gmra.mrb[16].mxu1 %vm602_vm2, %v747_v53  ;;  %v871_v42 = vpack.c.bf16 %v870_v39, %v868_v40  ;;  %v993_v46 = vmul.f32 %v1587_v43, %v1569_v14 }
 0x54b   : > { %1448 = vmatpush3.bf16.msra.mxu1 %v873_v37  ;;  %1449 = vmatprep.mubr.msk.bf16.mxu1 %vm1602_vm0, %v1601_v4 }
 0x54c   : > { %1459 = vmatprep.subr.bf16.mxu1 %v1601_v4  ;;  %v994_v47 = vpack.c.bf16 %v993_v46, %v991_v45 }
 0x552   : > { %1450 = vmatmul.mubr.msk.bf16.vlgmr.msra.gmra.mrb[20].mxu1 %vm602_vm2, %v871_v42 }
 0x553   : > { %1460 = vmatpush3.bf16.msra.mxu1 %v996_v44  ;;  %1461 = vmatprep.mubr.msk.bf16.mxu1 %vm1602_vm0, %v1601_v4 }
 0x55a   : > { %1462 = vmatmul.mubr.msk.bf16.vlgmr.msra.gmra.mrb[24].mxu1 %vm602_vm2, %v994_v47 }
 0x61d   : > { %v789_v54 = vpop.f32.mrb[16].mxu1 }
 0x61e   : > { %v1439_v55 = vpop.f32.mrb[17].mxu1 }
 0x61f   : > { %v792_v57 = vpop.f32.mrb[18].mxu1  ;;  %v1349_v55 = vld [vmem:[%s1888_s6] ss:$0 sm:$0xff] }
 0x620   : > { %v1499_v58 = vpack.i.bf16 %v792_v57, %v789_v54  ;;  %v1440_v59 = vpop.f32.mrb[19].mxu1 }
 0x622   : > { %1500 = vrot.lane.b32.xlu1 %v1499_v58, %s1604_s17 }
 0x625   : > { %v912_v61 = vpop.f32.mrb[20].mxu1 }
 0x626   : > { %v1451_v62 = vpop.f32.mrb[21].mxu1 }
 0x627   : > { %v915_v0 = vpop.f32.mrb[22].mxu1 }
 0x628   : > { %v1504_v1 = vpack.i.bf16 %v915_v0, %v912_v61  ;;  %v1452_v2 = vpop.f32.mrb[23].mxu1 }
 0x62a   : > { %1505 = vrot.lane.b32.xlu0 %v1504_v1, %s1605_s18 }
 0x62d   : > { %v1035_v3 = vpop.f32.mrb[24].mxu1 }
 0x62e   : > { %v1463_v5 = vpop.f32.mrb[25].mxu1 }
 0x62f   : > { %v1038_v6 = vpop.f32.mrb[26].mxu1 }
 0x630   : > { %v1509_v7 = vpack.i.bf16 %v1038_v6, %v1035_v3  ;;  %v1464_v8 = vpop.f32.mrb[27].mxu1 }
 0x632   : > { %1510 = vrot.lane.b32.xlu1 %v1509_v7, %s1603_s16 }
 0x694   : > { %v1501_v9 = vpop.permute.xlu1 %1500 }
 0x695   : > { %v1503_v10 = vunpack.i.h.bf16 %v1501_v9  ;;  %v1502_v11 = vunpack.i.l.bf16 %v1501_v9 }
 0x697   : > { %v1067_v15 = vsel %vm552_vm1, %v1796_v29, %v1503_v10  ;;  %v1066_v16 = vsel %vm552_vm1, %v1794_v26, %v1502_v11 }
 0x69c   : > { %v1506_v4 = vpop.permute.xlu0 %1505 }
 0x69d   : > { %v1508_v12 = vunpack.i.h.bf16 %v1506_v4  ;;  %v1507_v13 = vunpack.i.l.bf16 %v1506_v4 }
 0x69f   : > { %v1070_v19 = vsel %vm1068_vm3, %v1067_v15, %v1508_v12  ;;  %v1069_v20 = vsel %vm1068_vm3, %v1066_v16, %v1507_v13 }
 0x6a4   : > { %v1511_v14 = vpop.permute.xlu1 %1510 }
 0x6a5   : > { %v1513_v17 = vunpack.i.h.bf16 %v1511_v14  ;;  %v1512_v18 = vunpack.i.l.bf16 %v1511_v14 }
 0x6a7   : > { %v1073_v21 = vsel %vm1071_vm4, %v1070_v19, %v1513_v17  ;;  %v1072_v22 = vsel %vm1071_vm4, %v1069_v20, %v1512_v18 }
 0x6a8   : > { %v1074_v24 = vpack.c.bf16 %v1073_v21, %v1072_v22 }
 0x6aa   : > { %1482 = vmatmul.mubr.bf16.vlgmr.msra.gmra.mrb[12].mxu0 %v1074_v24 }
 0x77d   : > { %v1180_v28 = vpop.f32.mrb[12].mxu0 }
 0x77e   : > { %v1181_v30 = vadd.f32 %v1339_v25, %v1180_v28  ;;  %v1483_v29 = vpop.f32.mrb[13].mxu0 }
 0x77f   : > { %v1183_v26 = vpop.f32.mrb[14].mxu0 }
 0x780   : > { %v1184_v32 = vadd.f32 %v1339_v25, %v1183_v26  ;;  %v1484_v33 = vpop.f32.mrb[15].mxu0  ;;  %v1189_v34 = vadd.f32 %v1187_v27, %v1181_v30 }
 0x782   : > { %1191 = vadd.xlane.f32.xlu0 %v1189_v34  ;;  %v1190_v35 = vadd.f32 %v1188_v31, %v1184_v32 }
 0x784   : > { %1193 = vadd.xlane.f32.xlu1 %v1190_v35 }
 0x80f   : > { %v1192_v53 = vpop.xlane.xlu0 %1191 }
 0x810   : > { %v1196_v36 = vmul.f32 0.0078125, %v1192_v53 }
 0x811   : > { %v1194_v37 = vpop.xlane.xlu1 %1193 }
 0x812   : > { %v1198_v38 = vsub.f32 %v1189_v34, %v1196_v36  ;;  %v1197_v39 = vmul.f32 0.0078125, %v1194_v37 }
 0x814   : > { %v1199_v40 = vsub.f32 %v1190_v35, %v1197_v39  ;;  %v1200_v41 = vmul.f32 %v1198_v38, %v1198_v38 }
 0x816   : > { %1202 = vadd.xlane.f32.xlu0 %v1200_v41  ;;  %v1201_v42 = vmul.f32 %v1199_v40, %v1199_v40 }
 0x81a   : > { %1204 = vadd.xlane.f32.xlu0 %v1201_v42 }
 0x8a3   : > { %v1203_v43 = vpop.xlane.xlu0 %1202 }
 0x8a4   : > { %v1206_v44 = vmul.f32 0.0078125, %v1203_v43 }
 0x8a6   : > { %v1208_v23 = vadd.f32 1e-05, %v1206_v44 }
 0x8a7   : > { %v1205_v45 = vpop.xlane.xlu0 %1204 }
 0x8a8   : > { %1588 = vrsqrt.f32 %v1208_v23  ;;  %v1207_v46 = vmul.f32 0.0078125, %v1205_v45 }
 0x8aa   : > { %v1209_v47 = vadd.f32 1e-05, %v1207_v46 }
 0x8ac   : > { %1590 = vrsqrt.f32 %v1209_v47 }
 0x8b2   : > { %v1589_v48 = vpop.eup %1588 }
 0x8b3   : > { %v1212_v49 = vmul.f32 %v1589_v48, %v1198_v38 }
 0x8b5   : > { %v1221_v52 = vmul.f32 %v1348_v50, %v1212_v49 }
 0x8b6   : > { %v1591_v51 = vpop.eup %1590 }
 0x8b7   : > { %v1213_v54 = vmul.f32 %v1591_v51, %v1199_v40  ;;  %v1230_v57 = vadd.f32 %v1349_v55, %v1221_v52 }
 0x8b9   : > { %v1222_v56 = vmul.f32 %v1348_v50, %v1213_v54 }
 0x8bb   : > { %v1231_v58 = vadd.f32 %v1349_v55, %v1222_v56 }
 0x8bd   : > { %v1361_v59 = vpack.c.bf16 %v1231_v58, %v1230_v57 }
 0x8bf   : > { %1362 = vst [vmem:[%s278_s23] sm:$0xff] %v1361_v59  }
 0x8c0 PF: > { %s17_s24 = sadd.s32 1, %s1598_s24  }
 0x8c1   : > { %p14_p4 = scmp.ge.s32.totalorder %s17_s24, 4  }
 0x8c3   :  { %16 = sbr.rel (!%p14_p4) target bundleno = 1 (0x1), region = 78 }

// kernel: vision_language_model_forward.17
= control target key start
LH: loop header
LB: loop body
LE: loop exit
PB: predicated region body
PF: predicated region fallthrough
CT: control target
= control target key end

     0   :  { %v581_v1 = vmov 0   ;;  %v47_v34 = vlaneseq  ;;  %s741_s1 = inlined_call_operand.vmem [shape: bf16[128,256], index: 1, kind: input, shape index: {}]   ;;  %s742_s0 = inlined_call_operand.vmem [shape: bf16[16,128], index: 0, kind: input, shape index: {}]   ;;  %s743_s3 = inlined_call_operand.vmem [shape: bf16[256,128], index: 3, kind: input, shape index: {}]   ;;  %s744_s2 = inlined_call_operand.vmem [shape: f32[1,256], index: 2, kind: input, shape index: {}]   ;;  %s745_s4 = inlined_call_operand.vmem [shape: f32[1,128], index: 4, kind: input, shape index: {}]   ;;  %s746_s5 = inlined_call_operand.vmem [shape: f32[1,128], index: 5, kind: input, shape index: {}]   ;;  %s747_s6 = inlined_call_operand.vmem [shape: f32[1,128], index: 6, kind: input, shape index: {}]   ;;  %s748_s7 = inlined_call_operand.vmem [shape: bf16[16,128], index: 7, kind: output, shape index: {}]  }
   0x1   :  { %v527_v0 = vld [vmem:[%s741_s1 + $0x4] ss:$8 sps:$4 sm:$0xff]   ;;  %175 = vmatprep.mubr.bf16.mxu0 %v581_v1  ;;  %v529_v2 = vld [vmem:[%s741_s1] ss:$8 sps:$4 sm:$0xff]   ;;  %v530_v3 = vld [vmem:[%s741_s1 + $0x14] ss:$8 sps:$4 sm:$0xff]  }
   0x2   :  { %143 = vmatprep.subr.bf16.mxu0 %v527_v0  ;;  %v532_v4 = vld [vmem:[%s741_s1 + $0x10] ss:$8 sps:$4 sm:$0xff]   ;;  %v533_v5 = vld [vmem:[%s741_s1 + $0x24] ss:$8 sps:$4 sm:$0xff]   ;;  %v535_v6 = vld [vmem:[%s741_s1 + $0x20] ss:$8 sps:$4 sm:$0xff]  }
   0x3   :  { %144 = vmatpush1.bf16.msra.mxu0 %v529_v2  ;;  %v536_v7 = vld [vmem:[%s741_s1 + $0x34] ss:$8 sps:$4 sm:$0xff]   ;;  %v538_v8 = vld [vmem:[%s741_s1 + $0x30] ss:$8 sps:$4 sm:$0xff]   ;;  %v539_v9 = vld [vmem:[%s741_s1 + $0x44] ss:$8 sps:$4 sm:$0xff]  }
   0x4   :  { %145 = vmatprep.subr.bf16.mxu0 %v530_v3  ;;  %v541_v10 = vld [vmem:[%s741_s1 + $0x40] ss:$8 sps:$4 sm:$0xff]   ;;  %v542_v11 = vld [vmem:[%s741_s1 + $0x54] ss:$8 sps:$4 sm:$0xff]   ;;  %v544_v12 = vld [vmem:[%s741_s1 + $0x50] ss:$8 sps:$4 sm:$0xff]  }
   0x5   :  { %v545_v13 = vld [vmem:[%s741_s1 + $0x64] ss:$8 sps:$4 sm:$0xff]   ;;  %v547_v14 = vld [vmem:[%s741_s1 + $0x60] ss:$8 sps:$4 sm:$0xff]   ;;  %v548_v15 = vld [vmem:[%s741_s1 + $0x74] ss:$8 sps:$4 sm:$0xff]  }
   0x6   :  { %v550_v16 = vld [vmem:[%s741_s1 + $0x70] ss:$8 sps:$4 sm:$0xff]   ;;  %v673_v17 = vld [vmem:[%s742_s0] sm:$0xff]   ;;  %v554_v20 = vld [vmem:[%s743_s3 + $0x48] sm:$0xff]   ;;  %v48_v35 = vshrl.u32 %v47_v34, 7 }
   0x7   :  { %146 = vmatpush1.bf16.msra.mxu0 %v532_v4  ;;  %v552_v18 = vld [vmem:[%s743_s3 + $0x40] sm:$0xff]   ;;  %v555_v21 = vld [vmem:[%s743_s3 + $0x8] sm:$0xff]   ;;  %v556_v22 = vld [vmem:[%s743_s3 + $0x50] sm:$0xff]  }
   0x8   :  { %147 = vmatprep.subr.bf16.mxu0 %v533_v5  ;;  %v553_v19 = vld [vmem:[%s743_s3] sm:$0xff]   ;;  %504 = vmatprep.subr.bf16.mxu1 %v552_v18  ;;  %v557_v23 = vld [vmem:[%s743_s3 + $0x10] sm:$0xff]   ;;  %v558_v24 = vld [vmem:[%s743_s3 + $0x58] sm:$0xff]   ;;  %v49_v36 = vsub.s32 0, %v48_v35  ;;  %v53_v38 = vsub.s32 1, %v48_v35  ;;  %v401_v35 = vunpack.c.h.bf16 %v673_v17 }
   0x9   :  { %505 = vmatpush3.bf16.msra.mxu1 %v553_v19  ;;  %v559_v25 = vld [vmem:[%s743_s3 + $0x18] sm:$0xff]   ;;  %v560_v26 = vld [vmem:[%s743_s3 + $0x60] sm:$0xff]   ;;  %v562_v28 = vld [vmem:[%s743_s3 + $0x68] sm:$0xff]  }
   0xa   :  { %506 = vmatprep.subr.bf16.mxu1 %v554_v20  ;;  %v561_v27 = vld [vmem:[%s743_s3 + $0x20] sm:$0xff]   ;;  %v563_v29 = vld [vmem:[%s743_s3 + $0x28] sm:$0xff]   ;;  %v564_v30 = vld [vmem:[%s743_s3 + $0x70] sm:$0xff]  }
   0xb   :  { %148 = vmatpush1.bf16.msra.mxu0 %v535_v6  ;;  %v565_v31 = vld [vmem:[%s743_s3 + $0x30] sm:$0xff]   ;;  %v566_v32 = vld [vmem:[%s743_s3 + $0x78] sm:$0xff]   ;;  %v45_v37 = vld [vmem:[%s744_s2] sm:$0x3] }
   0xc   :  { %149 = vmatprep.subr.bf16.mxu0 %v536_v7  ;;  %v567_v33 = vld [vmem:[%s743_s3 + $0x38] sm:$0xff]   ;;  %v50_v39 = vrot.slane %v45_v37, %v49_v36  ;;  %v54_v40 = vrot.slane %v45_v37, %v53_v38 }
   0xd   :  { %507 = vmatpush3.bf16.msra.mxu1 %v555_v21 }
   0xe   :  { %508 = vmatprep.subr.bf16.mxu1 %v556_v22 }
   0xf   :  { %150 = vmatpush1.bf16.msra.mxu0 %v538_v8 }
  0x10   :  { %151 = vmatprep.subr.bf16.mxu0 %v539_v9 }
  0x11   :  { %509 = vmatpush3.bf16.msra.mxu1 %v557_v23 }
  0x12   :  { %510 = vmatprep.subr.bf16.mxu1 %v558_v24 }
  0x13   :  { %152 = vmatpush1.bf16.msra.mxu0 %v541_v10 }
  0x14   :  { %153 = vmatprep.subr.bf16.mxu0 %v542_v11 }
  0x15   :  { %511 = vmatpush3.bf16.msra.mxu1 %v559_v25  ;;  %v476_v25 = vld [vmem:[%s745_s4] ss:$0 sm:$0xff] }
  0x16   :  { %512 = vmatprep.subr.bf16.mxu1 %v560_v26 }
  0x17   :  { %154 = vmatpush1.bf16.msra.mxu0 %v544_v12 }
  0x18   :  { %155 = vmatprep.subr.bf16.mxu0 %v545_v13 }
  0x19   :  { %513 = vmatpush3.bf16.msra.mxu1 %v561_v27 }
  0x1a   :  { %514 = vmatprep.subr.bf16.mxu1 %v562_v28 }
  0x1b   :  { %156 = vmatpush1.bf16.msra.mxu0 %v547_v14 }
  0x1c   :  { %157 = vmatprep.subr.bf16.mxu0 %v548_v15 }
  0x1d   :  { %515 = vmatpush3.bf16.msra.mxu1 %v563_v29  ;;  %v400_v29 = vunpack.c.l.bf16 %v673_v17 }
  0x1e   :  { %516 = vmatprep.subr.bf16.mxu1 %v564_v30 }
  0x1f   :  { %158 = vmatpush1.bf16.msra.mxu0 %v550_v16 }
  0x21   :  { %517 = vmatpush3.bf16.msra.mxu1 %v565_v31 }
  0x22   :  { %176 = vmatmul.mubr.bf16.vlgmr.msra.gmra.mrb[0].mxu0 %v673_v17  ;;  %518 = vmatprep.subr.bf16.mxu1 %v566_v32 }
  0x25   :  { %519 = vmatpush3.bf16.msra.mxu1 %v567_v33 }
  0xf5   :  { %v177_v41 = vpop.f32.mrb[0].mxu0 }
  0xf6   :  { %v178_v42 = vadd.f32 %v177_v41, %v50_v39  ;;  %v179_v43 = vpop.f32.mrb[1].mxu0 }
  0xf7   :  { %v180_v44 = vadd.f32 %v179_v43, %v54_v40  ;;  %v181_v45 = vpop.f32.mrb[2].mxu0 }
  0xf8   :  { %v186_v46 = vmul.f32 %v178_v42, %v178_v42  ;;  %v182_v47 = vadd.f32 %v181_v45, %v50_v39  ;;  %v183_v48 = vpop.f32.mrb[3].mxu0 }
  0xf9   :  { %v187_v49 = vmul.f32 %v180_v44, %v180_v44  ;;  %v184_v50 = vadd.f32 %v183_v48, %v54_v40 }
  0xfa   :  { %v190_v51 = vmul.f32 %v186_v46, %v178_v42  ;;  %v188_v52 = vmul.f32 %v182_v47, %v182_v47 }
  0xfb   :  { %v191_v53 = vmul.f32 %v187_v49, %v180_v44  ;;  %v189_v54 = vmul.f32 %v184_v50, %v184_v50 }
  0xfc   :  { %v194_v55 = vmul.f32 0.044715, %v190_v51  ;;  %v192_v56 = vmul.f32 %v188_v52, %v182_v47  ;;  %v493_v52 = vld [vmem:[%s746_s5] ss:$0 sm:$0xff] }
  0xfd   :  { %v195_v57 = vmul.f32 0.044715, %v191_v53  ;;  %v193_v58 = vmul.f32 %v189_v54, %v184_v50 }
  0xfe   :  { %v198_v59 = vadd.f32 %v194_v55, %v178_v42  ;;  %v196_v60 = vmul.f32 0.044715, %v192_v56  ;;  %v494_v56 = vld [vmem:[%s747_s6] ss:$0 sm:$0xff] }
  0xff   :  { %v197_v61 = vmul.f32 0.044715, %v193_v58  ;;  %v199_v62 = vadd.f32 %v195_v57, %v180_v44 }
 0x100   :  { %v202_v63 = vmul.f32 0.7978846, %v198_v59  ;;  %v200_v0 = vadd.f32 %v196_v60, %v182_v47 }
 0x101   :  { %v201_v1 = vadd.f32 %v197_v61, %v184_v50  ;;  %v203_v2 = vmul.f32 0.7978846, %v199_v62 }
 0x102   :  { %569 = vtanh.f32 %v202_v63  ;;  %v204_v3 = vmul.f32 0.7978846, %v200_v0 }
 0x103   :  { %v205_v4 = vmul.f32 0.7978846, %v201_v1  ;;  %571 = vtanh.f32 %v203_v2 }
 0x104   :  { %573 = vtanh.f32 %v204_v3 }
 0x105   :  { %575 = vtanh.f32 %v205_v4 }
 0x10c   :  { %v570_v5 = vpop.eup %569 }
 0x10d   :  { %v572_v6 = vpop.eup %571  ;;  %v210_v7 = vadd.f32 1.0, %v570_v5 }
 0x10e   :  { %v574_v8 = vpop.eup %573  ;;  %v211_v9 = vadd.f32 1.0, %v572_v6 }
 0x10f   :  { %v576_v10 = vpop.eup %575  ;;  %v212_v11 = vadd.f32 1.0, %v574_v8  ;;  %v214_v12 = vmul.f32 0.5, %v210_v7 }
 0x110   :  { %v213_v13 = vadd.f32 1.0, %v576_v10  ;;  %v215_v14 = vmul.f32 0.5, %v211_v9 }
 0x111   :  { %v216_v15 = vmul.f32 0.5, %v212_v11  ;;  %v218_v18 = vmul.f32 %v214_v12, %v178_v42 }
 0x112   :  { %v217_v16 = vmul.f32 0.5, %v213_v13  ;;  %v219_v20 = vmul.f32 %v215_v14, %v180_v44 }
 0x113   :  { %v220_v19 = vmul.f32 %v216_v15, %v182_v47 }
 0x114   :  { %v221_v21 = vmul.f32 %v217_v16, %v184_v50 }
 0x115   :  { %v222_v22 = vpack.c.bf16 %v220_v19, %v218_v18 }
 0x116   :  { %v223_v23 = vpack.c.bf16 %v221_v21, %v219_v20 }
 0x118   :  { %391 = vmatprep.mubr.bf16.mxu1 %v223_v23 }
 0x119   :  { %392 = vmatmul.mubr.bf16.vlgmr.msra.gmra.mrb[0].mxu1 %v222_v22 }
 0x1ec   :  { %v520_v24 = vpop.f32.mrb[0].mxu1 }
 0x1ed   :  { %v521_v26 = vpop.f32.mrb[1].mxu1 }
 0x1ee   :  { %v522_v27 = vadd.f32 %v521_v26, %v520_v24  ;;  %v523_v28 = vpop.f32.mrb[2].mxu1 }
 0x1ef   :  { %v524_v30 = vpop.f32.mrb[3].mxu1 }
 0x1f0   :  { %v394_v31 = vadd.f32 %v522_v27, %v476_v25  ;;  %v525_v32 = vadd.f32 %v524_v30, %v523_v28 }
 0x1f2   :  { %v397_v33 = vadd.f32 %v525_v32, %v476_v25  ;;  %v402_v34 = vadd.f32 %v400_v29, %v394_v31 }
 0x1f4   :  { %404 = vadd.xlane.f32.xlu0 %v402_v34  ;;  %v403_v36 = vadd.f32 %v401_v35, %v397_v33 }
 0x1f8   :  { %406 = vadd.xlane.f32.xlu0 %v403_v36 }
 0x281   :  { %v405_v37 = vpop.xlane.xlu0 %404 }
 0x282   :  { %v409_v38 = vmul.f32 0.0078125, %v405_v37 }
 0x284   :  { %v411_v39 = vsub.f32 %v402_v34, %v409_v38 }
 0x285   :  { %v407_v40 = vpop.xlane.xlu0 %406 }
 0x286   :  { %v410_v41 = vmul.f32 0.0078125, %v407_v40  ;;  %v413_v42 = vmul.f32 %v411_v39, %v411_v39 }
 0x288   :  { %v412_v43 = vsub.f32 %v403_v36, %v410_v41  ;;  %415 = vadd.xlane.f32.xlu1 %v413_v42 }
 0x28a   :  { %v414_v44 = vmul.f32 %v412_v43, %v412_v43 }
 0x28c   :  { %417 = vadd.xlane.f32.xlu1 %v414_v44 }
 0x315   :  { %v416_v45 = vpop.xlane.xlu1 %415 }
 0x316   :  { %v419_v46 = vmul.f32 0.0078125, %v416_v45 }
 0x318   :  { %v421_v47 = vadd.f32 1e-05, %v419_v46 }
 0x319   :  { %v418_v48 = vpop.xlane.xlu1 %417 }
 0x31a   :  { %577 = vrsqrt.f32 %v421_v47  ;;  %v420_v49 = vmul.f32 0.0078125, %v418_v48 }
 0x31c   :  { %v422_v17 = vadd.f32 1e-05, %v420_v49 }
 0x31e   :  { %579 = vrsqrt.f32 %v422_v17 }
 0x324   :  { %v578_v50 = vpop.eup %577 }
 0x325   :  { %v425_v51 = vmul.f32 %v578_v50, %v411_v39 }
 0x327   :  { %v434_v54 = vmul.f32 %v493_v52, %v425_v51 }
 0x328   :  { %v580_v53 = vpop.eup %579 }
 0x329   :  { %v426_v55 = vmul.f32 %v580_v53, %v412_v43  ;;  %v443_v58 = vadd.f32 %v494_v56, %v434_v54 }
 0x32b   :  { %v435_v57 = vmul.f32 %v493_v52, %v426_v55 }
 0x32d   :  { %v444_v59 = vadd.f32 %v494_v56, %v435_v57 }
 0x32f   :  { %v502_v60 = vpack.c.bf16 %v444_v59, %v443_v58 }
 0x331   :  { %503 = vst [vmem:[%s748_s7] sm:$0xff] %v502_v60  }

// kernel: vision_language_model_forward.18
= control target key start
LH: loop header
LB: loop body
LE: loop exit
PB: predicated region body
PF: predicated region fallthrough
CT: control target
= control target key end

     0   :  { %v150_v7 = vmov 0   ;;  %v151_v21 = vmov 0.0   ;;  %v45_v25 = vlaneseq  ;;  %vm55_vm2 = vcmask 1041409   ;;  %s196_s0 = inlined_call_operand.vmem [shape: bf16[2,8,128], index: 0, kind: input, shape index: {}]   ;;  %s197_s1 = inlined_call_operand.vmem [shape: f32[8,128], index: 1, kind: input, shape index: {}]   ;;  %s198_s2 = inlined_call_operand.vmem [shape: f32[1,8], index: 2, kind: input, shape index: {}]   ;;  %s199_s3 = inlined_call_operand.vmem [shape: f32[3,2,8], index: 3, kind: output, shape index: {}]  }
   0x1   :  { %v130_v0 = vld [vmem:[%s196_s0] sm:$0xff]   ;;  %135 = vset.pattern.permute.xlu1 %v150_v7  ;;  %136 = vset.pattern.permute.xlu0 %v150_v7  ;;  %vm58_vm3 = vcmask 58368  }
   0x2   :  { %v18_v1 = vld [vmem:[%s197_s1] sm:$0xff]  ;;  %v131_v3 = vunpack.c.l.bf16 %v130_v0  ;;  %v132_v4 = vunpack.c.h.bf16 %v130_v0  ;;  %v46_v26 = vand.u32 127, %v45_v25  ;;  %v48_v27 = vshrl.u32 %v45_v25, 7 }
   0x3   :  { %v122_v2 = vld [vmem:[%s198_s2] ss:$0 sm:$0xff] }
   0x4   :  { %32 = vbcast.lane.b32.xlu1 %v122_v2, 256  ;;  %v19_v5 = vmul.f32 %v131_v3, %v18_v1  ;;  %v20_v6 = vmul.f32 %v132_v4, %v18_v1  ;;  %v49_v28 = vsub.s32 %v46_v26, %v48_v27 }
   0x6   :  { %21 = vadd.xlane.f32.xlu0 %v19_v5 }
   0xa   :  { %23 = vadd.xlane.f32.xlu0 %v20_v6 }
  0x76   :  { %v33_v8 = vpop.permute.xlu1 %32 }
  0x93   :  { %v22_v9 = vpop.xlane.xlu0 %21 }
  0x94   :  { %v35_v10 = vadd.f32 %v33_v8, %v22_v9 }
  0x96   :  { %v123_v11 = vmul.f32 -1.442695, %v35_v10  ;;  %40 = vperm.xlu1 %135, %v35_v10   ;;  %vm92_vm1 = vcmp.ge.f32.partialorder %v35_v10, 0.6 }
  0x97   :  { %v24_v12 = vpop.xlane.xlu0 %23  ;;  %v126_v23 = vsel %vm92_vm1, 1.0, %v151_v21 }
  0x98   :  { %142 = vpow2.f32 %v123_v11  ;;  %v36_v13 = vadd.f32 %v33_v8, %v24_v12 }
  0x9a   :  { %v124_v14 = vmul.f32 -1.442695, %v36_v13  ;;  %43 = vperm.xlu0 %136, %v36_v13   ;;  %vm93_vm0 = vcmp.ge.f32.partialorder %v36_v13, 0.6 }
  0x9b   :  { %v127_v22 = vsel %vm93_vm0, 1.0, %v151_v21 }
  0x9c   :  { %144 = vpow2.f32 %v124_v14  ;;  %v137_v24 = vpack.i.bf16 %v127_v22, %v126_v23 }
  0xa2   :  { %v143_v15 = vpop.eup %142 }
  0xa3   :  { %v66_v16 = vadd.f32 1.0, %v143_v15 }
  0xa5   :  { %146 = vrcp.f32 %v66_v16 }
  0xa6   :  { %v145_v17 = vpop.eup %144 }
  0xa7   :  { %v67_v18 = vadd.f32 1.0, %v145_v17 }
  0xa9   :  { %148 = vrcp.f32 %v67_v18 }
  0xaf   :  { %v147_v19 = vpop.eup %146 }
  0xb0   :  { %75 = vperm.xlu1 %135, %v147_v19  }
  0xb3   :  { %v149_v20 = vpop.eup %148 }
  0xb4   :  { %78 = vperm.xlu1 %135, %v149_v20  }
  0xb8   :  { %138 = vperm.xlu1 %135, %v137_v24  }
 0x115   :  { %v41_v29 = vpop.permute.xlu1 %40 }
 0x116   :  { %v50_v31 = vrot.slane %v41_v29, %v49_v28 }
 0x119   :  { %v44_v30 = vpop.permute.xlu0 %43 }
 0x11a   :  { %v54_v32 = vrot.slane %v44_v30, %v49_v28 }
 0x11c   :  { %v56_v33 = vsel %vm55_vm2, %v54_v32, %v50_v31 }
 0x11d   :  { %59 = vst.msk [vmem:[%s199_s3] sm:$0x3] %vm58_vm3, %v56_v33 }
 0x12f   :  { %v76_v34 = vpop.permute.xlu1 %75 }
 0x130   :  { %v83_v36 = vrot.slane %v76_v34, %v49_v28 }
 0x133   :  { %v79_v35 = vpop.permute.xlu1 %78 }
 0x134   :  { %v87_v37 = vrot.slane %v79_v35, %v49_v28 }
 0x136   :  { %v88_v38 = vsel %vm55_vm2, %v87_v37, %v83_v36 }
 0x137   :  { %125 = vst.msk [vmem:[%s199_s3 + $0x2] sm:$0x3] %vm58_vm3, %v88_v38  ;;  %v139_v39 = vpop.permute.xlu1 %138 }
 0x138   :  { %v141_v40 = vunpack.i.h.bf16 %v139_v39  ;;  %v140_v41 = vunpack.i.l.bf16 %v139_v39 }
 0x13a   :  { %v113_v42 = vrot.slane %v141_v40, %v49_v28  ;;  %v109_v43 = vrot.slane %v140_v41, %v49_v28 }
 0x13c   :  { %v114_v44 = vsel %vm55_vm2, %v113_v42, %v109_v43 }
 0x13d   :  { %128 = vst.msk [vmem:[%s199_s3 + $0x4] sm:$0x3] %vm58_vm3, %v114_v44 }

// kernel: vision_language_model_forward.15
= control target key start
LH: loop header
LB: loop body
LE: loop exit
PB: predicated region body
PF: predicated region fallthrough
CT: control target
= control target key end

     0   :  { %s1495_s24 = smov 0   ;;  %s1722_s0 = inlined_call_operand.vmem [shape: bf16[2,8,128], index: 0, kind: input, shape index: {}]   ;;  %s1723_s1 = inlined_call_operand.vmem [shape: bf16[128,384], index: 1, kind: input, shape index: {}]   ;;  %s1724_s2 = inlined_call_operand.vmem [shape: f32[1,384], index: 2, kind: input, shape index: {}]   ;;  %s1725_s3 = inlined_call_operand.vmem [shape: bf16[128,128], index: 3, kind: input, shape index: {}]   ;;  %s1726_s4 = inlined_call_operand.vmem [shape: f32[1,128], index: 4, kind: input, shape index: {}]   ;;  %s1727_s5 = inlined_call_operand.vmem [shape: f32[1,128], index: 5, kind: input, shape index: {}]   ;;  %s1728_s6 = inlined_call_operand.vmem [shape: f32[1,128], index: 6, kind: input, shape index: {}]   ;;  %s1729_s7 = inlined_call_operand.vmem [shape: bf16[2,8,128], index: 7, kind: output, shape index: {}]  }
   0x1 LB: > { %s1195_s25 = sadd.s32 4294967295, %s1447_s24   ;;  %p1199_p0 = scmp.ge.s32.totalorder %s1447_s24, 1  ;;  %s1447_s24 = sphi %s1495_s24, %s17_s24  }
   0x2   : > { %p236_p1 = scmp.lt.s32.totalorder %s1447_s24, 3 }
   0x4   : > { %p237_p2 = pnand %p1199_p0, %p236_p1 }
   0x5   : > { %v1383_v0 = vld [vmem:[%s1723_s1 + $0x4] ss:$12 sps:$4 sm:$0xff] (!%p237_p2)   ;;  %v1385_v1 = vld [vmem:[%s1723_s1] ss:$12 sps:$4 sm:$0xff] (!%p237_p2)   ;;  %v1449_v2 = vmov (!%p237_p2), 0   ;;  %v1450_v4 = vmov (!%p237_p2), 0.0   ;;  %v310_v27 = vlaneseq (!%p237_p2) }
   0x6   : > { %240 = sbr.rel (%p237_p2) target bundleno = 2215 (0x8a7), region = 48  ;;  %485 = vmatprep.mubr.bf16.mxu0 (!%p237_p2), %v1449_v2  ;;  %453 = vmatprep.subr.bf16.mxu0 (!%p237_p2), %v1383_v0  ;;  %v1386_v3 = vld [vmem:[%s1723_s1 + $0x1c] ss:$12 sps:$4 sm:$0xff] (!%p237_p2)   ;;  %v1388_v5 = vld [vmem:[%s1723_s1 + $0x18] ss:$12 sps:$4 sm:$0xff] (!%p237_p2)   ;;  %p266_p3 = scmp.lt.s32.totalorder (!%p237_p2), %s1195_s25, 1 }
   0x7   : > { %1281 = vmatprep.subr.bf16.mxu1 (!%p237_p2), %v1450_v4  ;;  %454 = vmatpush1.bf16.msra.mxu0 (!%p237_p2), %v1385_v1  ;;  %v1389_v6 = vld [vmem:[%s1723_s1 + $0x34] ss:$12 sps:$4 sm:$0xff] (!%p237_p2)   ;;  %v1391_v7 = vld [vmem:[%s1723_s1 + $0x30] ss:$12 sps:$4 sm:$0xff] (!%p237_p2)   ;;  %v1392_v8 = vld [vmem:[%s1723_s1 + $0x4c] ss:$12 sps:$4 sm:$0xff] (!%p237_p2)  }
   0x8   : > { %455 = vmatprep.subr.bf16.mxu0 (!%p237_p2), %v1386_v3  ;;  %v1394_v9 = vld [vmem:[%s1723_s1 + $0x48] ss:$12 sps:$4 sm:$0xff] (!%p237_p2)   ;;  %v1395_v11 = vld [vmem:[%s1723_s1 + $0x64] ss:$12 sps:$4 sm:$0xff] (!%p237_p2)   ;;  %v1408_v12 = vld [vmem:[%s1723_s1 + $0x20] ss:$12 sps:$4 sm:$0xff] (!%p237_p2)  }
   0x9   : > { %v1407_v10 = vld [vmem:[%s1723_s1 + $0x8] ss:$12 sps:$4 sm:$0xff] (!%p237_p2)   ;;  %v1397_v13 = vld [vmem:[%s1723_s1 + $0x60] ss:$12 sps:$4 sm:$0xff] (!%p237_p2)   ;;  %v1400_v15 = vld [vmem:[%s1723_s1 + $0x78] ss:$12 sps:$4 sm:$0xff] (!%p237_p2)  }
   0xa   : > { %1282 = vmatpush3.bf16.msra.mxu1 (!%p237_p2), %v1407_v10  ;;  %v1398_v14 = vld [vmem:[%s1723_s1 + $0x7c] ss:$12 sps:$4 sm:$0xff] (!%p237_p2)   ;;  %v1409_v16 = vld [vmem:[%s1723_s1 + $0x38] ss:$12 sps:$4 sm:$0xff] (!%p237_p2)   ;;  %v1401_v17 = vld [vmem:[%s1723_s1 + $0x94] ss:$12 sps:$4 sm:$0xff] (!%p237_p2)  }
   0xb   : > { %456 = vmatpush1.bf16.msra.mxu0 (!%p237_p2), %v1388_v5  ;;  %1283 = vmatprep.subr.bf16.mxu1 (!%p237_p2), %v1450_v4  ;;  %v1410_v18 = vld [vmem:[%s1723_s1 + $0x50] ss:$12 sps:$4 sm:$0xff] (!%p237_p2)   ;;  %v1404_v20 = vld [vmem:[%s1723_s1 + $0xac] ss:$12 sps:$4 sm:$0xff] (!%p237_p2)   ;;  %v1411_v21 = vld [vmem:[%s1723_s1 + $0x68] ss:$12 sps:$4 sm:$0xff] (!%p237_p2)  }
   0xc   : > { %457 = vmatprep.subr.bf16.mxu0 (!%p237_p2), %v1389_v6  ;;  %v1403_v19 = vld [vmem:[%s1723_s1 + $0x90] ss:$12 sps:$4 sm:$0xff] (!%p237_p2)   ;;  %v1406_v22 = vld [vmem:[%s1723_s1 + $0xa8] ss:$12 sps:$4 sm:$0xff] (!%p237_p2)   ;;  %v1412_v23 = vld [vmem:[%s1723_s1 + $0x80] ss:$12 sps:$4 sm:$0xff] (!%p237_p2)  }
   0xd   : > { %s1731_s25 = smov (!%p266_p3, %s1195_s25), 1  ;;  %v1413_v25 = vld [vmem:[%s1723_s1 + $0x98] ss:$12 sps:$4 sm:$0xff]   ;;  %v1414_v26 = vld [vmem:[%s1723_s1 + $0xb0] ss:$12 sps:$4 sm:$0xff]   ;;  %vm1451_vm0 = vmmov 0  }
   0xe   : > { %1284 = vmatpush3.bf16.msra.mxu1 %v1408_v12  ;;  %s1200_s20 = sshll.u32 %s1731_s25, 2  ;;  %1297 = vmatprep.mubr.msk.bf16.mxu1 %vm1451_vm0, %v1450_v4  ;;  %v311_v28 = vshrl.u32 %v310_v27, 7  ;;  %v308_v30 = vld [vmem:[%s1724_s2] sm:$0x7]  ;;  %vm537_vm1 = vcmask 261120   ;;  %s1452_s15 = smov 96  }
   0xf   : > { %458 = vmatpush1.bf16.msra.mxu0 %v1391_v7  ;;  %1285 = vmatprep.subr.bf16.mxu1 %v1450_v4  ;;  %s269_s29 = scalar_lea.vmem %s1722_s0, %s1200_s20  ;;  %s1453_s16 = smov 64   ;;  %vm601_vm2 = vcmask 1043456   ;;  %vm585_vm3 = vcmask 64512   ;;  %vm994_vm4 = vcmask 523264   ;;  %vm996_vm5 = vcmask 785408  }
  0x10   : > { %459 = vmatprep.subr.bf16.mxu0 %v1392_v8  ;;  %v1583_v24 = vld [vmem:[%s269_s29] sm:$0xf]  ;;  %v316_v29 = vsub.s32 1, %v311_v28  ;;  %v312_v31 = vsub.s32 0, %v311_v28  ;;  %s1454_s17 = smov 32   ;;  %v320_v43 = vsub.s32 2, %v311_v28  ;;  %s273_s23 = scalar_lea.vmem %s1729_s7, %s1200_s20 }
  0x12   : > { %1286 = vmatpush3.bf16.msra.mxu1 %v1409_v16  ;;  %v317_v32 = vrot.slane %v308_v30, %v316_v29  ;;  %v313_v33 = vrot.slane %v308_v30, %v312_v31  ;;  %v321_v44 = vrot.slane %v308_v30, %v320_v43 }
  0x13   : > { %460 = vmatpush1.bf16.msra.mxu0 %v1394_v9  ;;  %1287 = vmatprep.subr.bf16.mxu1 %v1450_v4 }
  0x14   : > { %461 = vmatprep.subr.bf16.mxu0 %v1395_v11 }
  0x16   : > { %1288 = vmatpush3.bf16.msra.mxu1 %v1410_v18 }
  0x17   : > { %462 = vmatpush1.bf16.msra.mxu0 %v1397_v13  ;;  %1289 = vmatprep.subr.bf16.mxu1 %v1450_v4 }
  0x18   : > { %463 = vmatprep.subr.bf16.mxu0 %v1398_v14 }
  0x1a   : > { %1290 = vmatpush3.bf16.msra.mxu1 %v1411_v21 }
  0x1b   : > { %464 = vmatpush1.bf16.msra.mxu0 %v1400_v15  ;;  %1291 = vmatprep.subr.bf16.mxu1 %v1450_v4 }
  0x1c   : > { %465 = vmatprep.subr.bf16.mxu0 %v1401_v17 }
  0x1e   : > { %1292 = vmatpush3.bf16.msra.mxu1 %v1412_v23 }
  0x1f   : > { %466 = vmatpush1.bf16.msra.mxu0 %v1403_v19  ;;  %1293 = vmatprep.subr.bf16.mxu1 %v1450_v4 }
  0x20   : > { %467 = vmatprep.subr.bf16.mxu0 %v1404_v20 }
  0x22   : > { %1294 = vmatpush3.bf16.msra.mxu1 %v1413_v25 }
  0x23   : > { %468 = vmatpush1.bf16.msra.mxu0 %v1406_v22  ;;  %1295 = vmatprep.subr.bf16.mxu1 %v1450_v4 }
  0x24   : > { %1325 = vmatprep.subr.bf16.mxu0 %v1450_v4 }
  0x26   : > { %486 = vmatmul.mubr.bf16.vlgmr.msra.gmra.mrb[0].mxu0 %v1583_v24  ;;  %1296 = vmatpush3.bf16.msra.mxu1 %v1414_v26 }
  0x27   : > { %1301 = vmatprep.subr.bf16.mxu1 %v1450_v4  ;;  %1327 = vmatprep.mubr.msk.bf16.mxu0 %vm1451_vm0, %v1450_v4 }
  0x29   : > { %1298 = vmatmul.mubr.bf16.vlgmr.msra.gmra.mrb[0].mxu1 %v1583_v24 }
  0x2a   : > { %1303 = vmatprep.mubr.msk.bf16.mxu1 %vm1451_vm0, %v1450_v4 }
  0xf9   : > { %v487_v34 = vpop.f32.mrb[0].mxu0 }
  0xfa   : > { %v489_v35 = vpop.f32.mrb[1].mxu0  ;;  %v488_v39 = vadd.f32 %v487_v34, %v313_v33 }
  0xfb   : > { %v490_v36 = vadd.f32 %v489_v35, %v317_v32  ;;  %v491_v37 = vpop.f32.mrb[2].mxu0 }
  0xfc   : > { %v492_v38 = vpop.f32.mrb[3].mxu0  ;;  %v534_v42 = vpack.c.bf16 %v488_v39, %v488_v39  ;;  %v528_v45 = vpop.f32.mrb[0].mxu1 }
  0xfd   : > { %v535_v40 = vpack.c.bf16 %v490_v36, %v490_v36  ;;  %v529_v46 = vadd.f32 %v528_v45, %v321_v44  ;;  %v1299_v47 = vpop.f32.mrb[1].mxu1 }
  0xfe   : > { %v531_v48 = vpop.f32.mrb[2].mxu1 }
  0xff   : > { %649 = vrot.lane.b32.xlu1 %v535_v40, %s1452_s15  ;;  %v542_v41 = vsel %vm537_vm1, %v535_v40, 0  ;;  %v1616_v49 = vpack.c.bf16 %v529_v46, %v529_v46  ;;  %v1300_v50 = vpop.f32.mrb[3].mxu1 }
 0x100   : > { %1302 = vmatpush3.bf16.xpose.msra.mxu1 %v542_v41 }
 0x101   : > { %1307 = vmatprep.subr.bf16.mxu1 %v1450_v4  ;;  %v603_v51 = vsel %vm601_vm2, %v1616_v49, 0 }
 0x103   : > { %646 = vrot.lane.b32.xlu1 %v534_v42, %s1452_s15 }
 0x107   : > { %759 = vrot.lane.b32.xlu1 %v534_v42, %s1453_s16  ;;  %1304 = vmatmul.mubr.msk.bf16.vlgmr.msra.gmra.mrb[4].mxu1 %vm537_vm1, %v534_v42 }
 0x108   : > { %1309 = vmatprep.mubr.msk.bf16.mxu1 %vm1451_vm0, %v1450_v4  ;;  %1308 = vmatpush3.bf16.msra.mxu1 %v603_v51 }
 0x109   : > { %1313 = vmatprep.subr.bf16.mxu1 %v1450_v4 }
 0x10b   : > { %872 = vrot.lane.b32.xlu1 %v535_v40, %s1454_s17 }
 0x10f   : > { %870 = vrot.lane.b32.xlu1 %v534_v42, %s1454_s17 }
 0x171   : > { %v650_v63 = vpop.permute.xlu1 %649 }
 0x172   : > { %v655_v11 = vsel %vm537_vm1, %v650_v63, 0 }
 0x175   : > { %v647_v0 = vpop.permute.xlu1 %646 }
 0x179   : > { %v760_v2 = vpop.permute.xlu1 %759 }
 0x17d   : > { %v873_v6 = vpop.permute.xlu1 %872 }
 0x17e   : > { %v878_v9 = vsel %vm537_vm1, %v873_v6, 0  ;;  %v1415_v6 = vld [vmem:[%s1725_s3] sm:$0xff]  }
 0x181   : > { %v871_v12 = vpop.permute.xlu1 %870 }
 0x1da   : > { %v578_v52 = vpop.f32.mrb[4].mxu1 }
 0x1db   : > { %v584_v53 = vmul.f32 0.17677669, %v578_v52  ;;  %v1305_v54 = vpop.f32.mrb[5].mxu1 }
 0x1dc   : > { %v581_v55 = vpop.f32.mrb[6].mxu1 }
 0x1dd   : > { %v1306_v56 = vpop.f32.mrb[7].mxu1  ;;  %v586_v57 = vsel %vm585_vm3, %v584_v53, -inf }
 0x1de   : > { %587 = vmax.xlane.f32.xlu0 %v586_v57 }
 0x26b   : > { %v588_v58 = vpop.xlane.xlu0 %587 }
 0x26c   : > { %v589_v59 = vsub.f32 %v584_v53, %v588_v58 }
 0x26e   : > { %v590_v60 = vmul.f32 1.442695, %v589_v59 }
 0x270   : > { %1423 = vpow2.f32 %v590_v60 }
 0x27a   : > { %v1424_v61 = vpop.eup %1423 }
 0x27b   : > { %v592_v62 = vsel %vm585_vm3, %v1424_v61, 0.0 }
 0x27c   : > { %593 = vadd.xlane.f32.xlu0 %v592_v62 }
 0x292   : > { %761 = vrot.lane.b32.xlu0 %v535_v40, %s1453_s16 }
 0x309   : > { %v594_v1 = vpop.xlane.xlu0 %593 }
 0x30a   : > { %1425 = vrcp.f32 %v594_v1 }
 0x30d   : > { %v762_v3 = vpop.permute.xlu0 %761 }
 0x30e   : > { %v767_v5 = vsel %vm537_vm1, %v762_v3, 0 }
 0x30f   : > { %1326 = vmatpush3.bf16.xpose.msra.mxu0 %v767_v5 }
 0x310   : > { %1337 = vmatprep.subr.bf16.mxu0 %v1450_v4 }
 0x314   : > { %v1426_v7 = vpop.eup %1425 }
 0x315   : > { %v596_v8 = vmul.f32 %v1426_v7, %v1424_v61  ;;  %v1416_v7 = vld [vmem:[%s1725_s3 + $0x8] sm:$0xff]  }
 0x316   : > { %1328 = vmatmul.mubr.msk.bf16.vlgmr.msra.gmra.mrb[4].mxu0 %vm537_vm1, %v760_v2 }
 0x317   : > { %1338 = vmatpush3.bf16.xpose.msra.mxu0 %v878_v9  ;;  %v597_v10 = vpack.c.bf16 %v596_v8, %v596_v8  ;;  %1339 = vmatprep.mubr.msk.bf16.mxu0 %vm1451_vm0, %v1450_v4  ;;  %v1417_v8 = vld [vmem:[%s1725_s3 + $0x10] sm:$0xff]   ;;  %v1418_v9 = vld [vmem:[%s1725_s3 + $0x18] sm:$0xff]  }
 0x318   : > { %1349 = vmatprep.subr.bf16.mxu0 %v1450_v4 }
 0x319   : > { %1310 = vmatmul.mubr.msk.bf16.vlgmr.msra.gmra.mrb[8].mxu1 %vm585_vm3, %v597_v10  ;;  %v1419_v10 = vld [vmem:[%s1725_s3 + $0x20] sm:$0xff]  }
 0x31a   : > { %1314 = vmatpush3.bf16.xpose.msra.mxu1 %v655_v11  ;;  %1315 = vmatprep.mubr.msk.bf16.mxu1 %vm1451_vm0, %v1450_v4  ;;  %v1420_v11 = vld [vmem:[%s1725_s3 + $0x28] sm:$0xff]  }
 0x31b   : > { %1319 = vmatprep.subr.bf16.mxu1 %v1450_v4 }
 0x31e   : > { %1340 = vmatmul.mubr.msk.bf16.vlgmr.msra.gmra.mrb[8].mxu0 %vm537_vm1, %v871_v12  ;;  %v1421_v12 = vld [vmem:[%s1725_s3 + $0x30] sm:$0xff]  }
 0x31f   : > { %1365 = vmatprep.mubr.msk.bf16.mxu0 %vm1451_vm0, %v1450_v4  ;;  %1350 = vmatpush3.bf16.msra.mxu0 %v1415_v6 }
 0x320   : > { %1351 = vmatprep.subr.bf16.mxu0 %v1450_v4 }
 0x321   : > { %1316 = vmatmul.mubr.msk.bf16.vlgmr.msra.gmra.mrb[12].mxu1 %vm537_vm1, %v647_v0 }
 0x322   : > { %1321 = vmatprep.mubr.msk.bf16.mxu1 %vm1451_vm0, %v1450_v4 }
 0x323   : > { %1352 = vmatpush3.bf16.msra.mxu0 %v1416_v7 }
 0x324   : > { %1353 = vmatprep.subr.bf16.mxu0 %v1450_v4 }
 0x327   : > { %1354 = vmatpush3.bf16.msra.mxu0 %v1417_v8 }
 0x328   : > { %1355 = vmatprep.subr.bf16.mxu0 %v1450_v4 }
 0x32b   : > { %1356 = vmatpush3.bf16.msra.mxu0 %v1418_v9 }
 0x32c   : > { %1357 = vmatprep.subr.bf16.mxu0 %v1450_v4 }
 0x32f   : > { %1358 = vmatpush3.bf16.msra.mxu0 %v1419_v10 }
 0x330   : > { %1359 = vmatprep.subr.bf16.mxu0 %v1450_v4 }
 0x333   : > { %1360 = vmatpush3.bf16.msra.mxu0 %v1420_v11 }
 0x334   : > { %1361 = vmatprep.subr.bf16.mxu0 %v1450_v4 }
 0x337   : > { %1362 = vmatpush3.bf16.msra.mxu0 %v1421_v12 }
 0x338   : > { %1363 = vmatprep.subr.bf16.mxu0 %v1450_v4 }
 0x3e9   : > { %v803_v13 = vpop.f32.mrb[4].mxu0 }
 0x3ea   : > { %v809_v14 = vmul.f32 0.17677669, %v803_v13  ;;  %v1329_v15 = vpop.f32.mrb[5].mxu0 }
 0x3eb   : > { %v806_v16 = vpop.f32.mrb[6].mxu0 }
 0x3ec   : > { %v1642_v17 = vpop.f32.mrb[8].mxu1  ;;  %v1330_v18 = vpop.f32.mrb[7].mxu0  ;;  %v810_v19 = vsel %vm585_vm3, %v809_v14, -inf }
 0x3ed   : > { %811 = vmax.xlane.f32.xlu0 %v810_v19  ;;  %v1311_v20 = vpop.f32.mrb[9].mxu1  ;;  %v1422_v18 = vld [vmem:[%s1725_s3 + $0x38] sm:$0xff]  }
 0x3ee   : > { %v642_v21 = vpop.f32.mrb[10].mxu1  ;;  %1364 = vmatpush3.bf16.msra.mxu0 %v1422_v18 }
 0x3ef   : > { %v1312_v22 = vpop.f32.mrb[11].mxu1 }
 0x3f1   : > { %v914_v23 = vpop.f32.mrb[8].mxu0 }
 0x3f2   : > { %v1341_v25 = vpop.f32.mrb[9].mxu0  ;;  %v920_v32 = vmul.f32 0.17677669, %v914_v23 }
 0x3f3   : > { %v917_v26 = vpop.f32.mrb[10].mxu0 }
 0x3f4   : > { %v691_v27 = vpop.f32.mrb[12].mxu1  ;;  %v1342_v28 = vpop.f32.mrb[11].mxu0  ;;  %v921_v35 = vsel %vm585_vm3, %v920_v32, -inf }
 0x3f5   : > { %v697_v29 = vmul.f32 0.17677669, %v691_v27  ;;  %v1317_v30 = vpop.f32.mrb[13].mxu1 }
 0x3f6   : > { %v694_v31 = vpop.f32.mrb[14].mxu1 }
 0x3f7   : > { %v1318_v33 = vpop.f32.mrb[15].mxu1  ;;  %v698_v34 = vsel %vm585_vm3, %v697_v29, -inf }
 0x3f8   : > { %699 = vmax.xlane.f32.xlu1 %v698_v34  ;;  %v1234_v34 = vld [vmem:[%s1726_s4] ss:$0 sm:$0xff] }
 0x3fc   : > { %922 = vmax.xlane.f32.xlu1 %v921_v35  ;;  %v1110_v35 = vunpack.c.l.bf16 %v1583_v24  ;;  %v1243_v24 = vld [vmem:[%s1727_s5] ss:$0 sm:$0xff] }
 0x47a   : > { %v812_v36 = vpop.xlane.xlu0 %811 }
 0x47b   : > { %v813_v37 = vsub.f32 %v809_v14, %v812_v36 }
 0x47d   : > { %v814_v38 = vmul.f32 1.442695, %v813_v37 }
 0x47f   : > { %1427 = vpow2.f32 %v814_v38 }
 0x485   : > { %v700_v39 = vpop.xlane.xlu1 %699 }
 0x486   : > { %v701_v40 = vsub.f32 %v697_v29, %v700_v39 }
 0x488   : > { %v702_v45 = vmul.f32 1.442695, %v701_v40 }
 0x489   : > { %v1428_v41 = vpop.eup %1427  ;;  %v923_v42 = vpop.xlane.xlu1 %922 }
 0x48a   : > { %v924_v43 = vsub.f32 %v920_v32, %v923_v42  ;;  %v816_v44 = vsel %vm585_vm3, %v1428_v41, 0.0 }
 0x48b   : > { %817 = vadd.xlane.f32.xlu0 %v816_v44 }
 0x48c   : > { %v925_v46 = vmul.f32 1.442695, %v924_v43 }
 0x48e   : > { %1429 = vpow2.f32 %v925_v46 }
 0x48f   : > { %1431 = vpow2.f32 %v702_v45 }
 0x498   : > { %v1430_v47 = vpop.eup %1429 }
 0x499   : > { %v927_v48 = vsel %vm585_vm3, %v1430_v47, 0.0  ;;  %v1432_v50 = vpop.eup %1431 }
 0x49a   : > { %928 = vadd.xlane.f32.xlu1 %v927_v48  ;;  %v704_v51 = vsel %vm585_vm3, %v1432_v50, 0.0 }
 0x49e   : > { %705 = vadd.xlane.f32.xlu1 %v704_v51  ;;  %v1244_v51 = vld [vmem:[%s1728_s6] ss:$0 sm:$0xff] }
 0x4a1   : > { %711 = vrot.lane.b32.xlu0 %v1616_v49, %s1452_s15 }
 0x4af   : > { %822 = vrot.lane.b32.xlu1 %v1616_v49, %s1453_s16 }
 0x4b3   : > { %933 = vrot.lane.b32.xlu1 %v1616_v49, %s1454_s17 }
 0x518   : > { %v818_v52 = vpop.xlane.xlu0 %817 }
 0x51c   : > { %v712_v53 = vpop.permute.xlu0 %711 }
 0x51d   : > { %v717_v54 = vsel %vm601_vm2, %v712_v53, 0 }
 0x51e   : > { %1320 = vmatpush3.bf16.msra.mxu1 %v717_v54 }
 0x51f   : > { %1331 = vmatprep.subr.bf16.mxu1 %v1450_v4 }
 0x527   : > { %v929_v55 = vpop.xlane.xlu1 %928 }
 0x52b   : > { %v706_v56 = vpop.xlane.xlu1 %705 }
 0x52c   : > { %1433 = vrcp.f32 %v706_v56 }
 0x52d   : > { %1435 = vrcp.f32 %v818_v52 }
 0x52e   : > { %1437 = vrcp.f32 %v929_v55 }
 0x52f   : > { %v823_v59 = vpop.permute.xlu1 %822 }
 0x530   : > { %v828_v62 = vsel %vm601_vm2, %v823_v59, 0 }
 0x533   : > { %v934_v63 = vpop.permute.xlu1 %933 }
 0x534   : > { %v939_v2 = vsel %vm601_vm2, %v934_v63, 0 }
 0x536   : > { %v1434_v57 = vpop.eup %1433 }
 0x537   : > { %v708_v58 = vmul.f32 %v1434_v57, %v1432_v50  ;;  %v1436_v61 = vpop.eup %1435 }
 0x538   : > { %v820_v49 = vmul.f32 %v1436_v61, %v1428_v41  ;;  %v1438_v1 = vpop.eup %1437 }
 0x539   : > { %v709_v60 = vpack.c.bf16 %v708_v58, %v708_v58  ;;  %v931_v3 = vmul.f32 %v1438_v1, %v1430_v47 }
 0x53a   : > { %v821_v0 = vpack.c.bf16 %v820_v49, %v820_v49 }
 0x53b   : > { %1322 = vmatmul.mubr.msk.bf16.vlgmr.msra.gmra.mrb[16].mxu1 %vm585_vm3, %v709_v60  ;;  %v932_v5 = vpack.c.bf16 %v931_v3, %v931_v3 }
 0x53c   : > { %1332 = vmatpush3.bf16.msra.mxu1 %v828_v62  ;;  %1333 = vmatprep.mubr.msk.bf16.mxu1 %vm1451_vm0, %v1450_v4 }
 0x53d   : > { %1343 = vmatprep.subr.bf16.mxu1 %v1450_v4 }
 0x543   : > { %1334 = vmatmul.mubr.msk.bf16.vlgmr.msra.gmra.mrb[20].mxu1 %vm585_vm3, %v821_v0 }
 0x544   : > { %1344 = vmatpush3.bf16.msra.mxu1 %v939_v2  ;;  %1345 = vmatprep.mubr.msk.bf16.mxu1 %vm1451_vm0, %v1450_v4 }
 0x54b   : > { %1346 = vmatmul.mubr.msk.bf16.vlgmr.msra.gmra.mrb[24].mxu1 %vm585_vm3, %v932_v5 }
 0x60e   : > { %v753_v13 = vpop.f32.mrb[16].mxu1 }
 0x60f   : > { %982 = vrot.lane.b32.xlu0 %v753_v13, %s1454_s17  ;;  %v1323_v14 = vpop.f32.mrb[17].mxu1 }
 0x610   : > { %v756_v15 = vpop.f32.mrb[18].mxu1 }
 0x611   : > { %v1324_v16 = vpop.f32.mrb[19].mxu1 }
 0x616   : > { %v864_v19 = vpop.f32.mrb[20].mxu1 }
 0x617   : > { %986 = vrot.lane.b32.xlu1 %v864_v19, %s1453_s16  ;;  %v1335_v20 = vpop.f32.mrb[21].mxu1 }
 0x618   : > { %v867_v21 = vpop.f32.mrb[22].mxu1 }
 0x619   : > { %v1336_v22 = vpop.f32.mrb[23].mxu1 }
 0x61e   : > { %v975_v23 = vpop.f32.mrb[24].mxu1 }
 0x61f   : > { %990 = vrot.lane.b32.xlu0 %v975_v23, %s1452_s15  ;;  %v1347_v25 = vpop.f32.mrb[25].mxu1 }
 0x620   : > { %v978_v26 = vpop.f32.mrb[26].mxu1 }
 0x621   : > { %v1348_v27 = vpop.f32.mrb[27].mxu1 }
 0x681   : > { %v983_v28 = vpop.permute.xlu0 %982 }
 0x682   : > { %v993_v29 = vsel %vm537_vm1, %v1642_v17, %v983_v28 }
 0x689   : > { %v987_v4 = vpop.permute.xlu1 %986 }
 0x68a   : > { %v995_v30 = vsel %vm994_vm4, %v993_v29, %v987_v4 }
 0x691   : > { %v991_v31 = vpop.permute.xlu0 %990 }
 0x692   : > { %v997_v32 = vsel %vm996_vm5, %v995_v30, %v991_v31 }
 0x693   : > { %v998_v33 = vpack.c.bf16 %v997_v32, %v997_v32 }
 0x695   : > { %1366 = vmatmul.mubr.bf16.vlgmr.msra.gmra.mrb[12].mxu0 %v998_v33 }
 0x768   : > { %v1104_v36 = vpop.f32.mrb[12].mxu0 }
 0x769   : > { %v1105_v37 = vadd.f32 %v1234_v34, %v1104_v36  ;;  %v1367_v38 = vpop.f32.mrb[13].mxu0 }
 0x76a   : > { %v1107_v39 = vpop.f32.mrb[14].mxu0 }
 0x76b   : > { %v1368_v40 = vpop.f32.mrb[15].mxu0  ;;  %v1111_v41 = vadd.f32 %v1110_v35, %v1105_v37 }
 0x76d   : > { %1112 = vadd.xlane.f32.xlu1 %v1111_v41 }
 0x7fa   : > { %v1113_v17 = vpop.xlane.xlu1 %1112 }
 0x7fb   : > { %v1115_v42 = vmul.f32 0.0078125, %v1113_v17 }
 0x7fd   : > { %v1116_v43 = vsub.f32 %v1111_v41, %v1115_v42 }
 0x7ff   : > { %v1117_v44 = vmul.f32 %v1116_v43, %v1116_v43 }
 0x801   : > { %1118 = vadd.xlane.f32.xlu0 %v1117_v44 }
 0x88e   : > { %v1119_v45 = vpop.xlane.xlu0 %1118 }
 0x88f   : > { %v1120_v46 = vmul.f32 0.0078125, %v1119_v45 }
 0x891   : > { %v1121_v47 = vadd.f32 1e-05, %v1120_v46 }
 0x893   : > { %1439 = vrsqrt.f32 %v1121_v47 }
 0x89d   : > { %v1440_v48 = vpop.eup %1439 }
 0x89e   : > { %v1123_v50 = vmul.f32 %v1440_v48, %v1116_v43 }
 0x8a0   : > { %v1131_v52 = vmul.f32 %v1243_v24, %v1123_v50 }
 0x8a2   : > { %v1139_v53 = vadd.f32 %v1244_v51, %v1131_v52 }
 0x8a4   : > { %v1140_v54 = vpack.c.bf16 %v1139_v53, %v1139_v53 }
 0x8a6   : > { %1141 = vst [vmem:[%s273_s23] sm:$0xf] %v1140_v54 }
 0x8a7 PF: > { %s17_s24 = sadd.s32 1, %s1447_s24  }
 0x8a8   : > { %p14_p4 = scmp.ge.s32.totalorder %s17_s24, 4  }
 0x8aa   :  { %16 = sbr.rel (!%p14_p4) target bundleno = 1 (0x1), region = 78 }

// kernel: vision_language_model_forward.16
= control target key start
LH: loop header
LB: loop body
LE: loop exit
PB: predicated region body
PF: predicated region fallthrough
CT: control target
= control target key end

     0   :  { %s1631_s13 = smov 0   ;;  %s1864_s0 = inlined_call_operand.vmem [shape: bf16[2,8,128], index: 0, kind: input, shape index: {}]   ;;  %s1865_s1 = inlined_call_operand.vmem [shape: bf16[2,16,128], index: 1, kind: input, shape index: {}]   ;;  %s1866_s2 = inlined_call_operand.vmem [shape: bf16[128,128], index: 2, kind: input, shape index: {}]   ;;  %s1867_s3 = inlined_call_operand.vmem [shape: f32[1,128], index: 3, kind: input, shape index: {}]   ;;  %s1868_s4 = inlined_call_operand.vmem [shape: bf16[128,256], index: 4, kind: input, shape index: {}]   ;;  %s1869_s5 = inlined_call_operand.vmem [shape: f32[1,256], index: 5, kind: input, shape index: {}]   ;;  %s1870_s6 = inlined_call_operand.vmem [shape: bf16[128,128], index: 6, kind: input, shape index: {}]   ;;  %s1871_s7 = inlined_call_operand.vmem [shape: f32[1,128], index: 7, kind: input, shape index: {}]   ;;  %s1872_s8 = inlined_call_operand.vmem [shape: f32[1,128], index: 8, kind: input, shape index: {}]   ;;  %s1873_s9 = inlined_call_operand.vmem [shape: f32[1,128], index: 9, kind: input, shape index: {}]   ;;  %s1874_s10 = inlined_call_operand.vmem [shape: bf16[2,8,128], index: 10, kind: output, shape index: {}]  }
   0x1 LB: > { %s1310_s14 = sadd.s32 4294967295, %s1568_s13   ;;  %p1314_p0 = scmp.ge.s32.totalorder %s1568_s13, 1  ;;  %s1568_s13 = sphi %s1631_s13, %s20_s13  }
   0x2   : > { %p321_p1 = scmp.lt.s32.totalorder %s1568_s13, 3 }
   0x4   : > { %p322_p2 = pnand %p1314_p0, %p321_p1 }
   0x5   : > { %v1503_v0 = vld [vmem:[%s1868_s4 + $0x4] ss:$8 sps:$4 sm:$0xff] (!%p322_p2)   ;;  %v1505_v1 = vld [vmem:[%s1868_s4] ss:$8 sps:$4 sm:$0xff] (!%p322_p2)   ;;  %v1570_v2 = vmov (!%p322_p2), 0.0   ;;  %v1571_v3 = vmov (!%p322_p2), 0   ;;  %v508_v28 = vlaneseq (!%p322_p2) }
   0x6   : > { %325 = sbr.rel (%p322_p2) target bundleno = 2217 (0x8a9), region = 60  ;;  %1401 = vmatprep.subr.bf16.mxu0 (!%p322_p2), %v1570_v2  ;;  %636 = vmatprep.mubr.bf16.mxu1 (!%p322_p2), %v1571_v3  ;;  %v1506_v4 = vld [vmem:[%s1868_s4 + $0x14] ss:$8 sps:$4 sm:$0xff] (!%p322_p2)   ;;  %v1508_v5 = vld [vmem:[%s1868_s4 + $0x10] ss:$8 sps:$4 sm:$0xff] (!%p322_p2)   ;;  %vm1572_vm0 = vmmov (!%p322_p2), 0  }
   0x7   : > { %604 = vmatprep.subr.bf16.mxu1 (!%p322_p2), %v1503_v0  ;;  %1417 = vmatprep.mubr.msk.bf16.mxu0 (!%p322_p2), %vm1572_vm0, %v1570_v2  ;;  %v1509_v6 = vld [vmem:[%s1866_s2] sm:$0xff] (!%p322_p2)   ;;  %v1513_v8 = vld [vmem:[%s1866_s2 + $0x8] sm:$0xff] (!%p322_p2)   ;;  %p362_p3 = scmp.lt.s32.totalorder (!%p322_p2), %s1310_s14, 1  ;;  %v1514_v10 = vld [vmem:[%s1868_s4 + $0x34] ss:$8 sps:$4 sm:$0xff] (!%p322_p2)   ;;  %v509_v29 = vshrl.u32 (!%p322_p2), %v508_v28, 7 }
   0x8   : > { %605 = vmatpush1.bf16.msra.mxu1 (!%p322_p2), %v1505_v1  ;;  %v1510_v7 = vld [vmem:[%s1868_s4 + $0x24] ss:$8 sps:$4 sm:$0xff] (!%p322_p2)   ;;  %1402 = vmatpush3.bf16.msra.mxu0 (!%p322_p2), %v1509_v6  ;;  %v1512_v9 = vld [vmem:[%s1868_s4 + $0x20] ss:$8 sps:$4 sm:$0xff] (!%p322_p2)   ;;  %v1517_v11 = vld [vmem:[%s1866_s2 + $0x10] sm:$0xff] (!%p322_p2)   ;;  %vm650_vm1 = vcmask (!%p322_p2), 261120  }
   0x9   : > { %606 = vmatprep.subr.bf16.mxu1 (!%p322_p2), %v1506_v4  ;;  %1403 = vmatprep.subr.bf16.mxu0 (!%p322_p2), %v1570_v2  ;;  %v1516_v12 = vld [vmem:[%s1868_s4 + $0x30] ss:$8 sps:$4 sm:$0xff] (!%p322_p2)   ;;  %v1518_v13 = vld [vmem:[%s1868_s4 + $0x44] ss:$8 sps:$4 sm:$0xff] (!%p322_p2)   ;;  %v1520_v15 = vld [vmem:[%s1868_s4 + $0x40] ss:$8 sps:$4 sm:$0xff] (!%p322_p2)  }
   0xa   : > { %v1521_v14 = vld [vmem:[%s1866_s2 + $0x18] sm:$0xff] (!%p322_p2)   ;;  %v1525_v17 = vld [vmem:[%s1866_s2 + $0x20] sm:$0xff] (!%p322_p2)   ;;  %v1529_v20 = vld [vmem:[%s1866_s2 + $0x28] sm:$0xff] (!%p322_p2)   ;;  %v510_v30 = vsub.s32 (!%p322_p2), 0, %v509_v29  ;;  %v514_v32 = vsub.s32 (!%p322_p2), 1, %v509_v29  ;;  %s1573_s21 = smov (!%p322_p2), 96  }
   0xb   : > { %v1522_v16 = vld [vmem:[%s1868_s4 + $0x54] ss:$8 sps:$4 sm:$0xff] (!%p322_p2)   ;;  %v1524_v18 = vld [vmem:[%s1868_s4 + $0x50] ss:$8 sps:$4 sm:$0xff] (!%p322_p2)   ;;  %v1526_v19 = vld [vmem:[%s1868_s4 + $0x64] ss:$8 sps:$4 sm:$0xff] (!%p322_p2)  }
   0xc   : > { %607 = vmatpush1.bf16.msra.mxu1 (!%p322_p2), %v1508_v5  ;;  %1404 = vmatpush3.bf16.msra.mxu0 (!%p322_p2), %v1513_v8  ;;  %v1528_v21 = vld [vmem:[%s1868_s4 + $0x60] ss:$8 sps:$4 sm:$0xff] (!%p322_p2)   ;;  %v1530_v22 = vld [vmem:[%s1868_s4 + $0x74] ss:$8 sps:$4 sm:$0xff] (!%p322_p2)   ;;  %v1532_v24 = vld [vmem:[%s1868_s4 + $0x70] ss:$8 sps:$4 sm:$0xff] (!%p322_p2)  }
   0xd   : > { %608 = vmatprep.subr.bf16.mxu1 %v1510_v7  ;;  %s1876_s14 = smov (!%p362_p3, %s1310_s14), 1  ;;  %1405 = vmatprep.subr.bf16.mxu0 %v1570_v2  ;;  %v1533_v23 = vld [vmem:[%s1866_s2 + $0x30] sm:$0xff]   ;;  %v1535_v25 = vld [vmem:[%s1866_s2 + $0x38] sm:$0xff]   ;;  %v506_v31 = vld [vmem:[%s1869_s5] sm:$0x3]  ;;  %s1574_s22 = smov 64  }
   0xe   : > { %s1366_s23 = sshll.u32 %s1876_s14, 3  ;;  %s1315_s29 = sshll.u32 %s1876_s14, 2  ;;  %v511_v33 = vrot.slane %v506_v31, %v510_v30  ;;  %v515_v35 = vrot.slane %v506_v31, %v514_v32  ;;  %v1319_v36 = vld [vmem:[%s1867_s3] ss:$0 sm:$0xff]  ;;  %vm698_vm2 = vcmask 130048   ;;  %vm1097_vm3 = vcmask 523264  }
   0xf   : > { %s370_s30 = scalar_lea.vmem %s1865_s1, %s1366_s23  ;;  %s365_s17 = scalar_lea.vmem %s1864_s0, %s1315_s29  ;;  %vm1099_vm4 = vcmask 785408  }
  0x10   : > { %609 = vmatpush1.bf16.msra.mxu1 %v1512_v9  ;;  %1406 = vmatpush3.bf16.msra.mxu0 %v1517_v11  ;;  %v1534_v26 = vld [vmem:[%s370_s30] sm:$0xff]   ;;  %s1575_s23 = smov 32   ;;  %s374_s15 = scalar_lea.vmem %s1874_s10, %s1315_s29 }
  0x11   : > { %610 = vmatprep.subr.bf16.mxu1 %v1514_v10  ;;  %1407 = vmatprep.subr.bf16.mxu0 %v1570_v2  ;;  %v1738_v27 = vld [vmem:[%s365_s17] sm:$0xf] }
  0x14   : > { %611 = vmatpush1.bf16.msra.mxu1 %v1516_v12  ;;  %1408 = vmatpush3.bf16.msra.mxu0 %v1521_v14 }
  0x15   : > { %612 = vmatprep.subr.bf16.mxu1 %v1518_v13  ;;  %1409 = vmatprep.subr.bf16.mxu0 %v1570_v2 }
  0x18   : > { %613 = vmatpush1.bf16.msra.mxu1 %v1520_v15  ;;  %1410 = vmatpush3.bf16.msra.mxu0 %v1525_v17 }
  0x19   : > { %614 = vmatprep.subr.bf16.mxu1 %v1522_v16  ;;  %1411 = vmatprep.subr.bf16.mxu0 %v1570_v2 }
  0x1c   : > { %615 = vmatpush1.bf16.msra.mxu1 %v1524_v18  ;;  %1412 = vmatpush3.bf16.msra.mxu0 %v1529_v20 }
  0x1d   : > { %616 = vmatprep.subr.bf16.mxu1 %v1526_v19  ;;  %1413 = vmatprep.subr.bf16.mxu0 %v1570_v2 }
  0x20   : > { %617 = vmatpush1.bf16.msra.mxu1 %v1528_v21  ;;  %1414 = vmatpush3.bf16.msra.mxu0 %v1533_v23 }
  0x21   : > { %618 = vmatprep.subr.bf16.mxu1 %v1530_v22  ;;  %1415 = vmatprep.subr.bf16.mxu0 %v1570_v2 }
  0x24   : > { %619 = vmatpush1.bf16.msra.mxu1 %v1532_v24  ;;  %1416 = vmatpush3.bf16.msra.mxu0 %v1535_v25 }
  0x25   : > { %1421 = vmatprep.subr.bf16.mxu1 %v1570_v2  ;;  %1445 = vmatprep.subr.bf16.mxu0 %v1570_v2 }
  0x27   : > { %637 = vmatmul.mubr.bf16.vlgmr.msra.gmra.mrb[0].mxu1 %v1534_v26  ;;  %1418 = vmatmul.mubr.bf16.vlgmr.msra.gmra.mrb[0].mxu0 %v1738_v27 }
  0x28   : > { %1423 = vmatprep.mubr.msk.bf16.mxu1 %vm1572_vm0, %v1570_v2  ;;  %1447 = vmatprep.mubr.msk.bf16.mxu0 %vm1572_vm0, %v1570_v2 }
  0xfa   : > { %v638_v34 = vpop.f32.mrb[0].mxu1  ;;  %v484_v39 = vpop.f32.mrb[0].mxu0 }
  0xfb   : > { %v640_v37 = vpop.f32.mrb[1].mxu1  ;;  %v639_v40 = vadd.f32 %v638_v34, %v511_v33  ;;  %v485_v43 = vadd.f32 %v1319_v36, %v484_v39  ;;  %v1419_v44 = vpop.f32.mrb[1].mxu0 }
  0xfc   : > { %v642_v38 = vpop.f32.mrb[2].mxu1  ;;  %v641_v45 = vadd.f32 %v640_v37, %v515_v35  ;;  %v487_v47 = vpop.f32.mrb[2].mxu0 }
  0xfd   : > { %v643_v41 = vadd.f32 %v642_v38, %v511_v33  ;;  %v644_v42 = vpop.f32.mrb[3].mxu1  ;;  %v1420_v49 = vpop.f32.mrb[3].mxu0  ;;  %v647_v51 = vpack.c.bf16 %v485_v43, %v485_v43 }
  0xfe   : > { %v645_v46 = vadd.f32 %v644_v42, %v515_v35 }
  0xff   : > { %v648_v48 = vpack.c.bf16 %v643_v41, %v639_v40 }
 0x100   : > { %v1752_v50 = vpack.c.bf16 %v645_v46, %v641_v45 }
 0x101   : > { %758 = vrot.lane.b32.xlu1 %v648_v48, %s1573_s21  ;;  %v655_v52 = vsel %vm650_vm1, %v648_v48, 0 }
 0x102   : > { %1422 = vmatpush3.bf16.xpose.msra.mxu1 %v655_v52 }
 0x103   : > { %1427 = vmatprep.subr.bf16.mxu1 %v1570_v2 }
 0x105   : > { %755 = vrot.lane.b32.xlu1 %v647_v51, %s1573_s21 }
 0x109   : > { %866 = vrot.lane.b32.xlu1 %v647_v51, %s1574_s22  ;;  %1424 = vmatmul.mubr.msk.bf16.vlgmr.msra.gmra.mrb[4].mxu1 %vm650_vm1, %v647_v51 }
 0x10a   : > { %1428 = vmatpush3.bf16.msra.mxu1 %v1752_v50  ;;  %1429 = vmatprep.mubr.msk.bf16.mxu1 %vm1572_vm0, %v1570_v2 }
 0x10b   : > { %1433 = vmatprep.subr.bf16.mxu1 %v1570_v2 }
 0x10d   : > { %977 = vrot.lane.b32.xlu1 %v648_v48, %s1575_s23 }
 0x111   : > { %975 = vrot.lane.b32.xlu1 %v647_v51, %s1575_s23 }
 0x173   : > { %v759_v0 = vpop.permute.xlu1 %758 }
 0x174   : > { %v764_v12 = vsel %vm650_vm1, %v759_v0, 0 }
 0x177   : > { %v756_v1 = vpop.permute.xlu1 %755 }
 0x17b   : > { %v867_v4 = vpop.permute.xlu1 %866 }
 0x17f   : > { %v978_v7 = vpop.permute.xlu1 %977 }
 0x180   : > { %v983_v10 = vsel %vm650_vm1, %v978_v7, 0  ;;  %v1539_v7 = vld [vmem:[%s1870_s6 + $0x18] sm:$0xff]  }
 0x183   : > { %v976_v13 = vpop.permute.xlu1 %975 }
 0x1dc   : > { %v691_v53 = vpop.f32.mrb[4].mxu1 }
 0x1dd   : > { %v697_v54 = vmul.f32 0.17677669, %v691_v53  ;;  %v1425_v55 = vpop.f32.mrb[5].mxu1 }
 0x1de   : > { %v694_v56 = vpop.f32.mrb[6].mxu1 }
 0x1df   : > { %v1426_v57 = vpop.f32.mrb[7].mxu1  ;;  %v699_v58 = vsel %vm698_vm2, %v697_v54, -inf }
 0x1e0   : > { %700 = vmax.xlane.f32.xlu0 %v699_v58 }
 0x26d   : > { %v701_v59 = vpop.xlane.xlu0 %700 }
 0x26e   : > { %v702_v60 = vsub.f32 %v697_v54, %v701_v59 }
 0x270   : > { %v703_v61 = vmul.f32 1.442695, %v702_v60 }
 0x272   : > { %1544 = vpow2.f32 %v703_v61 }
 0x27c   : > { %v1545_v62 = vpop.eup %1544 }
 0x27d   : > { %v705_v63 = vsel %vm698_vm2, %v1545_v62, 0.0 }
 0x27e   : > { %706 = vadd.xlane.f32.xlu0 %v705_v63 }
 0x294   : > { %868 = vrot.lane.b32.xlu0 %v648_v48, %s1574_s22 }
 0x30b   : > { %v707_v3 = vpop.xlane.xlu0 %706 }
 0x30c   : > { %1546 = vrcp.f32 %v707_v3 }
 0x30f   : > { %v869_v5 = vpop.permute.xlu0 %868 }
 0x310   : > { %v874_v6 = vsel %vm650_vm1, %v869_v5, 0  ;;  %v1537_v5 = vld [vmem:[%s1870_s6 + $0x8] sm:$0xff]  }
 0x311   : > { %1446 = vmatpush3.bf16.xpose.msra.mxu0 %v874_v6  ;;  %v1538_v6 = vld [vmem:[%s1870_s6 + $0x10] sm:$0xff]  }
 0x312   : > { %1457 = vmatprep.subr.bf16.mxu0 %v1570_v2 }
 0x316   : > { %v1547_v8 = vpop.eup %1546 }
 0x317   : > { %v709_v9 = vmul.f32 %v1547_v8, %v1545_v62  ;;  %v1540_v8 = vld [vmem:[%s1870_s6 + $0x20] sm:$0xff]  }
 0x318   : > { %1448 = vmatmul.mubr.msk.bf16.vlgmr.msra.gmra.mrb[4].mxu0 %vm650_vm1, %v867_v4  ;;  %v1536_v4 = vld [vmem:[%s1870_s6] sm:$0xff]  }
 0x319   : > { %1458 = vmatpush3.bf16.xpose.msra.mxu0 %v983_v10  ;;  %v710_v11 = vpack.c.bf16 %v709_v9, %v709_v9  ;;  %1459 = vmatprep.mubr.msk.bf16.mxu0 %vm1572_vm0, %v1570_v2  ;;  %v1541_v9 = vld [vmem:[%s1870_s6 + $0x28] sm:$0xff]   ;;  %v1542_v10 = vld [vmem:[%s1870_s6 + $0x30] sm:$0xff]  }
 0x31a   : > { %1469 = vmatprep.subr.bf16.mxu0 %v1570_v2 }
 0x31b   : > { %1430 = vmatmul.mubr.msk.bf16.vlgmr.msra.gmra.mrb[8].mxu1 %vm698_vm2, %v710_v11 }
 0x31c   : > { %1434 = vmatpush3.bf16.xpose.msra.mxu1 %v764_v12  ;;  %1435 = vmatprep.mubr.msk.bf16.mxu1 %vm1572_vm0, %v1570_v2 }
 0x31d   : > { %1439 = vmatprep.subr.bf16.mxu1 %v1570_v2 }
 0x320   : > { %1460 = vmatmul.mubr.msk.bf16.vlgmr.msra.gmra.mrb[8].mxu0 %vm650_vm1, %v976_v13 }
 0x321   : > { %1485 = vmatprep.mubr.msk.bf16.mxu0 %vm1572_vm0, %v1570_v2  ;;  %1470 = vmatpush3.bf16.msra.mxu0 %v1536_v4 }
 0x322   : > { %1471 = vmatprep.subr.bf16.mxu0 %v1570_v2 }
 0x323   : > { %1436 = vmatmul.mubr.msk.bf16.vlgmr.msra.gmra.mrb[12].mxu1 %vm650_vm1, %v756_v1 }
 0x324   : > { %1441 = vmatprep.mubr.msk.bf16.mxu1 %vm1572_vm0, %v1570_v2 }
 0x325   : > { %1472 = vmatpush3.bf16.msra.mxu0 %v1537_v5 }
 0x326   : > { %1473 = vmatprep.subr.bf16.mxu0 %v1570_v2 }
 0x329   : > { %1474 = vmatpush3.bf16.msra.mxu0 %v1538_v6 }
 0x32a   : > { %1475 = vmatprep.subr.bf16.mxu0 %v1570_v2 }
 0x32d   : > { %1476 = vmatpush3.bf16.msra.mxu0 %v1539_v7 }
 0x32e   : > { %1477 = vmatprep.subr.bf16.mxu0 %v1570_v2 }
 0x331   : > { %1478 = vmatpush3.bf16.msra.mxu0 %v1540_v8 }
 0x332   : > { %1479 = vmatprep.subr.bf16.mxu0 %v1570_v2 }
 0x335   : > { %1480 = vmatpush3.bf16.msra.mxu0 %v1541_v9 }
 0x336   : > { %1481 = vmatprep.subr.bf16.mxu0 %v1570_v2 }
 0x339   : > { %1482 = vmatpush3.bf16.msra.mxu0 %v1542_v10 }
 0x33a   : > { %1483 = vmatprep.subr.bf16.mxu0 %v1570_v2 }
 0x3eb   : > { %v910_v14 = vpop.f32.mrb[4].mxu0 }
 0x3ec   : > { %v916_v15 = vmul.f32 0.17677669, %v910_v14  ;;  %v1449_v16 = vpop.f32.mrb[5].mxu0 }
 0x3ed   : > { %v913_v17 = vpop.f32.mrb[6].mxu0 }
 0x3ee   : > { %v1787_v18 = vpop.f32.mrb[8].mxu1  ;;  %v1450_v19 = vpop.f32.mrb[7].mxu0  ;;  %v917_v20 = vsel %vm698_vm2, %v916_v15, -inf }
 0x3ef   : > { %v1431_v21 = vpop.f32.mrb[9].mxu1  ;;  %918 = vmax.xlane.f32.xlu0 %v917_v20 }
 0x3f0   : > { %v751_v22 = vpop.f32.mrb[10].mxu1 }
 0x3f1   : > { %v1432_v23 = vpop.f32.mrb[11].mxu1 }
 0x3f3   : > { %v1019_v24 = vpop.f32.mrb[8].mxu0 }
 0x3f4   : > { %v1461_v25 = vpop.f32.mrb[9].mxu0  ;;  %v1025_v33 = vmul.f32 0.17677669, %v1019_v24 }
 0x3f5   : > { %v1022_v26 = vpop.f32.mrb[10].mxu0 }
 0x3f6   : > { %v800_v28 = vpop.f32.mrb[12].mxu1  ;;  %v1462_v29 = vpop.f32.mrb[11].mxu0  ;;  %v1026_v36 = vsel %vm698_vm2, %v1025_v33, -inf }
 0x3f7   : > { %v806_v30 = vmul.f32 0.17677669, %v800_v28  ;;  %v1437_v31 = vpop.f32.mrb[13].mxu1 }
 0x3f8   : > { %v803_v32 = vpop.f32.mrb[14].mxu1 }
 0x3f9   : > { %v1438_v34 = vpop.f32.mrb[15].mxu1  ;;  %v807_v35 = vsel %vm698_vm2, %v806_v30, -inf  ;;  %v1353_v32 = vld [vmem:[%s1871_s7] ss:$0 sm:$0xff] }
 0x3fa   : > { %808 = vmax.xlane.f32.xlu1 %v807_v35 }
 0x3fe   : > { %1027 = vmax.xlane.f32.xlu1 %v1026_v36 }
 0x47c   : > { %v919_v37 = vpop.xlane.xlu0 %918 }
 0x47d   : > { %v920_v38 = vsub.f32 %v916_v15, %v919_v37  ;;  %v1543_v15 = vld [vmem:[%s1870_s6 + $0x38] sm:$0xff]  }
 0x47e   : > { %1484 = vmatpush3.bf16.msra.mxu0 %v1543_v15 }
 0x47f   : > { %v921_v39 = vmul.f32 1.442695, %v920_v38 }
 0x481   : > { %1548 = vpow2.f32 %v921_v39 }
 0x487   : > { %v809_v40 = vpop.xlane.xlu1 %808 }
 0x488   : > { %v810_v41 = vsub.f32 %v806_v30, %v809_v40 }
 0x48a   : > { %v811_v46 = vmul.f32 1.442695, %v810_v41 }
 0x48b   : > { %v1549_v42 = vpop.eup %1548  ;;  %v1028_v43 = vpop.xlane.xlu1 %1027 }
 0x48c   : > { %v1029_v44 = vsub.f32 %v1025_v33, %v1028_v43  ;;  %v923_v45 = vsel %vm698_vm2, %v1549_v42, 0.0  ;;  %v1213_v33 = vunpack.c.l.bf16 %v1738_v27  ;;  %v1362_v27 = vld [vmem:[%s1872_s8] ss:$0 sm:$0xff] }
 0x48d   : > { %924 = vadd.xlane.f32.xlu0 %v923_v45 }
 0x48e   : > { %v1030_v47 = vmul.f32 1.442695, %v1029_v44 }
 0x490   : > { %1550 = vpow2.f32 %v1030_v47 }
 0x491   : > { %1552 = vpow2.f32 %v811_v46 }
 0x49a   : > { %v1551_v48 = vpop.eup %1550 }
 0x49b   : > { %v1032_v49 = vsel %vm698_vm2, %v1551_v48, 0.0  ;;  %v1553_v51 = vpop.eup %1552 }
 0x49c   : > { %1033 = vadd.xlane.f32.xlu1 %v1032_v49  ;;  %v813_v52 = vsel %vm698_vm2, %v1553_v51, 0.0 }
 0x4a0   : > { %814 = vadd.xlane.f32.xlu1 %v813_v52 }
 0x4a3   : > { %820 = vrot.lane.b32.xlu0 %v1752_v50, %s1573_s21 }
 0x4b1   : > { %929 = vrot.lane.b32.xlu1 %v1752_v50, %s1574_s22 }
 0x4b5   : > { %1038 = vrot.lane.b32.xlu1 %v1752_v50, %s1575_s23 }
 0x51a   : > { %v925_v53 = vpop.xlane.xlu0 %924 }
 0x51e   : > { %v821_v54 = vpop.permute.xlu0 %820 }
 0x51f   : > { %1440 = vmatpush3.bf16.msra.mxu1 %v821_v54 }
 0x520   : > { %1451 = vmatprep.subr.bf16.mxu1 %v1570_v2 }
 0x529   : > { %v1034_v55 = vpop.xlane.xlu1 %1033 }
 0x52d   : > { %v815_v56 = vpop.xlane.xlu1 %814 }
 0x52e   : > { %1554 = vrcp.f32 %v815_v56 }
 0x52f   : > { %1556 = vrcp.f32 %v925_v53 }
 0x530   : > { %1558 = vrcp.f32 %v1034_v55 }
 0x531   : > { %v930_v61 = vpop.permute.xlu1 %929 }
 0x535   : > { %v1039_v0 = vpop.permute.xlu1 %1038 }
 0x538   : > { %v1555_v57 = vpop.eup %1554 }
 0x539   : > { %v817_v58 = vmul.f32 %v1555_v57, %v1553_v51  ;;  %v1557_v60 = vpop.eup %1556 }
 0x53a   : > { %v927_v50 = vmul.f32 %v1557_v60, %v1549_v42  ;;  %v1559_v63 = vpop.eup %1558 }
 0x53b   : > { %v818_v59 = vpack.c.bf16 %v817_v58, %v817_v58  ;;  %v1036_v1 = vmul.f32 %v1559_v63, %v1551_v48  ;;  %v1363_v48 = vld [vmem:[%s1873_s9] ss:$0 sm:$0xff] }
 0x53c   : > { %v928_v62 = vpack.c.bf16 %v927_v50, %v927_v50 }
 0x53d   : > { %1442 = vmatmul.mubr.msk.bf16.vlgmr.msra.gmra.mrb[16].mxu1 %vm698_vm2, %v818_v59  ;;  %v1037_v3 = vpack.c.bf16 %v1036_v1, %v1036_v1 }
 0x53e   : > { %1452 = vmatpush3.bf16.msra.mxu1 %v930_v61  ;;  %1453 = vmatprep.mubr.msk.bf16.mxu1 %vm1572_vm0, %v1570_v2 }
 0x53f   : > { %1463 = vmatprep.subr.bf16.mxu1 %v1570_v2 }
 0x545   : > { %1454 = vmatmul.mubr.msk.bf16.vlgmr.msra.gmra.mrb[20].mxu1 %vm698_vm2, %v928_v62 }
 0x546   : > { %1464 = vmatpush3.bf16.msra.mxu1 %v1039_v0  ;;  %1465 = vmatprep.mubr.msk.bf16.mxu1 %vm1572_vm0, %v1570_v2 }
 0x54d   : > { %1466 = vmatmul.mubr.msk.bf16.vlgmr.msra.gmra.mrb[24].mxu1 %vm698_vm2, %v1037_v3 }
 0x610   : > { %v860_v11 = vpop.f32.mrb[16].mxu1 }
 0x611   : > { %1085 = vrot.lane.b32.xlu0 %v860_v11, %s1575_s23  ;;  %v1443_v12 = vpop.f32.mrb[17].mxu1 }
 0x612   : > { %v863_v13 = vpop.f32.mrb[18].mxu1 }
 0x613   : > { %v1444_v14 = vpop.f32.mrb[19].mxu1 }
 0x618   : > { %v969_v16 = vpop.f32.mrb[20].mxu1 }
 0x619   : > { %1089 = vrot.lane.b32.xlu1 %v969_v16, %s1574_s22  ;;  %v1455_v17 = vpop.f32.mrb[21].mxu1 }
 0x61a   : > { %v972_v19 = vpop.f32.mrb[22].mxu1 }
 0x61b   : > { %v1456_v20 = vpop.f32.mrb[23].mxu1 }
 0x620   : > { %v1078_v21 = vpop.f32.mrb[24].mxu1 }
 0x621   : > { %1093 = vrot.lane.b32.xlu0 %v1078_v21, %s1573_s21  ;;  %v1467_v22 = vpop.f32.mrb[25].mxu1 }
 0x622   : > { %v1081_v23 = vpop.f32.mrb[26].mxu1 }
 0x623   : > { %v1468_v24 = vpop.f32.mrb[27].mxu1 }
 0x683   : > { %v1086_v25 = vpop.permute.xlu0 %1085 }
 0x684   : > { %v1096_v26 = vsel %vm650_vm1, %v1787_v18, %v1086_v25 }
 0x68b   : > { %v1090_v2 = vpop.permute.xlu1 %1089 }
 0x68c   : > { %v1098_v28 = vsel %vm1097_vm3, %v1096_v26, %v1090_v2 }
 0x693   : > { %v1094_v29 = vpop.permute.xlu0 %1093 }
 0x694   : > { %v1100_v30 = vsel %vm1099_vm4, %v1098_v28, %v1094_v29 }
 0x695   : > { %v1101_v31 = vpack.c.bf16 %v1100_v30, %v1100_v30 }
 0x697   : > { %1486 = vmatmul.mubr.bf16.vlgmr.msra.gmra.mrb[12].mxu0 %v1101_v31 }
 0x76a   : > { %v1207_v34 = vpop.f32.mrb[12].mxu0 }
 0x76b   : > { %v1208_v35 = vadd.f32 %v1353_v32, %v1207_v34  ;;  %v1487_v36 = vpop.f32.mrb[13].mxu0 }
 0x76c   : > { %v1210_v37 = vpop.f32.mrb[14].mxu0 }
 0x76d   : > { %v1488_v38 = vpop.f32.mrb[15].mxu0  ;;  %v1214_v39 = vadd.f32 %v1213_v33, %v1208_v35 }
 0x76f   : > { %1215 = vadd.xlane.f32.xlu1 %v1214_v39 }
 0x7fc   : > { %v1216_v18 = vpop.xlane.xlu1 %1215 }
 0x7fd   : > { %v1218_v40 = vmul.f32 0.0078125, %v1216_v18 }
 0x7ff   : > { %v1219_v41 = vsub.f32 %v1214_v39, %v1218_v40 }
 0x801   : > { %v1220_v42 = vmul.f32 %v1219_v41, %v1219_v41 }
 0x803   : > { %1221 = vadd.xlane.f32.xlu0 %v1220_v42 }
 0x890   : > { %v1222_v43 = vpop.xlane.xlu0 %1221 }
 0x891   : > { %v1223_v44 = vmul.f32 0.0078125, %v1222_v43 }
 0x893   : > { %v1224_v45 = vadd.f32 1e-05, %v1223_v44 }
 0x895   : > { %1560 = vrsqrt.f32 %v1224_v45 }
 0x89f   : > { %v1561_v46 = vpop.eup %1560 }
 0x8a0   : > { %v1226_v47 = vmul.f32 %v1561_v46, %v1219_v41 }
 0x8a2   : > { %v1234_v49 = vmul.f32 %v1362_v27, %v1226_v47 }
 0x8a4   : > { %v1242_v51 = vadd.f32 %v1363_v48, %v1234_v49 }
 0x8a6   : > { %v1243_v52 = vpack.c.bf16 %v1242_v51, %v1242_v51 }
 0x8a8   : > { %1244 = vst [vmem:[%s374_s15] sm:$0xf] %v1243_v52 }
 0x8a9 PF: > { %s20_s13 = sadd.s32 1, %s1568_s13  }
 0x8aa   : > { %p17_p4 = scmp.ge.s32.totalorder %s20_s13, 4  }
 0x8ac   :  { %19 = sbr.rel (!%p17_p4) target bundleno = 1 (0x1), region = 93 }

// kernel: vision_language_model_forward.20
= control target key start
LH: loop header
LB: loop body
LE: loop exit
PB: predicated region body
PF: predicated region fallthrough
CT: control target
= control target key end

     0   :  { %v851_v1 = vmov 0   ;;  %v51_v36 = vlaneseq  ;;  %s1133_s1 = inlined_call_operand.vmem [shape: bf16[128,256], index: 1, kind: input, shape index: {}]   ;;  %s1134_s0 = inlined_call_operand.vmem [shape: bf16[48,128], index: 0, kind: input, shape index: {}]   ;;  %s1135_s3 = inlined_call_operand.vmem [shape: bf16[256,128], index: 3, kind: input, shape index: {}]   ;;  %s1136_s2 = inlined_call_operand.vmem [shape: f32[1,256], index: 2, kind: input, shape index: {}]   ;;  %s1137_s4 = inlined_call_operand.vmem [shape: f32[1,128], index: 4, kind: input, shape index: {}]   ;;  %s1138_s5 = inlined_call_operand.vmem [shape: f32[1,128], index: 5, kind: input, shape index: {}]   ;;  %s1139_s6 = inlined_call_operand.vmem [shape: f32[1,128], index: 6, kind: input, shape index: {}]   ;;  %s1140_s7 = inlined_call_operand.vmem [shape: bf16[48,128], index: 7, kind: output, shape index: {}]  }
   0x1   :  { %v769_v0 = vld [vmem:[%s1133_s1 + $0x4] ss:$8 sps:$4 sm:$0xff]   ;;  %191 = vmatprep.mubr.bf16.mxu0 %v851_v1  ;;  %v771_v2 = vld [vmem:[%s1133_s1] ss:$8 sps:$4 sm:$0xff]   ;;  %v772_v3 = vld [vmem:[%s1133_s1 + $0x14] ss:$8 sps:$4 sm:$0xff]  }
   0x2   :  { %159 = vmatprep.subr.bf16.mxu0 %v769_v0  ;;  %v774_v4 = vld [vmem:[%s1133_s1 + $0x10] ss:$8 sps:$4 sm:$0xff]   ;;  %v775_v5 = vld [vmem:[%s1133_s1 + $0x24] ss:$8 sps:$4 sm:$0xff]   ;;  %v777_v6 = vld [vmem:[%s1133_s1 + $0x20] ss:$8 sps:$4 sm:$0xff]  }
   0x3   :  { %160 = vmatpush1.bf16.msra.mxu0 %v771_v2  ;;  %v778_v7 = vld [vmem:[%s1133_s1 + $0x34] ss:$8 sps:$4 sm:$0xff]   ;;  %v780_v8 = vld [vmem:[%s1133_s1 + $0x30] ss:$8 sps:$4 sm:$0xff]   ;;  %v781_v9 = vld [vmem:[%s1133_s1 + $0x44] ss:$8 sps:$4 sm:$0xff]  }
   0x4   :  { %161 = vmatprep.subr.bf16.mxu0 %v772_v3  ;;  %v783_v10 = vld [vmem:[%s1133_s1 + $0x40] ss:$8 sps:$4 sm:$0xff]   ;;  %v784_v11 = vld [vmem:[%s1133_s1 + $0x54] ss:$8 sps:$4 sm:$0xff]   ;;  %v786_v12 = vld [vmem:[%s1133_s1 + $0x50] ss:$8 sps:$4 sm:$0xff]  }
   0x5   :  { %v787_v13 = vld [vmem:[%s1133_s1 + $0x64] ss:$8 sps:$4 sm:$0xff]   ;;  %v789_v14 = vld [vmem:[%s1133_s1 + $0x60] ss:$8 sps:$4 sm:$0xff]   ;;  %v790_v15 = vld [vmem:[%s1133_s1 + $0x74] ss:$8 sps:$4 sm:$0xff]  }
   0x6   :  { %v792_v16 = vld [vmem:[%s1133_s1 + $0x70] ss:$8 sps:$4 sm:$0xff]   ;;  %v943_v17 = vld [vmem:[%s1134_s0] sm:$0xff]   ;;  %v949_v18 = vld [vmem:[%s1134_s0 + $0x8] sm:$0xff]   ;;  %v52_v37 = vshrl.u32 %v51_v36, 7 }
   0x7   :  { %162 = vmatpush1.bf16.msra.mxu0 %v774_v4  ;;  %v955_v19 = vld [vmem:[%s1134_s0 + $0x10] sm:$0xff]   ;;  %v796_v20 = vld [vmem:[%s1135_s3 + $0x40] sm:$0xff]   ;;  %v798_v22 = vld [vmem:[%s1135_s3 + $0x48] sm:$0xff]  }
   0x8   :  { %163 = vmatprep.subr.bf16.mxu0 %v775_v5  ;;  %v797_v21 = vld [vmem:[%s1135_s3] sm:$0xff]   ;;  %734 = vmatprep.subr.bf16.mxu1 %v796_v20  ;;  %v799_v23 = vld [vmem:[%s1135_s3 + $0x8] sm:$0xff]   ;;  %v800_v24 = vld [vmem:[%s1135_s3 + $0x50] sm:$0xff]   ;;  %v53_v38 = vsub.s32 0, %v52_v37  ;;  %v57_v40 = vsub.s32 1, %v52_v37 }
   0x9   :  { %735 = vmatpush3.bf16.msra.mxu1 %v797_v21  ;;  %v801_v25 = vld [vmem:[%s1135_s3 + $0x10] sm:$0xff]   ;;  %v802_v26 = vld [vmem:[%s1135_s3 + $0x58] sm:$0xff]   ;;  %v804_v28 = vld [vmem:[%s1135_s3 + $0x60] sm:$0xff]  }
   0xa   :  { %736 = vmatprep.subr.bf16.mxu1 %v798_v22  ;;  %v803_v27 = vld [vmem:[%s1135_s3 + $0x18] sm:$0xff]   ;;  %v805_v29 = vld [vmem:[%s1135_s3 + $0x20] sm:$0xff]   ;;  %v806_v30 = vld [vmem:[%s1135_s3 + $0x68] sm:$0xff]  }
   0xb   :  { %164 = vmatpush1.bf16.msra.mxu0 %v777_v6  ;;  %v807_v31 = vld [vmem:[%s1135_s3 + $0x28] sm:$0xff]   ;;  %v808_v32 = vld [vmem:[%s1135_s3 + $0x70] sm:$0xff]   ;;  %v810_v34 = vld [vmem:[%s1135_s3 + $0x78] sm:$0xff]  }
   0xc   :  { %165 = vmatprep.subr.bf16.mxu0 %v778_v7  ;;  %v809_v33 = vld [vmem:[%s1135_s3 + $0x30] sm:$0xff]   ;;  %v811_v35 = vld [vmem:[%s1135_s3 + $0x38] sm:$0xff]   ;;  %v49_v39 = vld [vmem:[%s1136_s2] sm:$0x3] }
   0xd   :  { %737 = vmatpush3.bf16.msra.mxu1 %v799_v23  ;;  %v1009_v41 = vrot.slane %v49_v39, %v53_v38  ;;  %v1011_v42 = vrot.slane %v49_v39, %v57_v40 }
   0xe   :  { %738 = vmatprep.subr.bf16.mxu1 %v800_v24 }
   0xf   :  { %166 = vmatpush1.bf16.msra.mxu0 %v780_v8 }
  0x10   :  { %167 = vmatprep.subr.bf16.mxu0 %v781_v9 }
  0x11   :  { %739 = vmatpush3.bf16.msra.mxu1 %v801_v25 }
  0x12   :  { %740 = vmatprep.subr.bf16.mxu1 %v802_v26 }
  0x13   :  { %168 = vmatpush1.bf16.msra.mxu0 %v783_v10 }
  0x14   :  { %169 = vmatprep.subr.bf16.mxu0 %v784_v11 }
  0x15   :  { %741 = vmatpush3.bf16.msra.mxu1 %v803_v27 }
  0x16   :  { %742 = vmatprep.subr.bf16.mxu1 %v804_v28 }
  0x17   :  { %170 = vmatpush1.bf16.msra.mxu0 %v786_v12 }
  0x18   :  { %171 = vmatprep.subr.bf16.mxu0 %v787_v13 }
  0x19   :  { %743 = vmatpush3.bf16.msra.mxu1 %v805_v29 }
  0x1a   :  { %744 = vmatprep.subr.bf16.mxu1 %v806_v30 }
  0x1b   :  { %172 = vmatpush1.bf16.msra.mxu0 %v789_v14 }
  0x1c   :  { %173 = vmatprep.subr.bf16.mxu0 %v790_v15 }
  0x1d   :  { %745 = vmatpush3.bf16.msra.mxu1 %v807_v31 }
  0x1e   :  { %746 = vmatprep.subr.bf16.mxu1 %v808_v32 }
  0x1f   :  { %174 = vmatpush1.bf16.msra.mxu0 %v792_v16 }
  0x21   :  { %747 = vmatpush3.bf16.msra.mxu1 %v809_v33 }
  0x22   :  { %192 = vmatmul.mubr.bf16.vlgmr.msra.gmra.mrb[0].mxu0 %v943_v17  ;;  %748 = vmatprep.subr.bf16.mxu1 %v810_v34 }
  0x23   :  { %201 = vmatprep.mubr.bf16.mxu0 %v851_v1 }
  0x25   :  { %749 = vmatpush3.bf16.msra.mxu1 %v811_v35 }
  0x2a   :  { %202 = vmatmul.mubr.bf16.gmra.mrb[4].mxu0 %v949_v18 }
  0x2b   :  { %211 = vmatprep.mubr.bf16.mxu0 %v851_v1 }
  0x32   :  { %212 = vmatmul.mubr.bf16.gmra.mrb[8].mxu0 %v955_v19 }
  0xf5   :  { %v193_v43 = vpop.f32.mrb[0].mxu0 }
  0xf6   :  { %v1014_v44 = vadd.f32 %v193_v43, %v1009_v41  ;;  %v195_v45 = vpop.f32.mrb[1].mxu0 }
  0xf7   :  { %v1017_v46 = vadd.f32 %v195_v45, %v1011_v42  ;;  %v197_v47 = vpop.f32.mrb[2].mxu0 }
  0xf8   :  { %v222_v48 = vmul.f32 %v1014_v44, %v1014_v44  ;;  %v1022_v49 = vadd.f32 %v197_v47, %v1009_v41  ;;  %v199_v50 = vpop.f32.mrb[3].mxu0 }
  0xf9   :  { %v223_v51 = vmul.f32 %v1017_v46, %v1017_v46  ;;  %v1027_v52 = vadd.f32 %v199_v50, %v1011_v42 }
  0xfa   :  { %v234_v53 = vmul.f32 %v222_v48, %v1014_v44  ;;  %v224_v54 = vmul.f32 %v1022_v49, %v1022_v49 }
  0xfb   :  { %v235_v55 = vmul.f32 %v223_v51, %v1017_v46  ;;  %v225_v56 = vmul.f32 %v1027_v52, %v1027_v52 }
  0xfc   :  { %v246_v57 = vmul.f32 0.044715, %v234_v53  ;;  %v236_v58 = vmul.f32 %v224_v54, %v1022_v49 }
  0xfd   :  { %v247_v59 = vmul.f32 0.044715, %v235_v55  ;;  %v237_v60 = vmul.f32 %v225_v56, %v1027_v52  ;;  %v203_v61 = vpop.f32.mrb[4].mxu0 }
  0xfe   :  { %v258_v62 = vadd.f32 %v246_v57, %v1014_v44  ;;  %v248_v63 = vmul.f32 0.044715, %v236_v58  ;;  %v1039_v0 = vadd.f32 %v203_v61, %v1009_v41  ;;  %v205_v1 = vpop.f32.mrb[5].mxu0 }
  0xff   :  { %v249_v2 = vmul.f32 0.044715, %v237_v60  ;;  %v1042_v3 = vadd.f32 %v205_v1, %v1011_v42  ;;  %v207_v4 = vpop.f32.mrb[6].mxu0  ;;  %v259_v5 = vadd.f32 %v247_v59, %v1017_v46 }
 0x100   :  { %v270_v6 = vmul.f32 0.7978846, %v258_v62  ;;  %v260_v7 = vadd.f32 %v248_v63, %v1022_v49  ;;  %v226_v8 = vmul.f32 %v1039_v0, %v1039_v0  ;;  %v1049_v9 = vadd.f32 %v207_v4, %v1009_v41  ;;  %v209_v10 = vpop.f32.mrb[7].mxu0 }
 0x101   :  { %v227_v11 = vmul.f32 %v1042_v3, %v1042_v3  ;;  %v1054_v12 = vadd.f32 %v209_v10, %v1011_v42  ;;  %v261_v13 = vadd.f32 %v249_v2, %v1027_v52  ;;  %v271_v14 = vmul.f32 0.7978846, %v259_v5 }
 0x102   :  { %815 = vtanh.f32 %v270_v6  ;;  %v272_v15 = vmul.f32 0.7978846, %v260_v7  ;;  %v238_v16 = vmul.f32 %v226_v8, %v1039_v0  ;;  %v228_v20 = vmul.f32 %v1049_v9, %v1049_v9 }
 0x103   :  { %v239_v21 = vmul.f32 %v227_v11, %v1042_v3  ;;  %v229_v22 = vmul.f32 %v1054_v12, %v1054_v12  ;;  %v273_v23 = vmul.f32 0.7978846, %v261_v13  ;;  %817 = vtanh.f32 %v271_v14 }
 0x104   :  { %819 = vtanh.f32 %v272_v15  ;;  %v250_v24 = vmul.f32 0.044715, %v238_v16  ;;  %v240_v25 = vmul.f32 %v228_v20, %v1049_v9 }
 0x105   :  { %v251_v26 = vmul.f32 0.044715, %v239_v21  ;;  %v241_v27 = vmul.f32 %v229_v22, %v1054_v12  ;;  %v213_v28 = vpop.f32.mrb[8].mxu0  ;;  %821 = vtanh.f32 %v273_v23 }
 0x106   :  { %v262_v29 = vadd.f32 %v250_v24, %v1039_v0  ;;  %v252_v30 = vmul.f32 0.044715, %v240_v25  ;;  %v1067_v31 = vadd.f32 %v213_v28, %v1009_v41  ;;  %v215_v32 = vpop.f32.mrb[9].mxu0 }
 0x107   :  { %v263_v33 = vadd.f32 %v251_v26, %v1042_v3  ;;  %v253_v34 = vmul.f32 0.044715, %v241_v27  ;;  %v1071_v35 = vadd.f32 %v215_v32, %v1011_v42  ;;  %v217_v36 = vpop.f32.mrb[10].mxu0 }
 0x108   :  { %v274_v37 = vmul.f32 0.7978846, %v262_v29  ;;  %v264_v38 = vadd.f32 %v252_v30, %v1049_v9  ;;  %v230_v39 = vmul.f32 %v1067_v31, %v1067_v31  ;;  %v1077_v40 = vadd.f32 %v217_v36, %v1009_v41  ;;  %v219_v43 = vpop.f32.mrb[11].mxu0 }
 0x109   :  { %v275_v45 = vmul.f32 0.7978846, %v263_v33  ;;  %v265_v47 = vadd.f32 %v253_v34, %v1054_v12  ;;  %v231_v48 = vmul.f32 %v1071_v35, %v1071_v35  ;;  %v1083_v50 = vadd.f32 %v219_v43, %v1011_v42 }
 0x10a   :  { %823 = vtanh.f32 %v274_v37  ;;  %v276_v51 = vmul.f32 0.7978846, %v264_v38  ;;  %v242_v53 = vmul.f32 %v230_v39, %v1067_v31  ;;  %v232_v54 = vmul.f32 %v1077_v40, %v1077_v40 }
 0x10b   :  { %825 = vtanh.f32 %v275_v45  ;;  %v277_v41 = vmul.f32 0.7978846, %v265_v47  ;;  %v243_v55 = vmul.f32 %v231_v48, %v1071_v35  ;;  %v233_v56 = vmul.f32 %v1083_v50, %v1083_v50 }
 0x10c   :  { %v816_v57 = vpop.eup %815  ;;  %827 = vtanh.f32 %v276_v51  ;;  %v254_v58 = vmul.f32 0.044715, %v242_v53  ;;  %v244_v42 = vmul.f32 %v232_v54, %v1077_v40 }
 0x10d   :  { %v818_v59 = vpop.eup %817  ;;  %829 = vtanh.f32 %v277_v41  ;;  %v255_v60 = vmul.f32 0.044715, %v243_v55  ;;  %v245_v61 = vmul.f32 %v233_v56, %v1083_v50  ;;  %v294_v62 = vadd.f32 1.0, %v816_v57 }
 0x10e   :  { %v820_v63 = vpop.eup %819  ;;  %v266_v1 = vadd.f32 %v254_v58, %v1067_v31  ;;  %v256_v2 = vmul.f32 0.044715, %v244_v42  ;;  %v295_v4 = vadd.f32 1.0, %v818_v59 }
 0x10f   :  { %v822_v5 = vpop.eup %821  ;;  %v267_v6 = vadd.f32 %v255_v60, %v1071_v35  ;;  %v257_v7 = vmul.f32 0.044715, %v245_v61  ;;  %v296_v8 = vadd.f32 1.0, %v820_v63  ;;  %v306_v10 = vmul.f32 0.5, %v294_v62 }
 0x110   :  { %v278_v11 = vmul.f32 0.7978846, %v266_v1  ;;  %v268_v13 = vadd.f32 %v256_v2, %v1077_v40  ;;  %v297_v14 = vadd.f32 1.0, %v822_v5  ;;  %v307_v15 = vmul.f32 0.5, %v295_v4 }
 0x111   :  { %v279_v16 = vmul.f32 0.7978846, %v267_v6  ;;  %v269_v20 = vadd.f32 %v257_v7, %v1083_v50  ;;  %v308_v21 = vmul.f32 0.5, %v296_v8  ;;  %v318_v25 = vmul.f32 %v306_v10, %v1014_v44  ;;  %v686_v6 = vld [vmem:[%s1137_s4] ss:$0 sm:$0xff] }
 0x112   :  { %831 = vtanh.f32 %v278_v11  ;;  %v280_v22 = vmul.f32 0.7978846, %v268_v13  ;;  %v309_v23 = vmul.f32 0.5, %v297_v14  ;;  %v319_v28 = vmul.f32 %v307_v15, %v1017_v46 }
 0x113   :  { %833 = vtanh.f32 %v279_v16  ;;  %v281_v24 = vmul.f32 0.7978846, %v269_v20  ;;  %v320_v26 = vmul.f32 %v308_v21, %v1022_v49 }
 0x114   :  { %v824_v27 = vpop.eup %823  ;;  %835 = vtanh.f32 %v280_v22  ;;  %v321_v29 = vmul.f32 %v309_v23, %v1027_v52  ;;  %v530_v23 = vunpack.c.l.bf16 %v949_v18 }
 0x115   :  { %v826_v30 = vpop.eup %825  ;;  %837 = vtanh.f32 %v281_v24  ;;  %v330_v32 = vpack.c.bf16 %v320_v26, %v318_v25  ;;  %v298_v33 = vadd.f32 1.0, %v824_v27 }
 0x116   :  { %v828_v34 = vpop.eup %827  ;;  %v331_v36 = vpack.c.bf16 %v321_v29, %v319_v28  ;;  %v299_v37 = vadd.f32 1.0, %v826_v30  ;;  %v531_v29 = vunpack.c.h.bf16 %v949_v18 }
 0x117   :  { %v830_v38 = vpop.eup %829  ;;  %v300_v39 = vadd.f32 1.0, %v828_v34  ;;  %v310_v43 = vmul.f32 0.5, %v298_v33 }
 0x118   :  { %503 = vmatprep.mubr.bf16.mxu1 %v331_v36  ;;  %v301_v44 = vadd.f32 1.0, %v830_v38  ;;  %v311_v45 = vmul.f32 0.5, %v299_v37  ;;  %v532_v36 = vunpack.c.l.bf16 %v955_v19 }
 0x119   :  { %504 = vmatmul.mubr.bf16.vlgmr.msra.gmra.mrb[0].mxu1 %v330_v32  ;;  %v312_v49 = vmul.f32 0.5, %v300_v39  ;;  %v322_v46 = vmul.f32 %v310_v43, %v1039_v0  ;;  %v533_v43 = vunpack.c.h.bf16 %v955_v19 }
 0x11a   :  { %v313_v47 = vmul.f32 0.5, %v301_v44  ;;  %v323_v51 = vmul.f32 %v311_v45, %v1042_v3 }
 0x11b   :  { %v324_v52 = vmul.f32 %v312_v49, %v1049_v9 }
 0x11c   :  { %v832_v48 = vpop.eup %831  ;;  %v325_v53 = vmul.f32 %v313_v47, %v1054_v12 }
 0x11d   :  { %v834_v54 = vpop.eup %833  ;;  %v332_v41 = vpack.c.bf16 %v324_v52, %v322_v46  ;;  %v302_v55 = vadd.f32 1.0, %v832_v48 }
 0x11e   :  { %v836_v56 = vpop.eup %835  ;;  %v333_v57 = vpack.c.bf16 %v325_v53, %v323_v51  ;;  %v303_v58 = vadd.f32 1.0, %v834_v54 }
 0x11f   :  { %v838_v42 = vpop.eup %837  ;;  %v304_v59 = vadd.f32 1.0, %v836_v56  ;;  %v314_v60 = vmul.f32 0.5, %v302_v55 }
 0x120   :  { %511 = vmatprep.mubr.bf16.mxu1 %v333_v57  ;;  %v305_v61 = vadd.f32 1.0, %v838_v42  ;;  %v315_v62 = vmul.f32 0.5, %v303_v58 }
 0x121   :  { %512 = vmatmul.mubr.bf16.gmra.mrb[4].mxu1 %v332_v41  ;;  %v316_v0 = vmul.f32 0.5, %v304_v59  ;;  %v326_v63 = vmul.f32 %v314_v60, %v1067_v31  ;;  %v528_v31 = vunpack.c.l.bf16 %v943_v17 }
 0x122   :  { %v317_v9 = vmul.f32 0.5, %v305_v61  ;;  %v327_v12 = vmul.f32 %v315_v62, %v1071_v35 }
 0x123   :  { %v328_v3 = vmul.f32 %v316_v0, %v1077_v40 }
 0x124   :  { %v329_v1 = vmul.f32 %v317_v9, %v1083_v50  ;;  %v529_v50 = vunpack.c.h.bf16 %v943_v17 }
 0x125   :  { %v334_v2 = vpack.c.bf16 %v328_v3, %v326_v63 }
 0x126   :  { %v335_v4 = vpack.c.bf16 %v329_v1, %v327_v12 }
 0x128   :  { %519 = vmatprep.mubr.bf16.mxu1 %v335_v4 }
 0x129   :  { %520 = vmatmul.mubr.bf16.gmra.mrb[8].mxu1 %v334_v2 }
 0x1ec   :  { %v750_v5 = vpop.f32.mrb[0].mxu1 }
 0x1ed   :  { %v751_v7 = vpop.f32.mrb[1].mxu1 }
 0x1ee   :  { %v752_v8 = vadd.f32 %v751_v7, %v750_v5  ;;  %v753_v10 = vpop.f32.mrb[2].mxu1 }
 0x1ef   :  { %v754_v11 = vpop.f32.mrb[3].mxu1 }
 0x1f0   :  { %v506_v40 = vadd.f32 %v752_v8, %v686_v6  ;;  %v755_v13 = vadd.f32 %v754_v11, %v753_v10 }
 0x1f2   :  { %v509_v35 = vadd.f32 %v755_v13, %v686_v6  ;;  %v534_v14 = vadd.f32 %v528_v31, %v506_v40 }
 0x1f4   :  { %v756_v15 = vpop.f32.mrb[4].mxu1  ;;  %540 = vadd.xlane.f32.xlu0 %v534_v14  ;;  %v535_v22 = vadd.f32 %v529_v50, %v509_v35 }
 0x1f5   :  { %v757_v16 = vpop.f32.mrb[5].mxu1 }
 0x1f6   :  { %v758_v20 = vadd.f32 %v757_v16, %v756_v15  ;;  %v759_v21 = vpop.f32.mrb[6].mxu1  ;;  %v703_v15 = vld [vmem:[%s1138_s5] ss:$0 sm:$0xff] }
 0x1f7   :  { %v760_v24 = vpop.f32.mrb[7].mxu1 }
 0x1f8   :  { %v514_v25 = vadd.f32 %v758_v20, %v686_v6  ;;  %v761_v26 = vadd.f32 %v760_v24, %v759_v21  ;;  %542 = vadd.xlane.f32.xlu0 %v535_v22 }
 0x1fa   :  { %v517_v27 = vadd.f32 %v761_v26, %v686_v6  ;;  %v536_v28 = vadd.f32 %v530_v23, %v514_v25  ;;  %v704_v26 = vld [vmem:[%s1139_s6] ss:$0 sm:$0xff] }
 0x1fc   :  { %v762_v30 = vpop.f32.mrb[8].mxu1  ;;  %544 = vadd.xlane.f32.xlu1 %v536_v28  ;;  %v537_v34 = vadd.f32 %v531_v29, %v517_v27 }
 0x1fd   :  { %v763_v32 = vpop.f32.mrb[9].mxu1 }
 0x1fe   :  { %v764_v17 = vadd.f32 %v763_v32, %v762_v30  ;;  %v765_v33 = vpop.f32.mrb[10].mxu1 }
 0x1ff   :  { %v766_v37 = vpop.f32.mrb[11].mxu1 }
 0x200   :  { %v522_v38 = vadd.f32 %v764_v17, %v686_v6  ;;  %v767_v39 = vadd.f32 %v766_v37, %v765_v33  ;;  %546 = vadd.xlane.f32.xlu1 %v537_v34 }
 0x202   :  { %v525_v44 = vadd.f32 %v767_v39, %v686_v6  ;;  %v538_v45 = vadd.f32 %v532_v36, %v522_v38 }
 0x204   :  { %548 = vadd.xlane.f32.xlu0 %v538_v45  ;;  %v539_v49 = vadd.f32 %v533_v43, %v525_v44 }
 0x206   :  { %550 = vadd.xlane.f32.xlu1 %v539_v49 }
 0x281   :  { %v541_v18 = vpop.xlane.xlu0 %540 }
 0x282   :  { %v553_v47 = vmul.f32 0.0078125, %v541_v18 }
 0x284   :  { %v559_v46 = vsub.f32 %v534_v14, %v553_v47 }
 0x285   :  { %v543_v52 = vpop.xlane.xlu0 %542 }
 0x286   :  { %v554_v48 = vmul.f32 0.0078125, %v543_v52  ;;  %v565_v51 = vmul.f32 %v559_v46, %v559_v46 }
 0x288   :  { %v560_v53 = vsub.f32 %v535_v22, %v554_v48  ;;  %571 = vadd.xlane.f32.xlu0 %v565_v51 }
 0x289   :  { %v545_v54 = vpop.xlane.xlu1 %544 }
 0x28a   :  { %v555_v41 = vmul.f32 0.0078125, %v545_v54  ;;  %v566_v55 = vmul.f32 %v560_v53, %v560_v53 }
 0x28c   :  { %v561_v56 = vsub.f32 %v536_v28, %v555_v41  ;;  %573 = vadd.xlane.f32.xlu1 %v566_v55 }
 0x28d   :  { %v547_v57 = vpop.xlane.xlu1 %546 }
 0x28e   :  { %v556_v19 = vmul.f32 0.0078125, %v547_v57  ;;  %v567_v58 = vmul.f32 %v561_v56, %v561_v56 }
 0x290   :  { %v562_v42 = vsub.f32 %v537_v34, %v556_v19  ;;  %575 = vadd.xlane.f32.xlu0 %v567_v58 }
 0x291   :  { %v549_v59 = vpop.xlane.xlu0 %548 }
 0x292   :  { %v557_v60 = vmul.f32 0.0078125, %v549_v59  ;;  %v568_v61 = vmul.f32 %v562_v42, %v562_v42 }
 0x293   :  { %v551_v62 = vpop.xlane.xlu1 %550 }
 0x294   :  { %v563_v0 = vsub.f32 %v538_v45, %v557_v60  ;;  %v558_v9 = vmul.f32 0.0078125, %v551_v62  ;;  %577 = vadd.xlane.f32.xlu1 %v568_v61 }
 0x296   :  { %v564_v63 = vsub.f32 %v539_v49, %v558_v9  ;;  %v569_v3 = vmul.f32 %v563_v0, %v563_v0 }
 0x298   :  { %579 = vadd.xlane.f32.xlu0 %v569_v3  ;;  %v570_v12 = vmul.f32 %v564_v63, %v564_v63 }
 0x29a   :  { %581 = vadd.xlane.f32.xlu1 %v570_v12 }
 0x315   :  { %v572_v1 = vpop.xlane.xlu0 %571 }
 0x316   :  { %v583_v2 = vmul.f32 0.0078125, %v572_v1 }
 0x318   :  { %v589_v4 = vadd.f32 1e-05, %v583_v2 }
 0x319   :  { %v574_v5 = vpop.xlane.xlu1 %573 }
 0x31a   :  { %839 = vrsqrt.f32 %v589_v4  ;;  %v584_v6 = vmul.f32 0.0078125, %v574_v5 }
 0x31c   :  { %v590_v7 = vadd.f32 1e-05, %v584_v6 }
 0x31d   :  { %v576_v8 = vpop.xlane.xlu0 %575 }
 0x31e   :  { %841 = vrsqrt.f32 %v590_v7  ;;  %v585_v10 = vmul.f32 0.0078125, %v576_v8 }
 0x320   :  { %v591_v31 = vadd.f32 1e-05, %v585_v10 }
 0x321   :  { %v578_v11 = vpop.xlane.xlu1 %577 }
 0x322   :  { %843 = vrsqrt.f32 %v591_v31  ;;  %v586_v40 = vmul.f32 0.0078125, %v578_v11 }
 0x324   :  { %v840_v13 = vpop.eup %839  ;;  %v592_v35 = vadd.f32 1e-05, %v586_v40 }
 0x325   :  { %v601_v14 = vmul.f32 %v840_v13, %v559_v46  ;;  %v580_v50 = vpop.xlane.xlu0 %579 }
 0x326   :  { %845 = vrsqrt.f32 %v592_v35  ;;  %v587_v16 = vmul.f32 0.0078125, %v580_v50 }
 0x327   :  { %v582_v20 = vpop.xlane.xlu1 %581  ;;  %v614_v24 = vmul.f32 %v703_v15, %v601_v14 }
 0x328   :  { %v842_v21 = vpop.eup %841  ;;  %v593_v22 = vadd.f32 1e-05, %v587_v16  ;;  %v588_v23 = vmul.f32 0.0078125, %v582_v20 }
 0x329   :  { %v602_v25 = vmul.f32 %v842_v21, %v560_v53  ;;  %v627_v30 = vadd.f32 %v704_v26, %v614_v24 }
 0x32a   :  { %847 = vrsqrt.f32 %v593_v22  ;;  %v594_v27 = vadd.f32 1e-05, %v588_v23 }
 0x32b   :  { %v615_v28 = vmul.f32 %v703_v15, %v602_v25 }
 0x32c   :  { %v844_v29 = vpop.eup %843  ;;  %849 = vrsqrt.f32 %v594_v27 }
 0x32d   :  { %v628_v32 = vadd.f32 %v704_v26, %v615_v28  ;;  %v603_v17 = vmul.f32 %v844_v29, %v561_v56 }
 0x32f   :  { %v720_v33 = vpack.c.bf16 %v628_v32, %v627_v30  ;;  %v616_v36 = vmul.f32 %v703_v15, %v603_v17 }
 0x330   :  { %v846_v34 = vpop.eup %845 }
 0x331   :  { %721 = vst [vmem:[%s1140_s7] sm:$0xff] %v720_v33   ;;  %v604_v37 = vmul.f32 %v846_v34, %v562_v42  ;;  %v629_v43 = vadd.f32 %v704_v26, %v616_v36 }
 0x333   :  { %v617_v38 = vmul.f32 %v703_v15, %v604_v37 }
 0x334   :  { %v848_v39 = vpop.eup %847 }
 0x335   :  { %v630_v44 = vadd.f32 %v704_v26, %v617_v38  ;;  %v605_v45 = vmul.f32 %v848_v39, %v563_v0 }
 0x336   :  { %v850_v49 = vpop.eup %849 }
 0x337   :  { %v725_v18 = vpack.c.bf16 %v630_v44, %v629_v43  ;;  %v618_v47 = vmul.f32 %v703_v15, %v605_v45  ;;  %v606_v46 = vmul.f32 %v850_v49, %v564_v63 }
 0x339   :  { %732 = vst [vmem:[%s1140_s7 + $0x8] sm:$0xff] %v725_v18   ;;  %v619_v52 = vmul.f32 %v703_v15, %v606_v46  ;;  %v631_v48 = vadd.f32 %v704_v26, %v618_v47 }
 0x33b   :  { %v632_v51 = vadd.f32 %v704_v26, %v619_v52 }
 0x33d   :  { %v730_v53 = vpack.c.bf16 %v632_v51, %v631_v48 }
 0x33f   :  { %733 = vst [vmem:[%s1140_s7 + $0x10] sm:$0xff] %v730_v53  }

// kernel: vision_language_model_forward.21
= control target key start
LH: loop header
LB: loop body
LE: loop exit
PB: predicated region body
PF: predicated region fallthrough
CT: control target
= control target key end

     0   :  { %vm43_vm0 = vcmask 1045504   ;;  %s617_s0 = inlined_call_operand.vmem [shape: bf16[14,128], index: 0, kind: input, shape index: {}]   ;;  %s618_s1 = inlined_call_operand.vmem [shape: f32[1,128], index: 1, kind: input, shape index: {}]   ;;  %s619_s2 = inlined_call_operand.vmem [shape: f32[1,128], index: 2, kind: input, shape index: {}]   ;;  %s620_s3 = inlined_call_operand.vmem [shape: bf16[128,128], index: 3, kind: input, shape index: {}]   ;;  %s621_s4 = inlined_call_operand.vmem [shape: s32[14,1], index: 4, kind: input, shape index: {}]   ;;  %s622_s5 = inlined_call_operand.vmem [shape: f32[14,1], index: 5, kind: input, shape index: {}]   ;;  %s623_s6 = inlined_call_operand.hbm [shape: f32[1,1], index: 6, kind: output, shape index: {}]  }
   0x1   :  { %v38_v0 = vld [vmem:[%s617_s0 + $0x4] sm:$0x7]  ;;  %v37_v1 = vld [vmem:[%s617_s0] sm:$0xf] }
   0x2   :  { %v40_v2 = vunpack.c.l.bf16 %v38_v0  ;;  %v39_v4 = vunpack.c.l.bf16 %v37_v1 }
   0x4   :  { %v44_v3 = vsel %vm43_vm0, %v40_v2, 0.0 }
   0x5   :  { %45 = vadd.xlane.f32.xlu0 %v44_v3 }
   0x6   :  { %11 = vsyncpa [#allocation9], 0  ;;  %v425_v5 = vld [vmem:[%s620_s3] sm:$0xff]   ;;  %v476_v6 = vmov 0.0   ;;  %v426_v7 = vld [vmem:[%s620_s3 + $0x8] sm:$0xff]   ;;  %vm477_vm1 = vmmov 0  }
   0x7   :  { %394 = vmatprep.subr.bf16.mxu0 %v476_v6  ;;  %v427_v8 = vld [vmem:[%s620_s3 + $0x10] sm:$0xff]   ;;  %v428_v9 = vld [vmem:[%s620_s3 + $0x18] sm:$0xff]   ;;  %v429_v19 = vld [vmem:[%s620_s3 + $0x20] sm:$0xff]   ;;  %410 = vmatprep.mubr.msk.bf16.mxu0 %vm477_vm1, %v476_v6  ;;  %vm95_vm2 = vcmask 7168   ;;  %v478_v42 = vmov -inf   ;;  %vm97_vm3 = vcmask 5120  }
   0x8   :  { %395 = vmatpush3.bf16.xpose.msra.mxu0 %v425_v5  ;;  %v430_v20 = vld [vmem:[%s620_s3 + $0x28] sm:$0xff]   ;;  %v431_v21 = vld [vmem:[%s620_s3 + $0x30] sm:$0xff]   ;;  %v432_v22 = vld [vmem:[%s620_s3 + $0x38] sm:$0xff]   ;;  %96 = vst.msk [vmem:[#allocation3] sm:$0xff] %vm95_vm2, %v478_v42  ;;  %v479_v48 = vmov 0   ;;  %vm31_vm6 = vcmask 0  }
   0x9   :  { %41 = vadd.xlane.f32.xlu0 %v39_v4  ;;  %396 = vmatprep.subr.bf16.mxu0 %v476_v6  ;;  %v370_v30 = vld [vmem:[%s618_s1] ss:$0 sm:$0xff]  ;;  %99 = vst.msk [vmem:[#allocation4] sm:$0xff] %vm95_vm2, %v476_v6  ;;  %101 = vst.msk [vmem:[#allocation5] sm:$0xff] %vm95_vm2, %v476_v6  ;;  %v273_v56 = vld [vmem:[%s621_s4 + $0x8] sm:$0x3f] }
   0xa   :  { %v371_v32 = vld [vmem:[%s619_s2] ss:$0 sm:$0xff]  ;;  %98 = vst.msk [vmem:[#allocation3 + $0x8] sm:$0x3f] %vm97_vm3, %v478_v42  ;;  %100 = vst.msk [vmem:[#allocation4 + $0x8] sm:$0x3f] %vm97_vm3, %v476_v6  ;;  %424 = vset.pattern.permute.xlu1 %v479_v48  ;;  %423 = vset.pattern.permute.xlu0 %v479_v48 }
   0xb   :  { %102 = vst.msk [vmem:[#allocation5 + $0x8] sm:$0x3f] %vm97_vm3, %v476_v6  ;;  %v272_v58 = vld [vmem:[%s621_s4] sm:$0xff]  ;;  %s480_s25 = smov [#allocation8]  }
   0xc   :  { %32 = vst.msk [vmem:[#allocation6] sm:$0x1] %vm31_vm6, %v476_v6  ;;  %33 = vst.msk [vmem:[#allocation7] sm:$0x1] %vm31_vm6, %v476_v6  ;;  %s362_s26 = sshll.u32 %s480_s25, 4  ;;  %s363_s26 = int_to_ptr.vmem [resolvable:$true] %s362_s26 }
   0xd   :  { %s452_s27 = scalar_lea.vmem %s363_s26, 16  ;;  %s456_s28 = scalar_lea.vmem %s363_s26, 32 }
   0xe   :  { %p453_p0 = scmp.ne.s32.totalorder %s363_s26, %s452_s27  ;;  %p457_p1 = scmp.lt.s32.totalorder %s363_s26, %s363_s26 }
   0xf   :  { %v216_v49 = vld [vmem:[#allocation3] sm:$0xff]  ;;  %p458_p2 = scmp.lt.s32.totalorder %s456_s28, %s452_s27 }
  0x10   :  { %397 = vmatpush3.bf16.xpose.msra.mxu0 %v426_v7 }
  0x11   :  { %398 = vmatprep.subr.bf16.mxu0 %v476_v6  ;;  %v217_v52 = vld [vmem:[#allocation3 + $0x8] sm:$0x3f]  ;;  %p459_p3 = por %p458_p2, %p457_p1 }
  0x13   :  { %p460_p4 = pnand %p459_p3, %p453_p0 }
  0x18   :  { %399 = vmatpush3.bf16.xpose.msra.mxu0 %v427_v8 }
  0x19   :  { %400 = vmatprep.subr.bf16.mxu0 %v476_v6 }
  0x20   :  { %401 = vmatpush3.bf16.xpose.msra.mxu0 %v428_v9 }
  0x21   :  { %402 = vmatprep.subr.bf16.mxu0 %v476_v6 }
  0x28   :  { %403 = vmatpush3.bf16.xpose.msra.mxu0 %v429_v19  ;;  %v227_v19 = vld [vmem:[#allocation4 + $0x8] sm:$0x3f] }
  0x29   :  { %404 = vmatprep.subr.bf16.mxu0 %v476_v6 }
  0x30   :  { %405 = vmatpush3.bf16.xpose.msra.mxu0 %v430_v20 }
  0x31   :  { %406 = vmatprep.subr.bf16.mxu0 %v476_v6 }
  0x38   :  { %407 = vmatpush3.bf16.xpose.msra.mxu0 %v431_v21  ;;  %v270_v21 = vld [vmem:[#allocation5] sm:$0xff] }
  0x39   :  { %408 = vmatprep.subr.bf16.mxu0 %v476_v6 }
  0x40   :  { %409 = vmatpush3.bf16.xpose.msra.mxu0 %v432_v22 }
  0x92   :  { %v46_v10 = vpop.xlane.xlu0 %45 }
  0x93   :  { %v49_v11 = vmul.f32 0.0078125, %v46_v10 }
  0x95   :  { %v51_v14 = vsub.f32 %v40_v2, %v49_v11  ;;  %v265_v2 = vlaneseq }
  0x96   :  { %v42_v12 = vpop.xlane.xlu0 %41 }
  0x97   :  { %v48_v13 = vmul.f32 0.0078125, %v42_v12  ;;  %v53_v17 = vmul.f32 %v51_v14, %v51_v14  ;;  %v266_v3 = vand.u32 127, %v265_v2 }
  0x99   :  { %v50_v15 = vsub.f32 %v39_v4, %v48_v13  ;;  %v56_v18 = vsel %vm43_vm0, %v53_v17, 0.0 }
  0x9b   :  { %v52_v16 = vmul.f32 %v50_v15, %v50_v15 }
  0x9d   :  { %54 = vadd.xlane.f32.xlu1 %v52_v16 }
  0xa1   :  { %57 = vadd.xlane.f32.xlu1 %v56_v18 }
 0x12a   :  { %v55_v23 = vpop.xlane.xlu1 %54 }
 0x12b   :  { %v59_v24 = vmul.f32 0.0078125, %v55_v23 }
 0x12d   :  { %v61_v25 = vadd.f32 1e-05, %v59_v24 }
 0x12e   :  { %v58_v26 = vpop.xlane.xlu1 %57 }
 0x12f   :  { %434 = vrsqrt.f32 %v61_v25  ;;  %v60_v27 = vmul.f32 0.0078125, %v58_v26 }
 0x131   :  { %v62_v28 = vadd.f32 1e-05, %v60_v27  ;;  %v271_v27 = vld [vmem:[#allocation5 + $0x8] sm:$0x3f] }
 0x133   :  { %436 = vrsqrt.f32 %v62_v28 }
 0x139   :  { %v435_v29 = vpop.eup %434 }
 0x13a   :  { %v65_v31 = vmul.f32 %v435_v29, %v50_v15  ;;  %v226_v15 = vld [vmem:[#allocation4] sm:$0xff] }
 0x13c   :  { %v74_v33 = vmul.f32 %v370_v30, %v65_v31 }
 0x13d   :  { %v437_v34 = vpop.eup %436 }
 0x13e   :  { %v83_v35 = vadd.f32 %v371_v32, %v74_v33  ;;  %v66_v36 = vmul.f32 %v437_v34, %v51_v14 }
 0x140   :  { %v383_v37 = vpack.c.bf16 %v83_v35, %v83_v35  ;;  %v75_v38 = vmul.f32 %v370_v30, %v66_v36 }
 0x142   :  { %93 = vst [vmem:[#allocation2] sm:$0xf] %v383_v37  ;;  %v84_v39 = vadd.f32 %v371_v32, %v75_v38 }
 0x144   :  { %v384_v40 = vpack.c.bf16 %v84_v39, %v84_v39 }
 0x146   :  { %94 = vst [vmem:[#allocation2 + $0x4] sm:$0x7] %v384_v40 }
 0x14d   :  { %v433_v41 = vld [vmem:[#allocation2] sm:$0x7f]  }
 0x14e   :  { %411 = vmatmul.mubr.bf16.vlgmr.msra.gmra.mrb[0].mxu0 %v433_v41  ;;  %v310_v41 = vld [vmem:[%s622_s5] sm:$0xff] }
 0x221   :  { %v209_v43 = vpop.f32.mrb[0].mxu0 }
 0x222   :  { %218 = vmax.xlane.f32.xlu1 %v209_v43  ;;  %v412_v44 = vpop.f32.mrb[1].mxu0 }
 0x223   :  { %v212_v45 = vpop.f32.mrb[2].mxu0  ;;  %v311_v44 = vld [vmem:[%s622_s5 + $0x8] sm:$0x3f] }
 0x224   :  { %v413_v46 = vpop.f32.mrb[3].mxu0  ;;  %v221_v47 = vsel %vm43_vm0, %v212_v45, -inf }
 0x225   :  { %222 = vmax.xlane.f32.xlu0 %v221_v47 }
 0x2af   :  { %v219_v50 = vpop.xlane.xlu1 %218 }
 0x2b0   :  { %v224_v51 = vmax.f32 %v216_v49, %v219_v50  ;;  %v332_v50 = vsel %vm95_vm2, %v310_v41, 0.0 }
 0x2b2   :  { %v228_v53 = vsub.f32 %v216_v49, %v224_v51  ;;  %263 = vst.msk [vmem:[#allocation3] sm:$0xff] %vm95_vm2, %v224_v51  ;;  %238 = vperm.xlu1 %424, %v224_v51   ;;  %v223_v54 = vpop.xlane.xlu0 %222  ;;  %v333_v51 = vsel %vm97_vm3, %v311_v44, 0.0 }
 0x2b3   :  { %v225_v55 = vmax.f32 %v217_v52, %v223_v54 }
 0x2b4   :  { %v230_v12 = vmul.f32 1.442695, %v228_v53  ;;  %v334_v53 = vadd.f32 %v333_v51, %v332_v50 }
 0x2b5   :  { %v229_v57 = vsub.f32 %v217_v52, %v225_v55  ;;  %264 = vst.msk [vmem:[#allocation3 + $0x8] sm:$0x3f] %vm97_vm3, %v225_v55  ;;  %243 = vperm.xlu0 %423, %v225_v55  }
 0x2b6   :  { %278 = vperm.xlu1 %424, %v273_v56  }
 0x2b7   :  { %v232_v13 = vmul.f32 1.442695, %v229_v57 }
 0x2b9   :  { %v296_v34 = vld [vmem:[#allocation3] sm:$0xff] }
 0x2ba   :  { %275 = vperm.xlu1 %424, %v272_v58  }
 0x2bc   :  { %v297_v40 = vld [vmem:[#allocation3 + $0x8] sm:$0x3f] }
 0x331   :  { %v239_v59 = vpop.permute.xlu1 %238 }
 0x332   :  { %v246_v60 = vsub.f32 %v209_v43, %v239_v59 }
 0x334   :  { %v248_v61 = vmul.f32 1.442695, %v246_v60  ;;  %v244_v62 = vpop.permute.xlu0 %243 }
 0x335   :  { %v247_v63 = vsub.f32 %v212_v45, %v244_v62  ;;  %v279_v1 = vpop.permute.xlu1 %278 }
 0x336   :  { %438 = vpow2.f32 %v248_v61  ;;  %vm281_vm5 = vcmp.eq.s32.totalorder %v266_v3, %v279_v1 }
 0x337   :  { %v250_v0 = vmul.f32 1.442695, %v247_v63  ;;  %v283_v10 = vsel %vm281_vm5, %v212_v45, 0.0 }
 0x338   :  { %v286_v11 = vsel %vm43_vm0, %v283_v10, 0.0 }
 0x339   :  { %440 = vpow2.f32 %v250_v0  ;;  %v276_v4 = vpop.permute.xlu1 %275 }
 0x33a   :  { %vm280_vm4 = vcmp.eq.s32.totalorder %v266_v3, %v276_v4  ;;  %442 = vpow2.f32 %v230_v12  ;;  %v312_v4 = vld [vmem:[#allocation6] sm:$0x1] }
 0x33b   :  { %v282_v8 = vsel %vm280_vm4, %v209_v43, 0.0  ;;  %444 = vpow2.f32 %v232_v13 }
 0x340   :  { %v439_v5 = vpop.eup %438 }
 0x341   :  { %252 = vadd.xlane.f32.xlu1 %v439_v5 }
 0x343   :  { %v441_v7 = vpop.eup %440 }
 0x344   :  { %v254_v9 = vsel %vm43_vm0, %v441_v7, 0.0  ;;  %v443_v14 = vpop.eup %442  ;;  %v331_v7 = vld [vmem:[#allocation7] sm:$0x1] }
 0x345   :  { %284 = vadd.xlane.f32.xlu1 %v282_v8  ;;  %255 = vadd.xlane.f32.xlu0 %v254_v9  ;;  %v234_v16 = vmul.f32 %v443_v14, %v226_v15  ;;  %v445_v17 = vpop.eup %444 }
 0x346   :  { %v235_v22 = vmul.f32 %v445_v17, %v227_v19 }
 0x349   :  { %287 = vadd.xlane.f32.xlu1 %v286_v11 }
 0x3ce   :  { %v253_v18 = vpop.xlane.xlu1 %252 }
 0x3cf   :  { %v257_v20 = vadd.f32 %v253_v18, %v234_v16 }
 0x3d1   :  { %260 = vst.msk [vmem:[#allocation4] sm:$0xff] %vm95_vm2, %v257_v20 }
 0x3d2   :  { %v285_v23 = vpop.xlane.xlu1 %284  ;;  %v256_v24 = vpop.xlane.xlu0 %255 }
 0x3d3   :  { %v289_v25 = vadd.f32 %v285_v23, %v270_v21  ;;  %v258_v26 = vadd.f32 %v256_v24, %v235_v22 }
 0x3d5   :  { %291 = vst.msk [vmem:[#allocation5] sm:$0xff] %vm95_vm2, %v289_v25 }
 0x3d6   :  { %262 = vst.msk [vmem:[#allocation4 + $0x8] sm:$0x3f] %vm97_vm3, %v258_v26  ;;  %v288_v28 = vpop.xlane.xlu1 %287 }
 0x3d7   :  { %v290_v29 = vadd.f32 %v288_v28, %v271_v27 }
 0x3d8   :  { %v298_v30 = vld [vmem:[#allocation4] sm:$0xff] }
 0x3d9   :  { %292 = vst.msk [vmem:[#allocation5 + $0x8] sm:$0x3f] %vm97_vm3, %v290_v29  ;;  %446 = vlog2.f32 %v298_v30 }
 0x3dc   :  { %v306_v37 = vld [vmem:[#allocation5] sm:$0xff] }
 0x3dd   :  { %v299_v31 = vld [vmem:[#allocation4 + $0x8] sm:$0x3f] }
 0x3de   :  { %448 = vlog2.f32 %v299_v31 }
 0x3e0   :  { %v307_v43 = vld [vmem:[#allocation5 + $0x8] sm:$0x3f] }
 0x3e3   :  { %v447_v32 = vpop.eup %446 }
 0x3e4   :  { %v301_v33 = vmul.f32 0.6931472, %v447_v32 }
 0x3e6   :  { %v304_v35 = vadd.f32 %v301_v33, %v296_v34 }
 0x3e8   :  { %v449_v36 = vpop.eup %448  ;;  %v308_v39 = vsub.f32 %v304_v35, %v306_v37 }
 0x3e9   :  { %v303_v38 = vmul.f32 0.6931472, %v449_v36 }
 0x3ea   :  { %v313_v46 = vmul.f32 %v310_v41, %v308_v39 }
 0x3eb   :  { %v305_v42 = vadd.f32 %v303_v38, %v297_v40 }
 0x3ec   :  { %v315_v48 = vsel %vm95_vm2, %v313_v46, 0.0 }
 0x3ed   :  { %v309_v45 = vsub.f32 %v305_v42, %v307_v43 }
 0x3ef   :  { %v314_v47 = vmul.f32 %v311_v44, %v309_v45 }
 0x3f1   :  { %v316_v49 = vsel %vm97_vm3, %v314_v47, 0.0 }
 0x3f2   :  { %v317_v52 = vadd.f32 %v316_v49, %v315_v48 }
 0x3f4   :  { %318 = vadd.xlane.f32.xlu1 %v317_v52 }
 0x3f8   :  { %335 = vadd.xlane.f32.xlu1 %v334_v53 }
 0x481   :  { %v319_v54 = vpop.xlane.xlu1 %318 }
 0x482   :  { %v320_v55 = vrot.slane %v319_v54, 4 }
 0x484   :  { %v321_v56 = vadd.f32 %v320_v55, %v319_v54 }
 0x485   :  { %v336_v57 = vpop.xlane.xlu1 %335 }
 0x486   :  { %v322_v58 = vrot.slane %v321_v56, 2  ;;  %v337_v59 = vrot.slane %v336_v57, 4 }
 0x488   :  { %v338_v60 = vadd.f32 %v337_v59, %v336_v57  ;;  %v323_v61 = vadd.f32 %v322_v58, %v321_v56 }
 0x48a   :  { %v339_v62 = vrot.slane %v338_v60, 2  ;;  %v324_v63 = vrot.slane %v323_v61, 1 }
 0x48c   :  { %v340_v0 = vadd.f32 %v339_v62, %v338_v60  ;;  %v325_v1 = vadd.f32 %v324_v63, %v323_v61 }
 0x48e   :  { %414 = vpush %v325_v1  ;;  %v341_v2 = vrot.slane %v340_v0, 1 }
 0x490   :  { %v342_v3 = vadd.f32 %v341_v2, %v340_v0 }
 0x492   :  { %416 = vpush %v342_v3 }
 0x4bf   :  { %s415_s5 = spop %414 }
 0x4c0   :  { %v327_v5 = vstv %s415_s5 }
 0x4c1   :  { %v328_v6 = vadd.f32 %v327_v5, %v312_v4 }
 0x4c3   :  { %330 = vst.msk [vmem:[#allocation6] sm:$0x1] %vm31_vm6, %v328_v6  ;;  %s417_s24 = spop %416 }
 0x4c4   :  { %v344_v8 = vstv %s417_s24 }
 0x4c5   :  { %v345_v9 = vadd.f32 %v344_v8, %v331_v7 }
 0x4c7   :  { %346 = vst.msk [vmem:[#allocation7] sm:$0x1] %vm31_vm6, %v345_v9 }
 0x4ca   :  { %v349_v13 = vld [vmem:[#allocation6] sm:$0x1] }
 0x4ce   :  { %v350_v10 = vld [vmem:[#allocation7] sm:$0x1] }
 0x4cf   :  { %v351_v11 = vmax.f32 %v350_v10, 1.0 }
 0x4d1   :  { %450 = vrcp.f32 %v351_v11 }
 0x4db   :  { %v451_v12 = vpop.eup %450 }
 0x4dc   :  { %v353_v14 = vmul.f32 %v451_v12, %v349_v13 }
 0x4de   :  { %355 = vst.msk [vmem:[#allocation8] sm:$0x1] %vm31_vm6, %v353_v14 }
 0x4df   :  { %463 = shalt.err (!%p460_p4)
}
 0x4e0   :  { %s464_s30 = scalar_lea.hbm %s623_s6, 16 }
 0x4e1   :  { %p465_p5 = scmp.ne.s32.totalorder %s623_s6, %s464_s30  ;;  %p468_p6 = scmp.lt.u32.totalorder %s464_s30, %s623_s6 }
 0x4e3   :  { %p470_p7 = pnand %p468_p6, %p465_p5 }
 0x4e5   :  { %473 = shalt.err (!%p470_p7)
}
 0x4e6   :  { %365 = dma.vmem_to_hbm [thread:$0]  %s363_s26, 16, %s623_s6, [#allocation9]  }
 0x4e7   :  { %474 = dma.done.wait [#allocation9], 16  }
 0x4e8   :  { %475 = vsyncadd [#allocation9], 4294967280 }
 0x4e9   :  { %369 = vsyncpa [#allocation9], 1 }

// kernel: vision_language_model_forward.19
= control target key start
LH: loop header
LB: loop body
LE: loop exit
PB: predicated region body
PF: predicated region fallthrough
CT: control target
= control target key end

     0   :  { %s2053_s27 = smov 0   ;;  %s2390_s0 = inlined_call_operand.vmem [shape: bf16[2,24,128], index: 0, kind: input, shape index: {}]   ;;  %s2391_s1 = inlined_call_operand.vmem [shape: f32[2,1,24], index: 1, kind: input, shape index: {}]   ;;  %s2392_s2 = inlined_call_operand.vmem [shape: bf16[128,384], index: 2, kind: input, shape index: {}]   ;;  %s2393_s3 = inlined_call_operand.vmem [shape: f32[1,384], index: 3, kind: input, shape index: {}]   ;;  %s2394_s4 = inlined_call_operand.vmem [shape: bf16[128,128], index: 4, kind: input, shape index: {}]   ;;  %s2395_s5 = inlined_call_operand.vmem [shape: f32[1,128], index: 5, kind: input, shape index: {}]   ;;  %s2396_s6 = inlined_call_operand.vmem [shape: f32[1,128], index: 6, kind: input, shape index: {}]   ;;  %s2397_s7 = inlined_call_operand.vmem [shape: f32[1,128], index: 7, kind: input, shape index: {}]   ;;  %s2398_s8 = inlined_call_operand.vmem [shape: bf16[2,24,128], index: 8, kind: output, shape index: {}]  }
   0x1 LB: > { %s1627_s28 = sadd.s32 4294967295, %s2001_s27   ;;  %p1631_p0 = scmp.ge.s32.totalorder %s2001_s27, 1  ;;  %s2001_s27 = sphi %s2053_s27, %s18_s27  }
   0x2   : > { %p270_p1 = scmp.lt.s32.totalorder %s2001_s27, 3 }
   0x4   : > { %p271_p2 = pnand %p1631_p0, %p270_p1 }
   0x5   : > { %v1897_v0 = vld [vmem:[%s2392_s2 + $0x4] ss:$12 sps:$4 sm:$0xff] (!%p271_p2)   ;;  %p307_p3 = scmp.lt.s32.totalorder (!%p271_p2), %s1627_s28, 1  ;;  %v1899_v1 = vld [vmem:[%s2392_s2] ss:$12 sps:$4 sm:$0xff] (!%p271_p2)   ;;  %v2003_v2 = vmov (!%p271_p2), 0   ;;  %v358_v5 = vlaneseq (!%p271_p2) }
   0x6   : > { %274 = sbr.rel (%p271_p2) target bundleno = 2815 (0xaff), region = 52  ;;  %543 = vmatprep.mubr.bf16.mxu0 (!%p271_p2), %v2003_v2  ;;  %511 = vmatprep.subr.bf16.mxu0 (!%p271_p2), %v1897_v0  ;;  %v1900_v3 = vld [vmem:[%s2392_s2 + $0x1c] ss:$12 sps:$4 sm:$0xff] (!%p271_p2)   ;;  %v1902_v4 = vld [vmem:[%s2392_s2 + $0x18] ss:$12 sps:$4 sm:$0xff] (!%p271_p2)   ;;  %vm639_vm1 = vcmask (!%p271_p2), 261120  }
   0x7   : > { %512 = vmatpush1.bf16.msra.mxu0 (!%p271_p2), %v1899_v1  ;;  %v1903_v6 = vld [vmem:[%s2392_s2 + $0x34] ss:$12 sps:$4 sm:$0xff] (!%p271_p2)   ;;  %v1905_v7 = vld [vmem:[%s2392_s2 + $0x30] ss:$12 sps:$4 sm:$0xff] (!%p271_p2)   ;;  %v2087_v8 = vshrl.u32 (!%p271_p2), %v358_v5, 7  ;;  %v615_v59 = vand.u32 (!%p271_p2), 127, %v358_v5 }
   0x8   : > { %513 = vmatprep.subr.bf16.mxu0 (!%p271_p2), %v1900_v3  ;;  %v1906_v9 = vld [vmem:[%s2392_s2 + $0x4c] ss:$12 sps:$4 sm:$0xff] (!%p271_p2)   ;;  %v1908_v10 = vld [vmem:[%s2392_s2 + $0x48] ss:$12 sps:$4 sm:$0xff] (!%p271_p2)   ;;  %v1909_v12 = vld [vmem:[%s2392_s2 + $0x64] ss:$12 sps:$4 sm:$0xff] (!%p271_p2)  }
   0x9   : > { %v360_v13 = vsub.s32 (!%p271_p2), 0, %v2087_v8  ;;  %v1911_v16 = vld [vmem:[%s2392_s2 + $0x60] ss:$12 sps:$4 sm:$0xff] (!%p271_p2)   ;;  %v1912_v18 = vld [vmem:[%s2392_s2 + $0x7c] ss:$12 sps:$4 sm:$0xff] (!%p271_p2)   ;;  %v364_v27 = vsub.s32 (!%p271_p2), 1, %v2087_v8  ;;  %vm616_vm4 = vcmp.le.s32.totalorder (!%p271_p2), %v615_v59, %v2087_v8 }
   0xa   : > { %v1914_v19 = vld [vmem:[%s2392_s2 + $0x78] ss:$12 sps:$4 sm:$0xff] (!%p271_p2)   ;;  %v1915_v20 = vld [vmem:[%s2392_s2 + $0x94] ss:$12 sps:$4 sm:$0xff] (!%p271_p2)   ;;  %v1917_v21 = vld [vmem:[%s2392_s2 + $0x90] ss:$12 sps:$4 sm:$0xff] (!%p271_p2)  }
   0xb   : > { %514 = vmatpush1.bf16.msra.mxu0 (!%p271_p2), %v1902_v4  ;;  %v1918_v22 = vld [vmem:[%s2392_s2 + $0xac] ss:$12 sps:$4 sm:$0xff] (!%p271_p2)   ;;  %v1920_v23 = vld [vmem:[%s2392_s2 + $0xa8] ss:$12 sps:$4 sm:$0xff] (!%p271_p2)   ;;  %v2138_v26 = vld [vmem:[%s2393_s3] sm:$0x7] (!%p271_p2) }
   0xc   : > { %515 = vmatprep.subr.bf16.mxu0 (!%p271_p2), %v1903_v6  ;;  %v361_v28 = vrot.slane (!%p271_p2), %v2138_v26, %v360_v13  ;;  %v365_v30 = vrot.slane (!%p271_p2), %v2138_v26, %v364_v27  ;;  %v1923_v50 = vld [vmem:[%s2392_s2 + $0x8] ss:$12 sps:$4 sm:$0xff] (!%p271_p2)   ;;  %v1924_v51 = vld [vmem:[%s2392_s2 + $0x20] ss:$12 sps:$4 sm:$0xff] (!%p271_p2)   ;;  %v1925_v52 = vld [vmem:[%s2392_s2 + $0x38] ss:$12 sps:$4 sm:$0xff] (!%p271_p2)  }
   0xd   : > { %s2400_s28 = smov (!%p307_p3, %s1627_s28), 1  ;;  %1752 = vmatprep.subr.bf16.mxu1 %v1923_v50  ;;  %v1926_v53 = vld [vmem:[%s2392_s2 + $0x50] ss:$12 sps:$4 sm:$0xff]   ;;  %v1927_v54 = vld [vmem:[%s2392_s2 + $0x68] ss:$12 sps:$4 sm:$0xff]   ;;  %v613_v58 = vadd.s32 16, %v2087_v8 }
   0xe   : > { %s1868_s17 = smul.u32 12, %s2400_s28  ;;  %s314_s22 = scalar_lea.vmem %s2391_s1, %s2400_s28  ;;  %1753 = vmatpush3.bf16.msra.mxu1 %v1923_v50  ;;  %v1928_v55 = vld [vmem:[%s2392_s2 + $0x80] ss:$12 sps:$4 sm:$0xff]   ;;  %v1929_v56 = vld [vmem:[%s2392_s2 + $0x98] ss:$12 sps:$4 sm:$0xff]   ;;  %v612_v60 = vadd.s32 8, %v2087_v8 }
   0xf   : > { %v619_v11 = vld [vmem:[%s314_s22] sm:$0x1]  ;;  %516 = vmatpush1.bf16.msra.mxu0 %v1905_v7  ;;  %1754 = vmatprep.subr.bf16.mxu1 %v1924_v51  ;;  %v1930_v57 = vld [vmem:[%s2392_s2 + $0xb0] ss:$12 sps:$4 sm:$0xff]   ;;  %vm618_vm3 = vcmp.le.s32.totalorder %v615_v59, %v613_v58  ;;  %v2004_v62 = vmov -1e+09  }
  0x10   : > { %s2097_s29 = scalar_lea.vmem %s2390_s0, %s1868_s17  ;;  %vm620_vm0 = vcmp.gt.f32.partialorder %v619_v11, 0.0  ;;  %517 = vmatprep.subr.bf16.mxu0 %v1906_v9  ;;  %vm617_vm6 = vcmp.le.s32.totalorder %v615_v59, %v612_v60  ;;  %vm706_vm9 = vcmask 195584   ;;  %vm748_vm10 = vcmask 1043456   ;;  %s2005_s30 = smov 96  }
  0x11   : > { %v321_v14 = vld [vmem:[%s2097_s29] sm:$0xff]   ;;  %v621_v15 = vsel %vm620_vm0, 1, %v2003_v2  ;;  %v2131_v24 = vld [vmem:[%s2097_s29 + $0x8] sm:$0xf]  ;;  %s2006_s9 = smov 64   ;;  %s2007_s10 = smov 32  }
  0x12   : > { %v2110_v17 = vrot.slane %v621_v15, %v360_v13  ;;  %1768 = vmatprep.mubr.bf16.mxu1 %v321_v14  ;;  %v1635_v25 = vcombine.low %v2131_v24, %v2131_v24  ;;  %1755 = vmatpush3.bf16.msra.mxu1 %v1924_v51  ;;  %v368_v15 = vsub.s32 2, %v2087_v8  ;;  %vm1358_vm11 = vcmask 523264   ;;  %s319_s16 = scalar_lea.vmem %s2398_s8, %s1868_s17 }
  0x13   : > { %518 = vmatpush1.bf16.msra.mxu0 %v1908_v10  ;;  %1756 = vmatprep.subr.bf16.mxu1 %v1925_v52  ;;  %vm1362_vm12 = vcmask 785408  }
  0x14   : > { %519 = vmatprep.subr.bf16.mxu0 %v1909_v12  ;;  %vm626_vm2 = vcmp.eq.s32.totalorder %v2110_v17, 1 }
  0x15   : > { %vm629_vm5 = vmand %vm618_vm3, %vm626_vm2 }
  0x16   : > { %1757 = vmatpush3.bf16.msra.mxu1 %v1925_v52  ;;  %vm627_vm7 = vmand %vm616_vm4, %vm626_vm2  ;;  %v2192_v63 = vsel %vm629_vm5, 0.0, %v2004_v62 }
  0x17   : > { %520 = vmatpush1.bf16.msra.mxu0 %v1911_v16  ;;  %1758 = vmatprep.subr.bf16.mxu1 %v1926_v53  ;;  %vm628_vm8 = vmand %vm617_vm6, %vm626_vm2  ;;  %v369_v16 = vrot.slane %v2138_v26, %v368_v15 }
  0x18   : > { %521 = vmatprep.subr.bf16.mxu0 %v1912_v18  ;;  %v2197_v7 = vsel %vm628_vm8, 0.0, %v2004_v62 }
  0x1a   : > { %1759 = vmatpush3.bf16.msra.mxu1 %v1926_v53 }
  0x1b   : > { %522 = vmatpush1.bf16.msra.mxu0 %v1914_v19  ;;  %1760 = vmatprep.subr.bf16.mxu1 %v1927_v54 }
  0x1c   : > { %523 = vmatprep.subr.bf16.mxu0 %v1915_v20 }
  0x1e   : > { %1761 = vmatpush3.bf16.msra.mxu1 %v1927_v54 }
  0x1f   : > { %524 = vmatpush1.bf16.msra.mxu0 %v1917_v21  ;;  %1762 = vmatprep.subr.bf16.mxu1 %v1928_v55 }
  0x20   : > { %525 = vmatprep.subr.bf16.mxu0 %v1918_v22 }
  0x22   : > { %1763 = vmatpush3.bf16.msra.mxu1 %v1928_v55 }
  0x23   : > { %526 = vmatpush1.bf16.msra.mxu0 %v1920_v23  ;;  %1764 = vmatprep.subr.bf16.mxu1 %v1929_v56 }
  0x26   : > { %544 = vmatmul.mubr.bf16.vlgmr.msra.gmra.mrb[0].mxu0 %v321_v14  ;;  %1765 = vmatpush3.bf16.msra.mxu1 %v1929_v56 }
  0x27   : > { %553 = vmatprep.mubr.bf16.mxu0 %v2003_v2  ;;  %1766 = vmatprep.subr.bf16.mxu1 %v1930_v57  ;;  %v2194_v2 = vsel %vm627_vm7, 0.0, %v2004_v62 }
  0x2a   : > { %1767 = vmatpush3.bf16.msra.mxu1 %v1930_v57 }
  0x2d   : > { %1769 = vmatmul.mubr.bf16.vlgmr.msra.gmra.mrb[0].mxu1 %v1635_v25 }
  0x2e   : > { %554 = vmatmul.mubr.bf16.gmra.mrb[4].mxu0 %v1635_v25 }
  0xf9   : > { %v545_v29 = vpop.f32.mrb[0].mxu0 }
  0xfa   : > { %v547_v31 = vpop.f32.mrb[1].mxu0  ;;  %v546_v33 = vadd.f32 %v545_v29, %v361_v28 }
  0xfb   : > { %v549_v32 = vpop.f32.mrb[2].mxu0  ;;  %v548_v36 = vadd.f32 %v547_v31, %v365_v30 }
  0xfc   : > { %v550_v34 = vadd.f32 %v549_v32, %v361_v28  ;;  %v551_v35 = vpop.f32.mrb[3].mxu0 }
  0xfd   : > { %v552_v37 = vadd.f32 %v551_v35, %v365_v30 }
  0xfe   : > { %v2143_v38 = vpack.c.bf16 %v550_v34, %v546_v33 }
  0xff   : > { %v2145_v39 = vpack.c.bf16 %v552_v37, %v548_v36 }
 0x100   : > { %1776 = vmatprep.mubr.msk.bf16.mxu0 %vm639_vm1, %v2143_v38  ;;  %v1770_v17 = vpop.f32.mrb[0].mxu1 }
 0x101   : > { %v555_v40 = vpop.f32.mrb[4].mxu0  ;;  %1856 = vmatprep.subr.msk.bf16.mxu0 %vm639_vm1, %v2145_v39  ;;  %v647_v41 = vsel %vm639_vm1, %v2145_v39, 0  ;;  %v596_v18 = vpop.f32.mrb[1].mxu1 }
 0x102   : > { %v557_v42 = vpop.f32.mrb[5].mxu0  ;;  %1773 = vmatpush3.bf16.xpose.msra.mxu0 %v647_v41  ;;  %v556_v48 = vadd.f32 %v555_v40, %v361_v28  ;;  %v597_v19 = vadd.f32 %v596_v18, %v369_v16  ;;  %v1771_v20 = vpop.f32.mrb[2].mxu1  ;;  %v605_v41 = vadd.f32 %v1770_v17, %v369_v16 }
 0x103   : > { %v558_v43 = vadd.f32 %v557_v42, %v365_v30  ;;  %v559_v44 = vpop.f32.mrb[6].mxu0  ;;  %v599_v21 = vpop.f32.mrb[3].mxu1 }
 0x104   : > { %v560_v45 = vpop.f32.mrb[7].mxu0  ;;  %v2159_v49 = vpack.c.bf16 %v556_v48, %v556_v48  ;;  %v600_v22 = vadd.f32 %v599_v21, %v369_v16  ;;  %v2213_v42 = vpack.c.bf16 %v605_v41, %v605_v41 }
 0x105   : > { %v2153_v46 = vpack.c.bf16 %v558_v43, %v558_v43 }
 0x106   : > { %v2206_v23 = vpack.c.bf16 %v600_v22, %v597_v19  ;;  %v750_v43 = vsel %vm748_vm10, %v2213_v42, 0 }
 0x107   : > { %1857 = vmatprep.subr.msk.bf16.mxu0 %vm639_vm1, %v2153_v46  ;;  %v650_v47 = vsel %vm639_vm1, %v2153_v46, 0 }
 0x108   : > { %1780 = vmatprep.subr.bf16.mxu1 %v2206_v23 }
 0x109   : > { %1781 = vmatpush3.bf16.msra.mxu1 %v2206_v23 }
 0x10a   : > { %1775 = vmatpush3.bf16.xpose.msra.mxu0 %v650_v47  ;;  %1858 = vmatprep.subr.msk.bf16.mxu1 %vm748_vm10, %v2213_v42 }
 0x10d   : > { %1783 = vmatpush3.bf16.msra.mxu1 %v750_v43 }
 0x111   : > { %1777 = vmatmul.mubr.msk.bf16.vlgmr.msra.gmra.mrb[8].mxu0 %vm639_vm1, %v2159_v49 }
 0x1e4   : > { %v1778_v61 = vpop.f32.mrb[8].mxu0 }
 0x1e5   : > { %v702_v0 = vmul.f32 0.17677669, %v1778_v61  ;;  %v686_v1 = vpop.f32.mrb[9].mxu0 }
 0x1e6   : > { %v700_v3 = vmul.f32 0.17677669, %v686_v1  ;;  %v1779_v4 = vpop.f32.mrb[10].mxu0 }
 0x1e7   : > { %v689_v5 = vpop.f32.mrb[11].mxu0  ;;  %v705_v6 = vadd.f32 %v702_v0, %v2192_v63 }
 0x1e8   : > { %v701_v9 = vmul.f32 0.17677669, %v689_v5  ;;  %v703_v10 = vadd.f32 %v700_v3, %v2194_v2 }
 0x1e9   : > { %v713_v11 = vsel %vm706_vm9, %v705_v6, -inf }
 0x1ea   : > { %714 = vmax.xlane.f32.xlu1 %v713_v11  ;;  %v707_v12 = vsel %vm706_vm9, %v703_v10, -inf  ;;  %v704_v13 = vadd.f32 %v701_v9, %v2197_v7 }
 0x1eb   : > { %708 = vmax.xlane.f32.xlu0 %v707_v12 }
 0x1ec   : > { %v710_v14 = vsel %vm706_vm9, %v704_v13, -inf }
 0x1ef   : > { %711 = vmax.xlane.f32.xlu0 %v710_v14 }
 0x277   : > { %v715_v25 = vpop.xlane.xlu1 %714 }
 0x278   : > { %v718_v27 = vsub.f32 %v705_v6, %v715_v25  ;;  %v709_v28 = vpop.xlane.xlu0 %708 }
 0x279   : > { %v716_v29 = vsub.f32 %v703_v10, %v709_v28 }
 0x27a   : > { %v723_v30 = vmul.f32 1.442695, %v718_v27 }
 0x27b   : > { %v719_v8 = vmul.f32 1.442695, %v716_v29 }
 0x27c   : > { %v712_v31 = vpop.xlane.xlu0 %711 }
 0x27d   : > { %1940 = vpow2.f32 %v719_v8  ;;  %v717_v26 = vsub.f32 %v704_v13, %v712_v31 }
 0x27e   : > { %1942 = vpow2.f32 %v723_v30 }
 0x27f   : > { %v721_v32 = vmul.f32 1.442695, %v717_v26 }
 0x281   : > { %1944 = vpow2.f32 %v721_v32 }
 0x287   : > { %v1941_v33 = vpop.eup %1940 }
 0x288   : > { %v725_v34 = vsel %vm706_vm9, %v1941_v33, 0.0  ;;  %v1943_v35 = vpop.eup %1942 }
 0x289   : > { %726 = vadd.xlane.f32.xlu1 %v725_v34  ;;  %v731_v37 = vsel %vm706_vm9, %v1943_v35, 0.0 }
 0x28b   : > { %v1945_v36 = vpop.eup %1944 }
 0x28c   : > { %v728_v40 = vsel %vm706_vm9, %v1945_v36, 0.0 }
 0x28d   : > { %732 = vadd.xlane.f32.xlu1 %v731_v37  ;;  %729 = vadd.xlane.f32.xlu0 %v728_v40 }
 0x29e   : > { %810 = vrot.lane.b32.xlu1 %v2153_v46, %s2005_s30 }
 0x2a2   : > { %802 = vrot.lane.b32.xlu1 %v2143_v38, %s2005_s30 }
 0x2a3   : > { %808 = vrot.lane.b32.xlu0 %v2145_v39, %s2005_s30 }
 0x2a6   : > { %981 = vrot.lane.b32.xlu1 %v2145_v39, %s2006_s9 }
 0x2a7   : > { %804 = vrot.lane.b32.xlu0 %v2159_v49, %s2005_s30 }
 0x2aa   : > { %983 = vrot.lane.b32.xlu1 %v2153_v46, %s2006_s9 }
 0x2ab   : > { %977 = vrot.lane.b32.xlu0 %v2143_v38, %s2006_s9 }
 0x2ae   : > { %979 = vrot.lane.b32.xlu1 %v2159_v49, %s2006_s9 }
 0x316   : > { %v727_v44 = vpop.xlane.xlu1 %726 }
 0x317   : > { %1946 = vrcp.f32 %v727_v44 }
 0x31a   : > { %v733_v45 = vpop.xlane.xlu1 %732  ;;  %v730_v47 = vpop.xlane.xlu0 %729 }
 0x31b   : > { %1948 = vrcp.f32 %v733_v45 }
 0x31c   : > { %1950 = vrcp.f32 %v730_v47 }
 0x31e   : > { %v809_v48 = vpop.permute.xlu0 %808  ;;  %v811_v54 = vpop.permute.xlu1 %810 }
 0x31f   : > { %1859 = vmatprep.subr.msk.bf16.mxu1 %vm639_vm1, %v809_v48  ;;  %v819_v59 = vsel %vm639_vm1, %v809_v48, 0  ;;  %v822_v61 = vsel %vm639_vm1, %v811_v54, 0 }
 0x321   : > { %v1947_v50 = vpop.eup %1946 }
 0x322   : > { %v735_v55 = vmul.f32 %v1947_v50, %v1941_v33  ;;  %v803_v60 = vpop.permute.xlu1 %802  ;;  %v805_v0 = vpop.permute.xlu0 %804 }
 0x325   : > { %v1949_v51 = vpop.eup %1948 }
 0x326   : > { %v1951_v52 = vpop.eup %1950  ;;  %v739_v53 = vmul.f32 %v1949_v51, %v1943_v35  ;;  %v982_v62 = vpop.permute.xlu1 %981 }
 0x327   : > { %v737_v56 = vmul.f32 %v1951_v52, %v1945_v36  ;;  %v992_v1 = vsel %vm639_vm1, %v982_v62, 0  ;;  %v978_v3 = vpop.permute.xlu0 %977 }
 0x328   : > { %v741_v57 = vpack.c.bf16 %v739_v53, %v739_v53 }
 0x329   : > { %v740_v58 = vpack.c.bf16 %v737_v56, %v735_v55 }
 0x32a   : > { %v984_v4 = vpop.permute.xlu1 %983 }
 0x32b   : > { %1784 = vmatprep.mubr.msk.bf16.mxu1 %vm706_vm9, %v740_v58  ;;  %v995_v5 = vsel %vm639_vm1, %v984_v4, 0 }
 0x32c   : > { %1785 = vmatmul.mubr.msk.bf16.vlgmr.msra.gmra.mrb[4].mxu1 %vm706_vm9, %v741_v57 }
 0x32d   : > { %1789 = vmatpush3.bf16.xpose.msra.mxu1 %v819_v59  ;;  %1792 = vmatprep.mubr.msk.bf16.mxu1 %vm639_vm1, %v803_v60 }
 0x32e   : > { %1860 = vmatprep.subr.msk.bf16.mxu1 %vm639_vm1, %v811_v54  ;;  %v980_v6 = vpop.permute.xlu1 %979 }
 0x335   : > { %1791 = vmatpush3.bf16.xpose.msra.mxu1 %v822_v61 }
 0x336   : > { %1862 = vmatprep.subr.msk.bf16.mxu1 %vm639_vm1, %v982_v62 }
 0x33c   : > { %1793 = vmatmul.mubr.msk.bf16.vlgmr.msra.gmra.mrb[8].mxu1 %vm639_vm1, %v805_v0 }
 0x33d   : > { %1805 = vmatpush3.bf16.xpose.msra.mxu1 %v992_v1  ;;  %1808 = vmatprep.mubr.msk.bf16.mxu1 %vm639_vm1, %v978_v3 }
 0x33e   : > { %1863 = vmatprep.subr.msk.bf16.mxu1 %vm639_vm1, %v984_v4 }
 0x345   : > { %1807 = vmatpush3.bf16.xpose.msra.mxu1 %v995_v5 }
 0x34c   : > { %1809 = vmatmul.mubr.msk.bf16.vlgmr.msra.gmra.mrb[12].mxu1 %vm639_vm1, %v980_v6 }
 0x3ff   : > { %v2249_v9 = vpop.f32.mrb[4].mxu1 }
 0x400   : > { %v2251_v10 = vpop.f32.mrb[5].mxu1 }
 0x401   : > { %v1787_v11 = vpop.f32.mrb[6].mxu1 }
 0x402   : > { %v2253_v12 = vpop.f32.mrb[7].mxu1 }
 0x40f   : > { %v1794_v13 = vpop.f32.mrb[8].mxu1 }
 0x410   : > { %v858_v14 = vpop.f32.mrb[9].mxu1  ;;  %v874_v52 = vmul.f32 0.17677669, %v1794_v13 }
 0x411   : > { %v1795_v15 = vpop.f32.mrb[10].mxu1  ;;  %v872_v51 = vmul.f32 0.17677669, %v858_v14 }
 0x412   : > { %v861_v16 = vpop.f32.mrb[11].mxu1 }
 0x413   : > { %v875_v53 = vadd.f32 %v872_v51, %v2194_v2  ;;  %v873_v54 = vmul.f32 0.17677669, %v861_v16 }
 0x415   : > { %v878_v55 = vsel %vm706_vm9, %v875_v53, -inf }
 0x41f   : > { %v1810_v17 = vpop.f32.mrb[12].mxu1 }
 0x420   : > { %v1031_v18 = vpop.f32.mrb[13].mxu1  ;;  %v1047_v19 = vmul.f32 0.17677669, %v1810_v17 }
 0x421   : > { %v1045_v20 = vmul.f32 0.17677669, %v1031_v18  ;;  %v1811_v21 = vpop.f32.mrb[14].mxu1 }
 0x422   : > { %v1034_v22 = vpop.f32.mrb[15].mxu1  ;;  %v1050_v30 = vadd.f32 %v1047_v19, %v2192_v63 }
 0x423   : > { %v1046_v25 = vmul.f32 0.17677669, %v1034_v22  ;;  %v1048_v27 = vadd.f32 %v1045_v20, %v2194_v2 }
 0x424   : > { %v1057_v31 = vsel %vm706_vm9, %v1050_v30, -inf }
 0x425   : > { %v1051_v28 = vsel %vm706_vm9, %v1048_v27, -inf  ;;  %v1049_v29 = vadd.f32 %v1046_v25, %v2197_v7 }
 0x426   : > { %1052 = vmax.xlane.f32.xlu0 %v1051_v28 }
 0x427   : > { %v1054_v8 = vsel %vm706_vm9, %v1049_v29, -inf }
 0x428   : > { %1055 = vmax.xlane.f32.xlu1 %v1054_v8 }
 0x42a   : > { %1058 = vmax.xlane.f32.xlu0 %v1057_v31 }
 0x4b3   : > { %v1053_v26 = vpop.xlane.xlu0 %1052 }
 0x4b4   : > { %v1060_v32 = vsub.f32 %v1048_v27, %v1053_v26 }
 0x4b5   : > { %v1056_v33 = vpop.xlane.xlu1 %1055 }
 0x4b6   : > { %v1063_v34 = vmul.f32 1.442695, %v1060_v32  ;;  %v1061_v35 = vsub.f32 %v1049_v29, %v1056_v33 }
 0x4b7   : > { %v1059_v36 = vpop.xlane.xlu0 %1058 }
 0x4b8   : > { %1952 = vpow2.f32 %v1063_v34  ;;  %v1065_v37 = vmul.f32 1.442695, %v1061_v35  ;;  %v1062_v40 = vsub.f32 %v1050_v30, %v1059_v36 }
 0x4ba   : > { %1954 = vpow2.f32 %v1065_v37  ;;  %v1067_v41 = vmul.f32 1.442695, %v1062_v40 }
 0x4bc   : > { %1956 = vpow2.f32 %v1067_v41 }
 0x4c2   : > { %v1953_v43 = vpop.eup %1952 }
 0x4c3   : > { %v1069_v44 = vsel %vm706_vm9, %v1953_v43, 0.0 }
 0x4c4   : > { %v1955_v45 = vpop.eup %1954  ;;  %1070 = vadd.xlane.f32.xlu0 %v1069_v44 }
 0x4c5   : > { %v1072_v50 = vsel %vm706_vm9, %v1955_v45, 0.0 }
 0x4c6   : > { %v1957_v47 = vpop.eup %1956 }
 0x4c7   : > { %v1075_v48 = vsel %vm706_vm9, %v1957_v47, 0.0 }
 0x4c8   : > { %1076 = vadd.xlane.f32.xlu1 %v1075_v48  ;;  %1073 = vadd.xlane.f32.xlu0 %v1072_v50 }
 0x4d9   : > { %1088 = vrot.lane.b32.xlu1 %v2213_v42, %s2006_s9 }
 0x4dd   : > { %1152 = vrot.lane.b32.xlu1 %v2145_v39, %s2007_s10  ;;  %v877_v39 = vadd.f32 %v874_v52, %v2192_v63 }
 0x4de   : > { %1086 = vrot.lane.b32.xlu0 %v2206_v23, %s2006_s9 }
 0x4df   : > { %v884_v56 = vsel %vm706_vm9, %v877_v39, -inf }
 0x4e1   : > { %1154 = vrot.lane.b32.xlu1 %v2153_v46, %s2007_s10  ;;  %v876_v46 = vadd.f32 %v873_v54, %v2197_v7 }
 0x4e2   : > { %1148 = vrot.lane.b32.xlu0 %v2143_v38, %s2007_s10 }
 0x4e3   : > { %v881_v38 = vsel %vm706_vm9, %v876_v46, -inf }
 0x4e5   : > { %1150 = vrot.lane.b32.xlu1 %v2159_v49, %s2007_s10 }
 0x501   : > { %879 = vmax.xlane.f32.xlu0 %v878_v55 }
 0x505   : > { %885 = vmax.xlane.f32.xlu0 %v884_v56 }
 0x509   : > { %882 = vmax.xlane.f32.xlu1 %v881_v38 }
 0x551   : > { %v1071_v57 = vpop.xlane.xlu0 %1070 }
 0x552   : > { %1958 = vrcp.f32 %v1071_v57 }
 0x555   : > { %v1074_v49 = vpop.xlane.xlu0 %1073  ;;  %v1077_v58 = vpop.xlane.xlu1 %1076 }
 0x556   : > { %1960 = vrcp.f32 %v1074_v49 }
 0x557   : > { %1962 = vrcp.f32 %v1077_v58 }
 0x559   : > { %v1087_v59 = vpop.permute.xlu0 %1086  ;;  %v1089_v60 = vpop.permute.xlu1 %1088 }
 0x55a   : > { %1812 = vmatprep.subr.bf16.mxu1 %v1087_v59  ;;  %v1098_v62 = vsel %vm748_vm10, %v1089_v60, 0 }
 0x55b   : > { %1813 = vmatpush3.bf16.msra.mxu1 %v1087_v59 }
 0x55c   : > { %1864 = vmatprep.subr.msk.bf16.mxu1 %vm748_vm10, %v1089_v60  ;;  %v1959_v61 = vpop.eup %1958 }
 0x55d   : > { %v1153_v0 = vpop.permute.xlu1 %1152  ;;  %v1079_v4 = vmul.f32 %v1959_v61, %v1953_v43  ;;  %v1149_v14 = vpop.permute.xlu0 %1148 }
 0x55e   : > { %v1163_v15 = vsel %vm639_vm1, %v1153_v0, 0 }
 0x55f   : > { %1815 = vmatpush3.bf16.msra.mxu1 %v1098_v62 }
 0x560   : > { %v1961_v1 = vpop.eup %1960  ;;  %1865 = vmatprep.subr.msk.bf16.mxu1 %vm639_vm1, %v1153_v0 }
 0x561   : > { %v1963_v3 = vpop.eup %1962  ;;  %v1081_v5 = vmul.f32 %v1961_v1, %v1955_v45  ;;  %v1155_v16 = vpop.permute.xlu1 %1154 }
 0x562   : > { %v1083_v6 = vmul.f32 %v1963_v3, %v1957_v47  ;;  %v1166_v17 = vsel %vm639_vm1, %v1155_v16, 0 }
 0x563   : > { %v1084_v11 = vpack.c.bf16 %v1081_v5, %v1079_v4 }
 0x564   : > { %v1085_v13 = vpack.c.bf16 %v1083_v6, %v1083_v6 }
 0x565   : > { %1816 = vmatprep.mubr.msk.bf16.mxu1 %vm706_vm9, %v1084_v11  ;;  %v1151_v18 = vpop.permute.xlu1 %1150 }
 0x566   : > { %1817 = vmatmul.mubr.msk.bf16.vlgmr.msra.gmra.mrb[16].mxu1 %vm706_vm9, %v1085_v13 }
 0x567   : > { %1824 = vmatprep.mubr.msk.bf16.mxu1 %vm639_vm1, %v1149_v14 }
 0x568   : > { %1821 = vmatpush3.bf16.xpose.msra.mxu1 %v1163_v15 }
 0x569   : > { %1866 = vmatprep.subr.msk.bf16.mxu1 %vm639_vm1, %v1155_v16 }
 0x570   : > { %1823 = vmatpush3.bf16.xpose.msra.mxu1 %v1166_v17 }
 0x577   : > { %1825 = vmatmul.mubr.msk.bf16.vlgmr.msra.gmra.mrb[20].mxu1 %vm639_vm1, %v1151_v18 }
 0x58e   : > { %v880_v28 = vpop.xlane.xlu0 %879 }
 0x58f   : > { %v887_v8 = vsub.f32 %v875_v53, %v880_v28 }
 0x591   : > { %v890_v26 = vmul.f32 1.442695, %v887_v8 }
 0x592   : > { %v886_v31 = vpop.xlane.xlu0 %885 }
 0x593   : > { %v889_v32 = vsub.f32 %v877_v39, %v886_v31 }
 0x595   : > { %v894_v34 = vmul.f32 1.442695, %v889_v32 }
 0x596   : > { %v883_v21 = vpop.xlane.xlu1 %882 }
 0x597   : > { %v888_v29 = vsub.f32 %v876_v46, %v883_v21 }
 0x599   : > { %v892_v30 = vmul.f32 1.442695, %v888_v29 }
 0x59b   : > { %1964 = vpow2.f32 %v892_v30 }
 0x59c   : > { %1966 = vpow2.f32 %v890_v26 }
 0x59d   : > { %1968 = vpow2.f32 %v894_v34 }
 0x5a5   : > { %v1965_v48 = vpop.eup %1964 }
 0x5a6   : > { %v899_v52 = vsel %vm706_vm9, %v1965_v48, 0.0  ;;  %v1967_v54 = vpop.eup %1966 }
 0x639   : > { %v2292_v19 = vpop.f32.mrb[16].mxu1 }
 0x63a   : > { %v2294_v20 = vpop.f32.mrb[17].mxu1 }
 0x63b   : > { %v1819_v22 = vpop.f32.mrb[18].mxu1 }
 0x63c   : > { %v2296_v25 = vpop.f32.mrb[19].mxu1 }
 0x63d   : > { %v1887_v27 = vpack.i.bf16 %v2296_v25, %v2294_v20 }
 0x64a   : > { %v1826_v33 = vpop.f32.mrb[20].mxu1 }
 0x64b   : > { %v1218_v35 = vmul.f32 0.17677669, %v1826_v33  ;;  %v1202_v36 = vpop.f32.mrb[21].mxu1 }
 0x64c   : > { %v1216_v37 = vmul.f32 0.17677669, %v1202_v36  ;;  %v1827_v40 = vpop.f32.mrb[22].mxu1 }
 0x64d   : > { %v1205_v41 = vpop.f32.mrb[23].mxu1  ;;  %v1221_v43 = vadd.f32 %v1218_v35, %v2192_v63  ;;  %v896_v63 = vsel %vm706_vm9, %v1967_v54, 0.0 }
 0x64e   : > { %v1217_v44 = vmul.f32 0.17677669, %v1205_v41  ;;  %v1219_v45 = vadd.f32 %v1216_v37, %v2194_v2  ;;  %v1969_v2 = vpop.eup %1968 }
 0x64f   : > { %v1228_v47 = vsel %vm706_vm9, %v1221_v43, -inf  ;;  %v902_v55 = vsel %vm706_vm9, %v1969_v2, 0.0 }
 0x650   : > { %v1220_v50 = vadd.f32 %v1217_v44, %v2197_v7  ;;  %1229 = vmax.xlane.f32.xlu1 %v1228_v47  ;;  %v1222_v51 = vsel %vm706_vm9, %v1219_v45, -inf  ;;  %v1932_v44 = vld [vmem:[%s2394_s4 + $0x8] sm:$0xff]   ;;  %v1934_v47 = vld [vmem:[%s2394_s4 + $0x18] sm:$0xff]  }
 0x651   : > { %1223 = vmax.xlane.f32.xlu0 %v1222_v51  ;;  %v1937_v51 = vld [vmem:[%s2394_s4 + $0x30] sm:$0xff]  }
 0x652   : > { %v1225_v53 = vsel %vm706_vm9, %v1220_v50, -inf }
 0x654   : > { %900 = vadd.xlane.f32.xlu1 %v899_v52 }
 0x655   : > { %1226 = vmax.xlane.f32.xlu0 %v1225_v53 }
 0x659   : > { %897 = vadd.xlane.f32.xlu0 %v896_v63 }
 0x65d   : > { %903 = vadd.xlane.f32.xlu0 %v902_v55 }
 0x6dd   : > { %v1230_v39 = vpop.xlane.xlu1 %1229 }
 0x6de   : > { %v1233_v7 = vsub.f32 %v1221_v43, %v1230_v39  ;;  %v1224_v56 = vpop.xlane.xlu0 %1223  ;;  %v1931_v43 = vld [vmem:[%s2394_s4] sm:$0xff]  }
 0x6df   : > { %v1231_v46 = vsub.f32 %v1219_v45, %v1224_v56  ;;  %v1933_v45 = vld [vmem:[%s2394_s4 + $0x10] sm:$0xff]  }
 0x6e0   : > { %v1238_v38 = vmul.f32 1.442695, %v1233_v7 }
 0x6e1   : > { %v1234_v57 = vmul.f32 1.442695, %v1231_v46  ;;  %v901_v58 = vpop.xlane.xlu1 %900 }
 0x6e2   : > { %1970 = vpow2.f32 %v1238_v38  ;;  %v1227_v49 = vpop.xlane.xlu0 %1226 }
 0x6e3   : > { %v1232_v59 = vsub.f32 %v1220_v50, %v1227_v49  ;;  %1972 = vpow2.f32 %v1234_v57  ;;  %v1936_v50 = vld [vmem:[%s2394_s4 + $0x28] sm:$0xff]  }
 0x6e4   : > { %1974 = vrcp.f32 %v901_v58 }
 0x6e5   : > { %v1236_v60 = vmul.f32 1.442695, %v1232_v59 }
 0x6e6   : > { %v898_v61 = vpop.xlane.xlu0 %897 }
 0x6e7   : > { %1976 = vpow2.f32 %v1236_v60 }
 0x6e8   : > { %1978 = vrcp.f32 %v898_v61 }
 0x6ea   : > { %v904_v16 = vpop.xlane.xlu0 %903 }
 0x6eb   : > { %1980 = vrcp.f32 %v904_v16 }
 0x6ec   : > { %v1971_v62 = vpop.eup %1970 }
 0x6ed   : > { %v1246_v0 = vsel %vm706_vm9, %v1971_v62, 0.0  ;;  %v1973_v1 = vpop.eup %1972 }
 0x6ee   : > { %1247 = vadd.xlane.f32.xlu1 %v1246_v0  ;;  %v1975_v3 = vpop.eup %1974  ;;  %v1240_v5 = vsel %vm706_vm9, %v1973_v1, 0.0 }
 0x6ef   : > { %v908_v14 = vmul.f32 %v1975_v3, %v1965_v48  ;;  %v1935_v48 = vld [vmem:[%s2394_s4 + $0x20] sm:$0xff]  }
 0x6f1   : > { %v1977_v4 = vpop.eup %1976 }
 0x6f2   : > { %v1979_v6 = vpop.eup %1978  ;;  %1241 = vadd.xlane.f32.xlu1 %v1240_v5  ;;  %v1243_v11 = vsel %vm706_vm9, %v1977_v4, 0.0 }
 0x6f3   : > { %1244 = vadd.xlane.f32.xlu0 %v1243_v11  ;;  %v906_v13 = vmul.f32 %v1979_v6, %v1967_v54  ;;  %v1938_v54 = vld [vmem:[%s2394_s4 + $0x38] sm:$0xff]  }
 0x6f5   : > { %v911_v15 = vpack.c.bf16 %v908_v14, %v906_v13  ;;  %v1981_v28 = vpop.eup %1980 }
 0x6f6   : > { %v910_v30 = vmul.f32 %v1981_v28, %v1969_v2 }
 0x6f7   : > { %1800 = vmatprep.mubr.msk.bf16.mxu0 %vm706_vm9, %v911_v15 }
 0x6f8   : > { %v912_v26 = vpack.c.bf16 %v910_v30, %v910_v30 }
 0x703   : > { %917 = vrot.lane.b32.xlu1 %v2213_v42, %s2005_s30 }
 0x707   : > { %1257 = vrot.lane.b32.xlu1 %v2206_v23, %s2007_s10 }
 0x709   : > { %915 = vrot.lane.b32.xlu0 %v2206_v23, %s2005_s30 }
 0x70b   : > { %1259 = vrot.lane.b32.xlu1 %v2213_v42, %s2007_s10 }
 0x77b   : > { %v1248_v17 = vpop.xlane.xlu1 %1247 }
 0x77f   : > { %v1242_v18 = vpop.xlane.xlu1 %1241 }
 0x780   : > { %1982 = vrcp.f32 %v1242_v18  ;;  %v1245_v21 = vpop.xlane.xlu0 %1244  ;;  %v1994_v18 = vld [vmem:[%s2097_s29] sm:$0xff]  }
 0x781   : > { %1984 = vrcp.f32 %v1245_v21 }
 0x782   : > { %1986 = vrcp.f32 %v1248_v17 }
 0x783   : > { %v918_v22 = vpop.permute.xlu1 %917 }
 0x784   : > { %v916_v29 = vpop.permute.xlu0 %915  ;;  %v927_v8 = vsel %vm748_vm10, %v918_v22, 0 }
 0x785   : > { %1796 = vmatprep.subr.bf16.mxu0 %v916_v29 }
 0x786   : > { %1797 = vmatpush3.bf16.msra.mxu0 %v916_v29  ;;  %v1488_v29 = vunpack.c.h.bf16 %v1994_v18 }
 0x787   : > { %1861 = vmatprep.subr.msk.bf16.mxu0 %vm748_vm10, %v918_v22  ;;  %v1258_v23 = vpop.permute.xlu1 %1257 }
 0x78a   : > { %v1983_v42 = vpop.eup %1982  ;;  %1799 = vmatpush3.bf16.msra.mxu0 %v927_v8 }
 0x78b   : > { %v1985_v31 = vpop.eup %1984  ;;  %1828 = vmatprep.subr.bf16.mxu0 %v1258_v23  ;;  %v1250_v32 = vmul.f32 %v1983_v42, %v1973_v1  ;;  %v1260_v35 = vpop.permute.xlu1 %1259 }
 0x78c   : > { %v1987_v33 = vpop.eup %1986  ;;  %v1252_v34 = vmul.f32 %v1985_v31, %v1977_v4  ;;  %v1269_v40 = vsel %vm748_vm10, %v1260_v35, 0  ;;  %v1489_v31 = vunpack.c.l.bf16 %v2131_v24 }
 0x78d   : > { %1801 = vmatmul.mubr.msk.bf16.vlgmr.msra.gmra.mrb[12].mxu0 %vm706_vm9, %v912_v26  ;;  %v1254_v37 = vmul.f32 %v1987_v33, %v1971_v62 }
 0x78e   : > { %1829 = vmatpush3.bf16.msra.mxu0 %v1258_v23  ;;  %v1255_v36 = vpack.c.bf16 %v1252_v34, %v1250_v32 }
 0x78f   : > { %1867 = vmatprep.subr.msk.bf16.mxu0 %vm748_vm10, %v1260_v35  ;;  %v1256_v41 = vpack.c.bf16 %v1254_v37, %v1254_v37 }
 0x790   : > { %1832 = vmatprep.mubr.msk.bf16.mxu0 %vm706_vm9, %v1255_v36 }
 0x792   : > { %1831 = vmatpush3.bf16.msra.mxu0 %v1269_v40 }
 0x793   : > { %1836 = vmatprep.subr.bf16.mxu0 %v1931_v43 }
 0x795   : > { %1833 = vmatmul.mubr.msk.bf16.vlgmr.msra.gmra.mrb[16].mxu0 %vm706_vm9, %v1256_v41 }
 0x796   : > { %1837 = vmatpush3.bf16.msra.mxu0 %v1931_v43 }
 0x797   : > { %1838 = vmatprep.subr.bf16.mxu0 %v1932_v44 }
 0x79a   : > { %1839 = vmatpush3.bf16.msra.mxu0 %v1932_v44 }
 0x79b   : > { %1840 = vmatprep.subr.bf16.mxu0 %v1933_v45 }
 0x79e   : > { %1841 = vmatpush3.bf16.msra.mxu0 %v1933_v45 }
 0x79f   : > { %1842 = vmatprep.subr.bf16.mxu0 %v1934_v47 }
 0x7a2   : > { %1843 = vmatpush3.bf16.msra.mxu0 %v1934_v47 }
 0x7a3   : > { %1844 = vmatprep.subr.bf16.mxu0 %v1935_v48 }
 0x7a6   : > { %1845 = vmatpush3.bf16.msra.mxu0 %v1935_v48 }
 0x7a7   : > { %1846 = vmatprep.subr.bf16.mxu0 %v1936_v50 }
 0x7aa   : > { %1847 = vmatpush3.bf16.msra.mxu0 %v1936_v50 }
 0x7ab   : > { %1848 = vmatprep.subr.bf16.mxu0 %v1937_v51 }
 0x7ae   : > { %1849 = vmatpush3.bf16.msra.mxu0 %v1937_v51 }
 0x7af   : > { %1850 = vmatprep.subr.bf16.mxu0 %v1938_v54 }
 0x7b2   : > { %1851 = vmatpush3.bf16.msra.mxu0 %v1938_v54 }
 0x860   : > { %v1802_v52 = vpop.f32.mrb[12].mxu0 }
 0x861   : > { %1326 = vrot.lane.b32.xlu1 %v1802_v52, %s2007_s10  ;;  %v963_v53 = vpop.f32.mrb[13].mxu0 }
 0x862   : > { %v1803_v63 = vpop.f32.mrb[14].mxu0 }
 0x863   : > { %v966_v2 = vpop.f32.mrb[15].mxu0 }
 0x864   : > { %v1882_v55 = vpack.i.bf16 %v966_v2, %v963_v53 }
 0x865   : > { %1338 = vrot.lane.b32.xlu1 %v2292_v19, %s2006_s9 }
 0x866   : > { %1883 = vrot.lane.b32.xlu0 %v1882_v55, %s2007_s10 }
 0x868   : > { %v1834_v39 = vpop.f32.mrb[16].mxu0 }
 0x869   : > { %1350 = vrot.lane.b32.xlu1 %v1834_v39, %s2005_s30  ;;  %v1305_v7 = vpop.f32.mrb[17].mxu0 }
 0x86a   : > { %1888 = vrot.lane.b32.xlu0 %v1887_v27, %s2006_s9  ;;  %v1835_v56 = vpop.f32.mrb[18].mxu0 }
 0x86b   : > { %v1308_v46 = vpop.f32.mrb[19].mxu0  ;;  %v1685_v56 = vld [vmem:[%s2396_s6] ss:$0 sm:$0xff] }
 0x86c   : > { %v1892_v38 = vpack.i.bf16 %v1308_v46, %v1305_v7 }
 0x86e   : > { %1893 = vrot.lane.b32.xlu0 %v1892_v38, %s2005_s30 }
 0x8d3   : > { %v1327_v57 = vpop.permute.xlu1 %1326 }
 0x8d4   : > { %v1357_v0 = vsel %vm639_vm1, %v2249_v9, %v1327_v57 }
 0x8d7   : > { %v1339_v19 = vpop.permute.xlu1 %1338 }
 0x8d8   : > { %v1884_v49 = vpop.permute.xlu0 %1883  ;;  %v1361_v25 = vsel %vm1358_vm11, %v1357_v0, %v1339_v19 }
 0x8d9   : > { %v1886_v59 = vunpack.i.h.bf16 %v1884_v49  ;;  %v1885_v60 = vunpack.i.l.bf16 %v1884_v49 }
 0x8db   : > { %v1351_v20 = vpop.permute.xlu1 %1350  ;;  %v1356_v1 = vsel %vm639_vm1, %v2253_v12, %v1886_v59  ;;  %v1355_v3 = vsel %vm639_vm1, %v2251_v10, %v1885_v60  ;;  %v1676_v12 = vld [vmem:[%s2395_s5] ss:$0 sm:$0xff]  ;;  %v1487_v10 = vunpack.c.l.bf16 %v1994_v18 }
 0x8dc   : > { %v1889_v58 = vpop.permute.xlu0 %1888  ;;  %v1365_v6 = vsel %vm1362_vm12, %v1361_v25, %v1351_v20 }
 0x8dd   : > { %v1891_v61 = vunpack.i.h.bf16 %v1889_v58  ;;  %v1890_v62 = vunpack.i.l.bf16 %v1889_v58  ;;  %v1367_v16 = vpack.c.bf16 %v1365_v6, %v1365_v6  ;;  %v1686_v58 = vld [vmem:[%s2397_s7] ss:$0 sm:$0xff] }
 0x8df   : > { %v1359_v11 = vsel %vm1358_vm11, %v1355_v3, %v1890_v62  ;;  %v1360_v13 = vsel %vm1358_vm11, %v1356_v1, %v1891_v61 }
 0x8e0   : > { %v1894_v27 = vpop.permute.xlu0 %1893 }
 0x8e1   : > { %v1896_v4 = vunpack.i.h.bf16 %v1894_v27  ;;  %v1895_v5 = vunpack.i.l.bf16 %v1894_v27 }
 0x8e3   : > { %v1363_v9 = vsel %vm1362_vm12, %v1359_v11, %v1895_v5  ;;  %v1364_v14 = vsel %vm1362_vm12, %v1360_v13, %v1896_v4 }
 0x8e4   : > { %v1366_v15 = vpack.c.bf16 %v1364_v14, %v1363_v9 }
 0x8e6   : > { %1852 = vmatprep.mubr.bf16.mxu0 %v1366_v15 }
 0x8e7   : > { %1853 = vmatmul.mubr.bf16.vlgmr.msra.gmra.mrb[20].mxu0 %v1367_v16 }
 0x9ba   : > { %v1854_v17 = vpop.f32.mrb[20].mxu0 }
 0x9bb   : > { %v1473_v21 = vpop.f32.mrb[21].mxu0  ;;  %v1482_v23 = vadd.f32 %v1854_v17, %v1676_v12 }
 0x9bc   : > { %v1474_v22 = vadd.f32 %v1676_v12, %v1473_v21  ;;  %v1855_v28 = vpop.f32.mrb[22].mxu0 }
 0x9bd   : > { %v1476_v30 = vpop.f32.mrb[23].mxu0  ;;  %v1492_v32 = vadd.f32 %v1489_v31, %v1482_v23 }
 0x9be   : > { %v1477_v8 = vadd.f32 %v1676_v12, %v1476_v30  ;;  %v1490_v42 = vadd.f32 %v1487_v10, %v1474_v22 }
 0x9c0   : > { %1493 = vadd.xlane.f32.xlu0 %v1490_v42  ;;  %v1491_v26 = vadd.f32 %v1488_v29, %v1477_v8 }
 0x9c2   : > { %1495 = vadd.xlane.f32.xlu1 %v1491_v26 }
 0x9c4   : > { %1497 = vadd.xlane.f32.xlu0 %v1492_v32 }
 0xa4d   : > { %v1494_v33 = vpop.xlane.xlu0 %1493 }
 0xa4e   : > { %v1500_v34 = vmul.f32 0.0078125, %v1494_v33 }
 0xa4f   : > { %v1496_v35 = vpop.xlane.xlu1 %1495 }
 0xa50   : > { %v1503_v36 = vsub.f32 %v1490_v42, %v1500_v34  ;;  %v1501_v37 = vmul.f32 0.0078125, %v1496_v35 }
 0xa51   : > { %v1498_v40 = vpop.xlane.xlu0 %1497 }
 0xa52   : > { %v1504_v41 = vsub.f32 %v1491_v26, %v1501_v37  ;;  %v1502_v43 = vmul.f32 0.0078125, %v1498_v40  ;;  %v1506_v44 = vmul.f32 %v1503_v36, %v1503_v36 }
 0xa54   : > { %v1505_v45 = vsub.f32 %v1492_v32, %v1502_v43  ;;  %1509 = vadd.xlane.f32.xlu0 %v1506_v44  ;;  %v1507_v47 = vmul.f32 %v1504_v41, %v1504_v41 }
 0xa56   : > { %v1508_v48 = vmul.f32 %v1505_v45, %v1505_v45 }
 0xa58   : > { %1511 = vadd.xlane.f32.xlu0 %v1507_v47  ;;  %1513 = vadd.xlane.f32.xlu1 %v1508_v48 }
 0xae1   : > { %v1510_v24 = vpop.xlane.xlu0 %1509 }
 0xae2   : > { %v1515_v50 = vmul.f32 0.0078125, %v1510_v24 }
 0xae4   : > { %v1518_v51 = vadd.f32 1e-05, %v1515_v50 }
 0xae5   : > { %v1514_v52 = vpop.xlane.xlu1 %1513  ;;  %v1512_v53 = vpop.xlane.xlu0 %1511 }
 0xae6   : > { %1988 = vrsqrt.f32 %v1518_v51  ;;  %v1517_v54 = vmul.f32 0.0078125, %v1514_v52  ;;  %v1516_v63 = vmul.f32 0.0078125, %v1512_v53 }
 0xae8   : > { %v1520_v2 = vadd.f32 1e-05, %v1517_v54  ;;  %v1519_v55 = vadd.f32 1e-05, %v1516_v63 }
 0xaea   : > { %1990 = vrsqrt.f32 %v1520_v2 }
 0xaeb   : > { %1992 = vrsqrt.f32 %v1519_v55 }
 0xaf0   : > { %v1989_v39 = vpop.eup %1988 }
 0xaf1   : > { %v1524_v7 = vmul.f32 %v1989_v39, %v1503_v36 }
 0xaf3   : > { %v1534_v49 = vmul.f32 %v1685_v56, %v1524_v7 }
 0xaf4   : > { %v1991_v46 = vpop.eup %1990 }
 0xaf5   : > { %v1993_v38 = vpop.eup %1992  ;;  %v1526_v57 = vmul.f32 %v1991_v46, %v1505_v45  ;;  %v1544_v62 = vadd.f32 %v1686_v58, %v1534_v49 }
 0xaf6   : > { %v1525_v19 = vmul.f32 %v1993_v38, %v1504_v41 }
 0xaf7   : > { %v1536_v59 = vmul.f32 %v1685_v56, %v1526_v57 }
 0xaf8   : > { %v1535_v60 = vmul.f32 %v1685_v56, %v1525_v19 }
 0xaf9   : > { %v1546_v61 = vadd.f32 %v1686_v58, %v1536_v59 }
 0xafa   : > { %v1545_v0 = vadd.f32 %v1686_v58, %v1535_v60 }
 0xafb   : > { %v1694_v20 = vpack.c.bf16 %v1546_v61, %v1546_v61 }
 0xafc   : > { %v1698_v25 = vpack.c.bf16 %v1545_v0, %v1544_v62 }
 0xafd   : > { %1562 = vst [vmem:[%s319_s16 + $0x8] sm:$0xf] %v1694_v20 }
 0xafe   : > { %1699 = vst [vmem:[%s319_s16] sm:$0xff] %v1698_v25  }
 0xaff PF: > { %s18_s27 = sadd.s32 1, %s2001_s27  }
 0xb00   : > { %p15_p4 = scmp.ge.s32.totalorder %s18_s27, 4  }
 0xb02   :  { %17 = sbr.rel (!%p15_p4) target bundleno = 1 (0x1), region = 85 }

</bundles_post_ra>
